<compile_context>
chip_gen: v5e
topology: v5e:2x2
jax: 0.10.0
libtpu: 0.0.40
codegen_flags: <defaults>
</compile_context>

<pallas_src>
import jax
import jax.numpy as jnp
from jax.experimental import pallas as pl
from jax.experimental.pallas import tpu as pltpu

RARITY_ALPHA = 0.5


# ----------------------------- Pallas kernels -----------------------------

def _proj_kernel(plm_ref, fw1_ref, fb1_ref, fw2_ref, fb2_ref,
                 gw1_ref, gb1_ref, gw2_ref, gb2_ref,
                 qv_ref, adj_ref):
    plm = plm_ref[...]                                                    # [V, P]
    # projection_f -> query vectors
    hf = jnp.maximum(jnp.dot(plm, fw1_ref[...],
                             preferred_element_type=jnp.float32) + fb1_ref[...], 0.0)
    qv_ref[...] = jnp.dot(hf, fw2_ref[...],
                          preferred_element_type=jnp.float32) + fb2_ref[...]
    # projection_g -> node embeddings -> normalized -> softmax(adjacency)
    hg = jnp.maximum(jnp.dot(plm, gw1_ref[...],
                             preferred_element_type=jnp.float32) + gb1_ref[...], 0.0)
    emb = jnp.dot(hg, gw2_ref[...],
                  preferred_element_type=jnp.float32) + gb2_ref[...]      # [V, E]
    nrm = jnp.sqrt(jnp.sum(emb * emb, axis=1, keepdims=True))
    emb_n = emb / jnp.maximum(nrm, 1e-12)                                 # F.normalize(p=2)
    sim = jax.lax.dot_general(emb_n, emb_n, (((1,), (1,)), ((), ())),
                              preferred_element_type=jnp.float32)         # emb_n @ emb_n.T
    m = jnp.max(sim, axis=-1, keepdims=True)
    e = jnp.exp(sim - m)
    adj_ref[...] = e / jnp.sum(e, axis=-1, keepdims=True)


def _recurrent_kernel(obs_ref,                        # [BB, T, V, D]
                      mask_col_ref, mask_row_ref,     # [BB, T, V, 1], [BB, T, 1, V]
                      int_col_ref, int_row_ref,       # [BB, T, V, 1], [BB, T, 1, V]
                      tot_col_ref, tot_row_ref,       # [BB, V, 1],    [BB, 1, V]
                      len_ref,                        # [BB, 1, 1] int32
                      qvr_ref,                        # [V, Q*2D]   (qv repeated 2D times per q)
                      adj_ref, rW_ref,                # [V, V], [V, V]
                      wru_ref, wc_ref,                # [Q*2D, 2D], [Q*2D, D]
                      rarw_ru_ref, rarw_c_ref,        # [V, 2D], [V, D]
                      bias_ru_ref, bias_c_ref,        # [V, 2D], [V, D]
                      out_ref):                       # [BB, V, D]
    BB, T, V, D = obs_ref.shape
    QC = qvr_ref.shape[1]                             # Q * 2D
    n_rep = QC // (2 * D)                             # == Q

    # ---- loop-invariant loads / hoisted broadcasts ----
    qvr_b = qvr_ref[...][None, :, :]                  # [1, V, QC]
    adj_b = adj_ref[...][None, :, :]                  # [1, V, V]
    rW_b = rW_ref[...][None, :, :]                    # [1, V, V]
    w_ru = wru_ref[...]                               # [QC, 2D]
    w_c = wc_ref[...]                                 # [QC, D]
    rarw_ru_b = rarw_ru_ref[...][None]                # [1, V, 2D]
    rarw_c_b = rarw_c_ref[...][None]                  # [1, V, D]
    bias_ru_b = bias_ru_ref[...][None]                # [1, V, 2D]
    bias_c_b = bias_c_ref[...][None]                  # [1, V, D]
    lm1 = len_ref[...] - 1                            # [BB, 1, 1] int32
    tot_cv = tot_col_ref[...]                         # [BB, V, 1]
    tot_rv = tot_row_ref[...]                         # [BB, 1, V]

    rows = jax.lax.broadcasted_iota(jnp.int32, (V, V), 0)
    cols = jax.lax.broadcasted_iota(jnp.int32, (V, V), 1)
    eye_b = (rows == cols).astype(jnp.float32)[None]  # [1, V, V]
    not_eye_b = 1.0 - eye_b

    def gate_x(comb):
        # comb [BB, V, 2D] -> X [BB*V, Q*2D] with X[:, q*2D + i] = qv[:, q] * comb[:, i]
        # (V is a multiple of 8, so the leading-dim collapse is a layout-trivial reshape.)
        tiled = jnp.concatenate([comb] * n_rep, axis=-1)          # [BB, V, QC]
        return (tiled * qvr_b).reshape(BB * V, QC)

    def step(t, carry):
        h, out = carry                                            # [BB, V, D] each
        cur_obs = obs_ref[:, t]                                   # [BB, V, D]
        m_cv = mask_col_ref[:, t]                                 # [BB, V, 1]
        m_rv = mask_row_ref[:, t]                                 # [BB, 1, V]
        i_cv = int_col_ref[:, t]                                  # [BB, V, 1]
        i_rv = int_row_ref[:, t]                                  # [BB, 1, V]

        rar_cv = RARITY_ALPHA * jnp.tanh(i_cv / (tot_cv + 1.0))   # [BB, V, 1]
        rar_rv = RARITY_ALPHA * jnp.tanh(i_rv / (tot_rv + 1.0))   # [BB, 1, V]

        rar_mat = -rW_b * jnp.abs(rar_cv - rar_rv)                # [BB, V, V]
        adj_mask = m_cv * m_rv                                    # [BB, V, V]
        cur_adj = adj_b * (1.0 + rar_mat) * adj_mask * not_eye_b + eye_b

        # fused graph convolution of [cur_obs | h] (rarity column handled analytically below)
        comb = jnp.concatenate([cur_obs, h], axis=-1)             # [BB, V, 2D]
        conv = jnp.einsum("bij,bjk->bik", cur_adj, comb,
                          preferred_element_type=jnp.float32)     # [BB, V, 2D]
        conv_rar = jnp.sum(cur_adj * rar_rv, axis=-1, keepdims=True)  # [BB, V, 1]

        # fused reset+update gate pre-activations: one wide matmul
        ru = jnp.dot(gate_x(conv), w_ru,
                     preferred_element_type=jnp.float32).reshape(BB, V, 2 * D)
        ru = ru + conv_rar * rarw_ru_b + bias_ru_b
        r = jax.nn.sigmoid(ru[..., :D])                           # reset
        u = jax.nn.sigmoid(ru[..., D:])                           # update

        observed = m_cv != 0.0                                    # [BB, V, 1] bool
        h_tmp = jnp.where(observed, r * h, h)

        # candidate uses the NON-convolved combined_new = [cur_obs | rarity | h_tmp]
        comb2 = jnp.concatenate([cur_obs, h_tmp], axis=-1)
        cand_pre = jnp.dot(gate_x(comb2), w_c,
                           preferred_element_type=jnp.float32).reshape(BB, V, D)
        cand = jnp.tanh(cand_pre + rar_cv * rarw_c_b + bias_c_b)

        h_new = jnp.where(observed, (1.0 - u) * h_tmp + u * cand, h_tmp)
        out_new = jnp.where(lm1 == t, h_new, out)
        return (h_new, out_new)

    zeros = jnp.zeros((BB, V, D), jnp.float32)
    _, out_fin = jax.lax.fori_loop(0, T, step, (zeros, zeros), unroll=(T <= 16))
    out_ref[...] = out_fin


# ----------------------------- wrapper -----------------------------

def vsdgcrnn_forward(params, obs_emb, observed_mask, lengths, avg_interval, var_plm_rep):
    f32 = jnp.float32
    HP = jax.lax.Precision.HIGHEST
    B, T, V, D = obs_emb.shape
    Q = params["b_all"].shape[1]

    obs_emb = obs_emb.astype(f32)
    observed_mask = observed_mask.astype(f32)
    avg_interval = avg_interval.astype(f32)
    var_plm_rep = var_plm_rep.astype(f32)

    # ---- projections + static adjacency (shared over batch) ----
    qv, adj = pl.pallas_call(
        _proj_kernel,
        out_shape=(jax.ShapeDtypeStruct((V, Q), f32),
                   jax.ShapeDtypeStruct((V, V), f32)),
    )(var_plm_rep,
      params["f_w1"], params["f_b1"], params["f_w2"], params["f_b2"],
      params["g_w1"], params["g_b1"], params["g_w2"], params["g_b2"])

    # ---- one-time MLP_Param restacking (hoisted out of the recurrence) ----
    W_all = params["W_all"].astype(f32)                 # [3, Q, 2D+1, D] (reset, update, candidate)
    b_all = params["b_all"].astype(f32)                 # [3, Q, D]
    Wx = W_all[:, :, :D, :]                             # rows for cur_obs
    Wr = W_all[:, :, D, :]                              # row  for the rarity scalar -> [3, Q, D]
    Wh = W_all[:, :, D + 1:, :]                         # rows for the hidden state
    Wstack = jnp.concatenate([Wx, Wh], axis=2).reshape(3, Q * 2 * D, D)   # q-major row stacking
    W_ru = jnp.concatenate([Wstack[0], Wstack[1]], axis=-1)               # [Q*2D, 2D]
    W_c = Wstack[2]                                                       # [Q*2D, D]
    rarw = jnp.einsum("vq,gqd->gvd", qv, Wr, precision=HP)                # [3, V, D]
    bias = jnp.einsum("vq,gqd->gvd", qv, b_all, precision=HP)             # [3, V, D]
    rarw_ru = jnp.concatenate([rarw[0], rarw[1]], axis=-1)                # [V, 2D]
    rarw_c = rarw[2]                                                      # [V, D]
    bias_ru = jnp.concatenate([bias[0], bias[1]], axis=-1)                # [V, 2D]
    bias_c = bias[2]                                                      # [V, D]
    qv_rep = jnp.repeat(qv, 2 * D, axis=1)                                # [V, Q*2D]
    QC = Q * 2 * D

    # ---- batch blocking: BB samples per grid step ----
    BB = min(B, 8)
    nblk = -(-B // BB)
    Bp = nblk * BB
    lengths_flat = lengths.reshape(B).astype(jnp.int32)
    if Bp != B:
        pad = Bp - B
        obs_emb = jnp.pad(obs_emb, ((0, pad), (0, 0), (0, 0), (0, 0)))
        observed_mask = jnp.pad(observed_mask, ((0, pad), (0, 0), (0, 0)))
        avg_interval = jnp.pad(avg_interval, ((0, pad), (0, 0), (0, 0)))
        lengths_flat = jnp.pad(lengths_flat, ((0, pad),))
    len3 = lengths_flat.reshape(Bp, 1, 1)

    # per-step row/column oriented views + pre-loop var_total_obs (as in the reference module)
    mask_col = observed_mask[..., None]                 # [Bp, T, V, 1]
    mask_row = observed_mask[:, :, None, :]             # [Bp, T, 1, V]
    int_col = avg_interval[..., None]
    int_row = avg_interval[:, :, None, :]
    var_tot = jnp.sum(observed_mask, axis=1)            # [Bp, V]
    tot_col = var_tot[:, :, None]                       # [Bp, V, 1]
    tot_row = var_tot[:, None, :]                       # [Bp, 1, V]

    grid_spec = pltpu.PrefetchScalarGridSpec(
        num_scalar_prefetch=0,
        grid=(nblk,),
        in_specs=[
            pl.BlockSpec((BB, T, V, D), lambda b: (b, 0, 0, 0)),   # obs_emb
            pl.BlockSpec((BB, T, V, 1), lambda b: (b, 0, 0, 0)),   # mask_col
            pl.BlockSpec((BB, T, 1, V), lambda b: (b, 0, 0, 0)),   # mask_row
            pl.BlockSpec((BB, T, V, 1), lambda b: (b, 0, 0, 0)),   # int_col
            pl.BlockSpec((BB, T, 1, V), lambda b: (b, 0, 0, 0)),   # int_row
            pl.BlockSpec((BB, V, 1), lambda b: (b, 0, 0)),         # tot_col
            pl.BlockSpec((BB, 1, V), lambda b: (b, 0, 0)),         # tot_row
            pl.BlockSpec((BB, 1, 1), lambda b: (b, 0, 0)),         # lengths
            pl.BlockSpec((V, QC), lambda b: (0, 0)),               # qv repeated
            pl.BlockSpec((V, V), lambda b: (0, 0)),                # adjacency
            pl.BlockSpec((V, V), lambda b: (0, 0)),                # rarity_W
            pl.BlockSpec((QC, 2 * D), lambda b: (0, 0)),           # W reset|update stacked
            pl.BlockSpec((QC, D), lambda b: (0, 0)),               # W candidate stacked
            pl.BlockSpec((V, 2 * D), lambda b: (0, 0)),            # rarity-row weights r|u
            pl.BlockSpec((V, D), lambda b: (0, 0)),                # rarity-row weights cand
            pl.BlockSpec((V, 2 * D), lambda b: (0, 0)),            # biases r|u
            pl.BlockSpec((V, D), lambda b: (0, 0)),                # bias cand
        ],
        out_specs=pl.BlockSpec((BB, V, D), lambda b: (b, 0, 0)),
    )

    output = pl.pallas_call(
        _recurrent_kernel,
        out_shape=jax.ShapeDtypeStruct((Bp, V, D), f32),
        grid_spec=grid_spec,
        compiler_params=pltpu.CompilerParams(dimension_semantics=("parallel",)),
    )(obs_emb, mask_col, mask_row, int_col, int_row, tot_col, tot_row, len3,
      qv_rep, adj, params["rarity_W"].astype(f32), W_ru, W_c,
      rarw_ru, rarw_c, bias_ru, bias_c)
    return output[:B]


# ----------------------------- params & reference -----------------------------

def init_params(key, V, D, Q, E, P):
    H = 2 * D
    ks = jax.random.split(key, 11)

    def nrm(k, shape, scale):
        return (scale * jax.random.normal(k, shape)).astype(jnp.float32)

    return dict(
        f_w1=nrm(ks[0], (P, H), P ** -0.5), f_b1=nrm(ks[1], (1, H), 0.1),
        f_w2=nrm(ks[2], (H, Q), H ** -0.5), f_b2=nrm(ks[3], (1, Q), 0.1),
        g_w1=nrm(ks[4], (P, H), P ** -0.5), g_b1=nrm(ks[5], (1, H), 0.1),
        g_w2=nrm(ks[6], (H, E), H ** -0.5), g_b2=nrm(ks[7], (1, E), 0.1),
        rarity_W=nrm(ks[8], (V, V), 1.0),
        W_all=nrm(ks[9], (3, Q, 2 * D + 1, D), (2 * D + 1) ** -0.5),
        b_all=nrm(ks[10], (3, Q, D), 0.1),
    )


def vsdgcrnn_ref(params, obs_emb, observed_mask, lengths, avg_interval, var_plm_rep):
    """Pure-JAX dense re-statement of the PyTorch forward (for verification)."""
    HP = jax.lax.Precision.HIGHEST
    B, T, V, D = obs_emb.shape

    def mlp(x, w1, b1, w2, b2):
        h = jnp.maximum(jnp.dot(x, w1, precision=HP) + b1, 0.0)
        return jnp.dot(h, w2, precision=HP) + b2

    qv = mlp(var_plm_rep, params["f_w1"], params["f_b1"], params["f_w2"], params["f_b2"])
    emb = mlp(var_plm_rep, params["g_w1"], params["g_b1"], params["g_w2"], params["g_b2"])
    emb_n = emb / jnp.maximum(jnp.linalg.norm(emb, axis=1, keepdims=True), 1e-12)
    adj = jax.nn.softmax(jnp.dot(emb_n, emb_n.T, precision=HP), axis=-1)

    W_all, b_all = params["W_all"], params["b_all"]
    W_eff = jnp.einsum("vq,gqio->gvio", qv, W_all, precision=HP)
    b_eff = jnp.einsum("vq,gqo->gvo", qv, b_all, precision=HP)

    rW = params["rarity_W"]
    eye = jnp.eye(V, dtype=jnp.float32)
    var_total_obs = jnp.sum(observed_mask, axis=1)     # [B, V]

    h = jnp.zeros((B, V, D), jnp.float32)
    output = jnp.zeros((B, V, D), jnp.float32)
    len_b = lengths.reshape(B)

    for t in range(T):
        cur_obs = obs_emb[:, t]
        cur_mask = observed_mask[:, t]
        rarity = RARITY_ALPHA * jnp.tanh(avg_interval[:, t] / (var_total_obs + 1.0))
        rar_mat = -rW[None] * jnp.abs(rarity[:, :, None] - rarity[:, None, :])
        adj_mask = cur_mask[:, :, None] * cur_mask[:, None, :]
        cur_adj = adj[None] * (1.0 + rar_mat) * adj_mask * (1.0 - eye)[None] + eye[None]

        x = jnp.concatenate([cur_obs, rarity[..., None]], axis=-1)
        combined = jnp.concatenate([x, h], axis=-1)
        conv = jnp.einsum("bij,bjk->bik", cur_adj, combined, precision=HP)

        def gate(g, inp):
            return jnp.einsum("bvi,vio->bvo", inp, W_eff[g], precision=HP) + b_eff[g][None]

        r = jax.nn.sigmoid(gate(0, conv))
        u = jax.nn.sigmoid(gate(1, conv))
        obs_b = (cur_mask != 0.0)[..., None]
        h_tmp = jnp.where(obs_b, r * h, h)
        combined_new = jnp.concatenate([x, h_tmp], axis=-1)
        cand = jnp.tanh(gate(2, combined_new))
        new_h = (1.0 - u) * h_tmp + u * cand
        h = jnp.where(obs_b, new_h, h_tmp)
        output = jnp.where((t == len_b - 1)[:, None, None], h, output)
    return output


# ----------------------------- main -----------------------------

if __name__ == "__main__":
    B, T, V = 2, 8, 16
    D = 8      # d_in == d_model
    Q = 5      # query_vector_dim
    E = 8      # node_emb_dim
    P = 64     # plm_rep_dim (small synthetic)

    key = jax.random.PRNGKey(0)
    kp, kd = jax.random.split(key)
    params = init_params(kp, V, D, Q, E, P)

    k1, k2, k3, k4 = jax.random.split(kd, 4)
    obs_emb = jax.random.normal(k1, (B, T, V, D), jnp.float32)
    observed_mask = (jax.random.uniform(k2, (B, T, V)) < 0.5).astype(jnp.float32)
    avg_interval = jax.random.uniform(k3, (B, T, V), jnp.float32, 0.0, 5.0)
    var_plm_rep = jax.random.normal(k4, (V, P), jnp.float32)
    lengths = jnp.array([[T], [T - 3]], dtype=jnp.int32)

    fwd = jax.jit(vsdgcrnn_forward)
    out = fwd(params, obs_emb, observed_mask, lengths, avg_interval, var_plm_rep)
    out = jax.block_until_ready(out)

    ref = vsdgcrnn_ref(params, obs_emb, observed_mask, lengths, avg_interval, var_plm_rep)
    max_err = float(jnp.max(jnp.abs(out - ref)))
    assert max_err < 2e-2, f"kernel/reference mismatch: max abs err {max_err}"
    print("KERNEL_OK")
</pallas_src>

<mosaic_0001>
module attributes {stable_mosaic.version = 11 : i64} {
  func.func @_proj_kernel(%arg0: memref<16x64xf32, #tpu.memory_space<vmem>>, %arg1: memref<64x16xf32, #tpu.memory_space<vmem>>, %arg2: memref<1x16xf32, #tpu.memory_space<vmem>>, %arg3: memref<16x5xf32, #tpu.memory_space<vmem>>, %arg4: memref<1x5xf32, #tpu.memory_space<vmem>>, %arg5: memref<64x16xf32, #tpu.memory_space<vmem>>, %arg6: memref<1x16xf32, #tpu.memory_space<vmem>>, %arg7: memref<16x8xf32, #tpu.memory_space<vmem>>, %arg8: memref<1x8xf32, #tpu.memory_space<vmem>>, %arg9: memref<16x5xf32, #tpu.memory_space<vmem>>, %arg10: memref<16x16xf32, #tpu.memory_space<vmem>>) attributes {dimension_semantics = [], scalar_prefetch = 0 : i64, scratch_operands = 0 : i64, tpu.core_type = #tpu.core_type<tc>} {
    %c0 = arith.constant 0 : index
    %c0_0 = arith.constant 0 : index
    %0 = vector.load %arg0[%c0, %c0_0] : memref<16x64xf32, #tpu.memory_space<vmem>>, vector<16x64xf32>
    %c0_1 = arith.constant 0 : index
    %c0_2 = arith.constant 0 : index
    %1 = vector.load %arg1[%c0_1, %c0_2] : memref<64x16xf32, #tpu.memory_space<vmem>>, vector<64x16xf32>
    %cst = arith.constant dense<0.000000e+00> : vector<16x16xf32>
    %2 = tpu.matmul %0, %1, %cst {dimension_numbers = #tpu.dot_dimension_numbers<[1], [0], [0], [1], [0, 0, 1, 1], [], []>} : vector<16x64xf32>, vector<64x16xf32>, vector<16x16xf32> -> vector<16x16xf32>
    %c0_3 = arith.constant 0 : index
    %c0_4 = arith.constant 0 : index
    %3 = vector.load %arg2[%c0_3, %c0_4] : memref<1x16xf32, #tpu.memory_space<vmem>>, vector<1x16xf32>
    %4 = vector.broadcast %3 : vector<1x16xf32> to vector<16x16xf32>
    %5 = arith.addf %2, %4 : vector<16x16xf32>
    %cst_5 = arith.constant 0.000000e+00 : f32
    %6 = vector.broadcast %cst_5 : f32 to vector<16x16xf32>
    %7 = arith.maximumf %5, %6 : vector<16x16xf32>
    %c0_6 = arith.constant 0 : index
    %c0_7 = arith.constant 0 : index
    %8 = vector.load %arg3[%c0_6, %c0_7] : memref<16x5xf32, #tpu.memory_space<vmem>>, vector<16x5xf32>
    %cst_8 = arith.constant dense<0.000000e+00> : vector<16x5xf32>
    %9 = tpu.matmul %7, %8, %cst_8 {dimension_numbers = #tpu.dot_dimension_numbers<[1], [0], [0], [1], [0, 0, 1, 1], [], []>} : vector<16x16xf32>, vector<16x5xf32>, vector<16x5xf32> -> vector<16x5xf32>
    %c0_9 = arith.constant 0 : index
    %c0_10 = arith.constant 0 : index
    %10 = vector.load %arg4[%c0_9, %c0_10] : memref<1x5xf32, #tpu.memory_space<vmem>>, vector<1x5xf32>
    %11 = vector.broadcast %10 : vector<1x5xf32> to vector<16x5xf32>
    %12 = arith.addf %9, %11 : vector<16x5xf32>
    %c0_11 = arith.constant 0 : index
    %c0_12 = arith.constant 0 : index
    %13 = vector.load %arg9[%c0_11, %c0_12] : memref<16x5xf32, #tpu.memory_space<vmem>>, vector<16x5xf32>
    tpu.vector_store %arg9[%c0_11, %c0_12], %12 {strides = array<i32>} : memref<16x5xf32, #tpu.memory_space<vmem>>, vector<16x5xf32>,
    %c0_13 = arith.constant 0 : index
    %c0_14 = arith.constant 0 : index
    %14 = vector.load %arg5[%c0_13, %c0_14] : memref<64x16xf32, #tpu.memory_space<vmem>>, vector<64x16xf32>
    %cst_15 = arith.constant dense<0.000000e+00> : vector<16x16xf32>
    %15 = tpu.matmul %0, %14, %cst_15 {dimension_numbers = #tpu.dot_dimension_numbers<[1], [0], [0], [1], [0, 0, 1, 1], [], []>} : vector<16x64xf32>, vector<64x16xf32>, vector<16x16xf32> -> vector<16x16xf32>
    %c0_16 = arith.constant 0 : index
    %c0_17 = arith.constant 0 : index
    %16 = vector.load %arg6[%c0_16, %c0_17] : memref<1x16xf32, #tpu.memory_space<vmem>>, vector<1x16xf32>
    %17 = vector.broadcast %16 : vector<1x16xf32> to vector<16x16xf32>
    %18 = arith.addf %15, %17 : vector<16x16xf32>
    %cst_18 = arith.constant 0.000000e+00 : f32
    %19 = vector.broadcast %cst_18 : f32 to vector<16x16xf32>
    %20 = arith.maximumf %18, %19 : vector<16x16xf32>
    %c0_19 = arith.constant 0 : index
    %c0_20 = arith.constant 0 : index
    %21 = vector.load %arg7[%c0_19, %c0_20] : memref<16x8xf32, #tpu.memory_space<vmem>>, vector<16x8xf32>
    %cst_21 = arith.constant dense<0.000000e+00> : vector<16x8xf32>
    %22 = tpu.matmul %20, %21, %cst_21 {dimension_numbers = #tpu.dot_dimension_numbers<[1], [0], [0], [1], [0, 0, 1, 1], [], []>} : vector<16x16xf32>, vector<16x8xf32>, vector<16x8xf32> -> vector<16x8xf32>
    %c0_22 = arith.constant 0 : index
    %c0_23 = arith.constant 0 : index
    %23 = vector.load %arg8[%c0_22, %c0_23] : memref<1x8xf32, #tpu.memory_space<vmem>>, vector<1x8xf32>
    %24 = vector.broadcast %23 : vector<1x8xf32> to vector<16x8xf32>
    %25 = arith.addf %22, %24 : vector<16x8xf32>
    %26 = arith.mulf %25, %25 : vector<16x8xf32>
    %cst_24 = arith.constant dense<0.000000e+00> : vector<16xf32>
    %27 = vector.multi_reduction <add>, %26, %cst_24 [1] : vector<16x8xf32> to vector<16xf32>
    %28 = vector.shape_cast %27 : vector<16xf32> to vector<16x1xf32>
    %29 = math.sqrt %28 : vector<16x1xf32>
    %cst_25 = arith.constant 9.99999996E-13 : f32
    %30 = vector.broadcast %cst_25 : f32 to vector<16x1xf32>
    %31 = arith.maximumf %29, %30 : vector<16x1xf32>
    %32 = vector.broadcast %31 : vector<16x1xf32> to vector<16x8xf32>
    %33 = arith.divf %25, %32 : vector<16x8xf32>
    %cst_26 = arith.constant dense<0.000000e+00> : vector<16x16xf32>
    %34 = tpu.matmul %33, %33, %cst_26 {dimension_numbers = #tpu.dot_dimension_numbers<[1], [1], [0], [0], [0, 0, 1, 0], [], []>} : vector<16x8xf32>, vector<16x8xf32>, vector<16x16xf32> -> vector<16x16xf32>
    %cst_27 = arith.constant dense<0xFF800000> : vector<16xf32>
    %35 = vector.multi_reduction <maximumf>, %34, %cst_27 [1] : vector<16x16xf32> to vector<16xf32>
    %36 = vector.shape_cast %35 : vector<16xf32> to vector<16x1xf32>
    %37 = vector.broadcast %36 : vector<16x1xf32> to vector<16x16xf32>
    %38 = arith.subf %34, %37 : vector<16x16xf32>
    %39 = math.exp %38 : vector<16x16xf32>
    %cst_28 = arith.constant dense<0.000000e+00> : vector<16xf32>
    %40 = vector.multi_reduction <add>, %39, %cst_28 [1] : vector<16x16xf32> to vector<16xf32>
    %41 = vector.shape_cast %40 : vector<16xf32> to vector<16x1xf32>
    %42 = vector.broadcast %41 : vector<16x1xf32> to vector<16x16xf32>
    %43 = arith.divf %39, %42 : vector<16x16xf32>
    %c0_29 = arith.constant 0 : index
    %c0_30 = arith.constant 0 : index
    %44 = vector.load %arg10[%c0_29, %c0_30] : memref<16x16xf32, #tpu.memory_space<vmem>>, vector<16x16xf32>
    tpu.vector_store %arg10[%c0_29, %c0_30], %43 {strides = array<i32>} : memref<16x16xf32, #tpu.memory_space<vmem>>, vector<16x16xf32>,
    return
  }
}

module attributes {stable_mosaic.version = 11 : i64} {
  func.func @_recurrent_kernel(%arg0: i32, %arg1: memref<2x8x16x8xf32, #tpu.memory_space<vmem>>, %arg2: memref<2x8x16x1xf32, #tpu.memory_space<vmem>>, %arg3: memref<2x8x1x16xf32, #tpu.memory_space<vmem>>, %arg4: memref<2x8x16x1xf32, #tpu.memory_space<vmem>>, %arg5: memref<2x8x1x16xf32, #tpu.memory_space<vmem>>, %arg6: memref<2x16x1xf32, #tpu.memory_space<vmem>>, %arg7: memref<2x1x16xf32, #tpu.memory_space<vmem>>, %arg8: memref<2x1x1xi32, #tpu.memory_space<vmem>>, %arg9: memref<16x80xf32, #tpu.memory_space<vmem>>, %arg10: memref<16x16xf32, #tpu.memory_space<vmem>>, %arg11: memref<16x16xf32, #tpu.memory_space<vmem>>, %arg12: memref<80x16xf32, #tpu.memory_space<vmem>>, %arg13: memref<80x8xf32, #tpu.memory_space<vmem>>, %arg14: memref<16x16xf32, #tpu.memory_space<vmem>>, %arg15: memref<16x8xf32, #tpu.memory_space<vmem>>, %arg16: memref<16x16xf32, #tpu.memory_space<vmem>>, %arg17: memref<16x8xf32, #tpu.memory_space<vmem>>, %arg18: memref<2x16x8xf32, #tpu.memory_space<vmem>>) attributes {dimension_semantics = [#tpu.dimension_semantics<parallel>], iteration_bounds = array<i64: 1>, scalar_prefetch = 0 : i64, scratch_operands = 0 : i64, tpu.core_type = #tpu.core_type<tc>, window_params = [{transform_indices = @transform_0, window_bounds = array<i64: 2, 8, 16, 8>}, {transform_indices = @transform_1, window_bounds = array<i64: 2, 8, 16, 1>}, {transform_indices = @transform_2, window_bounds = array<i64: 2, 8, 1, 16>}, {transform_indices = @transform_3, window_bounds = array<i64: 2, 8, 16, 1>}, {transform_indices = @transform_4, window_bounds = array<i64: 2, 8, 1, 16>}, {transform_indices = @transform_5, window_bounds = array<i64: 2, 16, 1>}, {transform_indices = @transform_6, window_bounds = array<i64: 2, 1, 16>}, {transform_indices = @transform_7, window_bounds = array<i64: 2, 1, 1>}, {pipeline_mode = #tpu.pipeline_mode<synchronous>, transform_indices = @transform_8, window_bounds = array<i64: 16, 80>}, {pipeline_mode = #tpu.pipeline_mode<synchronous>, transform_indices = @transform_9, window_bounds = array<i64: 16, 16>}, {pipeline_mode = #tpu.pipeline_mode<synchronous>, transform_indices = @transform_10, window_bounds = array<i64: 16, 16>}, {pipeline_mode = #tpu.pipeline_mode<synchronous>, transform_indices = @transform_11, window_bounds = array<i64: 80, 16>}, {pipeline_mode = #tpu.pipeline_mode<synchronous>, transform_indices = @transform_12, window_bounds = array<i64: 80, 8>}, {pipeline_mode = #tpu.pipeline_mode<synchronous>, transform_indices = @transform_13, window_bounds = array<i64: 16, 16>}, {pipeline_mode = #tpu.pipeline_mode<synchronous>, transform_indices = @transform_14, window_bounds = array<i64: 16, 8>}, {pipeline_mode = #tpu.pipeline_mode<synchronous>, transform_indices = @transform_15, window_bounds = array<i64: 16, 16>}, {pipeline_mode = #tpu.pipeline_mode<synchronous>, transform_indices = @transform_16, window_bounds = array<i64: 16, 8>}, {transform_indices = @transform_17, window_bounds = array<i64: 2, 16, 8>}]} {
    %c0 = arith.constant 0 : index
    %c0_0 = arith.constant 0 : index
    %0 = vector.load %arg9[%c0, %c0_0] : memref<16x80xf32, #tpu.memory_space<vmem>>, vector<16x80xf32>
    %1 = vector.shape_cast %0 : vector<16x80xf32> to vector<1x16x80xf32>
    %c0_1 = arith.constant 0 : index
    %c0_2 = arith.constant 0 : index
    %2 = vector.load %arg10[%c0_1, %c0_2] : memref<16x16xf32, #tpu.memory_space<vmem>>, vector<16x16xf32>
    %3 = vector.shape_cast %2 : vector<16x16xf32> to vector<1x16x16xf32>
    %c0_3 = arith.constant 0 : index
    %c0_4 = arith.constant 0 : index
    %4 = vector.load %arg11[%c0_3, %c0_4] : memref<16x16xf32, #tpu.memory_space<vmem>>, vector<16x16xf32>
    %5 = vector.shape_cast %4 : vector<16x16xf32> to vector<1x16x16xf32>
    %c0_5 = arith.constant 0 : index
    %c0_6 = arith.constant 0 : index
    %6 = vector.load %arg12[%c0_5, %c0_6] : memref<80x16xf32, #tpu.memory_space<vmem>>, vector<80x16xf32>
    %c0_7 = arith.constant 0 : index
    %c0_8 = arith.constant 0 : index
    %7 = vector.load %arg13[%c0_7, %c0_8] : memref<80x8xf32, #tpu.memory_space<vmem>>, vector<80x8xf32>
    %c0_9 = arith.constant 0 : index
    %c0_10 = arith.constant 0 : index
    %8 = vector.load %arg14[%c0_9, %c0_10] : memref<16x16xf32, #tpu.memory_space<vmem>>, vector<16x16xf32>
    %9 = vector.shape_cast %8 : vector<16x16xf32> to vector<1x16x16xf32>
    %c0_11 = arith.constant 0 : index
    %c0_12 = arith.constant 0 : index
    %10 = vector.load %arg15[%c0_11, %c0_12] : memref<16x8xf32, #tpu.memory_space<vmem>>, vector<16x8xf32>
    %11 = vector.shape_cast %10 : vector<16x8xf32> to vector<1x16x8xf32>
    %c0_13 = arith.constant 0 : index
    %c0_14 = arith.constant 0 : index
    %12 = vector.load %arg16[%c0_13, %c0_14] : memref<16x16xf32, #tpu.memory_space<vmem>>, vector<16x16xf32>
    %13 = vector.shape_cast %12 : vector<16x16xf32> to vector<1x16x16xf32>
    %c0_15 = arith.constant 0 : index
    %c0_16 = arith.constant 0 : index
    %14 = vector.load %arg17[%c0_15, %c0_16] : memref<16x8xf32, #tpu.memory_space<vmem>>, vector<16x8xf32>
    %15 = vector.shape_cast %14 : vector<16x8xf32> to vector<1x16x8xf32>
    %c0_17 = arith.constant 0 : index
    %c0_18 = arith.constant 0 : index
    %c0_19 = arith.constant 0 : index
    %16 = vector.load %arg8[%c0_17, %c0_18, %c0_19] : memref<2x1x1xi32, #tpu.memory_space<vmem>>, vector<2x1x1xi32>
    %c1_i32 = arith.constant 1 : i32
    %17 = vector.broadcast %c1_i32 : i32 to vector<2x1x1xi32>
    %18 = arith.subi %16, %17 : vector<2x1x1xi32>
    %c0_20 = arith.constant 0 : index
    %c0_21 = arith.constant 0 : index
    %c0_22 = arith.constant 0 : index
    %19 = vector.load %arg6[%c0_20, %c0_21, %c0_22] : memref<2x16x1xf32, #tpu.memory_space<vmem>>, vector<2x16x1xf32>
    %c0_23 = arith.constant 0 : index
    %c0_24 = arith.constant 0 : index
    %c0_25 = arith.constant 0 : index
    %20 = vector.load %arg7[%c0_23, %c0_24, %c0_25] : memref<2x1x16xf32, #tpu.memory_space<vmem>>, vector<2x1x16xf32>
    %21 = tpu.iota {dimensions = array<i32: 0>} : vector<16x16xi32>
    %22 = tpu.iota {dimensions = array<i32: 1>} : vector<16x16xi32>
    %23 = arith.cmpi eq, %21, %22 : vector<16x16xi32>
    %24 = arith.extui %23 : vector<16x16xi1> to vector<16x16xi32>
    %25 = arith.sitofp %24 : vector<16x16xi32> to vector<16x16xf32>
    %26 = vector.shape_cast %25 : vector<16x16xf32> to vector<1x16x16xf32>
    %cst = arith.constant 1.000000e+00 : f32
    %27 = vector.broadcast %cst : f32 to vector<1x16x16xf32>
    %28 = arith.subf %27, %26 : vector<1x16x16xf32>
    %cst_26 = arith.constant 0.000000e+00 : f32
    %29 = vector.broadcast %cst_26 : f32 to vector<2x16x8xf32>
    %c0_i32 = arith.constant 0 : i32
    %c0_27 = arith.constant 0 : index
    %30 = arith.index_cast %c0_i32 : i32 to index
    %c0_28 = arith.constant 0 : index
    %c0_29 = arith.constant 0 : index
    %31 = vector.load %arg1[%c0_27, %30, %c0_28, %c0_29] : memref<2x8x16x8xf32, #tpu.memory_space<vmem>>, vector<2x1x16x8xf32>
    %32 = vector.shape_cast %31 : vector<2x1x16x8xf32> to vector<2x16x8xf32>
    %c0_30 = arith.constant 0 : index
    %33 = arith.index_cast %c0_i32 : i32 to index
    %c0_31 = arith.constant 0 : index
    %c0_32 = arith.constant 0 : index
    %34 = vector.load %arg2[%c0_30, %33, %c0_31, %c0_32] : memref<2x8x16x1xf32, #tpu.memory_space<vmem>>, vector<2x1x16x1xf32>
    %35 = vector.shape_cast %34 : vector<2x1x16x1xf32> to vector<2x16x1xf32>
    %c0_33 = arith.constant 0 : index
    %36 = arith.index_cast %c0_i32 : i32 to index
    %c0_34 = arith.constant 0 : index
    %c0_35 = arith.constant 0 : index
    %37 = vector.load %arg3[%c0_33, %36, %c0_34, %c0_35] : memref<2x8x1x16xf32, #tpu.memory_space<vmem>>, vector<2x1x1x16xf32>
    %38 = vector.shape_cast %37 : vector<2x1x1x16xf32> to vector<2x1x16xf32>
    %c0_36 = arith.constant 0 : index
    %39 = arith.index_cast %c0_i32 : i32 to index
    %c0_37 = arith.constant 0 : index
    %c0_38 = arith.constant 0 : index
    %40 = vector.load %arg4[%c0_36, %39, %c0_37, %c0_38] : memref<2x8x16x1xf32, #tpu.memory_space<vmem>>, vector<2x1x16x1xf32>
    %41 = vector.shape_cast %40 : vector<2x1x16x1xf32> to vector<2x16x1xf32>
    %c0_39 = arith.constant 0 : index
    %42 = arith.index_cast %c0_i32 : i32 to index
    %c0_40 = arith.constant 0 : index
    %c0_41 = arith.constant 0 : index
    %43 = vector.load %arg5[%c0_39, %42, %c0_40, %c0_41] : memref<2x8x1x16xf32, #tpu.memory_space<vmem>>, vector<2x1x1x16xf32>
    %44 = vector.shape_cast %43 : vector<2x1x1x16xf32> to vector<2x1x16xf32>
    %cst_42 = arith.constant 1.000000e+00 : f32
    %45 = vector.broadcast %cst_42 : f32 to vector<2x16x1xf32>
    %46 = arith.addf %19, %45 : vector<2x16x1xf32>
    %47 = arith.divf %41, %46 : vector<2x16x1xf32>
    %48 = math.tanh %47 : vector<2x16x1xf32>
    %cst_43 = arith.constant 5.000000e-01 : f32
    %49 = vector.broadcast %cst_43 : f32 to vector<2x16x1xf32>
    %50 = arith.mulf %49, %48 : vector<2x16x1xf32>
    %cst_44 = arith.constant 1.000000e+00 : f32
    %51 = vector.broadcast %cst_44 : f32 to vector<2x1x16xf32>
    %52 = arith.addf %20, %51 : vector<2x1x16xf32>
    %53 = arith.divf %44, %52 : vector<2x1x16xf32>
    %54 = math.tanh %53 : vector<2x1x16xf32>
    %cst_45 = arith.constant 5.000000e-01 : f32
    %55 = vector.broadcast %cst_45 : f32 to vector<2x1x16xf32>
    %56 = arith.mulf %55, %54 : vector<2x1x16xf32>
    %cst_46 = arith.constant 0.000000e+00 : f32
    %57 = vector.broadcast %cst_46 : f32 to vector<1x16x16xf32>
    %58 = arith.subf %57, %5 : vector<1x16x16xf32>
    %59 = vector.broadcast %50 : vector<2x16x1xf32> to vector<2x16x16xf32>
    %60 = vector.broadcast %56 : vector<2x1x16xf32> to vector<2x16x16xf32>
    %61 = arith.subf %59, %60 : vector<2x16x16xf32>
    %62 = math.absf %61 : vector<2x16x16xf32>
    %63 = vector.broadcast %58 : vector<1x16x16xf32> to vector<2x16x16xf32>
    %64 = arith.mulf %63, %62 : vector<2x16x16xf32>
    %65 = vector.broadcast %35 : vector<2x16x1xf32> to vector<2x16x16xf32>
    %66 = vector.broadcast %38 : vector<2x1x16xf32> to vector<2x16x16xf32>
    %67 = arith.mulf %65, %66 : vector<2x16x16xf32>
    %cst_47 = arith.constant 1.000000e+00 : f32
    %68 = vector.broadcast %cst_47 : f32 to vector<2x16x16xf32>
    %69 = arith.addf %68, %64 : vector<2x16x16xf32>
    %70 = vector.broadcast %3 : vector<1x16x16xf32> to vector<2x16x16xf32>
    %71 = arith.mulf %70, %69 : vector<2x16x16xf32>
    %72 = arith.mulf %71, %67 : vector<2x16x16xf32>
    %73 = vector.broadcast %28 : vector<1x16x16xf32> to vector<2x16x16xf32>
    %74 = arith.mulf %72, %73 : vector<2x16x16xf32>
    %75 = vector.broadcast %26 : vector<1x16x16xf32> to vector<2x16x16xf32>
    %76 = arith.addf %74, %75 : vector<2x16x16xf32>
    %77 = tpu.concatenate %32, %29 in 2 : vector<2x16x8xf32>, vector<2x16x8xf32> -> vector<2x16x16xf32>
    "tpu.trace_start"() <{level = 10 : i32, message = "bij,bjk->bik"}> : () -> ()
    %cst_48 = arith.constant dense<0.000000e+00> : vector<2x16x16xf32>
    %78 = tpu.matmul %76, %77, %cst_48 {dimension_numbers = #tpu.dot_dimension_numbers<[2], [1], [1], [2], [0, 0, 0, 1, 1, 2], [0], [0]>} : vector<2x16x16xf32>, vector<2x16x16xf32>, vector<2x16x16xf32> -> vector<2x16x16xf32>
    "tpu.trace_stop"() : () -> ()
    %79 = vector.broadcast %56 : vector<2x1x16xf32> to vector<2x16x16xf32>
    %80 = arith.mulf %76, %79 : vector<2x16x16xf32>
    %cst_49 = arith.constant dense<0.000000e+00> : vector<2x16xf32>
    %81 = vector.multi_reduction <add>, %80, %cst_49 [2] : vector<2x16x16xf32> to vector<2x16xf32>
    %82 = vector.shape_cast %81 : vector<2x16xf32> to vector<2x16x1xf32>
    %83 = tpu.concatenate %78, %78, %78, %78, %78 in 2 : vector<2x16x16xf32>, vector<2x16x16xf32>, vector<2x16x16xf32>, vector<2x16x16xf32>, vector<2x16x16xf32> -> vector<2x16x80xf32>
    %84 = vector.broadcast %1 : vector<1x16x80xf32> to vector<2x16x80xf32>
    %85 = arith.mulf %83, %84 : vector<2x16x80xf32>
    %86 = vector.shape_cast %85 : vector<2x16x80xf32> to vector<32x80xf32>
    %cst_50 = arith.constant dense<0.000000e+00> : vector<32x16xf32>
    %87 = tpu.matmul %86, %6, %cst_50 {dimension_numbers = #tpu.dot_dimension_numbers<[1], [0], [0], [1], [0, 0, 1, 1], [], []>} : vector<32x80xf32>, vector<80x16xf32>, vector<32x16xf32> -> vector<32x16xf32>
    %88 = vector.shape_cast %87 : vector<32x16xf32> to vector<2x16x16xf32>
    %89 = vector.broadcast %82 : vector<2x16x1xf32> to vector<2x16x16xf32>
    %90 = vector.broadcast %9 : vector<1x16x16xf32> to vector<2x16x16xf32>
    %91 = arith.mulf %89, %90 : vector<2x16x16xf32>
    %92 = arith.addf %88, %91 : vector<2x16x16xf32>
    %93 = vector.broadcast %13 : vector<1x16x16xf32> to vector<2x16x16xf32>
    %94 = arith.addf %92, %93 : vector<2x16x16xf32>
    %95 = vector.extract_strided_slice %94 {offsets = [0, 0, 0], sizes = [2, 16, 8], strides = [1, 1, 1]} : vector<2x16x16xf32> to vector<2x16x8xf32>
    %96 = arith.negf %95 : vector<2x16x8xf32>
    %97 = math.exp %96 : vector<2x16x8xf32>
    %cst_51 = arith.constant 1.000000e+00 : f32
    %98 = vector.broadcast %cst_51 : f32 to vector<2x16x8xf32>
    %99 = arith.addf %98, %97 : vector<2x16x8xf32>
    %100 = arith.divf %98, %99 : vector<2x16x8xf32>
    %101 = vector.extract_strided_slice %94 {offsets = [0, 0, 8], sizes = [2, 16, 8], strides = [1, 1, 1]} : vector<2x16x16xf32> to vector<2x16x8xf32>
    %102 = arith.negf %101 : vector<2x16x8xf32>
    %103 = math.exp %102 : vector<2x16x8xf32>
    %cst_52 = arith.constant 1.000000e+00 : f32
    %104 = vector.broadcast %cst_52 : f32 to vector<2x16x8xf32>
    %105 = arith.addf %104, %103 : vector<2x16x8xf32>
    %106 = arith.divf %104, %105 : vector<2x16x8xf32>
    %cst_53 = arith.constant 0.000000e+00 : f32
    %107 = vector.broadcast %cst_53 : f32 to vector<2x16x1xf32>
    %108 = arith.cmpf one, %35, %107 : vector<2x16x1xf32>
    %109 = arith.mulf %100, %29 : vector<2x16x8xf32>
    %110 = vector.shape_cast %108 : vector<2x16x1xi1> to vector<2x16x1xi1>
    %111 = vector.broadcast %110 : vector<2x16x1xi1> to vector<2x16x8xi1>
    %112 = arith.select %111, %109, %29 : vector<2x16x8xi1>, vector<2x16x8xf32>
    %113 = tpu.concatenate %32, %112 in 2 : vector<2x16x8xf32>, vector<2x16x8xf32> -> vector<2x16x16xf32>
    %114 = tpu.concatenate %113, %113, %113, %113, %113 in 2 : vector<2x16x16xf32>, vector<2x16x16xf32>, vector<2x16x16xf32>, vector<2x16x16xf32>, vector<2x16x16xf32> -> vector<2x16x80xf32>
    %115 = vector.broadcast %1 : vector<1x16x80xf32> to vector<2x16x80xf32>
    %116 = arith.mulf %114, %115 : vector<2x16x80xf32>
    %117 = vector.shape_cast %116 : vector<2x16x80xf32> to vector<32x80xf32>
    %cst_54 = arith.constant dense<0.000000e+00> : vector<32x8xf32>
    %118 = tpu.matmul %117, %7, %cst_54 {dimension_numbers = #tpu.dot_dimension_numbers<[1], [0], [0], [1], [0, 0, 1, 1], [], []>} : vector<32x80xf32>, vector<80x8xf32>, vector<32x8xf32> -> vector<32x8xf32>
    %119 = vector.shape_cast %118 : vector<32x8xf32> to vector<2x16x8xf32>
    %120 = vector.broadcast %50 : vector<2x16x1xf32> to vector<2x16x8xf32>
    %121 = vector.broadcast %11 : vector<1x16x8xf32> to vector<2x16x8xf32>
    %122 = arith.mulf %120, %121 : vector<2x16x8xf32>
    %123 = arith.addf %119, %122 : vector<2x16x8xf32>
    %124 = vector.broadcast %15 : vector<1x16x8xf32> to vector<2x16x8xf32>
    %125 = arith.addf %123, %124 : vector<2x16x8xf32>
    %126 = math.tanh %125 : vector<2x16x8xf32>
    %cst_55 = arith.constant 1.000000e+00 : f32
    %127 = vector.broadcast %cst_55 : f32 to vector<2x16x8xf32>
    %128 = arith.subf %127, %106 : vector<2x16x8xf32>
    %129 = arith.mulf %128, %112 : vector<2x16x8xf32>
    %130 = arith.mulf %106, %126 : vector<2x16x8xf32>
    %131 = arith.addf %129, %130 : vector<2x16x8xf32>
    %132 = vector.shape_cast %108 : vector<2x16x1xi1> to vector<2x16x1xi1>
    %133 = vector.broadcast %132 : vector<2x16x1xi1> to vector<2x16x8xi1>
    %134 = arith.select %133, %131, %112 : vector<2x16x8xi1>, vector<2x16x8xf32>
    %135 = vector.broadcast %c0_i32 : i32 to vector<2x1x1xi32>
    %136 = arith.cmpi eq, %18, %135 : vector<2x1x1xi32>
    %137 = vector.shape_cast %136 : vector<2x1x1xi1> to vector<2x1x1xi1>
    %138 = vector.broadcast %137 : vector<2x1x1xi1> to vector<2x16x8xi1>
    %139 = arith.select %138, %134, %29 : vector<2x16x8xi1>, vector<2x16x8xf32>
    %c1_i32_56 = arith.constant 1 : i32
    %c0_57 = arith.constant 0 : index
    %140 = arith.index_cast %c1_i32_56 : i32 to index
    %c0_58 = arith.constant 0 : index
    %c0_59 = arith.constant 0 : index
    %141 = vector.load %arg1[%c0_57, %140, %c0_58, %c0_59] : memref<2x8x16x8xf32, #tpu.memory_space<vmem>>, vector<2x1x16x8xf32>
    %142 = vector.shape_cast %141 : vector<2x1x16x8xf32> to vector<2x16x8xf32>
    %c0_60 = arith.constant 0 : index
    %143 = arith.index_cast %c1_i32_56 : i32 to index
    %c0_61 = arith.constant 0 : index
    %c0_62 = arith.constant 0 : index
    %144 = vector.load %arg2[%c0_60, %143, %c0_61, %c0_62] : memref<2x8x16x1xf32, #tpu.memory_space<vmem>>, vector<2x1x16x1xf32>
    %145 = vector.shape_cast %144 : vector<2x1x16x1xf32> to vector<2x16x1xf32>
    %c0_63 = arith.constant 0 : index
    %146 = arith.index_cast %c1_i32_56 : i32 to index
    %c0_64 = arith.constant 0 : index
    %c0_65 = arith.constant 0 : index
    %147 = vector.load %arg3[%c0_63, %146, %c0_64, %c0_65] : memref<2x8x1x16xf32, #tpu.memory_space<vmem>>, vector<2x1x1x16xf32>
    %148 = vector.shape_cast %147 : vector<2x1x1x16xf32> to vector<2x1x16xf32>
    %c0_66 = arith.constant 0 : index
    %149 = arith.index_cast %c1_i32_56 : i32 to index
    %c0_67 = arith.constant 0 : index
    %c0_68 = arith.constant 0 : index
    %150 = vector.load %arg4[%c0_66, %149, %c0_67, %c0_68] : memref<2x8x16x1xf32, #tpu.memory_space<vmem>>, vector<2x1x16x1xf32>
    %151 = vector.shape_cast %150 : vector<2x1x16x1xf32> to vector<2x16x1xf32>
    %c0_69 = arith.constant 0 : index
    %152 = arith.index_cast %c1_i32_56 : i32 to index
    %c0_70 = arith.constant 0 : index
    %c0_71 = arith.constant 0 : index
    %153 = vector.load %arg5[%c0_69, %152, %c0_70, %c0_71] : memref<2x8x1x16xf32, #tpu.memory_space<vmem>>, vector<2x1x1x16xf32>
    %154 = vector.shape_cast %153 : vector<2x1x1x16xf32> to vector<2x1x16xf32>
    %cst_72 = arith.constant 1.000000e+00 : f32
    %155 = vector.broadcast %cst_72 : f32 to vector<2x16x1xf32>
    %156 = arith.addf %19, %155 : vector<2x16x1xf32>
    %157 = arith.divf %151, %156 : vector<2x16x1xf32>
    %158 = math.tanh %157 : vector<2x16x1xf32>
    %cst_73 = arith.constant 5.000000e-01 : f32
    %159 = vector.broadcast %cst_73 : f32 to vector<2x16x1xf32>
    %160 = arith.mulf %159, %158 : vector<2x16x1xf32>
    %cst_74 = arith.constant 1.000000e+00 : f32
    %161 = vector.broadcast %cst_74 : f32 to vector<2x1x16xf32>
    %162 = arith.addf %20, %161 : vector<2x1x16xf32>
    %163 = arith.divf %154, %162 : vector<2x1x16xf32>
    %164 = math.tanh %163 : vector<2x1x16xf32>
    %cst_75 = arith.constant 5.000000e-01 : f32
    %165 = vector.broadcast %cst_75 : f32 to vector<2x1x16xf32>
    %166 = arith.mulf %165, %164 : vector<2x1x16xf32>
    %cst_76 = arith.constant 0.000000e+00 : f32
    %167 = vector.broadcast %cst_76 : f32 to vector<1x16x16xf32>
    %168 = arith.subf %167, %5 : vector<1x16x16xf32>
    %169 = vector.broadcast %160 : vector<2x16x1xf32> to vector<2x16x16xf32>
    %170 = vector.broadcast %166 : vector<2x1x16xf32> to vector<2x16x16xf32>
    %171 = arith.subf %169, %170 : vector<2x16x16xf32>
    %172 = math.absf %171 : vector<2x16x16xf32>
    %173 = vector.broadcast %168 : vector<1x16x16xf32> to vector<2x16x16xf32>
    %174 = arith.mulf %173, %172 : vector<2x16x16xf32>
    %175 = vector.broadcast %145 : vector<2x16x1xf32> to vector<2x16x16xf32>
    %176 = vector.broadcast %148 : vector<2x1x16xf32> to vector<2x16x16xf32>
    %177 = arith.mulf %175, %176 : vector<2x16x16xf32>
    %cst_77 = arith.constant 1.000000e+00 : f32
    %178 = vector.broadcast %cst_77 : f32 to vector<2x16x16xf32>
    %179 = arith.addf %178, %174 : vector<2x16x16xf32>
    %180 = vector.broadcast %3 : vector<1x16x16xf32> to vector<2x16x16xf32>
    %181 = arith.mulf %180, %179 : vector<2x16x16xf32>
    %182 = arith.mulf %181, %177 : vector<2x16x16xf32>
    %183 = vector.broadcast %28 : vector<1x16x16xf32> to vector<2x16x16xf32>
    %184 = arith.mulf %182, %183 : vector<2x16x16xf32>
    %185 = vector.broadcast %26 : vector<1x16x16xf32> to vector<2x16x16xf32>
    %186 = arith.addf %184, %185 : vector<2x16x16xf32>
    %187 = tpu.concatenate %142, %134 in 2 : vector<2x16x8xf32>, vector<2x16x8xf32> -> vector<2x16x16xf32>
    "tpu.trace_start"() <{level = 10 : i32, message = "bij,bjk->bik"}> : () -> ()
    %cst_78 = arith.constant dense<0.000000e+00> : vector<2x16x16xf32>
    %188 = tpu.matmul %186, %187, %cst_78 {dimension_numbers = #tpu.dot_dimension_numbers<[2], [1], [1], [2], [0, 0, 0, 1, 1, 2], [0], [0]>} : vector<2x16x16xf32>, vector<2x16x16xf32>, vector<2x16x16xf32> -> vector<2x16x16xf32>
    "tpu.trace_stop"() : () -> ()
    %189 = vector.broadcast %166 : vector<2x1x16xf32> to vector<2x16x16xf32>
    %190 = arith.mulf %186, %189 : vector<2x16x16xf32>
    %cst_79 = arith.constant dense<0.000000e+00> : vector<2x16xf32>
    %191 = vector.multi_reduction <add>, %190, %cst_79 [2] : vector<2x16x16xf32> to vector<2x16xf32>
    %192 = vector.shape_cast %191 : vector<2x16xf32> to vector<2x16x1xf32>
    %193 = tpu.concatenate %188, %188, %188, %188, %188 in 2 : vector<2x16x16xf32>, vector<2x16x16xf32>, vector<2x16x16xf32>, vector<2x16x16xf32>, vector<2x16x16xf32> -> vector<2x16x80xf32>
    %194 = vector.broadcast %1 : vector<1x16x80xf32> to vector<2x16x80xf32>
    %195 = arith.mulf %193, %194 : vector<2x16x80xf32>
    %196 = vector.shape_cast %195 : vector<2x16x80xf32> to vector<32x80xf32>
    %cst_80 = arith.constant dense<0.000000e+00> : vector<32x16xf32>
    %197 = tpu.matmul %196, %6, %cst_80 {dimension_numbers = #tpu.dot_dimension_numbers<[1], [0], [0], [1], [0, 0, 1, 1], [], []>} : vector<32x80xf32>, vector<80x16xf32>, vector<32x16xf32> -> vector<32x16xf32>
    %198 = vector.shape_cast %197 : vector<32x16xf32> to vector<2x16x16xf32>
    %199 = vector.broadcast %192 : vector<2x16x1xf32> to vector<2x16x16xf32>
    %200 = vector.broadcast %9 : vector<1x16x16xf32> to vector<2x16x16xf32>
    %201 = arith.mulf %199, %200 : vector<2x16x16xf32>
    %202 = arith.addf %198, %201 : vector<2x16x16xf32>
    %203 = vector.broadcast %13 : vector<1x16x16xf32> to vector<2x16x16xf32>
    %204 = arith.addf %202, %203 : vector<2x16x16xf32>
    %205 = vector.extract_strided_slice %204 {offsets = [0, 0, 0], sizes = [2, 16, 8], strides = [1, 1, 1]} : vector<2x16x16xf32> to vector<2x16x8xf32>
    %206 = arith.negf %205 : vector<2x16x8xf32>
    %207 = math.exp %206 : vector<2x16x8xf32>
    %cst_81 = arith.constant 1.000000e+00 : f32
    %208 = vector.broadcast %cst_81 : f32 to vector<2x16x8xf32>
    %209 = arith.addf %208, %207 : vector<2x16x8xf32>
    %210 = arith.divf %208, %209 : vector<2x16x8xf32>
    %211 = vector.extract_strided_slice %204 {offsets = [0, 0, 8], sizes = [2, 16, 8], strides = [1, 1, 1]} : vector<2x16x16xf32> to vector<2x16x8xf32>
    %212 = arith.negf %211 : vector<2x16x8xf32>
    %213 = math.exp %212 : vector<2x16x8xf32>
    %cst_82 = arith.constant 1.000000e+00 : f32
    %214 = vector.broadcast %cst_82 : f32 to vector<2x16x8xf32>
    %215 = arith.addf %214, %213 : vector<2x16x8xf32>
    %216 = arith.divf %214, %215 : vector<2x16x8xf32>
    %cst_83 = arith.constant 0.000000e+00 : f32
    %217 = vector.broadcast %cst_83 : f32 to vector<2x16x1xf32>
    %218 = arith.cmpf one, %145, %217 : vector<2x16x1xf32>
    %219 = arith.mulf %210, %134 : vector<2x16x8xf32>
    %220 = vector.shape_cast %218 : vector<2x16x1xi1> to vector<2x16x1xi1>
    %221 = vector.broadcast %220 : vector<2x16x1xi1> to vector<2x16x8xi1>
    %222 = arith.select %221, %219, %134 : vector<2x16x8xi1>, vector<2x16x8xf32>
    %223 = tpu.concatenate %142, %222 in 2 : vector<2x16x8xf32>, vector<2x16x8xf32> -> vector<2x16x16xf32>
    %224 = tpu.concatenate %223, %223, %223, %223, %223 in 2 : vector<2x16x16xf32>, vector<2x16x16xf32>, vector<2x16x16xf32>, vector<2x16x16xf32>, vector<2x16x16xf32> -> vector<2x16x80xf32>
    %225 = vector.broadcast %1 : vector<1x16x80xf32> to vector<2x16x80xf32>
    %226 = arith.mulf %224, %225 : vector<2x16x80xf32>
    %227 = vector.shape_cast %226 : vector<2x16x80xf32> to vector<32x80xf32>
    %cst_84 = arith.constant dense<0.000000e+00> : vector<32x8xf32>
    %228 = tpu.matmul %227, %7, %cst_84 {dimension_numbers = #tpu.dot_dimension_numbers<[1], [0], [0], [1], [0, 0, 1, 1], [], []>} : vector<32x80xf32>, vector<80x8xf32>, vector<32x8xf32> -> vector<32x8xf32>
    %229 = vector.shape_cast %228 : vector<32x8xf32> to vector<2x16x8xf32>
    %230 = vector.broadcast %160 : vector<2x16x1xf32> to vector<2x16x8xf32>
    %231 = vector.broadcast %11 : vector<1x16x8xf32> to vector<2x16x8xf32>
    %232 = arith.mulf %230, %231 : vector<2x16x8xf32>
    %233 = arith.addf %229, %232 : vector<2x16x8xf32>
    %234 = vector.broadcast %15 : vector<1x16x8xf32> to vector<2x16x8xf32>
    %235 = arith.addf %233, %234 : vector<2x16x8xf32>
    %236 = math.tanh %235 : vector<2x16x8xf32>
    %cst_85 = arith.constant 1.000000e+00 : f32
    %237 = vector.broadcast %cst_85 : f32 to vector<2x16x8xf32>
    %238 = arith.subf %237, %216 : vector<2x16x8xf32>
    %239 = arith.mulf %238, %222 : vector<2x16x8xf32>
    %240 = arith.mulf %216, %236 : vector<2x16x8xf32>
    %241 = arith.addf %239, %240 : vector<2x16x8xf32>
    %242 = vector.shape_cast %218 : vector<2x16x1xi1> to vector<2x16x1xi1>
    %243 = vector.broadcast %242 : vector<2x16x1xi1> to vector<2x16x8xi1>
    %244 = arith.select %243, %241, %222 : vector<2x16x8xi1>, vector<2x16x8xf32>
    %245 = vector.broadcast %c1_i32_56 : i32 to vector<2x1x1xi32>
    %246 = arith.cmpi eq, %18, %245 : vector<2x1x1xi32>
    %247 = vector.shape_cast %246 : vector<2x1x1xi1> to vector<2x1x1xi1>
    %248 = vector.broadcast %247 : vector<2x1x1xi1> to vector<2x16x8xi1>
    %249 = arith.select %248, %244, %139 : vector<2x16x8xi1>, vector<2x16x8xf32>
    %c2_i32 = arith.constant 2 : i32
    %c0_86 = arith.constant 0 : index
    %250 = arith.index_cast %c2_i32 : i32 to index
    %c0_87 = arith.constant 0 : index
    %c0_88 = arith.constant 0 : index
    %251 = vector.load %arg1[%c0_86, %250, %c0_87, %c0_88] : memref<2x8x16x8xf32, #tpu.memory_space<vmem>>, vector<2x1x16x8xf32>
    %252 = vector.shape_cast %251 : vector<2x1x16x8xf32> to vector<2x16x8xf32>
    %c0_89 = arith.constant 0 : index
    %253 = arith.index_cast %c2_i32 : i32 to index
    %c0_90 = arith.constant 0 : index
    %c0_91 = arith.constant 0 : index
    %254 = vector.load %arg2[%c0_89, %253, %c0_90, %c0_91] : memref<2x8x16x1xf32, #tpu.memory_space<vmem>>, vector<2x1x16x1xf32>
    %255 = vector.shape_cast %254 : vector<2x1x16x1xf32> to vector<2x16x1xf32>
    %c0_92 = arith.constant 0 : index
    %256 = arith.index_cast %c2_i32 : i32 to index
    %c0_93 = arith.constant 0 : index
    %c0_94 = arith.constant 0 : index
    %257 = vector.load %arg3[%c0_92, %256, %c0_93, %c0_94] : memref<2x8x1x16xf32, #tpu.memory_space<vmem>>, vector<2x1x1x16xf32>
    %258 = vector.shape_cast %257 : vector<2x1x1x16xf32> to vector<2x1x16xf32>
    %c0_95 = arith.constant 0 : index
    %259 = arith.index_cast %c2_i32 : i32 to index
    %c0_96 = arith.constant 0 : index
    %c0_97 = arith.constant 0 : index
    %260 = vector.load %arg4[%c0_95, %259, %c0_96, %c0_97] : memref<2x8x16x1xf32, #tpu.memory_space<vmem>>, vector<2x1x16x1xf32>
    %261 = vector.shape_cast %260 : vector<2x1x16x1xf32> to vector<2x16x1xf32>
    %c0_98 = arith.constant 0 : index
    %262 = arith.index_cast %c2_i32 : i32 to index
    %c0_99 = arith.constant 0 : index
    %c0_100 = arith.constant 0 : index
    %263 = vector.load %arg5[%c0_98, %262, %c0_99, %c0_100] : memref<2x8x1x16xf32, #tpu.memory_space<vmem>>, vector<2x1x1x16xf32>
    %264 = vector.shape_cast %263 : vector<2x1x1x16xf32> to vector<2x1x16xf32>
    %cst_101 = arith.constant 1.000000e+00 : f32
    %265 = vector.broadcast %cst_101 : f32 to vector<2x16x1xf32>
    %266 = arith.addf %19, %265 : vector<2x16x1xf32>
    %267 = arith.divf %261, %266 : vector<2x16x1xf32>
    %268 = math.tanh %267 : vector<2x16x1xf32>
    %cst_102 = arith.constant 5.000000e-01 : f32
    %269 = vector.broadcast %cst_102 : f32 to vector<2x16x1xf32>
    %270 = arith.mulf %269, %268 : vector<2x16x1xf32>
    %cst_103 = arith.constant 1.000000e+00 : f32
    %271 = vector.broadcast %cst_103 : f32 to vector<2x1x16xf32>
    %272 = arith.addf %20, %271 : vector<2x1x16xf32>
    %273 = arith.divf %264, %272 : vector<2x1x16xf32>
    %274 = math.tanh %273 : vector<2x1x16xf32>
    %cst_104 = arith.constant 5.000000e-01 : f32
    %275 = vector.broadcast %cst_104 : f32 to vector<2x1x16xf32>
    %276 = arith.mulf %275, %274 : vector<2x1x16xf32>
    %cst_105 = arith.constant 0.000000e+00 : f32
    %277 = vector.broadcast %cst_105 : f32 to vector<1x16x16xf32>
    %278 = arith.subf %277, %5 : vector<1x16x16xf32>
    %279 = vector.broadcast %270 : vector<2x16x1xf32> to vector<2x16x16xf32>
    %280 = vector.broadcast %276 : vector<2x1x16xf32> to vector<2x16x16xf32>
    %281 = arith.subf %279, %280 : vector<2x16x16xf32>
    %282 = math.absf %281 : vector<2x16x16xf32>
    %283 = vector.broadcast %278 : vector<1x16x16xf32> to vector<2x16x16xf32>
    %284 = arith.mulf %283, %282 : vector<2x16x16xf32>
    %285 = vector.broadcast %255 : vector<2x16x1xf32> to vector<2x16x16xf32>
    %286 = vector.broadcast %258 : vector<2x1x16xf32> to vector<2x16x16xf32>
    %287 = arith.mulf %285, %286 : vector<2x16x16xf32>
    %cst_106 = arith.constant 1.000000e+00 : f32
    %288 = vector.broadcast %cst_106 : f32 to vector<2x16x16xf32>
    %289 = arith.addf %288, %284 : vector<2x16x16xf32>
    %290 = vector.broadcast %3 : vector<1x16x16xf32> to vector<2x16x16xf32>
    %291 = arith.mulf %290, %289 : vector<2x16x16xf32>
    %292 = arith.mulf %291, %287 : vector<2x16x16xf32>
    %293 = vector.broadcast %28 : vector<1x16x16xf32> to vector<2x16x16xf32>
    %294 = arith.mulf %292, %293 : vector<2x16x16xf32>
    %295 = vector.broadcast %26 : vector<1x16x16xf32> to vector<2x16x16xf32>
    %296 = arith.addf %294, %295 : vector<2x16x16xf32>
    %297 = tpu.concatenate %252, %244 in 2 : vector<2x16x8xf32>, vector<2x16x8xf32> -> vector<2x16x16xf32>
    "tpu.trace_start"() <{level = 10 : i32, message = "bij,bjk->bik"}> : () -> ()
    %cst_107 = arith.constant dense<0.000000e+00> : vector<2x16x16xf32>
    %298 = tpu.matmul %296, %297, %cst_107 {dimension_numbers = #tpu.dot_dimension_numbers<[2], [1], [1], [2], [0, 0, 0, 1, 1, 2], [0], [0]>} : vector<2x16x16xf32>, vector<2x16x16xf32>, vector<2x16x16xf32> -> vector<2x16x16xf32>
    "tpu.trace_stop"() : () -> ()
    %299 = vector.broadcast %276 : vector<2x1x16xf32> to vector<2x16x16xf32>
    %300 = arith.mulf %296, %299 : vector<2x16x16xf32>
    %cst_108 = arith.constant dense<0.000000e+00> : vector<2x16xf32>
    %301 = vector.multi_reduction <add>, %300, %cst_108 [2] : vector<2x16x16xf32> to vector<2x16xf32>
    %302 = vector.shape_cast %301 : vector<2x16xf32> to vector<2x16x1xf32>
    %303 = tpu.concatenate %298, %298, %298, %298, %298 in 2 : vector<2x16x16xf32>, vector<2x16x16xf32>, vector<2x16x16xf32>, vector<2x16x16xf32>, vector<2x16x16xf32> -> vector<2x16x80xf32>
    %304 = vector.broadcast %1 : vector<1x16x80xf32> to vector<2x16x80xf32>
    %305 = arith.mulf %303, %304 : vector<2x16x80xf32>
    %306 = vector.shape_cast %305 : vector<2x16x80xf32> to vector<32x80xf32>
    %cst_109 = arith.constant dense<0.000000e+00> : vector<32x16xf32>
    %307 = tpu.matmul %306, %6, %cst_109 {dimension_numbers = #tpu.dot_dimension_numbers<[1], [0], [0], [1], [0, 0, 1, 1], [], []>} : vector<32x80xf32>, vector<80x16xf32>, vector<32x16xf32> -> vector<32x16xf32>
    %308 = vector.shape_cast %307 : vector<32x16xf32> to vector<2x16x16xf32>
    %309 = vector.broadcast %302 : vector<2x16x1xf32> to vector<2x16x16xf32>
    %310 = vector.broadcast %9 : vector<1x16x16xf32> to vector<2x16x16xf32>
    %311 = arith.mulf %309, %310 : vector<2x16x16xf32>
    %312 = arith.addf %308, %311 : vector<2x16x16xf32>
    %313 = vector.broadcast %13 : vector<1x16x16xf32> to vector<2x16x16xf32>
    %314 = arith.addf %312, %313 : vector<2x16x16xf32>
    %315 = vector.extract_strided_slice %314 {offsets = [0, 0, 0], sizes = [2, 16, 8], strides = [1, 1, 1]} : vector<2x16x16xf32> to vector<2x16x8xf32>
    %316 = arith.negf %315 : vector<2x16x8xf32>
    %317 = math.exp %316 : vector<2x16x8xf32>
    %cst_110 = arith.constant 1.000000e+00 : f32
    %318 = vector.broadcast %cst_110 : f32 to vector<2x16x8xf32>
    %319 = arith.addf %318, %317 : vector<2x16x8xf32>
    %320 = arith.divf %318, %319 : vector<2x16x8xf32>
    %321 = vector.extract_strided_slice %314 {offsets = [0, 0, 8], sizes = [2, 16, 8], strides = [1, 1, 1]} : vector<2x16x16xf32> to vector<2x16x8xf32>
    %322 = arith.negf %321 : vector<2x16x8xf32>
    %323 = math.exp %322 : vector<2x16x8xf32>
    %cst_111 = arith.constant 1.000000e+00 : f32
    %324 = vector.broadcast %cst_111 : f32 to vector<2x16x8xf32>
    %325 = arith.addf %324, %323 : vector<2x16x8xf32>
    %326 = arith.divf %324, %325 : vector<2x16x8xf32>
    %cst_112 = arith.constant 0.000000e+00 : f32
    %327 = vector.broadcast %cst_112 : f32 to vector<2x16x1xf32>
    %328 = arith.cmpf one, %255, %327 : vector<2x16x1xf32>
    %329 = arith.mulf %320, %244 : vector<2x16x8xf32>
    %330 = vector.shape_cast %328 : vector<2x16x1xi1> to vector<2x16x1xi1>
    %331 = vector.broadcast %330 : vector<2x16x1xi1> to vector<2x16x8xi1>
    %332 = arith.select %331, %329, %244 : vector<2x16x8xi1>, vector<2x16x8xf32>
    %333 = tpu.concatenate %252, %332 in 2 : vector<2x16x8xf32>, vector<2x16x8xf32> -> vector<2x16x16xf32>
    %334 = tpu.concatenate %333, %333, %333, %333, %333 in 2 : vector<2x16x16xf32>, vector<2x16x16xf32>, vector<2x16x16xf32>, vector<2x16x16xf32>, vector<2x16x16xf32> -> vector<2x16x80xf32>
    %335 = vector.broadcast %1 : vector<1x16x80xf32> to vector<2x16x80xf32>
    %336 = arith.mulf %334, %335 : vector<2x16x80xf32>
    %337 = vector.shape_cast %336 : vector<2x16x80xf32> to vector<32x80xf32>
    %cst_113 = arith.constant dense<0.000000e+00> : vector<32x8xf32>
    %338 = tpu.matmul %337, %7, %cst_113 {dimension_numbers = #tpu.dot_dimension_numbers<[1], [0], [0], [1], [0, 0, 1, 1], [], []>} : vector<32x80xf32>, vector<80x8xf32>, vector<32x8xf32> -> vector<32x8xf32>
    %339 = vector.shape_cast %338 : vector<32x8xf32> to vector<2x16x8xf32>
    %340 = vector.broadcast %270 : vector<2x16x1xf32> to vector<2x16x8xf32>
    %341 = vector.broadcast %11 : vector<1x16x8xf32> to vector<2x16x8xf32>
    %342 = arith.mulf %340, %341 : vector<2x16x8xf32>
    %343 = arith.addf %339, %342 : vector<2x16x8xf32>
    %344 = vector.broadcast %15 : vector<1x16x8xf32> to vector<2x16x8xf32>
    %345 = arith.addf %343, %344 : vector<2x16x8xf32>
    %346 = math.tanh %345 : vector<2x16x8xf32>
    %cst_114 = arith.constant 1.000000e+00 : f32
    %347 = vector.broadcast %cst_114 : f32 to vector<2x16x8xf32>
    %348 = arith.subf %347, %326 : vector<2x16x8xf32>
    %349 = arith.mulf %348, %332 : vector<2x16x8xf32>
    %350 = arith.mulf %326, %346 : vector<2x16x8xf32>
    %351 = arith.addf %349, %350 : vector<2x16x8xf32>
    %352 = vector.shape_cast %328 : vector<2x16x1xi1> to vector<2x16x1xi1>
    %353 = vector.broadcast %352 : vector<2x16x1xi1> to vector<2x16x8xi1>
    %354 = arith.select %353, %351, %332 : vector<2x16x8xi1>, vector<2x16x8xf32>
    %355 = vector.broadcast %c2_i32 : i32 to vector<2x1x1xi32>
    %356 = arith.cmpi eq, %18, %355 : vector<2x1x1xi32>
    %357 = vector.shape_cast %356 : vector<2x1x1xi1> to vector<2x1x1xi1>
    %358 = vector.broadcast %357 : vector<2x1x1xi1> to vector<2x16x8xi1>
    %359 = arith.select %358, %354, %249 : vector<2x16x8xi1>, vector<2x16x8xf32>
    %c3_i32 = arith.constant 3 : i32
    %c0_115 = arith.constant 0 : index
    %360 = arith.index_cast %c3_i32 : i32 to index
    %c0_116 = arith.constant 0 : index
    %c0_117 = arith.constant 0 : index
    %361 = vector.load %arg1[%c0_115, %360, %c0_116, %c0_117] : memref<2x8x16x8xf32, #tpu.memory_space<vmem>>, vector<2x1x16x8xf32>
    %362 = vector.shape_cast %361 : vector<2x1x16x8xf32> to vector<2x16x8xf32>
    %c0_118 = arith.constant 0 : index
    %363 = arith.index_cast %c3_i32 : i32 to index
    %c0_119 = arith.constant 0 : index
    %c0_120 = arith.constant 0 : index
    %364 = vector.load %arg2[%c0_118, %363, %c0_119, %c0_120] : memref<2x8x16x1xf32, #tpu.memory_space<vmem>>, vector<2x1x16x1xf32>
    %365 = vector.shape_cast %364 : vector<2x1x16x1xf32> to vector<2x16x1xf32>
    %c0_121 = arith.constant 0 : index
    %366 = arith.index_cast %c3_i32 : i32 to index
    %c0_122 = arith.constant 0 : index
    %c0_123 = arith.constant 0 : index
    %367 = vector.load %arg3[%c0_121, %366, %c0_122, %c0_123] : memref<2x8x1x16xf32, #tpu.memory_space<vmem>>, vector<2x1x1x16xf32>
    %368 = vector.shape_cast %367 : vector<2x1x1x16xf32> to vector<2x1x16xf32>
    %c0_124 = arith.constant 0 : index
    %369 = arith.index_cast %c3_i32 : i32 to index
    %c0_125 = arith.constant 0 : index
    %c0_126 = arith.constant 0 : index
    %370 = vector.load %arg4[%c0_124, %369, %c0_125, %c0_126] : memref<2x8x16x1xf32, #tpu.memory_space<vmem>>, vector<2x1x16x1xf32>
    %371 = vector.shape_cast %370 : vector<2x1x16x1xf32> to vector<2x16x1xf32>
    %c0_127 = arith.constant 0 : index
    %372 = arith.index_cast %c3_i32 : i32 to index
    %c0_128 = arith.constant 0 : index
    %c0_129 = arith.constant 0 : index
    %373 = vector.load %arg5[%c0_127, %372, %c0_128, %c0_129] : memref<2x8x1x16xf32, #tpu.memory_space<vmem>>, vector<2x1x1x16xf32>
    %374 = vector.shape_cast %373 : vector<2x1x1x16xf32> to vector<2x1x16xf32>
    %cst_130 = arith.constant 1.000000e+00 : f32
    %375 = vector.broadcast %cst_130 : f32 to vector<2x16x1xf32>
    %376 = arith.addf %19, %375 : vector<2x16x1xf32>
    %377 = arith.divf %371, %376 : vector<2x16x1xf32>
    %378 = math.tanh %377 : vector<2x16x1xf32>
    %cst_131 = arith.constant 5.000000e-01 : f32
    %379 = vector.broadcast %cst_131 : f32 to vector<2x16x1xf32>
    %380 = arith.mulf %379, %378 : vector<2x16x1xf32>
    %cst_132 = arith.constant 1.000000e+00 : f32
    %381 = vector.broadcast %cst_132 : f32 to vector<2x1x16xf32>
    %382 = arith.addf %20, %381 : vector<2x1x16xf32>
    %383 = arith.divf %374, %382 : vector<2x1x16xf32>
    %384 = math.tanh %383 : vector<2x1x16xf32>
    %cst_133 = arith.constant 5.000000e-01 : f32
    %385 = vector.broadcast %cst_133 : f32 to vector<2x1x16xf32>
    %386 = arith.mulf %385, %384 : vector<2x1x16xf32>
    %cst_134 = arith.constant 0.000000e+00 : f32
    %387 = vector.broadcast %cst_134 : f32 to vector<1x16x16xf32>
    %388 = arith.subf %387, %5 : vector<1x16x16xf32>
    %389 = vector.broadcast %380 : vector<2x16x1xf32> to vector<2x16x16xf32>
    %390 = vector.broadcast %386 : vector<2x1x16xf32> to vector<2x16x16xf32>
    %391 = arith.subf %389, %390 : vector<2x16x16xf32>
    %392 = math.absf %391 : vector<2x16x16xf32>
    %393 = vector.broadcast %388 : vector<1x16x16xf32> to vector<2x16x16xf32>
    %394 = arith.mulf %393, %392 : vector<2x16x16xf32>
    %395 = vector.broadcast %365 : vector<2x16x1xf32> to vector<2x16x16xf32>
    %396 = vector.broadcast %368 : vector<2x1x16xf32> to vector<2x16x16xf32>
    %397 = arith.mulf %395, %396 : vector<2x16x16xf32>
    %cst_135 = arith.constant 1.000000e+00 : f32
    %398 = vector.broadcast %cst_135 : f32 to vector<2x16x16xf32>
    %399 = arith.addf %398, %394 : vector<2x16x16xf32>
    %400 = vector.broadcast %3 : vector<1x16x16xf32> to vector<2x16x16xf32>
    %401 = arith.mulf %400, %399 : vector<2x16x16xf32>
    %402 = arith.mulf %401, %397 : vector<2x16x16xf32>
    %403 = vector.broadcast %28 : vector<1x16x16xf32> to vector<2x16x16xf32>
    %404 = arith.mulf %402, %403 : vector<2x16x16xf32>
    %405 = vector.broadcast %26 : vector<1x16x16xf32> to vector<2x16x16xf32>
    %406 = arith.addf %404, %405 : vector<2x16x16xf32>
    %407 = tpu.concatenate %362, %354 in 2 : vector<2x16x8xf32>, vector<2x16x8xf32> -> vector<2x16x16xf32>
    "tpu.trace_start"() <{level = 10 : i32, message = "bij,bjk->bik"}> : () -> ()
    %cst_136 = arith.constant dense<0.000000e+00> : vector<2x16x16xf32>
    %408 = tpu.matmul %406, %407, %cst_136 {dimension_numbers = #tpu.dot_dimension_numbers<[2], [1], [1], [2], [0, 0, 0, 1, 1, 2], [0], [0]>} : vector<2x16x16xf32>, vector<2x16x16xf32>, vector<2x16x16xf32> -> vector<2x16x16xf32>
    "tpu.trace_stop"() : () -> ()
    %409 = vector.broadcast %386 : vector<2x1x16xf32> to vector<2x16x16xf32>
    %410 = arith.mulf %406, %409 : vector<2x16x16xf32>
    %cst_137 = arith.constant dense<0.000000e+00> : vector<2x16xf32>
    %411 = vector.multi_reduction <add>, %410, %cst_137 [2] : vector<2x16x16xf32> to vector<2x16xf32>
    %412 = vector.shape_cast %411 : vector<2x16xf32> to vector<2x16x1xf32>
    %413 = tpu.concatenate %408, %408, %408, %408, %408 in 2 : vector<2x16x16xf32>, vector<2x16x16xf32>, vector<2x16x16xf32>, vector<2x16x16xf32>, vector<2x16x16xf32> -> vector<2x16x80xf32>
    %414 = vector.broadcast %1 : vector<1x16x80xf32> to vector<2x16x80xf32>
    %415 = arith.mulf %413, %414 : vector<2x16x80xf32>
    %416 = vector.shape_cast %415 : vector<2x16x80xf32> to vector<32x80xf32>
    %cst_138 = arith.constant dense<0.000000e+00> : vector<32x16xf32>
    %417 = tpu.matmul %416, %6, %cst_138 {dimension_numbers = #tpu.dot_dimension_numbers<[1], [0], [0], [1], [0, 0, 1, 1], [], []>} : vector<32x80xf32>, vector<80x16xf32>, vector<32x16xf32> -> vector<32x16xf32>
    %418 = vector.shape_cast %417 : vector<32x16xf32> to vector<2x16x16xf32>
    %419 = vector.broadcast %412 : vector<2x16x1xf32> to vector<2x16x16xf32>
    %420 = vector.broadcast %9 : vector<1x16x16xf32> to vector<2x16x16xf32>
    %421 = arith.mulf %419, %420 : vector<2x16x16xf32>
    %422 = arith.addf %418, %421 : vector<2x16x16xf32>
    %423 = vector.broadcast %13 : vector<1x16x16xf32> to vector<2x16x16xf32>
    %424 = arith.addf %422, %423 : vector<2x16x16xf32>
    %425 = vector.extract_strided_slice %424 {offsets = [0, 0, 0], sizes = [2, 16, 8], strides = [1, 1, 1]} : vector<2x16x16xf32> to vector<2x16x8xf32>
    %426 = arith.negf %425 : vector<2x16x8xf32>
    %427 = math.exp %426 : vector<2x16x8xf32>
    %cst_139 = arith.constant 1.000000e+00 : f32
    %428 = vector.broadcast %cst_139 : f32 to vector<2x16x8xf32>
    %429 = arith.addf %428, %427 : vector<2x16x8xf32>
    %430 = arith.divf %428, %429 : vector<2x16x8xf32>
    %431 = vector.extract_strided_slice %424 {offsets = [0, 0, 8], sizes = [2, 16, 8], strides = [1, 1, 1]} : vector<2x16x16xf32> to vector<2x16x8xf32>
    %432 = arith.negf %431 : vector<2x16x8xf32>
    %433 = math.exp %432 : vector<2x16x8xf32>
    %cst_140 = arith.constant 1.000000e+00 : f32
    %434 = vector.broadcast %cst_140 : f32 to vector<2x16x8xf32>
    %435 = arith.addf %434, %433 : vector<2x16x8xf32>
    %436 = arith.divf %434, %435 : vector<2x16x8xf32>
    %cst_141 = arith.constant 0.000000e+00 : f32
    %437 = vector.broadcast %cst_141 : f32 to vector<2x16x1xf32>
    %438 = arith.cmpf one, %365, %437 : vector<2x16x1xf32>
    %439 = arith.mulf %430, %354 : vector<2x16x8xf32>
    %440 = vector.shape_cast %438 : vector<2x16x1xi1> to vector<2x16x1xi1>
    %441 = vector.broadcast %440 : vector<2x16x1xi1> to vector<2x16x8xi1>
    %442 = arith.select %441, %439, %354 : vector<2x16x8xi1>, vector<2x16x8xf32>
    %443 = tpu.concatenate %362, %442 in 2 : vector<2x16x8xf32>, vector<2x16x8xf32> -> vector<2x16x16xf32>
    %444 = tpu.concatenate %443, %443, %443, %443, %443 in 2 : vector<2x16x16xf32>, vector<2x16x16xf32>, vector<2x16x16xf32>, vector<2x16x16xf32>, vector<2x16x16xf32> -> vector<2x16x80xf32>
    %445 = vector.broadcast %1 : vector<1x16x80xf32> to vector<2x16x80xf32>
    %446 = arith.mulf %444, %445 : vector<2x16x80xf32>
    %447 = vector.shape_cast %446 : vector<2x16x80xf32> to vector<32x80xf32>
    %cst_142 = arith.constant dense<0.000000e+00> : vector<32x8xf32>
    %448 = tpu.matmul %447, %7, %cst_142 {dimension_numbers = #tpu.dot_dimension_numbers<[1], [0], [0], [1], [0, 0, 1, 1], [], []>} : vector<32x80xf32>, vector<80x8xf32>, vector<32x8xf32> -> vector<32x8xf32>
    %449 = vector.shape_cast %448 : vector<32x8xf32> to vector<2x16x8xf32>
    %450 = vector.broadcast %380 : vector<2x16x1xf32> to vector<2x16x8xf32>
    %451 = vector.broadcast %11 : vector<1x16x8xf32> to vector<2x16x8xf32>
    %452 = arith.mulf %450, %451 : vector<2x16x8xf32>
    %453 = arith.addf %449, %452 : vector<2x16x8xf32>
    %454 = vector.broadcast %15 : vector<1x16x8xf32> to vector<2x16x8xf32>
    %455 = arith.addf %453, %454 : vector<2x16x8xf32>
    %456 = math.tanh %455 : vector<2x16x8xf32>
    %cst_143 = arith.constant 1.000000e+00 : f32
    %457 = vector.broadcast %cst_143 : f32 to vector<2x16x8xf32>
    %458 = arith.subf %457, %436 : vector<2x16x8xf32>
    %459 = arith.mulf %458, %442 : vector<2x16x8xf32>
    %460 = arith.mulf %436, %456 : vector<2x16x8xf32>
    %461 = arith.addf %459, %460 : vector<2x16x8xf32>
    %462 = vector.shape_cast %438 : vector<2x16x1xi1> to vector<2x16x1xi1>
    %463 = vector.broadcast %462 : vector<2x16x1xi1> to vector<2x16x8xi1>
    %464 = arith.select %463, %461, %442 : vector<2x16x8xi1>, vector<2x16x8xf32>
    %465 = vector.broadcast %c3_i32 : i32 to vector<2x1x1xi32>
    %466 = arith.cmpi eq, %18, %465 : vector<2x1x1xi32>
    %467 = vector.shape_cast %466 : vector<2x1x1xi1> to vector<2x1x1xi1>
    %468 = vector.broadcast %467 : vector<2x1x1xi1> to vector<2x16x8xi1>
    %469 = arith.select %468, %464, %359 : vector<2x16x8xi1>, vector<2x16x8xf32>
    %c4_i32 = arith.constant 4 : i32
    %c0_144 = arith.constant 0 : index
    %470 = arith.index_cast %c4_i32 : i32 to index
    %c0_145 = arith.constant 0 : index
    %c0_146 = arith.constant 0 : index
    %471 = vector.load %arg1[%c0_144, %470, %c0_145, %c0_146] : memref<2x8x16x8xf32, #tpu.memory_space<vmem>>, vector<2x1x16x8xf32>
    %472 = vector.shape_cast %471 : vector<2x1x16x8xf32> to vector<2x16x8xf32>
    %c0_147 = arith.constant 0 : index
    %473 = arith.index_cast %c4_i32 : i32 to index
    %c0_148 = arith.constant 0 : index
    %c0_149 = arith.constant 0 : index
    %474 = vector.load %arg2[%c0_147, %473, %c0_148, %c0_149] : memref<2x8x16x1xf32, #tpu.memory_space<vmem>>, vector<2x1x16x1xf32>
    %475 = vector.shape_cast %474 : vector<2x1x16x1xf32> to vector<2x16x1xf32>
    %c0_150 = arith.constant 0 : index
    %476 = arith.index_cast %c4_i32 : i32 to index
    %c0_151 = arith.constant 0 : index
    %c0_152 = arith.constant 0 : index
    %477 = vector.load %arg3[%c0_150, %476, %c0_151, %c0_152] : memref<2x8x1x16xf32, #tpu.memory_space<vmem>>, vector<2x1x1x16xf32>
    %478 = vector.shape_cast %477 : vector<2x1x1x16xf32> to vector<2x1x16xf32>
    %c0_153 = arith.constant 0 : index
    %479 = arith.index_cast %c4_i32 : i32 to index
    %c0_154 = arith.constant 0 : index
    %c0_155 = arith.constant 0 : index
    %480 = vector.load %arg4[%c0_153, %479, %c0_154, %c0_155] : memref<2x8x16x1xf32, #tpu.memory_space<vmem>>, vector<2x1x16x1xf32>
    %481 = vector.shape_cast %480 : vector<2x1x16x1xf32> to vector<2x16x1xf32>
    %c0_156 = arith.constant 0 : index
    %482 = arith.index_cast %c4_i32 : i32 to index
    %c0_157 = arith.constant 0 : index
    %c0_158 = arith.constant 0 : index
    %483 = vector.load %arg5[%c0_156, %482, %c0_157, %c0_158] : memref<2x8x1x16xf32, #tpu.memory_space<vmem>>, vector<2x1x1x16xf32>
    %484 = vector.shape_cast %483 : vector<2x1x1x16xf32> to vector<2x1x16xf32>
    %cst_159 = arith.constant 1.000000e+00 : f32
    %485 = vector.broadcast %cst_159 : f32 to vector<2x16x1xf32>
    %486 = arith.addf %19, %485 : vector<2x16x1xf32>
    %487 = arith.divf %481, %486 : vector<2x16x1xf32>
    %488 = math.tanh %487 : vector<2x16x1xf32>
    %cst_160 = arith.constant 5.000000e-01 : f32
    %489 = vector.broadcast %cst_160 : f32 to vector<2x16x1xf32>
    %490 = arith.mulf %489, %488 : vector<2x16x1xf32>
    %cst_161 = arith.constant 1.000000e+00 : f32
    %491 = vector.broadcast %cst_161 : f32 to vector<2x1x16xf32>
    %492 = arith.addf %20, %491 : vector<2x1x16xf32>
    %493 = arith.divf %484, %492 : vector<2x1x16xf32>
    %494 = math.tanh %493 : vector<2x1x16xf32>
    %cst_162 = arith.constant 5.000000e-01 : f32
    %495 = vector.broadcast %cst_162 : f32 to vector<2x1x16xf32>
    %496 = arith.mulf %495, %494 : vector<2x1x16xf32>
    %cst_163 = arith.constant 0.000000e+00 : f32
    %497 = vector.broadcast %cst_163 : f32 to vector<1x16x16xf32>
    %498 = arith.subf %497, %5 : vector<1x16x16xf32>
    %499 = vector.broadcast %490 : vector<2x16x1xf32> to vector<2x16x16xf32>
    %500 = vector.broadcast %496 : vector<2x1x16xf32> to vector<2x16x16xf32>
    %501 = arith.subf %499, %500 : vector<2x16x16xf32>
    %502 = math.absf %501 : vector<2x16x16xf32>
    %503 = vector.broadcast %498 : vector<1x16x16xf32> to vector<2x16x16xf32>
    %504 = arith.mulf %503, %502 : vector<2x16x16xf32>
    %505 = vector.broadcast %475 : vector<2x16x1xf32> to vector<2x16x16xf32>
    %506 = vector.broadcast %478 : vector<2x1x16xf32> to vector<2x16x16xf32>
    %507 = arith.mulf %505, %506 : vector<2x16x16xf32>
    %cst_164 = arith.constant 1.000000e+00 : f32
    %508 = vector.broadcast %cst_164 : f32 to vector<2x16x16xf32>
    %509 = arith.addf %508, %504 : vector<2x16x16xf32>
    %510 = vector.broadcast %3 : vector<1x16x16xf32> to vector<2x16x16xf32>
    %511 = arith.mulf %510, %509 : vector<2x16x16xf32>
    %512 = arith.mulf %511, %507 : vector<2x16x16xf32>
    %513 = vector.broadcast %28 : vector<1x16x16xf32> to vector<2x16x16xf32>
    %514 = arith.mulf %512, %513 : vector<2x16x16xf32>
    %515 = vector.broadcast %26 : vector<1x16x16xf32> to vector<2x16x16xf32>
    %516 = arith.addf %514, %515 : vector<2x16x16xf32>
    %517 = tpu.concatenate %472, %464 in 2 : vector<2x16x8xf32>, vector<2x16x8xf32> -> vector<2x16x16xf32>
    "tpu.trace_start"() <{level = 10 : i32, message = "bij,bjk->bik"}> : () -> ()
    %cst_165 = arith.constant dense<0.000000e+00> : vector<2x16x16xf32>
    %518 = tpu.matmul %516, %517, %cst_165 {dimension_numbers = #tpu.dot_dimension_numbers<[2], [1], [1], [2], [0, 0, 0, 1, 1, 2], [0], [0]>} : vector<2x16x16xf32>, vector<2x16x16xf32>, vector<2x16x16xf32> -> vector<2x16x16xf32>
    "tpu.trace_stop"() : () -> ()
    %519 = vector.broadcast %496 : vector<2x1x16xf32> to vector<2x16x16xf32>
    %520 = arith.mulf %516, %519 : vector<2x16x16xf32>
    %cst_166 = arith.constant dense<0.000000e+00> : vector<2x16xf32>
    %521 = vector.multi_reduction <add>, %520, %cst_166 [2] : vector<2x16x16xf32> to vector<2x16xf32>
    %522 = vector.shape_cast %521 : vector<2x16xf32> to vector<2x16x1xf32>
    %523 = tpu.concatenate %518, %518, %518, %518, %518 in 2 : vector<2x16x16xf32>, vector<2x16x16xf32>, vector<2x16x16xf32>, vector<2x16x16xf32>, vector<2x16x16xf32> -> vector<2x16x80xf32>
    %524 = vector.broadcast %1 : vector<1x16x80xf32> to vector<2x16x80xf32>
    %525 = arith.mulf %523, %524 : vector<2x16x80xf32>
    %526 = vector.shape_cast %525 : vector<2x16x80xf32> to vector<32x80xf32>
    %cst_167 = arith.constant dense<0.000000e+00> : vector<32x16xf32>
    %527 = tpu.matmul %526, %6, %cst_167 {dimension_numbers = #tpu.dot_dimension_numbers<[1], [0], [0], [1], [0, 0, 1, 1], [], []>} : vector<32x80xf32>, vector<80x16xf32>, vector<32x16xf32> -> vector<32x16xf32>
    %528 = vector.shape_cast %527 : vector<32x16xf32> to vector<2x16x16xf32>
    %529 = vector.broadcast %522 : vector<2x16x1xf32> to vector<2x16x16xf32>
    %530 = vector.broadcast %9 : vector<1x16x16xf32> to vector<2x16x16xf32>
    %531 = arith.mulf %529, %530 : vector<2x16x16xf32>
    %532 = arith.addf %528, %531 : vector<2x16x16xf32>
    %533 = vector.broadcast %13 : vector<1x16x16xf32> to vector<2x16x16xf32>
    %534 = arith.addf %532, %533 : vector<2x16x16xf32>
    %535 = vector.extract_strided_slice %534 {offsets = [0, 0, 0], sizes = [2, 16, 8], strides = [1, 1, 1]} : vector<2x16x16xf32> to vector<2x16x8xf32>
    %536 = arith.negf %535 : vector<2x16x8xf32>
    %537 = math.exp %536 : vector<2x16x8xf32>
    %cst_168 = arith.constant 1.000000e+00 : f32
    %538 = vector.broadcast %cst_168 : f32 to vector<2x16x8xf32>
    %539 = arith.addf %538, %537 : vector<2x16x8xf32>
    %540 = arith.divf %538, %539 : vector<2x16x8xf32>
    %541 = vector.extract_strided_slice %534 {offsets = [0, 0, 8], sizes = [2, 16, 8], strides = [1, 1, 1]} : vector<2x16x16xf32> to vector<2x16x8xf32>
    %542 = arith.negf %541 : vector<2x16x8xf32>
    %543 = math.exp %542 : vector<2x16x8xf32>
    %cst_169 = arith.constant 1.000000e+00 : f32
    %544 = vector.broadcast %cst_169 : f32 to vector<2x16x8xf32>
    %545 = arith.addf %544, %543 : vector<2x16x8xf32>
    %546 = arith.divf %544, %545 : vector<2x16x8xf32>
    %cst_170 = arith.constant 0.000000e+00 : f32
    %547 = vector.broadcast %cst_170 : f32 to vector<2x16x1xf32>
    %548 = arith.cmpf one, %475, %547 : vector<2x16x1xf32>
    %549 = arith.mulf %540, %464 : vector<2x16x8xf32>
    %550 = vector.shape_cast %548 : vector<2x16x1xi1> to vector<2x16x1xi1>
    %551 = vector.broadcast %550 : vector<2x16x1xi1> to vector<2x16x8xi1>
    %552 = arith.select %551, %549, %464 : vector<2x16x8xi1>, vector<2x16x8xf32>
    %553 = tpu.concatenate %472, %552 in 2 : vector<2x16x8xf32>, vector<2x16x8xf32> -> vector<2x16x16xf32>
    %554 = tpu.concatenate %553, %553, %553, %553, %553 in 2 : vector<2x16x16xf32>, vector<2x16x16xf32>, vector<2x16x16xf32>, vector<2x16x16xf32>, vector<2x16x16xf32> -> vector<2x16x80xf32>
    %555 = vector.broadcast %1 : vector<1x16x80xf32> to vector<2x16x80xf32>
    %556 = arith.mulf %554, %555 : vector<2x16x80xf32>
    %557 = vector.shape_cast %556 : vector<2x16x80xf32> to vector<32x80xf32>
    %cst_171 = arith.constant dense<0.000000e+00> : vector<32x8xf32>
    %558 = tpu.matmul %557, %7, %cst_171 {dimension_numbers = #tpu.dot_dimension_numbers<[1], [0], [0], [1], [0, 0, 1, 1], [], []>} : vector<32x80xf32>, vector<80x8xf32>, vector<32x8xf32> -> vector<32x8xf32>
    %559 = vector.shape_cast %558 : vector<32x8xf32> to vector<2x16x8xf32>
    %560 = vector.broadcast %490 : vector<2x16x1xf32> to vector<2x16x8xf32>
    %561 = vector.broadcast %11 : vector<1x16x8xf32> to vector<2x16x8xf32>
    %562 = arith.mulf %560, %561 : vector<2x16x8xf32>
    %563 = arith.addf %559, %562 : vector<2x16x8xf32>
    %564 = vector.broadcast %15 : vector<1x16x8xf32> to vector<2x16x8xf32>
    %565 = arith.addf %563, %564 : vector<2x16x8xf32>
    %566 = math.tanh %565 : vector<2x16x8xf32>
    %cst_172 = arith.constant 1.000000e+00 : f32
    %567 = vector.broadcast %cst_172 : f32 to vector<2x16x8xf32>
    %568 = arith.subf %567, %546 : vector<2x16x8xf32>
    %569 = arith.mulf %568, %552 : vector<2x16x8xf32>
    %570 = arith.mulf %546, %566 : vector<2x16x8xf32>
    %571 = arith.addf %569, %570 : vector<2x16x8xf32>
    %572 = vector.shape_cast %548 : vector<2x16x1xi1> to vector<2x16x1xi1>
    %573 = vector.broadcast %572 : vector<2x16x1xi1> to vector<2x16x8xi1>
    %574 = arith.select %573, %571, %552 : vector<2x16x8xi1>, vector<2x16x8xf32>
    %575 = vector.broadcast %c4_i32 : i32 to vector<2x1x1xi32>
    %576 = arith.cmpi eq, %18, %575 : vector<2x1x1xi32>
    %577 = vector.shape_cast %576 : vector<2x1x1xi1> to vector<2x1x1xi1>
    %578 = vector.broadcast %577 : vector<2x1x1xi1> to vector<2x16x8xi1>
    %579 = arith.select %578, %574, %469 : vector<2x16x8xi1>, vector<2x16x8xf32>
    %c5_i32 = arith.constant 5 : i32
    %c0_173 = arith.constant 0 : index
    %580 = arith.index_cast %c5_i32 : i32 to index
    %c0_174 = arith.constant 0 : index
    %c0_175 = arith.constant 0 : index
    %581 = vector.load %arg1[%c0_173, %580, %c0_174, %c0_175] : memref<2x8x16x8xf32, #tpu.memory_space<vmem>>, vector<2x1x16x8xf32>
    %582 = vector.shape_cast %581 : vector<2x1x16x8xf32> to vector<2x16x8xf32>
    %c0_176 = arith.constant 0 : index
    %583 = arith.index_cast %c5_i32 : i32 to index
    %c0_177 = arith.constant 0 : index
    %c0_178 = arith.constant 0 : index
    %584 = vector.load %arg2[%c0_176, %583, %c0_177, %c0_178] : memref<2x8x16x1xf32, #tpu.memory_space<vmem>>, vector<2x1x16x1xf32>
    %585 = vector.shape_cast %584 : vector<2x1x16x1xf32> to vector<2x16x1xf32>
    %c0_179 = arith.constant 0 : index
    %586 = arith.index_cast %c5_i32 : i32 to index
    %c0_180 = arith.constant 0 : index
    %c0_181 = arith.constant 0 : index
    %587 = vector.load %arg3[%c0_179, %586, %c0_180, %c0_181] : memref<2x8x1x16xf32, #tpu.memory_space<vmem>>, vector<2x1x1x16xf32>
    %588 = vector.shape_cast %587 : vector<2x1x1x16xf32> to vector<2x1x16xf32>
    %c0_182 = arith.constant 0 : index
    %589 = arith.index_cast %c5_i32 : i32 to index
    %c0_183 = arith.constant 0 : index
    %c0_184 = arith.constant 0 : index
    %590 = vector.load %arg4[%c0_182, %589, %c0_183, %c0_184] : memref<2x8x16x1xf32, #tpu.memory_space<vmem>>, vector<2x1x16x1xf32>
    %591 = vector.shape_cast %590 : vector<2x1x16x1xf32> to vector<2x16x1xf32>
    %c0_185 = arith.constant 0 : index
    %592 = arith.index_cast %c5_i32 : i32 to index
    %c0_186 = arith.constant 0 : index
    %c0_187 = arith.constant 0 : index
    %593 = vector.load %arg5[%c0_185, %592, %c0_186, %c0_187] : memref<2x8x1x16xf32, #tpu.memory_space<vmem>>, vector<2x1x1x16xf32>
    %594 = vector.shape_cast %593 : vector<2x1x1x16xf32> to vector<2x1x16xf32>
    %cst_188 = arith.constant 1.000000e+00 : f32
    %595 = vector.broadcast %cst_188 : f32 to vector<2x16x1xf32>
    %596 = arith.addf %19, %595 : vector<2x16x1xf32>
    %597 = arith.divf %591, %596 : vector<2x16x1xf32>
    %598 = math.tanh %597 : vector<2x16x1xf32>
    %cst_189 = arith.constant 5.000000e-01 : f32
    %599 = vector.broadcast %cst_189 : f32 to vector<2x16x1xf32>
    %600 = arith.mulf %599, %598 : vector<2x16x1xf32>
    %cst_190 = arith.constant 1.000000e+00 : f32
    %601 = vector.broadcast %cst_190 : f32 to vector<2x1x16xf32>
    %602 = arith.addf %20, %601 : vector<2x1x16xf32>
    %603 = arith.divf %594, %602 : vector<2x1x16xf32>
    %604 = math.tanh %603 : vector<2x1x16xf32>
    %cst_191 = arith.constant 5.000000e-01 : f32
    %605 = vector.broadcast %cst_191 : f32 to vector<2x1x16xf32>
    %606 = arith.mulf %605, %604 : vector<2x1x16xf32>
    %cst_192 = arith.constant 0.000000e+00 : f32
    %607 = vector.broadcast %cst_192 : f32 to vector<1x16x16xf32>
    %608 = arith.subf %607, %5 : vector<1x16x16xf32>
    %609 = vector.broadcast %600 : vector<2x16x1xf32> to vector<2x16x16xf32>
    %610 = vector.broadcast %606 : vector<2x1x16xf32> to vector<2x16x16xf32>
    %611 = arith.subf %609, %610 : vector<2x16x16xf32>
    %612 = math.absf %611 : vector<2x16x16xf32>
    %613 = vector.broadcast %608 : vector<1x16x16xf32> to vector<2x16x16xf32>
    %614 = arith.mulf %613, %612 : vector<2x16x16xf32>
    %615 = vector.broadcast %585 : vector<2x16x1xf32> to vector<2x16x16xf32>
    %616 = vector.broadcast %588 : vector<2x1x16xf32> to vector<2x16x16xf32>
    %617 = arith.mulf %615, %616 : vector<2x16x16xf32>
    %cst_193 = arith.constant 1.000000e+00 : f32
    %618 = vector.broadcast %cst_193 : f32 to vector<2x16x16xf32>
    %619 = arith.addf %618, %614 : vector<2x16x16xf32>
    %620 = vector.broadcast %3 : vector<1x16x16xf32> to vector<2x16x16xf32>
    %621 = arith.mulf %620, %619 : vector<2x16x16xf32>
    %622 = arith.mulf %621, %617 : vector<2x16x16xf32>
    %623 = vector.broadcast %28 : vector<1x16x16xf32> to vector<2x16x16xf32>
    %624 = arith.mulf %622, %623 : vector<2x16x16xf32>
    %625 = vector.broadcast %26 : vector<1x16x16xf32> to vector<2x16x16xf32>
    %626 = arith.addf %624, %625 : vector<2x16x16xf32>
    %627 = tpu.concatenate %582, %574 in 2 : vector<2x16x8xf32>, vector<2x16x8xf32> -> vector<2x16x16xf32>
    "tpu.trace_start"() <{level = 10 : i32, message = "bij,bjk->bik"}> : () -> ()
    %cst_194 = arith.constant dense<0.000000e+00> : vector<2x16x16xf32>
    %628 = tpu.matmul %626, %627, %cst_194 {dimension_numbers = #tpu.dot_dimension_numbers<[2], [1], [1], [2], [0, 0, 0, 1, 1, 2], [0], [0]>} : vector<2x16x16xf32>, vector<2x16x16xf32>, vector<2x16x16xf32> -> vector<2x16x16xf32>
    "tpu.trace_stop"() : () -> ()
    %629 = vector.broadcast %606 : vector<2x1x16xf32> to vector<2x16x16xf32>
    %630 = arith.mulf %626, %629 : vector<2x16x16xf32>
    %cst_195 = arith.constant dense<0.000000e+00> : vector<2x16xf32>
    %631 = vector.multi_reduction <add>, %630, %cst_195 [2] : vector<2x16x16xf32> to vector<2x16xf32>
    %632 = vector.shape_cast %631 : vector<2x16xf32> to vector<2x16x1xf32>
    %633 = tpu.concatenate %628, %628, %628, %628, %628 in 2 : vector<2x16x16xf32>, vector<2x16x16xf32>, vector<2x16x16xf32>, vector<2x16x16xf32>, vector<2x16x16xf32> -> vector<2x16x80xf32>
    %634 = vector.broadcast %1 : vector<1x16x80xf32> to vector<2x16x80xf32>
    %635 = arith.mulf %633, %634 : vector<2x16x80xf32>
    %636 = vector.shape_cast %635 : vector<2x16x80xf32> to vector<32x80xf32>
    %cst_196 = arith.constant dense<0.000000e+00> : vector<32x16xf32>
    %637 = tpu.matmul %636, %6, %cst_196 {dimension_numbers = #tpu.dot_dimension_numbers<[1], [0], [0], [1], [0, 0, 1, 1], [], []>} : vector<32x80xf32>, vector<80x16xf32>, vector<32x16xf32> -> vector<32x16xf32>
    %638 = vector.shape_cast %637 : vector<32x16xf32> to vector<2x16x16xf32>
    %639 = vector.broadcast %632 : vector<2x16x1xf32> to vector<2x16x16xf32>
    %640 = vector.broadcast %9 : vector<1x16x16xf32> to vector<2x16x16xf32>
    %641 = arith.mulf %639, %640 : vector<2x16x16xf32>
    %642 = arith.addf %638, %641 : vector<2x16x16xf32>
    %643 = vector.broadcast %13 : vector<1x16x16xf32> to vector<2x16x16xf32>
    %644 = arith.addf %642, %643 : vector<2x16x16xf32>
    %645 = vector.extract_strided_slice %644 {offsets = [0, 0, 0], sizes = [2, 16, 8], strides = [1, 1, 1]} : vector<2x16x16xf32> to vector<2x16x8xf32>
    %646 = arith.negf %645 : vector<2x16x8xf32>
    %647 = math.exp %646 : vector<2x16x8xf32>
    %cst_197 = arith.constant 1.000000e+00 : f32
    %648 = vector.broadcast %cst_197 : f32 to vector<2x16x8xf32>
    %649 = arith.addf %648, %647 : vector<2x16x8xf32>
    %650 = arith.divf %648, %649 : vector<2x16x8xf32>
    %651 = vector.extract_strided_slice %644 {offsets = [0, 0, 8], sizes = [2, 16, 8], strides = [1, 1, 1]} : vector<2x16x16xf32> to vector<2x16x8xf32>
    %652 = arith.negf %651 : vector<2x16x8xf32>
    %653 = math.exp %652 : vector<2x16x8xf32>
    %cst_198 = arith.constant 1.000000e+00 : f32
    %654 = vector.broadcast %cst_198 : f32 to vector<2x16x8xf32>
    %655 = arith.addf %654, %653 : vector<2x16x8xf32>
    %656 = arith.divf %654, %655 : vector<2x16x8xf32>
    %cst_199 = arith.constant 0.000000e+00 : f32
    %657 = vector.broadcast %cst_199 : f32 to vector<2x16x1xf32>
    %658 = arith.cmpf one, %585, %657 : vector<2x16x1xf32>
    %659 = arith.mulf %650, %574 : vector<2x16x8xf32>
    %660 = vector.shape_cast %658 : vector<2x16x1xi1> to vector<2x16x1xi1>
    %661 = vector.broadcast %660 : vector<2x16x1xi1> to vector<2x16x8xi1>
    %662 = arith.select %661, %659, %574 : vector<2x16x8xi1>, vector<2x16x8xf32>
    %663 = tpu.concatenate %582, %662 in 2 : vector<2x16x8xf32>, vector<2x16x8xf32> -> vector<2x16x16xf32>
    %664 = tpu.concatenate %663, %663, %663, %663, %663 in 2 : vector<2x16x16xf32>, vector<2x16x16xf32>, vector<2x16x16xf32>, vector<2x16x16xf32>, vector<2x16x16xf32> -> vector<2x16x80xf32>
    %665 = vector.broadcast %1 : vector<1x16x80xf32> to vector<2x16x80xf32>
    %666 = arith.mulf %664, %665 : vector<2x16x80xf32>
    %667 = vector.shape_cast %666 : vector<2x16x80xf32> to vector<32x80xf32>
    %cst_200 = arith.constant dense<0.000000e+00> : vector<32x8xf32>
    %668 = tpu.matmul %667, %7, %cst_200 {dimension_numbers = #tpu.dot_dimension_numbers<[1], [0], [0], [1], [0, 0, 1, 1], [], []>} : vector<32x80xf32>, vector<80x8xf32>, vector<32x8xf32> -> vector<32x8xf32>
    %669 = vector.shape_cast %668 : vector<32x8xf32> to vector<2x16x8xf32>
    %670 = vector.broadcast %600 : vector<2x16x1xf32> to vector<2x16x8xf32>
    %671 = vector.broadcast %11 : vector<1x16x8xf32> to vector<2x16x8xf32>
    %672 = arith.mulf %670, %671 : vector<2x16x8xf32>
    %673 = arith.addf %669, %672 : vector<2x16x8xf32>
    %674 = vector.broadcast %15 : vector<1x16x8xf32> to vector<2x16x8xf32>
    %675 = arith.addf %673, %674 : vector<2x16x8xf32>
    %676 = math.tanh %675 : vector<2x16x8xf32>
    %cst_201 = arith.constant 1.000000e+00 : f32
    %677 = vector.broadcast %cst_201 : f32 to vector<2x16x8xf32>
    %678 = arith.subf %677, %656 : vector<2x16x8xf32>
    %679 = arith.mulf %678, %662 : vector<2x16x8xf32>
    %680 = arith.mulf %656, %676 : vector<2x16x8xf32>
    %681 = arith.addf %679, %680 : vector<2x16x8xf32>
    %682 = vector.shape_cast %658 : vector<2x16x1xi1> to vector<2x16x1xi1>
    %683 = vector.broadcast %682 : vector<2x16x1xi1> to vector<2x16x8xi1>
    %684 = arith.select %683, %681, %662 : vector<2x16x8xi1>, vector<2x16x8xf32>
    %685 = vector.broadcast %c5_i32 : i32 to vector<2x1x1xi32>
    %686 = arith.cmpi eq, %18, %685 : vector<2x1x1xi32>
    %687 = vector.shape_cast %686 : vector<2x1x1xi1> to vector<2x1x1xi1>
    %688 = vector.broadcast %687 : vector<2x1x1xi1> to vector<2x16x8xi1>
    %689 = arith.select %688, %684, %579 : vector<2x16x8xi1>, vector<2x16x8xf32>
    %c6_i32 = arith.constant 6 : i32
    %c0_202 = arith.constant 0 : index
    %690 = arith.index_cast %c6_i32 : i32 to index
    %c0_203 = arith.constant 0 : index
    %c0_204 = arith.constant 0 : index
    %691 = vector.load %arg1[%c0_202, %690, %c0_203, %c0_204] : memref<2x8x16x8xf32, #tpu.memory_space<vmem>>, vector<2x1x16x8xf32>
    %692 = vector.shape_cast %691 : vector<2x1x16x8xf32> to vector<2x16x8xf32>
    %c0_205 = arith.constant 0 : index
    %693 = arith.index_cast %c6_i32 : i32 to index
    %c0_206 = arith.constant 0 : index
    %c0_207 = arith.constant 0 : index
    %694 = vector.load %arg2[%c0_205, %693, %c0_206, %c0_207] : memref<2x8x16x1xf32, #tpu.memory_space<vmem>>, vector<2x1x16x1xf32>
    %695 = vector.shape_cast %694 : vector<2x1x16x1xf32> to vector<2x16x1xf32>
    %c0_208 = arith.constant 0 : index
    %696 = arith.index_cast %c6_i32 : i32 to index
    %c0_209 = arith.constant 0 : index
    %c0_210 = arith.constant 0 : index
    %697 = vector.load %arg3[%c0_208, %696, %c0_209, %c0_210] : memref<2x8x1x16xf32, #tpu.memory_space<vmem>>, vector<2x1x1x16xf32>
    %698 = vector.shape_cast %697 : vector<2x1x1x16xf32> to vector<2x1x16xf32>
    %c0_211 = arith.constant 0 : index
    %699 = arith.index_cast %c6_i32 : i32 to index
    %c0_212 = arith.constant 0 : index
    %c0_213 = arith.constant 0 : index
    %700 = vector.load %arg4[%c0_211, %699, %c0_212, %c0_213] : memref<2x8x16x1xf32, #tpu.memory_space<vmem>>, vector<2x1x16x1xf32>
    %701 = vector.shape_cast %700 : vector<2x1x16x1xf32> to vector<2x16x1xf32>
    %c0_214 = arith.constant 0 : index
    %702 = arith.index_cast %c6_i32 : i32 to index
    %c0_215 = arith.constant 0 : index
    %c0_216 = arith.constant 0 : index
    %703 = vector.load %arg5[%c0_214, %702, %c0_215, %c0_216] : memref<2x8x1x16xf32, #tpu.memory_space<vmem>>, vector<2x1x1x16xf32>
    %704 = vector.shape_cast %703 : vector<2x1x1x16xf32> to vector<2x1x16xf32>
    %cst_217 = arith.constant 1.000000e+00 : f32
    %705 = vector.broadcast %cst_217 : f32 to vector<2x16x1xf32>
    %706 = arith.addf %19, %705 : vector<2x16x1xf32>
    %707 = arith.divf %701, %706 : vector<2x16x1xf32>
    %708 = math.tanh %707 : vector<2x16x1xf32>
    %cst_218 = arith.constant 5.000000e-01 : f32
    %709 = vector.broadcast %cst_218 : f32 to vector<2x16x1xf32>
    %710 = arith.mulf %709, %708 : vector<2x16x1xf32>
    %cst_219 = arith.constant 1.000000e+00 : f32
    %711 = vector.broadcast %cst_219 : f32 to vector<2x1x16xf32>
    %712 = arith.addf %20, %711 : vector<2x1x16xf32>
    %713 = arith.divf %704, %712 : vector<2x1x16xf32>
    %714 = math.tanh %713 : vector<2x1x16xf32>
    %cst_220 = arith.constant 5.000000e-01 : f32
    %715 = vector.broadcast %cst_220 : f32 to vector<2x1x16xf32>
    %716 = arith.mulf %715, %714 : vector<2x1x16xf32>
    %cst_221 = arith.constant 0.000000e+00 : f32
    %717 = vector.broadcast %cst_221 : f32 to vector<1x16x16xf32>
    %718 = arith.subf %717, %5 : vector<1x16x16xf32>
    %719 = vector.broadcast %710 : vector<2x16x1xf32> to vector<2x16x16xf32>
    %720 = vector.broadcast %716 : vector<2x1x16xf32> to vector<2x16x16xf32>
    %721 = arith.subf %719, %720 : vector<2x16x16xf32>
    %722 = math.absf %721 : vector<2x16x16xf32>
    %723 = vector.broadcast %718 : vector<1x16x16xf32> to vector<2x16x16xf32>
    %724 = arith.mulf %723, %722 : vector<2x16x16xf32>
    %725 = vector.broadcast %695 : vector<2x16x1xf32> to vector<2x16x16xf32>
    %726 = vector.broadcast %698 : vector<2x1x16xf32> to vector<2x16x16xf32>
    %727 = arith.mulf %725, %726 : vector<2x16x16xf32>
    %cst_222 = arith.constant 1.000000e+00 : f32
    %728 = vector.broadcast %cst_222 : f32 to vector<2x16x16xf32>
    %729 = arith.addf %728, %724 : vector<2x16x16xf32>
    %730 = vector.broadcast %3 : vector<1x16x16xf32> to vector<2x16x16xf32>
    %731 = arith.mulf %730, %729 : vector<2x16x16xf32>
    %732 = arith.mulf %731, %727 : vector<2x16x16xf32>
    %733 = vector.broadcast %28 : vector<1x16x16xf32> to vector<2x16x16xf32>
    %734 = arith.mulf %732, %733 : vector<2x16x16xf32>
    %735 = vector.broadcast %26 : vector<1x16x16xf32> to vector<2x16x16xf32>
    %736 = arith.addf %734, %735 : vector<2x16x16xf32>
    %737 = tpu.concatenate %692, %684 in 2 : vector<2x16x8xf32>, vector<2x16x8xf32> -> vector<2x16x16xf32>
    "tpu.trace_start"() <{level = 10 : i32, message = "bij,bjk->bik"}> : () -> ()
    %cst_223 = arith.constant dense<0.000000e+00> : vector<2x16x16xf32>
    %738 = tpu.matmul %736, %737, %cst_223 {dimension_numbers = #tpu.dot_dimension_numbers<[2], [1], [1], [2], [0, 0, 0, 1, 1, 2], [0], [0]>} : vector<2x16x16xf32>, vector<2x16x16xf32>, vector<2x16x16xf32> -> vector<2x16x16xf32>
    "tpu.trace_stop"() : () -> ()
    %739 = vector.broadcast %716 : vector<2x1x16xf32> to vector<2x16x16xf32>
    %740 = arith.mulf %736, %739 : vector<2x16x16xf32>
    %cst_224 = arith.constant dense<0.000000e+00> : vector<2x16xf32>
    %741 = vector.multi_reduction <add>, %740, %cst_224 [2] : vector<2x16x16xf32> to vector<2x16xf32>
    %742 = vector.shape_cast %741 : vector<2x16xf32> to vector<2x16x1xf32>
    %743 = tpu.concatenate %738, %738, %738, %738, %738 in 2 : vector<2x16x16xf32>, vector<2x16x16xf32>, vector<2x16x16xf32>, vector<2x16x16xf32>, vector<2x16x16xf32> -> vector<2x16x80xf32>
    %744 = vector.broadcast %1 : vector<1x16x80xf32> to vector<2x16x80xf32>
    %745 = arith.mulf %743, %744 : vector<2x16x80xf32>
    %746 = vector.shape_cast %745 : vector<2x16x80xf32> to vector<32x80xf32>
    %cst_225 = arith.constant dense<0.000000e+00> : vector<32x16xf32>
    %747 = tpu.matmul %746, %6, %cst_225 {dimension_numbers = #tpu.dot_dimension_numbers<[1], [0], [0], [1], [0, 0, 1, 1], [], []>} : vector<32x80xf32>, vector<80x16xf32>, vector<32x16xf32> -> vector<32x16xf32>
    %748 = vector.shape_cast %747 : vector<32x16xf32> to vector<2x16x16xf32>
    %749 = vector.broadcast %742 : vector<2x16x1xf32> to vector<2x16x16xf32>
    %750 = vector.broadcast %9 : vector<1x16x16xf32> to vector<2x16x16xf32>
    %751 = arith.mulf %749, %750 : vector<2x16x16xf32>
    %752 = arith.addf %748, %751 : vector<2x16x16xf32>
    %753 = vector.broadcast %13 : vector<1x16x16xf32> to vector<2x16x16xf32>
    %754 = arith.addf %752, %753 : vector<2x16x16xf32>
    %755 = vector.extract_strided_slice %754 {offsets = [0, 0, 0], sizes = [2, 16, 8], strides = [1, 1, 1]} : vector<2x16x16xf32> to vector<2x16x8xf32>
    %756 = arith.negf %755 : vector<2x16x8xf32>
    %757 = math.exp %756 : vector<2x16x8xf32>
    %cst_226 = arith.constant 1.000000e+00 : f32
    %758 = vector.broadcast %cst_226 : f32 to vector<2x16x8xf32>
    %759 = arith.addf %758, %757 : vector<2x16x8xf32>
    %760 = arith.divf %758, %759 : vector<2x16x8xf32>
    %761 = vector.extract_strided_slice %754 {offsets = [0, 0, 8], sizes = [2, 16, 8], strides = [1, 1, 1]} : vector<2x16x16xf32> to vector<2x16x8xf32>
    %762 = arith.negf %761 : vector<2x16x8xf32>
    %763 = math.exp %762 : vector<2x16x8xf32>
    %cst_227 = arith.constant 1.000000e+00 : f32
    %764 = vector.broadcast %cst_227 : f32 to vector<2x16x8xf32>
    %765 = arith.addf %764, %763 : vector<2x16x8xf32>
    %766 = arith.divf %764, %765 : vector<2x16x8xf32>
    %cst_228 = arith.constant 0.000000e+00 : f32
    %767 = vector.broadcast %cst_228 : f32 to vector<2x16x1xf32>
    %768 = arith.cmpf one, %695, %767 : vector<2x16x1xf32>
    %769 = arith.mulf %760, %684 : vector<2x16x8xf32>
    %770 = vector.shape_cast %768 : vector<2x16x1xi1> to vector<2x16x1xi1>
    %771 = vector.broadcast %770 : vector<2x16x1xi1> to vector<2x16x8xi1>
    %772 = arith.select %771, %769, %684 : vector<2x16x8xi1>, vector<2x16x8xf32>
    %773 = tpu.concatenate %692, %772 in 2 : vector<2x16x8xf32>, vector<2x16x8xf32> -> vector<2x16x16xf32>
    %774 = tpu.concatenate %773, %773, %773, %773, %773 in 2 : vector<2x16x16xf32>, vector<2x16x16xf32>, vector<2x16x16xf32>, vector<2x16x16xf32>, vector<2x16x16xf32> -> vector<2x16x80xf32>
    %775 = vector.broadcast %1 : vector<1x16x80xf32> to vector<2x16x80xf32>
    %776 = arith.mulf %774, %775 : vector<2x16x80xf32>
    %777 = vector.shape_cast %776 : vector<2x16x80xf32> to vector<32x80xf32>
    %cst_229 = arith.constant dense<0.000000e+00> : vector<32x8xf32>
    %778 = tpu.matmul %777, %7, %cst_229 {dimension_numbers = #tpu.dot_dimension_numbers<[1], [0], [0], [1], [0, 0, 1, 1], [], []>} : vector<32x80xf32>, vector<80x8xf32>, vector<32x8xf32> -> vector<32x8xf32>
    %779 = vector.shape_cast %778 : vector<32x8xf32> to vector<2x16x8xf32>
    %780 = vector.broadcast %710 : vector<2x16x1xf32> to vector<2x16x8xf32>
    %781 = vector.broadcast %11 : vector<1x16x8xf32> to vector<2x16x8xf32>
    %782 = arith.mulf %780, %781 : vector<2x16x8xf32>
    %783 = arith.addf %779, %782 : vector<2x16x8xf32>
    %784 = vector.broadcast %15 : vector<1x16x8xf32> to vector<2x16x8xf32>
    %785 = arith.addf %783, %784 : vector<2x16x8xf32>
    %786 = math.tanh %785 : vector<2x16x8xf32>
    %cst_230 = arith.constant 1.000000e+00 : f32
    %787 = vector.broadcast %cst_230 : f32 to vector<2x16x8xf32>
    %788 = arith.subf %787, %766 : vector<2x16x8xf32>
    %789 = arith.mulf %788, %772 : vector<2x16x8xf32>
    %790 = arith.mulf %766, %786 : vector<2x16x8xf32>
    %791 = arith.addf %789, %790 : vector<2x16x8xf32>
    %792 = vector.shape_cast %768 : vector<2x16x1xi1> to vector<2x16x1xi1>
    %793 = vector.broadcast %792 : vector<2x16x1xi1> to vector<2x16x8xi1>
    %794 = arith.select %793, %791, %772 : vector<2x16x8xi1>, vector<2x16x8xf32>
    %795 = vector.broadcast %c6_i32 : i32 to vector<2x1x1xi32>
    %796 = arith.cmpi eq, %18, %795 : vector<2x1x1xi32>
    %797 = vector.shape_cast %796 : vector<2x1x1xi1> to vector<2x1x1xi1>
    %798 = vector.broadcast %797 : vector<2x1x1xi1> to vector<2x16x8xi1>
    %799 = arith.select %798, %794, %689 : vector<2x16x8xi1>, vector<2x16x8xf32>
    %c7_i32 = arith.constant 7 : i32
    %c0_231 = arith.constant 0 : index
    %800 = arith.index_cast %c7_i32 : i32 to index
    %c0_232 = arith.constant 0 : index
    %c0_233 = arith.constant 0 : index
    %801 = vector.load %arg1[%c0_231, %800, %c0_232, %c0_233] : memref<2x8x16x8xf32, #tpu.memory_space<vmem>>, vector<2x1x16x8xf32>
    %802 = vector.shape_cast %801 : vector<2x1x16x8xf32> to vector<2x16x8xf32>
    %c0_234 = arith.constant 0 : index
    %803 = arith.index_cast %c7_i32 : i32 to index
    %c0_235 = arith.constant 0 : index
    %c0_236 = arith.constant 0 : index
    %804 = vector.load %arg2[%c0_234, %803, %c0_235, %c0_236] : memref<2x8x16x1xf32, #tpu.memory_space<vmem>>, vector<2x1x16x1xf32>
    %805 = vector.shape_cast %804 : vector<2x1x16x1xf32> to vector<2x16x1xf32>
    %c0_237 = arith.constant 0 : index
    %806 = arith.index_cast %c7_i32 : i32 to index
    %c0_238 = arith.constant 0 : index
    %c0_239 = arith.constant 0 : index
    %807 = vector.load %arg3[%c0_237, %806, %c0_238, %c0_239] : memref<2x8x1x16xf32, #tpu.memory_space<vmem>>, vector<2x1x1x16xf32>
    %808 = vector.shape_cast %807 : vector<2x1x1x16xf32> to vector<2x1x16xf32>
    %c0_240 = arith.constant 0 : index
    %809 = arith.index_cast %c7_i32 : i32 to index
    %c0_241 = arith.constant 0 : index
    %c0_242 = arith.constant 0 : index
    %810 = vector.load %arg4[%c0_240, %809, %c0_241, %c0_242] : memref<2x8x16x1xf32, #tpu.memory_space<vmem>>, vector<2x1x16x1xf32>
    %811 = vector.shape_cast %810 : vector<2x1x16x1xf32> to vector<2x16x1xf32>
    %c0_243 = arith.constant 0 : index
    %812 = arith.index_cast %c7_i32 : i32 to index
    %c0_244 = arith.constant 0 : index
    %c0_245 = arith.constant 0 : index
    %813 = vector.load %arg5[%c0_243, %812, %c0_244, %c0_245] : memref<2x8x1x16xf32, #tpu.memory_space<vmem>>, vector<2x1x1x16xf32>
    %814 = vector.shape_cast %813 : vector<2x1x1x16xf32> to vector<2x1x16xf32>
    %cst_246 = arith.constant 1.000000e+00 : f32
    %815 = vector.broadcast %cst_246 : f32 to vector<2x16x1xf32>
    %816 = arith.addf %19, %815 : vector<2x16x1xf32>
    %817 = arith.divf %811, %816 : vector<2x16x1xf32>
    %818 = math.tanh %817 : vector<2x16x1xf32>
    %cst_247 = arith.constant 5.000000e-01 : f32
    %819 = vector.broadcast %cst_247 : f32 to vector<2x16x1xf32>
    %820 = arith.mulf %819, %818 : vector<2x16x1xf32>
    %cst_248 = arith.constant 1.000000e+00 : f32
    %821 = vector.broadcast %cst_248 : f32 to vector<2x1x16xf32>
    %822 = arith.addf %20, %821 : vector<2x1x16xf32>
    %823 = arith.divf %814, %822 : vector<2x1x16xf32>
    %824 = math.tanh %823 : vector<2x1x16xf32>
    %cst_249 = arith.constant 5.000000e-01 : f32
    %825 = vector.broadcast %cst_249 : f32 to vector<2x1x16xf32>
    %826 = arith.mulf %825, %824 : vector<2x1x16xf32>
    %cst_250 = arith.constant 0.000000e+00 : f32
    %827 = vector.broadcast %cst_250 : f32 to vector<1x16x16xf32>
    %828 = arith.subf %827, %5 : vector<1x16x16xf32>
    %829 = vector.broadcast %820 : vector<2x16x1xf32> to vector<2x16x16xf32>
    %830 = vector.broadcast %826 : vector<2x1x16xf32> to vector<2x16x16xf32>
    %831 = arith.subf %829, %830 : vector<2x16x16xf32>
    %832 = math.absf %831 : vector<2x16x16xf32>
    %833 = vector.broadcast %828 : vector<1x16x16xf32> to vector<2x16x16xf32>
    %834 = arith.mulf %833, %832 : vector<2x16x16xf32>
    %835 = vector.broadcast %805 : vector<2x16x1xf32> to vector<2x16x16xf32>
    %836 = vector.broadcast %808 : vector<2x1x16xf32> to vector<2x16x16xf32>
    %837 = arith.mulf %835, %836 : vector<2x16x16xf32>
    %cst_251 = arith.constant 1.000000e+00 : f32
    %838 = vector.broadcast %cst_251 : f32 to vector<2x16x16xf32>
    %839 = arith.addf %838, %834 : vector<2x16x16xf32>
    %840 = vector.broadcast %3 : vector<1x16x16xf32> to vector<2x16x16xf32>
    %841 = arith.mulf %840, %839 : vector<2x16x16xf32>
    %842 = arith.mulf %841, %837 : vector<2x16x16xf32>
    %843 = vector.broadcast %28 : vector<1x16x16xf32> to vector<2x16x16xf32>
    %844 = arith.mulf %842, %843 : vector<2x16x16xf32>
    %845 = vector.broadcast %26 : vector<1x16x16xf32> to vector<2x16x16xf32>
    %846 = arith.addf %844, %845 : vector<2x16x16xf32>
    %847 = tpu.concatenate %802, %794 in 2 : vector<2x16x8xf32>, vector<2x16x8xf32> -> vector<2x16x16xf32>
    "tpu.trace_start"() <{level = 10 : i32, message = "bij,bjk->bik"}> : () -> ()
    %cst_252 = arith.constant dense<0.000000e+00> : vector<2x16x16xf32>
    %848 = tpu.matmul %846, %847, %cst_252 {dimension_numbers = #tpu.dot_dimension_numbers<[2], [1], [1], [2], [0, 0, 0, 1, 1, 2], [0], [0]>} : vector<2x16x16xf32>, vector<2x16x16xf32>, vector<2x16x16xf32> -> vector<2x16x16xf32>
    "tpu.trace_stop"() : () -> ()
    %849 = vector.broadcast %826 : vector<2x1x16xf32> to vector<2x16x16xf32>
    %850 = arith.mulf %846, %849 : vector<2x16x16xf32>
    %cst_253 = arith.constant dense<0.000000e+00> : vector<2x16xf32>
    %851 = vector.multi_reduction <add>, %850, %cst_253 [2] : vector<2x16x16xf32> to vector<2x16xf32>
    %852 = vector.shape_cast %851 : vector<2x16xf32> to vector<2x16x1xf32>
    %853 = tpu.concatenate %848, %848, %848, %848, %848 in 2 : vector<2x16x16xf32>, vector<2x16x16xf32>, vector<2x16x16xf32>, vector<2x16x16xf32>, vector<2x16x16xf32> -> vector<2x16x80xf32>
    %854 = vector.broadcast %1 : vector<1x16x80xf32> to vector<2x16x80xf32>
    %855 = arith.mulf %853, %854 : vector<2x16x80xf32>
    %856 = vector.shape_cast %855 : vector<2x16x80xf32> to vector<32x80xf32>
    %cst_254 = arith.constant dense<0.000000e+00> : vector<32x16xf32>
    %857 = tpu.matmul %856, %6, %cst_254 {dimension_numbers = #tpu.dot_dimension_numbers<[1], [0], [0], [1], [0, 0, 1, 1], [], []>} : vector<32x80xf32>, vector<80x16xf32>, vector<32x16xf32> -> vector<32x16xf32>
    %858 = vector.shape_cast %857 : vector<32x16xf32> to vector<2x16x16xf32>
    %859 = vector.broadcast %852 : vector<2x16x1xf32> to vector<2x16x16xf32>
    %860 = vector.broadcast %9 : vector<1x16x16xf32> to vector<2x16x16xf32>
    %861 = arith.mulf %859, %860 : vector<2x16x16xf32>
    %862 = arith.addf %858, %861 : vector<2x16x16xf32>
    %863 = vector.broadcast %13 : vector<1x16x16xf32> to vector<2x16x16xf32>
    %864 = arith.addf %862, %863 : vector<2x16x16xf32>
    %865 = vector.extract_strided_slice %864 {offsets = [0, 0, 0], sizes = [2, 16, 8], strides = [1, 1, 1]} : vector<2x16x16xf32> to vector<2x16x8xf32>
    %866 = arith.negf %865 : vector<2x16x8xf32>
    %867 = math.exp %866 : vector<2x16x8xf32>
    %cst_255 = arith.constant 1.000000e+00 : f32
    %868 = vector.broadcast %cst_255 : f32 to vector<2x16x8xf32>
    %869 = arith.addf %868, %867 : vector<2x16x8xf32>
    %870 = arith.divf %868, %869 : vector<2x16x8xf32>
    %871 = vector.extract_strided_slice %864 {offsets = [0, 0, 8], sizes = [2, 16, 8], strides = [1, 1, 1]} : vector<2x16x16xf32> to vector<2x16x8xf32>
    %872 = arith.negf %871 : vector<2x16x8xf32>
    %873 = math.exp %872 : vector<2x16x8xf32>
    %cst_256 = arith.constant 1.000000e+00 : f32
    %874 = vector.broadcast %cst_256 : f32 to vector<2x16x8xf32>
    %875 = arith.addf %874, %873 : vector<2x16x8xf32>
    %876 = arith.divf %874, %875 : vector<2x16x8xf32>
    %cst_257 = arith.constant 0.000000e+00 : f32
    %877 = vector.broadcast %cst_257 : f32 to vector<2x16x1xf32>
    %878 = arith.cmpf one, %805, %877 : vector<2x16x1xf32>
    %879 = arith.mulf %870, %794 : vector<2x16x8xf32>
    %880 = vector.shape_cast %878 : vector<2x16x1xi1> to vector<2x16x1xi1>
    %881 = vector.broadcast %880 : vector<2x16x1xi1> to vector<2x16x8xi1>
    %882 = arith.select %881, %879, %794 : vector<2x16x8xi1>, vector<2x16x8xf32>
    %883 = tpu.concatenate %802, %882 in 2 : vector<2x16x8xf32>, vector<2x16x8xf32> -> vector<2x16x16xf32>
    %884 = tpu.concatenate %883, %883, %883, %883, %883 in 2 : vector<2x16x16xf32>, vector<2x16x16xf32>, vector<2x16x16xf32>, vector<2x16x16xf32>, vector<2x16x16xf32> -> vector<2x16x80xf32>
    %885 = vector.broadcast %1 : vector<1x16x80xf32> to vector<2x16x80xf32>
    %886 = arith.mulf %884, %885 : vector<2x16x80xf32>
    %887 = vector.shape_cast %886 : vector<2x16x80xf32> to vector<32x80xf32>
    %cst_258 = arith.constant dense<0.000000e+00> : vector<32x8xf32>
    %888 = tpu.matmul %887, %7, %cst_258 {dimension_numbers = #tpu.dot_dimension_numbers<[1], [0], [0], [1], [0, 0, 1, 1], [], []>} : vector<32x80xf32>, vector<80x8xf32>, vector<32x8xf32> -> vector<32x8xf32>
    %889 = vector.shape_cast %888 : vector<32x8xf32> to vector<2x16x8xf32>
    %890 = vector.broadcast %820 : vector<2x16x1xf32> to vector<2x16x8xf32>
    %891 = vector.broadcast %11 : vector<1x16x8xf32> to vector<2x16x8xf32>
    %892 = arith.mulf %890, %891 : vector<2x16x8xf32>
    %893 = arith.addf %889, %892 : vector<2x16x8xf32>
    %894 = vector.broadcast %15 : vector<1x16x8xf32> to vector<2x16x8xf32>
    %895 = arith.addf %893, %894 : vector<2x16x8xf32>
    %896 = math.tanh %895 : vector<2x16x8xf32>
    %cst_259 = arith.constant 1.000000e+00 : f32
    %897 = vector.broadcast %cst_259 : f32 to vector<2x16x8xf32>
    %898 = arith.subf %897, %876 : vector<2x16x8xf32>
    %899 = arith.mulf %898, %882 : vector<2x16x8xf32>
    %900 = arith.mulf %876, %896 : vector<2x16x8xf32>
    %901 = arith.addf %899, %900 : vector<2x16x8xf32>
    %902 = vector.shape_cast %878 : vector<2x16x1xi1> to vector<2x16x1xi1>
    %903 = vector.broadcast %902 : vector<2x16x1xi1> to vector<2x16x8xi1>
    %904 = arith.select %903, %901, %882 : vector<2x16x8xi1>, vector<2x16x8xf32>
    %905 = vector.broadcast %c7_i32 : i32 to vector<2x1x1xi32>
    %906 = arith.cmpi eq, %18, %905 : vector<2x1x1xi32>
    %907 = vector.shape_cast %906 : vector<2x1x1xi1> to vector<2x1x1xi1>
    %908 = vector.broadcast %907 : vector<2x1x1xi1> to vector<2x16x8xi1>
    %909 = arith.select %908, %904, %799 : vector<2x16x8xi1>, vector<2x16x8xf32>
    %c8_i32 = arith.constant 8 : i32
    %c0_260 = arith.constant 0 : index
    %c0_261 = arith.constant 0 : index
    %c0_262 = arith.constant 0 : index
    %910 = vector.load %arg18[%c0_260, %c0_261, %c0_262] : memref<2x16x8xf32, #tpu.memory_space<vmem>>, vector<2x16x8xf32>
    tpu.vector_store %arg18[%c0_260, %c0_261, %c0_262], %909 {strides = array<i32>} : memref<2x16x8xf32, #tpu.memory_space<vmem>>, vector<2x16x8xf32>,
    return
  }
  func.func @transform_0(%arg0: i32) -> (i32, i32, i32, i32) {
    %c0_i32 = arith.constant 0 : i32
    %c0_i32_0 = arith.constant 0 : i32
    %c0_i32_1 = arith.constant 0 : i32
    %c0_i32_2 = arith.constant 0 : i32
    return %arg0, %c0_i32, %c0_i32_0, %c0_i32_1 : i32, i32, i32, i32
  }
  func.func @transform_1(%arg0: i32) -> (i32, i32, i32, i32) {
    %c0_i32 = arith.constant 0 : i32
    %c0_i32_0 = arith.constant 0 : i32
    %c0_i32_1 = arith.constant 0 : i32
    %c0_i32_2 = arith.constant 0 : i32
    return %arg0, %c0_i32, %c0_i32_0, %c0_i32_1 : i32, i32, i32, i32
  }
  func.func @transform_2(%arg0: i32) -> (i32, i32, i32, i32) {
    %c0_i32 = arith.constant 0 : i32
    %c0_i32_0 = arith.constant 0 : i32
    %c0_i32_1 = arith.constant 0 : i32
    %c0_i32_2 = arith.constant 0 : i32
    return %arg0, %c0_i32, %c0_i32_0, %c0_i32_1 : i32, i32, i32, i32
  }
  func.func @transform_3(%arg0: i32) -> (i32, i32, i32, i32) {
    %c0_i32 = arith.constant 0 : i32
    %c0_i32_0 = arith.constant 0 : i32
    %c0_i32_1 = arith.constant 0 : i32
    %c0_i32_2 = arith.constant 0 : i32
    return %arg0, %c0_i32, %c0_i32_0, %c0_i32_1 : i32, i32, i32, i32
  }
  func.func @transform_4(%arg0: i32) -> (i32, i32, i32, i32) {
    %c0_i32 = arith.constant 0 : i32
    %c0_i32_0 = arith.constant 0 : i32
    %c0_i32_1 = arith.constant 0 : i32
    %c0_i32_2 = arith.constant 0 : i32
    return %arg0, %c0_i32, %c0_i32_0, %c0_i32_1 : i32, i32, i32, i32
  }
  func.func @transform_5(%arg0: i32) -> (i32, i32, i32) {
    %c0_i32 = arith.constant 0 : i32
    %c0_i32_0 = arith.constant 0 : i32
    %c0_i32_1 = arith.constant 0 : i32
    return %arg0, %c0_i32, %c0_i32_0 : i32, i32, i32
  }
  func.func @transform_6(%arg0: i32) -> (i32, i32, i32) {
    %c0_i32 = arith.constant 0 : i32
    %c0_i32_0 = arith.constant 0 : i32
    %c0_i32_1 = arith.constant 0 : i32
    return %arg0, %c0_i32, %c0_i32_0 : i32, i32, i32
  }
  func.func @transform_7(%arg0: i32) -> (i32, i32, i32) {
    %c0_i32 = arith.constant 0 : i32
    %c0_i32_0 = arith.constant 0 : i32
    %c0_i32_1 = arith.constant 0 : i32
    return %arg0, %c0_i32, %c0_i32_0 : i32, i32, i32
  }
  func.func @transform_8(%arg0: i32) -> (i32, i32) {
    %c0_i32 = arith.constant 0 : i32
    %c0_i32_0 = arith.constant 0 : i32
    %c0_i32_1 = arith.constant 0 : i32
    return %c0_i32, %c0_i32_0 : i32, i32
  }
  func.func @transform_9(%arg0: i32) -> (i32, i32) {
    %c0_i32 = arith.constant 0 : i32
    %c0_i32_0 = arith.constant 0 : i32
    %c0_i32_1 = arith.constant 0 : i32
    return %c0_i32, %c0_i32_0 : i32, i32
  }
  func.func @transform_10(%arg0: i32) -> (i32, i32) {
    %c0_i32 = arith.constant 0 : i32
    %c0_i32_0 = arith.constant 0 : i32
    %c0_i32_1 = arith.constant 0 : i32
    return %c0_i32, %c0_i32_0 : i32, i32
  }
  func.func @transform_11(%arg0: i32) -> (i32, i32) {
    %c0_i32 = arith.constant 0 : i32
    %c0_i32_0 = arith.constant 0 : i32
    %c0_i32_1 = arith.constant 0 : i32
    return %c0_i32, %c0_i32_0 : i32, i32
  }
  func.func @transform_12(%arg0: i32) -> (i32, i32) {
    %c0_i32 = arith.constant 0 : i32
    %c0_i32_0 = arith.constant 0 : i32
    %c0_i32_1 = arith.constant 0 : i32
    return %c0_i32, %c0_i32_0 : i32, i32
  }
  func.func @transform_13(%arg0: i32) -> (i32, i32) {
    %c0_i32 = arith.constant 0 : i32
    %c0_i32_0 = arith.constant 0 : i32
    %c0_i32_1 = arith.constant 0 : i32
    return %c0_i32, %c0_i32_0 : i32, i32
  }
  func.func @transform_14(%arg0: i32) -> (i32, i32) {
    %c0_i32 = arith.constant 0 : i32
    %c0_i32_0 = arith.constant 0 : i32
    %c0_i32_1 = arith.constant 0 : i32
    return %c0_i32, %c0_i32_0 : i32, i32
  }
  func.func @transform_15(%arg0: i32) -> (i32, i32) {
    %c0_i32 = arith.constant 0 : i32
    %c0_i32_0 = arith.constant 0 : i32
    %c0_i32_1 = arith.constant 0 : i32
    return %c0_i32, %c0_i32_0 : i32, i32
  }
  func.func @transform_16(%arg0: i32) -> (i32, i32) {
    %c0_i32 = arith.constant 0 : i32
    %c0_i32_0 = arith.constant 0 : i32
    %c0_i32_1 = arith.constant 0 : i32
    return %c0_i32, %c0_i32_0 : i32, i32
  }
  func.func @transform_17(%arg0: i32) -> (i32, i32, i32) {
    %c0_i32 = arith.constant 0 : i32
    %c0_i32_0 = arith.constant 0 : i32
    %c0_i32_1 = arith.constant 0 : i32
    return %arg0, %c0_i32, %c0_i32_0 : i32, i32, i32
  }
}

</mosaic_0001>

<bundles_post_ra>
// kernel: vsdgcrnn_forward.2
= control target key start
LH: loop header
LB: loop body
LE: loop exit
PB: predicated region body
PF: predicated region fallthrough
CT: control target
= control target key end

     0   :  { %vm48_vm0 = vcmask 523264   ;;  %vm86_vm1 = vcmask 130048   ;;  %vm116_vm2 = vcmask 39936   ;;  %vm193_vm3 = vcmask 64512   ;;  %s543_s1 = inlined_call_operand.vmem [shape: f32[64,16], index: 1, kind: input, shape index: {}]   ;;  %s544_s5 = inlined_call_operand.vmem [shape: f32[64,16], index: 5, kind: input, shape index: {}]   ;;  %s545_s2 = inlined_call_operand.vmem [shape: f32[1,16], index: 2, kind: input, shape index: {}]   ;;  %s546_s0 = inlined_call_operand.vmem [shape: f32[16,64], index: 0, kind: input, shape index: {}]   ;;  %s547_s6 = inlined_call_operand.vmem [shape: f32[1,16], index: 6, kind: input, shape index: {}]   ;;  %s548_s4 = inlined_call_operand.vmem [shape: f32[1,5], index: 4, kind: input, shape index: {}]   ;;  %s549_s3 = inlined_call_operand.vmem [shape: f32[16,5], index: 3, kind: input, shape index: {}]   ;;  %s550_s7 = inlined_call_operand.vmem [shape: f32[16,8], index: 7, kind: input, shape index: {}]   ;;  %s551_s8 = inlined_call_operand.vmem [shape: f32[1,8], index: 8, kind: input, shape index: {}]   ;;  %s552_s9 = inlined_call_operand.vmem [shape: f32[16,5], index: 9, kind: output, shape index: {0}]   ;;  %s553_s10 = inlined_call_operand.vmem [shape: f32[16,16], index: 10, kind: output, shape index: {1}]  }
   0x1   :  { %v43_v0 = vld [vmem:[%s543_s1 + $0x38] sm:$0xff]  ;;  %v42_v1 = vld [vmem:[%s543_s1 + $0x30] sm:$0xff]  ;;  %v41_v2 = vld [vmem:[%s543_s1 + $0x28] sm:$0xff] }
   0x2   :  { %63 = vmatpush.msra.mxu0 %v43_v0  ;;  %v126_v3 = vld [vmem:[%s544_s5 + $0x38] sm:$0xff]  ;;  %v125_v4 = vld [vmem:[%s544_s5 + $0x30] sm:$0xff]  ;;  %v40_v5 = vld [vmem:[%s543_s1 + $0x20] sm:$0xff] }
   0x3   :  { %139 = vmatpush.msra.mxu2 %v126_v3  ;;  %v124_v6 = vld [vmem:[%s544_s5 + $0x28] sm:$0xff]  ;;  %v39_v7 = vld [vmem:[%s543_s1 + $0x18] sm:$0xff]  ;;  %v123_v8 = vld [vmem:[%s544_s5 + $0x20] sm:$0xff] }
   0x4   :  { %64 = vmatpush.msra.mxu0 %v42_v1  ;;  %v38_v9 = vld [vmem:[%s543_s1 + $0x10] sm:$0xff]  ;;  %v122_v10 = vld [vmem:[%s544_s5 + $0x18] sm:$0xff]  ;;  %v37_v11 = vld [vmem:[%s543_s1 + $0x8] sm:$0xff] }
   0x5   :  { %140 = vmatpush.msra.mxu2 %v125_v4  ;;  %v121_v12 = vld [vmem:[%s544_s5 + $0x10] sm:$0xff]  ;;  %v36_v13 = vld [vmem:[%s543_s1] sm:$0xff]  ;;  %v120_v14 = vld [vmem:[%s544_s5 + $0x8] sm:$0xff] }
   0x6   :  { %65 = vmatpush.msra.mxu0 %v41_v2  ;;  %v34_v15 = vld [vmem:[%s546_s0] sm:$0xff]  ;;  %v35_v17 = vld [vmem:[%s546_s0 + $0x8] sm:$0xff] }
   0x7   :  { %141 = vmatpush.msra.mxu2 %v124_v6  ;;  %v119_v16 = vld [vmem:[%s544_s5] sm:$0xff]  ;;  %v81_v18 = vld [vmem:[%s549_s3 + $0x8] sm:$0xff] }
   0x8   :  { %66 = vmatpush.msra.mxu0 %v40_v5  ;;  %107 = vmatpush.msra.mxu1 %v81_v18  ;;  %v80_v19 = vld [vmem:[%s549_s3] sm:$0xff]  ;;  %v157_v20 = vld [vmem:[%s550_s7 + $0x8] sm:$0xff] }
   0x9   :  { %142 = vmatpush.msra.mxu2 %v123_v8  ;;  %355 = vmatpush.msra.mxu3 %v81_v18  ;;  %v156_v21 = vld [vmem:[%s550_s7] sm:$0xff] }
   0xa   :  { %67 = vmatpush.msra.mxu0 %v39_v7  ;;  %108 = vmatpush.msra.mxu1 %v80_v19  ;;  %v357_v22 = vld [vmem:[%s545_s2] ss:$0 sm:$0xff] }
   0xb   :  { %143 = vmatpush.msra.mxu2 %v122_v10  ;;  %356 = vmatpush.msra.mxu3 %v80_v19  ;;  %v358_v29 = vld [vmem:[%s547_s6] ss:$0 sm:$0xff] }
   0xc   :  { %68 = vmatpush.msra.mxu0 %v38_v9  ;;  %v359_v36 = vld [vmem:[%s548_s4] ss:$0 sm:$0xff] }
   0xd   :  { %144 = vmatpush.msra.mxu2 %v121_v12  ;;  %182 = vmatpush.msrb.mxu3 %v157_v20  ;;  %v360_v42 = vld [vmem:[%s551_s8] ss:$0 sm:$0xff] }
   0xe   :  { %69 = vmatpush.msra.mxu0 %v37_v11 }
   0xf   :  { %145 = vmatpush.msra.mxu2 %v120_v14  ;;  %183 = vmatpush.msrb.mxu3 %v156_v21 }
  0x10   :  { %70 = vmatpush.msra.mxu0 %v36_v13 }
  0x11   :  { %343 = vmatmul.msk.f32.vlgmr.msra.gmra.mxu0 %vm48_vm0, %v34_v15  ;;  %146 = vmatpush.msra.mxu2 %v119_v16 }
  0x12   :  { %347 = vmatmul.msk.f32.vlgmr.msra.gmra.mxu2 %vm48_vm0, %v34_v15 }
  0x19   :  { %344 = vmatmul.msk.f32.gmra.mxu0 %vm48_vm0, %v35_v17 }
  0x1a   :  { %348 = vmatmul.msk.f32.gmra.mxu2 %vm48_vm0, %v35_v17 }
  0x8e   :  { %v72_v23 = vpop.f32.mrf.mxu0 }
  0x8f   :  { %v73_v24 = vadd.f32 %v357_v22, %v72_v23 }
  0x91   :  { %v78_v25 = vmax.f32 %v73_v24, 0.0 }
  0x93   :  { %345 = vmatmul.msk.f32.vlgmr.msra.gmra.mxu1 %vm86_vm1, %v78_v25 }
  0x95   :  { %v148_v27 = vpop.f32.mrf.mxu2 }
  0x96   :  { %v75_v26 = vpop.f32.mrf.mxu0  ;;  %v149_v31 = vadd.f32 %v358_v29, %v148_v27 }
  0x97   :  { %v76_v28 = vadd.f32 %v357_v22, %v75_v26 }
  0x98   :  { %v154_v32 = vmax.f32 %v149_v31, 0.0 }
  0x99   :  { %v79_v30 = vmax.f32 %v76_v28, 0.0 }
  0x9b   :  { %346 = vmatmul.msk.f32.vlgmr.msra.gmra.mxu3 %vm86_vm1, %v79_v30 }
  0x9d   :  { %v151_v33 = vpop.f32.mrf.mxu2 }
  0x9e   :  { %v152_v34 = vadd.f32 %v358_v29, %v151_v33 }
  0xa0   :  { %v155_v35 = vmax.f32 %v152_v34, 0.0 }
  0xa3   :  { %349 = vmatmul.msk.f32.vlgmr.msrb.gmra.mxu3 %vm86_vm1, %v154_v32 }
  0xab   :  { %350 = vmatmul.msk.f32.gmra.mxu3 %vm86_vm1, %v155_v35 }
 0x110   :  { %v110_v37 = vpop.f32.mrf.mxu1 }
 0x111   :  { %v111_v38 = vadd.f32 %v359_v36, %v110_v37 }
 0x113   :  { %117 = vst.msk [vmem:[%s552_s9] sm:$0xff] %vm116_vm2, %v111_v38 }
 0x11e   :  { %v113_v39 = vpop.f32.mrf.mxu3 }
 0x11f   :  { %v114_v40 = vadd.f32 %v359_v36, %v113_v39 }
 0x121   :  { %118 = vst.msk [vmem:[%s552_s9 + $0x8] sm:$0xff] %vm116_vm2, %v114_v40 }
 0x126   :  { %v185_v41 = vpop.f32.mrf.mxu3 }
 0x127   :  { %v520_v46 = vadd.f32 %v360_v42, %v185_v41 }
 0x129   :  { %v191_v48 = vmul.f32 %v520_v46, %v520_v46 }
 0x12b   :  { %v194_v49 = vsel %vm193_vm3, %v191_v48, 0.0 }
 0x12e   :  { %v188_v43 = vpop.f32.mrf.mxu3 }
 0x12f   :  { %v189_v44 = vadd.f32 %v360_v42, %v188_v43 }
 0x131   :  { %v192_v45 = vmul.f32 %v189_v44, %v189_v44 }
 0x133   :  { %v197_v47 = vsel %vm193_vm3, %v192_v45, 0.0 }
 0x134   :  { %198 = vadd.xlane.f32.xlu0 %v197_v47 }
 0x13c   :  { %195 = vadd.xlane.f32.xlu0 %v194_v49 }
 0x1a7   :  { %v199_v50 = vpop.xlane.xlu0 %198 }
 0x1a8   :  { %361 = vrsqrt.f32 %v199_v50  ;;  %vm219_vm4 = vcmp.eq.f32.partialorder %v199_v50, inf  ;;  %v222_v62 = vand.u32 2147483648, %v199_v50  ;;  %vm221_vm5 = vcmp.eq.f32.partialorder %v199_v50, 0.0 }
 0x1ae   :  { %v362_v51 = vpop.eup %361 }
 0x1af   :  { %v213_v52 = vmul.f32 %v362_v51, %v199_v50  ;;  %v196_v53 = vpop.xlane.xlu0 %195 }
 0x1b0   :  { %363 = vrsqrt.f32 %v196_v53  ;;  %vm207_vm6 = vcmp.eq.f32.partialorder %v196_v53, inf  ;;  %v210_v6 = vand.u32 2147483648, %v196_v53  ;;  %vm209_vm7 = vcmp.eq.f32.partialorder %v196_v53, 0.0 }
 0x1b1   :  { %v214_v54 = vmul.f32 %v362_v51, %v213_v52 }
 0x1b3   :  { %v215_v55 = vmul.f32 0.5, %v214_v54 }
 0x1b5   :  { %v216_v56 = vsub.f32 1.5, %v215_v55 }
 0x1b6   :  { %v364_v57 = vpop.eup %363 }
 0x1b7   :  { %v217_v58 = vmul.f32 %v362_v51, %v216_v56  ;;  %v201_v59 = vmul.f32 %v364_v57, %v196_v53 }
 0x1b9   :  { %v218_v60 = vmul.f32 %v217_v58, %v199_v50  ;;  %v202_v61 = vmul.f32 %v364_v57, %v201_v59 }
 0x1bb   :  { %v220_v63 = vsel %vm219_vm4, %v199_v50, %v218_v60  ;;  %v203_v0 = vmul.f32 0.5, %v202_v61 }
 0x1bc   :  { %v223_v1 = vsel %vm221_vm5, %v222_v62, %v220_v63 }
 0x1bd   :  { %v225_v2 = vmax.f32 %v223_v1, 1e-12  ;;  %v204_v3 = vsub.f32 1.5, %v203_v0 }
 0x1bf   :  { %365 = vrcp.f32 %v225_v2  ;;  %v205_v4 = vmul.f32 %v364_v57, %v204_v3  ;;  %v252_v13 = vand.u32 2147483648, %v225_v2  ;;  %v250_v15 = vand.u32 2147483647, %v225_v2 }
 0x1c0   :  { %vm246_vm9 = vweird.f32 %v225_v2 }
 0x1c1   :  { %v206_v5 = vmul.f32 %v205_v4, %v196_v53  ;;  %v253_v18 = vor.u32 1.1754944e-38, %v252_v13  ;;  %vm251_vm11 = vcmp.eq.f32.partialorder %v250_v15, 8.507059e+37 }
 0x1c3   :  { %v208_v7 = vsel %vm207_vm6, %v196_v53, %v206_v5 }
 0x1c4   :  { %v211_v8 = vsel %vm209_vm7, %v210_v6, %v208_v7 }
 0x1c5   :  { %v366_v9 = vpop.eup %365  ;;  %v224_v10 = vmax.f32 %v211_v8, 1e-12 }
 0x1c6   :  { %v242_v11 = vmul.f32 %v366_v9, %v225_v2  ;;  %vm247_vm8 = vweird.f32 %v366_v9 }
 0x1c7   :  { %367 = vrcp.f32 %v224_v10  ;;  %vm248_vm10 = vmor %vm246_vm9, %vm247_vm8  ;;  %v237_v24 = vand.u32 2147483648, %v224_v10  ;;  %v235_v26 = vand.u32 2147483647, %v224_v10  ;;  %vm231_vm13 = vweird.f32 %v224_v10 }
 0x1c8   :  { %v243_v12 = vsub.f32 1.0, %v242_v11 }
 0x1c9   :  { %v238_v28 = vor.u32 1.1754944e-38, %v237_v24  ;;  %vm236_vm15 = vcmp.eq.f32.partialorder %v235_v26, 8.507059e+37 }
 0x1ca   :  { %v244_v14 = vmul.f32 %v366_v9, %v243_v12 }
 0x1cc   :  { %v245_v16 = vadd.f32 %v366_v9, %v244_v14 }
 0x1cd   :  { %v368_v17 = vpop.eup %367 }
 0x1ce   :  { %v249_v19 = vsel %vm248_vm10, %v366_v9, %v245_v16  ;;  %v227_v20 = vmul.f32 %v368_v17, %v224_v10  ;;  %vm232_vm12 = vweird.f32 %v368_v17 }
 0x1cf   :  { %v254_v21 = vsel %vm251_vm11, %v253_v18, %v249_v19  ;;  %vm233_vm14 = vmor %vm231_vm13, %vm232_vm12 }
 0x1d0   :  { %v255_v22 = vmul.f32 %v254_v21, %v189_v44  ;;  %v228_v23 = vsub.f32 1.0, %v227_v20 }
 0x1d2   :  { %351 = vmatpush.xpose.msk.msrb.mxu1 %vm193_vm3, %v255_v22  ;;  %v229_v25 = vmul.f32 %v368_v17, %v228_v23 }
 0x1d4   :  { %v230_v27 = vadd.f32 %v368_v17, %v229_v25 }
 0x1d6   :  { %v234_v29 = vsel %vm233_vm14, %v368_v17, %v230_v27 }
 0x1d7   :  { %v239_v30 = vsel %vm236_vm15, %v238_v28, %v234_v29 }
 0x1d8   :  { %v240_v31 = vmul.f32 %v239_v30, %v520_v46 }
 0x1da   :  { %352 = vmatpush.xpose.msk.msrb.mxu1 %vm193_vm3, %v240_v31 }
 0x1dd   :  { %353 = vmatmul.msk.f32.vlgmr.msrb.gmra.mxu1 %vm193_vm3, %v240_v31 }
 0x1e5   :  { %354 = vmatmul.msk.f32.gmra.mxu1 %vm193_vm3, %v255_v22 }
 0x25a   :  { %v279_v32 = vpop.f32.mrf.mxu1 }
 0x25b   :  { %v285_v33 = vsel %vm86_vm1, %v279_v32, -inf }
 0x25c   :  { %286 = vmax.xlane.f32.xlu1 %v285_v33 }
 0x262   :  { %v282_v34 = vpop.f32.mrf.mxu1 }
 0x263   :  { %v288_v35 = vsel %vm86_vm1, %v282_v34, -inf }
 0x264   :  { %289 = vmax.xlane.f32.xlu1 %v288_v35 }
 0x2cf   :  { %v287_v36 = vpop.xlane.xlu1 %286 }
 0x2d0   :  { %v291_v37 = vsub.f32 %v279_v32, %v287_v36 }
 0x2d2   :  { %v293_v38 = vmul.f32 1.442695, %v291_v37 }
 0x2d4   :  { %369 = vpow2.f32 %v293_v38 }
 0x2d7   :  { %v290_v39 = vpop.xlane.xlu1 %289 }
 0x2d8   :  { %v292_v40 = vsub.f32 %v282_v34, %v290_v39 }
 0x2da   :  { %v370_v41 = vpop.eup %369  ;;  %v295_v42 = vmul.f32 1.442695, %v292_v40 }
 0x2db   :  { %v297_v43 = vsel %vm86_vm1, %v370_v41, 0.0 }
 0x2dc   :  { %371 = vpow2.f32 %v295_v42  ;;  %298 = vadd.xlane.f32.xlu2 %v297_v43 }
 0x2e2   :  { %v372_v44 = vpop.eup %371 }
 0x2e3   :  { %v300_v45 = vsel %vm86_vm1, %v372_v44, 0.0 }
 0x2e4   :  { %301 = vadd.xlane.f32.xlu2 %v300_v45 }
 0x34f   :  { %v299_v46 = vpop.xlane.xlu2 %298 }
 0x350   :  { %373 = vrcp.f32 %v299_v46  ;;  %v314_v51 = vand.u32 2147483648, %v299_v46  ;;  %v312_v53 = vand.u32 2147483647, %v299_v46  ;;  %vm308_vm2 = vweird.f32 %v299_v46 }
 0x352   :  { %v315_v56 = vor.u32 1.1754944e-38, %v314_v51  ;;  %vm313_vm4 = vcmp.eq.f32.partialorder %v312_v53, 8.507059e+37 }
 0x356   :  { %v374_v47 = vpop.eup %373 }
 0x357   :  { %v304_v48 = vmul.f32 %v374_v47, %v299_v46  ;;  %v302_v49 = vpop.xlane.xlu2 %301  ;;  %vm309_vm0 = vweird.f32 %v374_v47 }
 0x358   :  { %375 = vrcp.f32 %v302_v49  ;;  %vm310_vm3 = vmor %vm308_vm2, %vm309_vm0  ;;  %v329_v62 = vand.u32 2147483648, %v302_v49  ;;  %v327_v0 = vand.u32 2147483647, %v302_v49  ;;  %vm323_vm6 = vweird.f32 %v302_v49 }
 0x359   :  { %v305_v50 = vsub.f32 1.0, %v304_v48 }
 0x35a   :  { %v330_v2 = vor.u32 1.1754944e-38, %v329_v62  ;;  %vm328_vm8 = vcmp.eq.f32.partialorder %v327_v0, 8.507059e+37 }
 0x35b   :  { %v306_v52 = vmul.f32 %v374_v47, %v305_v50 }
 0x35d   :  { %v307_v54 = vadd.f32 %v374_v47, %v306_v52 }
 0x35e   :  { %v376_v55 = vpop.eup %375 }
 0x35f   :  { %v311_v57 = vsel %vm310_vm3, %v374_v47, %v307_v54  ;;  %v319_v58 = vmul.f32 %v376_v55, %v302_v49  ;;  %vm324_vm5 = vweird.f32 %v376_v55 }
 0x360   :  { %v316_v59 = vsel %vm313_vm4, %v315_v56, %v311_v57  ;;  %vm325_vm7 = vmor %vm323_vm6, %vm324_vm5 }
 0x361   :  { %v317_v60 = vmul.f32 %v370_v41, %v316_v59  ;;  %v320_v61 = vsub.f32 1.0, %v319_v58 }
 0x363   :  { %333 = vst.msk [vmem:[%s553_s10] sm:$0xff] %vm86_vm1, %v317_v60  ;;  %v321_v63 = vmul.f32 %v376_v55, %v320_v61 }
 0x365   :  { %v322_v1 = vadd.f32 %v376_v55, %v321_v63 }
 0x367   :  { %v326_v3 = vsel %vm325_vm7, %v376_v55, %v322_v1 }
 0x368   :  { %v331_v4 = vsel %vm328_vm8, %v330_v2, %v326_v3 }
 0x369   :  { %v332_v5 = vmul.f32 %v372_v44, %v331_v4 }
 0x36b   :  { %334 = vst.msk [vmem:[%s553_s10 + $0x8] sm:$0xff] %vm86_vm1, %v332_v5 }

// kernel: vsdgcrnn_forward.3
= control target key start
LH: loop header
LB: loop body
LE: loop exit
PB: predicated region body
PF: predicated region fallthrough
CT: control target
= control target key end

     0   :  { %v10198_v0 = vmov 0   ;;  %s6192_s19 = smov 48   ;;  %s6194_s20 = smov 16   ;;  %s10178_s1 = inlined_call_operand.vmem [shape: f32[2,8,16,1], index: 1, kind: input, shape index: {}]   ;;  %s10179_s5 = inlined_call_operand.vmem [shape: f32[2,16,1], index: 5, kind: input, shape index: {}]   ;;  %s10180_s2 = inlined_call_operand.vmem [shape: f32[2,8,1,16], index: 2, kind: input, shape index: {}]   ;;  %s10181_s3 = inlined_call_operand.vmem [shape: f32[2,8,16,1], index: 3, kind: input, shape index: {}]   ;;  %s10182_s6 = inlined_call_operand.vmem [shape: f32[2,1,16], index: 6, kind: input, shape index: {}]   ;;  %s10183_s4 = inlined_call_operand.vmem [shape: f32[2,8,1,16], index: 4, kind: input, shape index: {}]   ;;  %s10184_s0 = inlined_call_operand.vmem [shape: f32[2,8,16,8], index: 0, kind: input, shape index: {}]   ;;  %s10185_s10 = inlined_call_operand.vmem [shape: f32[16,16], index: 10, kind: input, shape index: {}]   ;;  %s10186_s9 = inlined_call_operand.vmem [shape: f32[16,16], index: 9, kind: input, shape index: {}]   ;;  %s10187_s11 = inlined_call_operand.vmem [shape: f32[80,16], index: 11, kind: input, shape index: {}]   ;;  %s10188_s8 = inlined_call_operand.vmem [shape: f32[16,80], index: 8, kind: input, shape index: {}]   ;;  %s10189_s13 = inlined_call_operand.vmem [shape: f32[16,16], index: 13, kind: input, shape index: {}]   ;;  %s10190_s15 = inlined_call_operand.vmem [shape: f32[16,16], index: 15, kind: input, shape index: {}]   ;;  %s10191_s12 = inlined_call_operand.vmem [shape: f32[80,8], index: 12, kind: input, shape index: {}]   ;;  %s10192_s14 = inlined_call_operand.vmem [shape: f32[16,8], index: 14, kind: input, shape index: {}]   ;;  %s10193_s16 = inlined_call_operand.vmem [shape: f32[16,8], index: 16, kind: input, shape index: {}]   ;;  %s10194_s7 = inlined_call_operand.vmem [shape: s32[2,1,1], index: 7, kind: input, shape index: {}]   ;;  %s10195_s17 = inlined_call_operand.vmem [shape: f32[2,16,8], index: 17, kind: output, shape index: {}]  }
   0x1   :  { %10243 = sst [smem:[#allocation23_spill]] %s10178_s1  ;;  %5747 = vset.pattern.permute.xlu1 %v10198_v0  ;;  %5746 = vset.pattern.permute.xlu0 %v10198_v0  ;;  %v123_v40 = vld [vmem:[%s10181_s3] sm:$0xff]  ;;  %v124_v51 = vld [vmem:[%s10181_s3 + $0x8] sm:$0xff]  ;;  %s6195_s21 = smov 64  }
   0x2   :  { %10244 = sst [smem:[#allocation24_spill]] %s10179_s5  ;;  %5748 = vset.pattern.permute.xlu2 %v10198_v0  ;;  %v125_v46 = vld [vmem:[%s10181_s3 + $0x80] sm:$0xff]  ;;  %v126_v61 = vld [vmem:[%s10181_s3 + $0x88] sm:$0xff]  ;;  %s6193_s5 = smov 32  }
   0x3   :  { %s10245_s26 = sld [smem:[#allocation23_spill]]  ;;  %s6197_s25 = smov 120  }
   0x4   :  { %s10246_s29 = sld [smem:[#allocation24_spill]] }
   0x9   :  { %v6292_v1 = vld [vmem:[%s10245_s26] sm:$0xff]  ;;  %v6332_v34 = vld [vmem:[%s10245_s26 + $0x8] sm:$0xff] }
   0xa   :  { %v94_v2 = vld [vmem:[%s10246_s29] sm:$0xff]  ;;  %279 = vperm.xlu1 %5747, %v6292_v1   ;;  %v96_v4 = vld [vmem:[%s10246_s29 + $0x10] sm:$0xff]  ;;  %v95_v5 = vld [vmem:[%s10246_s29 + $0x8] sm:$0xff]  ;;  %284 = vperm.xlu2 %5748, %v6332_v34  }
   0xb   :  { %v129_v3 = vadd.f32 1.0, %v94_v2  ;;  %v131_v6 = vadd.f32 1.0, %v96_v4  ;;  %v130_v7 = vadd.f32 1.0, %v95_v5  ;;  %v97_v8 = vld [vmem:[%s10246_s29 + $0x18] sm:$0xff]  ;;  %s6196_s29 = smov 8  }
   0xc   :  { %v6309_v9 = vadd.f32 1.0, %v97_v8 }
   0xd   :  { %5765 = vrcp.f32 %v129_v3  ;;  %v142_v10 = vand.u32 2147483647, %v129_v3  ;;  %v144_v12 = vand.u32 2147483648, %v129_v3  ;;  %v172_v13 = vand.u32 2147483647, %v131_v6 }
   0xe   :  { %5767 = vrcp.f32 %v131_v6  ;;  %v174_v14 = vand.u32 2147483648, %v131_v6  ;;  %vm138_vm0 = vweird.f32 %v129_v3  ;;  %vm168_vm1 = vweird.f32 %v131_v6 }
   0xf   :  { %5769 = vrcp.f32 %v130_v7  ;;  %v157_v19 = vand.u32 2147483647, %v130_v7  ;;  %v159_v22 = vand.u32 2147483648, %v130_v7  ;;  %vm6312_vm3 = vcmp.eq.f32.partialorder %v142_v10, 8.507059e+37 }
  0x10   :  { %5771 = vrcp.f32 %v6309_v9  ;;  %v145_v24 = vor.u32 1.1754944e-38, %v144_v12  ;;  %vm153_vm5 = vweird.f32 %v130_v7  ;;  %vm6321_vm8 = vcmp.eq.f32.partialorder %v172_v13, 8.507059e+37  ;;  %v6397_v12 = vld [vmem:[%s10245_s26 + $0x80] sm:$0xff] }
  0x11   :  { %v175_v32 = vor.u32 1.1754944e-38, %v174_v14  ;;  %vm6325_vm9 = vcmp.eq.f32.partialorder %v157_v19, 8.507059e+37  ;;  %v160_v38 = vor.u32 1.1754944e-38, %v159_v22  ;;  %vm183_vm12 = vweird.f32 %v6309_v9  ;;  %v99_v13 = vld [vmem:[%s10182_s6 + $0x1] sm:$0x1] }
  0x12   :  { %v187_v43 = vand.u32 2147483647, %v6309_v9  ;;  %v189_v44 = vand.u32 2147483648, %v6309_v9  ;;  %v202_v14 = vadd.f32 1.0, %v99_v13 }
  0x13   :  { %v5766_v11 = vpop.eup %5765 }
  0x14   :  { %v5768_v15 = vpop.eup %5767  ;;  %v134_v16 = vmul.f32 %v5766_v11, %v129_v3  ;;  %vm139_vm2 = vweird.f32 %v5766_v11  ;;  %v190_v58 = vor.u32 1.1754944e-38, %v189_v44  ;;  %vm188_vm15 = vcmp.eq.f32.partialorder %v187_v43, 8.507059e+37  ;;  %v6423_v44 = vld [vmem:[%s10184_s0 + $0x8] sm:$0xff] }
  0x15   :  { %v5770_v17 = vpop.eup %5769  ;;  %v164_v18 = vmul.f32 %v5768_v15, %v131_v6  ;;  %vm169_vm4 = vweird.f32 %v5768_v15  ;;  %vm6317_vm7 = vmor %vm138_vm0, %vm139_vm2  ;;  %vm223_vm0 = vweird.f32 %v202_v14  ;;  %v229_v23 = vand.u32 2147483648, %v202_v14 }
  0x16   :  { %v135_v20 = vsub.f32 1.0, %v134_v16  ;;  %v149_v21 = vmul.f32 %v5770_v17, %v130_v7  ;;  %vm154_vm6 = vweird.f32 %v5770_v17  ;;  %v5772_v28 = vpop.eup %5771  ;;  %vm6335_vm10 = vmor %vm168_vm1, %vm169_vm4 }
  0x17   :  { %v165_v25 = vsub.f32 1.0, %v164_v18  ;;  %v179_v39 = vmul.f32 %v5772_v28, %v6309_v9  ;;  %vm6346_vm11 = vmor %vm153_vm5, %vm154_vm6  ;;  %vm184_vm13 = vweird.f32 %v5772_v28 }
  0x18   :  { %v136_v26 = vmul.f32 %v5766_v11, %v135_v20  ;;  %v150_v27 = vsub.f32 1.0, %v149_v21  ;;  %vm185_vm14 = vmor %vm183_vm12, %vm184_vm13  ;;  %vm612_vm12 = vcmp.ne.f32.partialorder %v6292_v1, 0.0  ;;  %vm613_vm13 = vcmp.ne.f32.partialorder %v6332_v34, 0.0 }
  0x19   :  { %v166_v30 = vmul.f32 %v5768_v15, %v165_v25  ;;  %v180_v48 = vsub.f32 1.0, %v179_v39  ;;  %v227_v25 = vand.u32 2147483647, %v202_v14  ;;  %v127_v39 = vld [vmem:[%s10183_s4] sm:$0x1] }
  0x1a   :  { %v137_v35 = vadd.f32 %v5766_v11, %v136_v26  ;;  %v151_v37 = vmul.f32 %v5770_v17, %v150_v27  ;;  %v230_v27 = vor.u32 1.1754944e-38, %v229_v23 }
  0x1b   :  { %v167_v41 = vadd.f32 %v5768_v15, %v166_v30  ;;  %v181_v55 = vmul.f32 %v5772_v28, %v180_v48  ;;  %v128_v30 = vld [vmem:[%s10183_s4 + $0x8] sm:$0x1] }
  0x1c   :  { %v141_v45 = vsel %vm6317_vm7, %v5766_v11, %v137_v35  ;;  %v152_v47 = vadd.f32 %v5770_v17, %v151_v37  ;;  %v6391_v11 = vld [vmem:[%s10245_s26 + $0x88] sm:$0xff] }
  0x1d   :  { %v6360_v49 = vsel %vm6312_vm3, %v145_v24, %v141_v45  ;;  %v171_v50 = vsel %vm6335_vm10, %v5768_v15, %v167_v41  ;;  %v182_v60 = vadd.f32 %v5772_v28, %v181_v55  ;;  %v98_v15 = vld [vmem:[%s10182_s6] sm:$0x1]  ;;  %vm228_vm3 = vcmp.eq.f32.partialorder %v227_v25, 8.507059e+37 }
  0x1e   :  { %10259 = vst [vmem:[#allocation2_spill] sm:$0xff] %v6360_v49  ;;  %v147_v52 = vmul.f32 %v6360_v49, %v123_v40  ;;  %v6370_v53 = vsel %vm6321_vm8, %v175_v32, %v171_v50  ;;  %v156_v54 = vsel %vm6346_vm11, %v5770_v17, %v152_v47  ;;  %v201_v16 = vadd.f32 1.0, %v98_v15  ;;  %v6441_v50 = vld [vmem:[%s10184_s0 + $0x88] sm:$0xff] }
  0x1f   :  { %10260 = vst [vmem:[#allocation3_spill] sm:$0xff] %v6370_v53  ;;  %v177_v56 = vmul.f32 %v6370_v53, %v125_v46  ;;  %v6377_v57 = vsel %vm6325_vm9, %v160_v38, %v156_v54  ;;  %v186_v62 = vsel %vm185_vm14, %v5772_v28, %v182_v60  ;;  %vm327_vm8 = vcmask 64512   ;;  %v6430_v46 = vld [vmem:[%s10184_s0] sm:$0xff] }
  0x20   :  { %10261 = vst [vmem:[#allocation4_spill] sm:$0xff] %v6377_v57  ;;  %5773 = vtanh.f32 %v147_v52  ;;  %v162_v59 = vmul.f32 %v6377_v57, %v124_v51  ;;  %v6385_v63 = vsel %vm188_vm15, %v190_v58, %v186_v62  ;;  %vm208_vm4 = vweird.f32 %v201_v16  ;;  %5474 = vmatpush.msk.msra.mxu0 %vm327_vm8, %v6423_v44  ;;  %v6446_v51 = vld [vmem:[%s10184_s0 + $0x80] sm:$0xff]  ;;  %5478 = vmatpush.msk.msra.mxu1 %vm327_vm8, %v6441_v50 }
  0x21   :  { %5775 = vtanh.f32 %v177_v56  ;;  %10262 = vst [vmem:[#allocation5_spill] sm:$0xff] %v6385_v63  ;;  %v192_v2 = vmul.f32 %v6385_v63, %v126_v61  ;;  %v214_v32 = vand.u32 2147483648, %v201_v16  ;;  %v212_v35 = vand.u32 2147483647, %v201_v16 }
  0x22   :  { %5777 = vtanh.f32 %v162_v59  ;;  %5475 = vmatpush.msk.msra.mxu0 %vm327_vm8, %v6430_v46  ;;  %v100_v56 = vlaneseq  ;;  %5479 = vmatpush.msk.msra.mxu1 %vm327_vm8, %v6446_v51  ;;  %v61_v59 = vld [vmem:[%s10185_s10 + $0x8] sm:$0xff]  ;;  %vm332_vm11 = vcmask 130048   ;;  %vm615_vm14 = vcmp.ne.f32.partialorder %v6391_v11, 0.0 }
  0x23   :  { %5779 = vtanh.f32 %v192_v2  ;;  %v215_v37 = vor.u32 1.1754944e-38, %v214_v32  ;;  %vm213_vm7 = vcmp.eq.f32.partialorder %v212_v35, 8.507059e+37  ;;  %v6457_v60 = vsub.f32 0.0, %v61_v59 }
  0x24   :  { %5781 = vrcp.f32 %v202_v14  ;;  %v101_v62 = vshrl.u32 %v100_v56, 7  ;;  %vm614_vm15 = vcmp.ne.f32.partialorder %v6397_v12, 0.0 }
  0x25   :  { %5783 = vrcp.f32 %v201_v16 }
  0x26   :  { %v5774_v3 = vpop.eup %5773 }
  0x27   :  { %v5776_v4 = vpop.eup %5775  ;;  %v197_v5 = vmul.f32 0.5, %v5774_v3  ;;  %v60_v3 = vld [vmem:[%s10185_s10] sm:$0xff] }
  0x28   :  { %v199_v6 = vmul.f32 0.5, %v5776_v4  ;;  %v5778_v7 = vpop.eup %5777  ;;  %v104_v4 = vand.u32 127, %v100_v56 }
  0x29   :  { %241 = vperm.xlu0 %5746, %v197_v5   ;;  %v5780_v8 = vpop.eup %5779  ;;  %v198_v9 = vmul.f32 0.5, %v5778_v7  ;;  %v102_v7 = vadd.s32 8, %v101_v62 }
  0x2a   :  { %251 = vperm.xlu1 %5747, %v199_v6   ;;  %v200_v10 = vmul.f32 0.5, %v5780_v8  ;;  %v5782_v17 = vpop.eup %5781  ;;  %v6465_v8 = vsub.f32 0.0, %v60_v3  ;;  %vm105_vm9 = vcmp.eq.s32.totalorder %v101_v62, %v104_v4 }
  0x2b   :  { %v219_v18 = vmul.f32 %v5782_v17, %v202_v14  ;;  %v5784_v20 = vpop.eup %5783  ;;  %vm224_vm1 = vweird.f32 %v5782_v17  ;;  %v5749_v14 = vld [vmem:[%s10180_s2] ss:$0 sm:$0xff]  ;;  %vm106_vm10 = vcmp.eq.s32.totalorder %v102_v7, %v104_v4 }
  0x2c   :  { %256 = vperm.xlu2 %5748, %v200_v10   ;;  %v204_v22 = vmul.f32 %v5784_v20, %v201_v16  ;;  %vm225_vm2 = vmor %vm223_vm0, %vm224_vm1  ;;  %vm209_vm5 = vweird.f32 %v5784_v20  ;;  %10265 = vst [vmem:[#allocation8_spill] sm:$0xff] %v6465_v8  ;;  %vm463_vm0 = vcmask 261120   ;;  %vm468_vm1 = vcmask 392192  }
  0x2d   :  { %v220_v19 = vsub.f32 1.0, %v219_v18  ;;  %vm210_vm6 = vmor %vm208_vm4, %vm209_vm5 }
  0x2e   :  { %v205_v26 = vsub.f32 1.0, %v204_v22  ;;  %v6191_v22 = vmov 0.0  }
  0x2f   :  { %v221_v21 = vmul.f32 %v5782_v17, %v220_v19  ;;  %v6479_v19 = vld [vmem:[%s10186_s9 + $0x8] sm:$0xff]  ;;  %v6489_v23 = vsel %vm105_vm9, 1.0, %v6191_v22 }
  0x30   :  { %v206_v29 = vmul.f32 %v5784_v20, %v205_v26  ;;  %v6500_v35 = vsub.f32 1.0, %v6489_v23 }
  0x31   :  { %246 = vperm.xlu0 %5746, %v198_v9   ;;  %v222_v24 = vadd.f32 %v5782_v17, %v221_v21  ;;  %v5750_v21 = vld [vmem:[%s10180_s2 + $0x8] ss:$0 sm:$0xff] }
  0x32   :  { %294 = vperm.xlu1 %5747, %v6391_v11   ;;  %v207_v33 = vadd.f32 %v5784_v20, %v206_v29 }
  0x33   :  { %v226_v28 = vsel %vm225_vm2, %v5782_v17, %v222_v24  ;;  %vm473_vm2 = vcmask 523264  }
  0x34   :  { %v6409_v31 = vsel %vm228_vm3, %v230_v27, %v226_v28  ;;  %v211_v38 = vsel %vm210_vm6, %v5784_v20, %v207_v33  ;;  %v6484_v20 = vld [vmem:[%s10186_s9] sm:$0xff]  ;;  %v6492_v27 = vsel %vm106_vm10, 1.0, %v6191_v22  ;;  %vm482_vm3 = vcmask 654336  }
  0x35   :  { %10263 = vst [vmem:[#allocation6_spill] sm:$0xff] %v6409_v31  ;;  %v232_v36 = vmul.f32 %v6409_v31, %v128_v30  ;;  %v6415_v40 = vsel %vm213_vm7, %v215_v37, %v211_v38 }
  0x36   :  { %10264 = vst [vmem:[#allocation7_spill] sm:$0xff] %v6415_v40  ;;  %v217_v42 = vmul.f32 %v6415_v40, %v127_v39 }
  0x37   :  { %5785 = vtanh.f32 %v232_v36  ;;  %v6503_v36 = vsub.f32 1.0, %v6492_v27 }
  0x38   :  { %5787 = vtanh.f32 %v217_v42 }
  0x39   :  { %289 = vperm.xlu0 %5746, %v6397_v12  }
  0x3d   :  { %v5786_v43 = vpop.eup %5785 }
  0x3e   :  { %v236_v45 = vmul.f32 0.5, %v5786_v43  ;;  %v5788_v52 = vpop.eup %5787 }
  0x3f   :  { %v235_v58 = vmul.f32 0.5, %v5788_v52 }
  0x40   :  { %v6434_v47 = vperm.slane %v236_v45, 0 }
  0x41   :  { %v261_v2 = vperm.slane %v235_v58, 0 }
  0x64   :  { %v6417_v41 = vpop.permute.xlu2 %284 }
  0x7c   :  { %v280_v54 = vpop.permute.xlu1 %279 }
  0x7d   :  { %v303_v24 = vmul.f32 %v5749_v14, %v280_v54 }
  0x86   :  { %v6436_v48 = vpop.permute.xlu2 %256 }
  0x87   :  { %v268_v55 = vsub.f32 %v6436_v48, %v6434_v47 }
  0x89   :  { %v272_v61 = vand.u32 2147483647, %v268_v55  ;;  %v304_v55 = vmul.f32 %v5749_v14, %v6417_v41 }
  0x8b   :  { %v276_v6 = vmul.f32 %v272_v61, %v6457_v60 }
  0x8d   :  { %v310_v16 = vadd.f32 1.0, %v276_v6 }
  0x8f   :  { %v314_v29 = vmul.f32 %v310_v16, %v6479_v19 }
  0x9b   :  { %v6462_v5 = vpop.permute.xlu0 %241 }
  0x9c   :  { %v265_v9 = vsub.f32 %v6462_v5, %v261_v2  ;;  %v6468_v10 = vpop.permute.xlu1 %251 }
  0x9d   :  { %v267_v13 = vsub.f32 %v6468_v10, %v6434_v47 }
  0x9e   :  { %v269_v15 = vand.u32 2147483647, %v265_v9 }
  0x9f   :  { %v271_v17 = vand.u32 2147483647, %v267_v13 }
  0xa0   :  { %v273_v18 = vmul.f32 %v269_v15, %v6465_v8 }
  0xa1   :  { %v275_v26 = vmul.f32 %v271_v17, %v6465_v8 }
  0xa2   :  { %v307_v25 = vadd.f32 1.0, %v273_v18 }
  0xa3   :  { %v6494_v28 = vpop.permute.xlu0 %246  ;;  %v309_v38 = vadd.f32 1.0, %v275_v26  ;;  %v6579_v26 = vld [vmem:[%s10187_s11 + $0x38] sm:$0xff] }
  0xa4   :  { %v311_v30 = vmul.f32 %v307_v25, %v6484_v20  ;;  %v266_v32 = vsub.f32 %v6494_v28, %v261_v2  ;;  %v295_v33 = vpop.permute.xlu1 %294  ;;  %v6574_v25 = vld [vmem:[%s10187_s11 + $0x40] sm:$0xff] }
  0xa5   :  { %v306_v37 = vmul.f32 %v5750_v21, %v295_v33  ;;  %v313_v58 = vmul.f32 %v309_v38, %v6484_v20  ;;  %v6593_v33 = vld [vmem:[%s10187_s11 + $0x28] sm:$0xff]  ;;  %v6605_v38 = vld [vmem:[%s10187_s11 + $0x18] sm:$0xff] }
  0xa6   :  { %v270_v39 = vand.u32 2147483647, %v266_v32  ;;  %v315_v42 = vmul.f32 %v311_v30, %v303_v24  ;;  %v6568_v24 = vld [vmem:[%s10187_s11 + $0x48] sm:$0xff]  ;;  %v6588_v32 = vld [vmem:[%s10187_s11 + $0x30] sm:$0xff] }
  0xa7   :  { %v318_v43 = vmul.f32 %v314_v29, %v306_v37  ;;  %501 = vmatpush.msra.mxu2 %v6568_v24  ;;  %v6599_v37 = vld [vmem:[%s10187_s11 + $0x20] sm:$0xff] }
  0xa8   :  { %v274_v45 = vmul.f32 %v270_v39, %v6457_v60  ;;  %v319_v52 = vmul.f32 %v315_v42, %v6500_v35  ;;  %v6613_v42 = vld [vmem:[%s10187_s11 + $0x10] sm:$0xff] }
  0xa9   :  { %v322_v54 = vmul.f32 %v318_v43, %v6503_v36  ;;  %502 = vmatpush.msra.mxu2 %v6574_v25  ;;  %v6619_v43 = vld [vmem:[%s10187_s11 + $0x8] sm:$0xff] }
  0xaa   :  { %v308_v56 = vadd.f32 1.0, %v274_v45  ;;  %v323_v59 = vadd.f32 %v6489_v23, %v319_v52  ;;  %v6624_v45 = vld [vmem:[%s10187_s11] sm:$0xff] }
  0xab   :  { %v290_v61 = vpop.permute.xlu0 %289  ;;  %v326_v62 = vadd.f32 %v6492_v27, %v322_v54  ;;  %503 = vmatpush.msra.mxu2 %v6579_v26  ;;  %v620_v54 = vsel %vm612_vm12, 1, %v10198_v0 }
  0xac   :  { %v312_v3 = vmul.f32 %v308_v56, %v6479_v19  ;;  %v305_v4 = vmul.f32 %v5750_v21, %v290_v61  ;;  %5476 = vmatmul.msk.f32.vlgmr.msra.gmra.mxu0 %vm332_vm11, %v323_v59  ;;  %v391_v6 = vmul.f32 %v323_v59, %v261_v2  ;;  %v622_v59 = vsel %vm614_vm15, 1, %v10198_v0 }
  0xad   :  { %v6515_v7 = vmul.f32 %v326_v62, %v6434_v47  ;;  %504 = vmatpush.msra.mxu2 %v6588_v32 }
  0xae   :  { %v317_v9 = vmul.f32 %v313_v58, %v305_v4  ;;  %v316_v13 = vmul.f32 %v312_v3, %v304_v55  ;;  %v395_v30 = vsel %vm332_vm11, %v391_v6, 0.0  ;;  %v621_v55 = vsel %vm613_vm13, 1, %v10198_v0  ;;  %v6644_v3 = vld [vmem:[%s10188_s8] sm:$0xff] }
  0xaf   :  { %505 = vmatpush.msra.mxu2 %v6593_v33  ;;  %v404_v52 = vsel %vm332_vm11, %v6515_v7, 0.0  ;;  %v623_v58 = vsel %vm615_vm14, 1, %v10198_v0  ;;  %v6897_v0 = vld [vmem:[%s10191_s12] sm:$0xff] }
  0xb0   :  { %v321_v41 = vmul.f32 %v317_v9, %v6500_v35  ;;  %v320_v14 = vmul.f32 %v316_v13, %v6503_v36  ;;  %10274 = vst [vmem:[#allocation17_spill] sm:$0xff] %v6897_v0 }
  0xb1   :  { %506 = vmatpush.msra.mxu2 %v6599_v37 }
  0xb2   :  { %v324_v15 = vadd.f32 %v6492_v27, %v320_v14  ;;  %v325_v16 = vadd.f32 %v6489_v23, %v321_v41 }
  0xb3   :  { %507 = vmatpush.msra.mxu2 %v6605_v38 }
  0xb4   :  { %5477 = vmatmul.msk.f32.gmra.mxu0 %vm332_vm11, %v324_v15  ;;  %5480 = vmatmul.msk.f32.vlgmr.msra.gmra.mxu1 %vm332_vm11, %v325_v16  ;;  %v392_v17 = vmul.f32 %v324_v15, %v261_v2  ;;  %v393_v18 = vmul.f32 %v325_v16, %v6434_v47  ;;  %v6656_v16 = vld [vmem:[%s10188_s8 + $0x8] sm:$0xff] }
  0xb5   :  { %508 = vmatpush.msra.mxu2 %v6613_v42 }
  0xb6   :  { %v398_v29 = vsel %vm332_vm11, %v392_v17, 0.0  ;;  %v401_v39 = vsel %vm332_vm11, %v393_v18, 0.0 }
  0xb7   :  { %509 = vmatpush.msra.mxu2 %v6619_v43 }
  0xb9   :  { %510 = vmatpush.msra.mxu2 %v6624_v45 }
  0xbc   :  { %5481 = vmatmul.msk.f32.gmra.mxu1 %vm332_vm11, %v326_v62 }
 0x129   :  { %v6525_v21 = vpop.f32.mrf.mxu0 }
 0x12a   :  { %435 = vrot.lane.b32.xlu1 %v6525_v21, %s6192_s19  ;;  %423 = vrot.lane.b32.xlu0 %v6525_v21, %s6193_s5 }
 0x12b   :  { %411 = vrot.lane.b32.xlu2 %v6525_v21, %s6194_s20 }
 0x131   :  { %v6533_v22 = vpop.f32.mrf.mxu0  ;;  %v6541_v47 = vpop.f32.mrf.mxu1 }
 0x132   :  { %425 = vrot.lane.b32.xlu1 %v6533_v22, %s6193_s5  ;;  %413 = vrot.lane.b32.xlu0 %v6533_v22, %s6194_s20 }
 0x133   :  { %447 = vrot.lane.b32.xlu2 %v6525_v21, %s6195_s21 }
 0x139   :  { %v6555_v2 = vpop.f32.mrf.mxu1 }
 0x13a   :  { %415 = vrot.lane.b32.xlu1 %v6541_v47, %s6194_s20  ;;  %449 = vrot.lane.b32.xlu0 %v6533_v22, %s6195_s21 }
 0x13b   :  { %437 = vrot.lane.b32.xlu2 %v6533_v22, %s6192_s19 }
 0x142   :  { %451 = vrot.lane.b32.xlu1 %v6541_v47, %s6195_s21  ;;  %439 = vrot.lane.b32.xlu0 %v6541_v47, %s6192_s19 }
 0x143   :  { %427 = vrot.lane.b32.xlu2 %v6541_v47, %s6193_s5 }
 0x14a   :  { %441 = vrot.lane.b32.xlu1 %v6555_v2, %s6192_s19  ;;  %429 = vrot.lane.b32.xlu0 %v6555_v2, %s6193_s5 }
 0x14b   :  { %417 = vrot.lane.b32.xlu2 %v6555_v2, %s6194_s20 }
 0x153   :  { %453 = vrot.lane.b32.xlu2 %v6555_v2, %s6195_s21 }
 0x174   :  { %399 = vadd.xlane.f32.xlu1 %v398_v29  ;;  %396 = vadd.xlane.f32.xlu0 %v395_v30 }
 0x17c   :  { %402 = vadd.xlane.f32.xlu2 %v401_v39 }
 0x184   :  { %405 = vadd.xlane.f32.xlu2 %v404_v52 }
 0x185   :  { %v412_v56 = vpop.permute.xlu2 %411 }
 0x186   :  { %v459_v34 = vsel %vm332_vm11, %v6525_v21, %v412_v56 }
 0x188   :  { %625 = vperm.xlu0 %5746, %v620_v54  }
 0x18d   :  { %628 = vperm.xlu1 %5747, %v621_v55   ;;  %v448_v1 = vpop.permute.xlu2 %447 }
 0x190   :  { %634 = vperm.xlu0 %5746, %v623_v58  }
 0x195   :  { %v438_v4 = vpop.permute.xlu2 %437 }
 0x19c   :  { %631 = vperm.xlu2 %5748, %v622_v59   ;;  %v436_v61 = vpop.permute.xlu1 %435  ;;  %v424_v62 = vpop.permute.xlu0 %423 }
 0x19d   :  { %v464_v11 = vsel %vm463_vm0, %v459_v34, %v424_v62  ;;  %v428_v14 = vpop.permute.xlu2 %427 }
 0x19e   :  { %v469_v12 = vsel %vm468_vm1, %v464_v11, %v436_v61 }
 0x19f   :  { %v474_v6 = vsel %vm473_vm2, %v469_v12, %v448_v1 }
 0x1a0   :  { %v478_v7 = vmul.f32 %v474_v6, %v6644_v3  ;;  %v6679_v6 = vld [vmem:[%s10189_s13] sm:$0xff] }
 0x1a1   :  { %10266 = vst [vmem:[#allocation9_spill] sm:$0xff] %v6679_v6 }
 0x1a2   :  { %5482 = vmatmul.msk.f32.vlgmr.msra.gmra.mxu2 %vm482_vm3, %v478_v7 }
 0x1a4   :  { %v426_v9 = vpop.permute.xlu1 %425  ;;  %v414_v13 = vpop.permute.xlu0 %413 }
 0x1a5   :  { %v460_v41 = vsel %vm332_vm11, %v6533_v22, %v414_v13  ;;  %v418_v39 = vpop.permute.xlu2 %417 }
 0x1a6   :  { %v465_v15 = vsel %vm463_vm0, %v460_v41, %v426_v9  ;;  %v462_v59 = vsel %vm332_vm11, %v6555_v2, %v418_v39  ;;  %v6685_v9 = vld [vmem:[%s10190_s15] sm:$0xff] }
 0x1a7   :  { %v470_v18 = vsel %vm468_vm1, %v465_v15, %v438_v4  ;;  %10267 = vst [vmem:[#allocation10_spill] sm:$0xff] %v6685_v9 }
 0x1ac   :  { %v416_v17 = vpop.permute.xlu1 %415  ;;  %v450_v21 = vpop.permute.xlu0 %449 }
 0x1ad   :  { %v475_v29 = vsel %vm473_vm2, %v470_v18, %v450_v21  ;;  %v461_v22 = vsel %vm332_vm11, %v6541_v47, %v416_v17  ;;  %v454_v62 = vpop.permute.xlu2 %453  ;;  %v6691_v17 = vld [vmem:[%s10189_s13 + $0x8] sm:$0xff] }
 0x1ae   :  { %v479_v30 = vmul.f32 %v475_v29, %v6656_v16  ;;  %v466_v54 = vsel %vm463_vm0, %v461_v22, %v428_v14  ;;  %10268 = vst [vmem:[#allocation11_spill] sm:$0xff] %v6691_v17  ;;  %v6697_v22 = vld [vmem:[%s10190_s15 + $0x8] sm:$0xff] }
 0x1af   :  { %10269 = vst [vmem:[#allocation12_spill] sm:$0xff] %v6697_v22 }
 0x1b0   :  { %5483 = vmatmul.msk.f32.gmra.mxu2 %vm482_vm3, %v479_v30 }
 0x1b4   :  { %v452_v52 = vpop.permute.xlu1 %451  ;;  %v440_v55 = vpop.permute.xlu0 %439 }
 0x1b5   :  { %v471_v56 = vsel %vm468_vm1, %v466_v54, %v440_v55 }
 0x1b6   :  { %v476_v58 = vsel %vm473_vm2, %v471_v56, %v452_v52 }
 0x1b7   :  { %v480_v1 = vmul.f32 %v476_v58, %v6644_v3 }
 0x1b9   :  { %5484 = vmatmul.msk.f32.gmra.mxu2 %vm482_vm3, %v480_v1 }
 0x1bc   :  { %v442_v34 = vpop.permute.xlu1 %441  ;;  %v430_v61 = vpop.permute.xlu0 %429 }
 0x1bd   :  { %v467_v47 = vsel %vm463_vm0, %v462_v59, %v430_v61 }
 0x1be   :  { %v472_v11 = vsel %vm468_vm1, %v467_v47, %v442_v34 }
 0x1bf   :  { %v477_v12 = vsel %vm473_vm2, %v472_v11, %v454_v62 }
 0x1c0   :  { %v481_v4 = vmul.f32 %v477_v12, %v6656_v16 }
 0x1c2   :  { %5485 = vmatmul.msk.f32.gmra.mxu2 %vm482_vm3, %v481_v4 }
 0x1e7   :  { %v397_v7 = vpop.xlane.xlu0 %396  ;;  %v400_v18 = vpop.xlane.xlu1 %399 }
 0x1e8   :  { %v524_v2 = vmul.f32 %v397_v7, %v6679_v6  ;;  %v525_v29 = vmul.f32 %v400_v18, %v6691_v17 }
 0x1ef   :  { %v403_v55 = vpop.xlane.xlu2 %402 }
 0x1f0   :  { %v526_v1 = vmul.f32 %v403_v55, %v6679_v6 }
 0x225   :  { %v512_v13 = vpop.f32.mrf.mxu2 }
 0x226   :  { %v528_v41 = vadd.f32 %v524_v2, %v512_v13  ;;  %v406_v2 = vpop.xlane.xlu2 %405 }
 0x227   :  { %v527_v18 = vmul.f32 %v406_v2, %v6691_v17 }
 0x228   :  { %v532_v14 = vadd.f32 %v528_v41, %v6685_v9 }
 0x22a   :  { %v5486_v15 = vmul.f32 -1.442695, %v532_v14 }
 0x22c   :  { %5789 = vpow2.f32 %v5486_v15 }
 0x232   :  { %v5790_v21 = vpop.eup %5789 }
 0x233   :  { %v548_v30 = vadd.f32 1.0, %v5790_v21  ;;  %v515_v39 = vpop.f32.mrf.mxu2  ;;  %v6703_v21 = vpop.permute.xlu0 %625 }
 0x234   :  { %v529_v52 = vadd.f32 %v525_v29, %v515_v39  ;;  %vm636_vm9 = vcmp.eq.s32.totalorder %v6703_v21, 1 }
 0x235   :  { %5791 = vrcp.f32 %v548_v30  ;;  %v563_v11 = vand.u32 2147483648, %v548_v30  ;;  %v561_v7 = vand.u32 2147483647, %v548_v30  ;;  %vm557_vm5 = vweird.f32 %v548_v30 }
 0x236   :  { %v533_v54 = vadd.f32 %v529_v52, %v6697_v22 }
 0x237   :  { %v564_v15 = vor.u32 1.1754944e-38, %v563_v11  ;;  %vm562_vm7 = vcmp.eq.f32.partialorder %v561_v7, 8.507059e+37 }
 0x238   :  { %v5487_v56 = vmul.f32 -1.442695, %v533_v54 }
 0x23a   :  { %5793 = vpow2.f32 %v5487_v56 }
 0x23b   :  { %v5792_v58 = vpop.eup %5791 }
 0x23c   :  { %v518_v59 = vpop.f32.mrf.mxu2  ;;  %v553_v34 = vmul.f32 %v5792_v58, %v548_v30  ;;  %vm558_vm4 = vweird.f32 %v5792_v58 }
 0x23d   :  { %v530_v61 = vadd.f32 %v526_v1, %v518_v59  ;;  %vm559_vm6 = vmor %vm557_vm5, %vm558_vm4 }
 0x23e   :  { %v554_v47 = vsub.f32 1.0, %v553_v34 }
 0x23f   :  { %v534_v62 = vadd.f32 %v530_v61, %v6685_v9 }
 0x240   :  { %v5794_v12 = vpop.eup %5793  ;;  %v555_v4 = vmul.f32 %v5792_v58, %v554_v47 }
 0x241   :  { %v549_v13 = vadd.f32 1.0, %v5794_v12  ;;  %v5488_v41 = vmul.f32 -1.442695, %v534_v62 }
 0x242   :  { %v556_v14 = vadd.f32 %v5792_v58, %v555_v4 }
 0x243   :  { %5795 = vrcp.f32 %v549_v13  ;;  %v578_v62 = vand.u32 2147483648, %v549_v13  ;;  %v576_v12 = vand.u32 2147483647, %v549_v13  ;;  %vm572_vm12 = vweird.f32 %v549_v13 }
 0x244   :  { %5797 = vpow2.f32 %v5488_v41  ;;  %v560_v29 = vsel %vm559_vm6, %v5792_v58, %v556_v14  ;;  %v6713_v41 = vpop.permute.xlu1 %628 }
 0x245   :  { %v521_v39 = vpop.f32.mrf.mxu2  ;;  %v6705_v52 = vsel %vm562_vm7, %v564_v15, %v560_v29  ;;  %v579_v7 = vor.u32 1.1754944e-38, %v578_v62  ;;  %vm577_vm14 = vcmp.eq.f32.partialorder %v576_v12, 8.507059e+37  ;;  %vm637_vm15 = vcmp.eq.s32.totalorder %v6713_v41, 1 }
 0x246   :  { %v531_v54 = vadd.f32 %v527_v18, %v521_v39  ;;  %v616_v55 = vmul.f32 0.0, %v6705_v52 }
 0x248   :  { %v535_v30 = vadd.f32 %v531_v54, %v6697_v22  ;;  %v640_v56 = vsel %vm636_vm9, %v616_v55, 0.0 }
 0x249   :  { %v5796_v1 = vpop.eup %5795  ;;  %648 = vrot.lane.b32.xlu1 %v640_v56, %s6196_s29 }
 0x24a   :  { %v5798_v59 = vpop.eup %5797  ;;  %v5489_v58 = vmul.f32 -1.442695, %v535_v30  ;;  %v568_v34 = vmul.f32 %v5796_v1, %v549_v13  ;;  %vm573_vm10 = vweird.f32 %v5796_v1 }
 0x24b   :  { %v550_v61 = vadd.f32 1.0, %v5798_v59  ;;  %vm574_vm13 = vmor %vm572_vm12, %vm573_vm10 }
 0x24c   :  { %5799 = vpow2.f32 %v5489_v58  ;;  %v569_v47 = vsub.f32 1.0, %v568_v34 }
 0x24d   :  { %5801 = vrcp.f32 %v550_v61  ;;  %v593_v30 = vand.u32 2147483648, %v550_v61  ;;  %vm587_vm5 = vweird.f32 %v550_v61 }
 0x24e   :  { %v570_v11 = vmul.f32 %v5796_v1, %v569_v47  ;;  %v6722_v47 = vpop.permute.xlu2 %631 }
 0x24f   :  { %v594_v34 = vor.u32 1.1754944e-38, %v593_v30  ;;  %vm638_vm10 = vcmp.eq.s32.totalorder %v6722_v47, 1 }
 0x250   :  { %v571_v4 = vadd.f32 %v5796_v1, %v570_v11 }
 0x252   :  { %v5800_v2 = vpop.eup %5799  ;;  %v575_v14 = vsel %vm574_vm13, %v5796_v1, %v571_v4  ;;  %v591_v1 = vand.u32 2147483647, %v550_v61 }
 0x253   :  { %v5802_v15 = vpop.eup %5801  ;;  %v551_v18 = vadd.f32 1.0, %v5800_v2  ;;  %v6715_v29 = vsel %vm577_vm14, %v579_v7, %v575_v14 }
 0x254   :  { %v617_v39 = vmul.f32 0.0, %v6715_v29  ;;  %v583_v54 = vmul.f32 %v5802_v15, %v550_v61  ;;  %vm588_vm4 = vweird.f32 %v5802_v15  ;;  %vm592_vm7 = vcmp.eq.f32.partialorder %v591_v1, 8.507059e+37 }
 0x255   :  { %5803 = vrcp.f32 %v551_v18  ;;  %vm589_vm6 = vmor %vm587_vm5, %vm588_vm4  ;;  %v608_v2 = vand.u32 2147483648, %v551_v18  ;;  %vm602_vm13 = vweird.f32 %v551_v18 }
 0x256   :  { %v641_v13 = vsel %vm637_vm15, %v617_v39, 0.0  ;;  %v584_v55 = vsub.f32 1.0, %v583_v54  ;;  %v606_v39 = vand.u32 2147483647, %v551_v18 }
 0x257   :  { %650 = vrot.lane.b32.xlu0 %v641_v13, %s6196_s29  ;;  %v6731_v13 = vpop.permute.xlu0 %634 }
 0x258   :  { %v585_v56 = vmul.f32 %v5802_v15, %v584_v55  ;;  %vm607_vm4 = vcmp.eq.f32.partialorder %v606_v39, 8.507059e+37  ;;  %vm639_vm5 = vcmp.eq.s32.totalorder %v6731_v13, 1 }
 0x25a   :  { %v586_v59 = vadd.f32 %v5802_v15, %v585_v56 }
 0x25b   :  { %v5804_v58 = vpop.eup %5803 }
 0x25c   :  { %v590_v62 = vsel %vm589_vm6, %v5802_v15, %v586_v59  ;;  %v598_v11 = vmul.f32 %v5804_v58, %v551_v18  ;;  %vm603_vm12 = vweird.f32 %v5804_v58  ;;  %v609_v15 = vor.u32 1.1754944e-38, %v608_v2 }
 0x25d   :  { %v6724_v12 = vsel %vm592_vm7, %v594_v34, %v590_v62  ;;  %vm604_vm14 = vmor %vm602_vm13, %vm603_vm12 }
 0x25e   :  { %v618_v4 = vmul.f32 0.0, %v6724_v12  ;;  %v599_v7 = vsub.f32 1.0, %v598_v11  ;;  %v5505_v11 = vld [vmem:[%s10181_s3 + $0x18] sm:$0xff] }
 0x25f   :  { %v869_v2 = vmul.f32 %v5505_v11, %v6377_v57 }
 0x260   :  { %v642_v14 = vsel %vm638_vm10, %v618_v4, 0.0  ;;  %v600_v61 = vmul.f32 %v5804_v58, %v599_v7 }
 0x261   :  { %652 = vrot.lane.b32.xlu2 %v642_v14, %s6196_s29  ;;  %v5506_v14 = vld [vmem:[%s10181_s3 + $0x90] sm:$0xff] }
 0x262   :  { %v601_v54 = vadd.f32 %v5804_v58, %v600_v61 }
 0x264   :  { %v605_v55 = vsel %vm604_vm14, %v5804_v58, %v601_v54 }
 0x265   :  { %v6733_v30 = vsel %vm607_vm4, %v609_v15, %v605_v55  ;;  %v5507_v55 = vld [vmem:[%s10181_s3 + $0x98] sm:$0xff] }
 0x266   :  { %v619_v56 = vmul.f32 0.0, %v6733_v30 }
 0x268   :  { %v643_v1 = vsel %vm639_vm5, %v619_v56, 0.0  ;;  %v871_v56 = vmul.f32 %v5507_v55, %v6385_v63  ;;  %v6861_v55 = vld [vmem:[%s10191_s12 + $0x30] sm:$0xff] }
 0x269   :  { %654 = vrot.lane.b32.xlu1 %v643_v1, %s6196_s29 }
 0x2bb   :  { %v6740_v59 = vpop.permute.xlu1 %648 }
 0x2bc   :  { %v6745_v18 = vsel %vm327_vm8, %v6430_v46, %v6740_v59  ;;  %v6768_v46 = vpop.permute.xlu2 %652 }
 0x2bd   :  { %680 = vrot.lane.b32.xlu2 %v6745_v18, %s6193_s5  ;;  %668 = vrot.lane.b32.xlu0 %v6745_v18, %s6194_s20  ;;  %v6773_v62 = vsel %vm327_vm8, %v6446_v51, %v6768_v46 }
 0x2be   :  { %692 = vrot.lane.b32.xlu1 %v6745_v18, %s6192_s19 }
 0x2c5   :  { %704 = vrot.lane.b32.xlu0 %v6745_v18, %s6195_s21 }
 0x2c9   :  { %v6755_v58 = vpop.permute.xlu0 %650 }
 0x2ca   :  { %v6760_v34 = vsel %vm327_vm8, %v6423_v44, %v6755_v58  ;;  %v5504_v44 = vld [vmem:[%s10181_s3 + $0x10] sm:$0xff] }
 0x2cb   :  { %682 = vrot.lane.b32.xlu1 %v6760_v34, %s6193_s5  ;;  %670 = vrot.lane.b32.xlu2 %v6760_v34, %s6194_s20  ;;  %v868_v51 = vmul.f32 %v5504_v44, %v6360_v49  ;;  %v6819_v44 = vld [vmem:[%s10245_s26 + $0x10] sm:$0xff] }
 0x2cc   :  { %10270 = vst [vmem:[#allocation13_spill] sm:$0xff] %v6819_v44 }
 0x2cd   :  { %694 = vrot.lane.b32.xlu0 %v6760_v34, %s6192_s19  ;;  %5805 = vtanh.f32 %v868_v51 }
 0x2ce   :  { %5807 = vtanh.f32 %v869_v2  ;;  %v6825_v2 = vld [vmem:[%s10245_s26 + $0x18] sm:$0xff] }
 0x2cf   :  { %10271 = vst [vmem:[#allocation14_spill] sm:$0xff] %v6825_v2 }
 0x2d3   :  { %672 = vrot.lane.b32.xlu1 %v6773_v62, %s6194_s20  ;;  %706 = vrot.lane.b32.xlu2 %v6760_v34, %s6195_s21  ;;  %v5806_v61 = vpop.eup %5805 }
 0x2d4   :  { %v5808_v39 = vpop.eup %5807  ;;  %v876_v54 = vmul.f32 0.5, %v5806_v61  ;;  %v6831_v61 = vld [vmem:[%s10245_s26 + $0x90] sm:$0xff] }
 0x2d5   :  { %684 = vrot.lane.b32.xlu0 %v6773_v62, %s6193_s5  ;;  %v877_v15 = vmul.f32 0.5, %v5808_v39  ;;  %10272 = vst [vmem:[#allocation15_spill] sm:$0xff] %v6831_v61  ;;  %v6843_v39 = vld [vmem:[%s10191_s12 + $0x48] sm:$0xff] }
 0x2d6   :  { %754 = vmatpush.msra.mxu3 %v6843_v39 }
 0x2db   :  { %v6788_v4 = vpop.permute.xlu1 %654  ;;  %708 = vrot.lane.b32.xlu1 %v6773_v62, %s6195_s21  ;;  %696 = vrot.lane.b32.xlu2 %v6773_v62, %s6192_s19 }
 0x2dc   :  { %v6797_v7 = vsel %vm327_vm8, %v6441_v50, %v6788_v4  ;;  %v870_v50 = vmul.f32 %v5506_v14, %v6370_v53 }
 0x2dd   :  { %674 = vrot.lane.b32.xlu0 %v6797_v7, %s6194_s20 }
 0x2de   :  { %5809 = vtanh.f32 %v870_v50  ;;  %v6836_v50 = vld [vmem:[%s10245_s26 + $0x98] sm:$0xff] }
 0x2df   :  { %5811 = vtanh.f32 %v871_v56  ;;  %10273 = vst [vmem:[#allocation16_spill] sm:$0xff] %v6836_v50  ;;  %v6867_v56 = vld [vmem:[%s10191_s12 + $0x28] sm:$0xff] }
 0x2e3   :  { %698 = vrot.lane.b32.xlu1 %v6797_v7, %s6192_s19  ;;  %686 = vrot.lane.b32.xlu2 %v6797_v7, %s6193_s5 }
 0x2e4   :  { %v5810_v1 = vpop.eup %5809 }
 0x2e5   :  { %710 = vrot.lane.b32.xlu0 %v6797_v7, %s6195_s21  ;;  %v878_v11 = vmul.f32 0.5, %v5810_v1  ;;  %v5812_v51 = vpop.eup %5811  ;;  %v6873_v1 = vld [vmem:[%s10191_s12 + $0x20] sm:$0xff] }
 0x2e6   :  { %v879_v14 = vmul.f32 0.5, %v5812_v51  ;;  %v6885_v51 = vld [vmem:[%s10191_s12 + $0x10] sm:$0xff] }
 0x2eb   :  { %888 = vperm.xlu2 %5748, %v876_v54   ;;  %v6848_v54 = vld [vmem:[%s10191_s12 + $0x40] sm:$0xff] }
 0x2ec   :  { %755 = vmatpush.msra.mxu3 %v6848_v54 }
 0x2ed   :  { %893 = vperm.xlu0 %5746, %v877_v15   ;;  %v6854_v15 = vld [vmem:[%s10191_s12 + $0x38] sm:$0xff] }
 0x2ee   :  { %756 = vmatpush.msra.mxu3 %v6854_v15 }
 0x2f0   :  { %757 = vmatpush.msra.mxu3 %v6861_v55 }
 0x2f2   :  { %758 = vmatpush.msra.mxu3 %v6867_v56 }
 0x2f3   :  { %926 = vperm.xlu2 %5748, %v6819_v44  }
 0x2f4   :  { %759 = vmatpush.msra.mxu3 %v6873_v1 }
 0x2f5   :  { %898 = vperm.xlu0 %5746, %v878_v11   ;;  %v6878_v11 = vld [vmem:[%s10191_s12 + $0x18] sm:$0xff] }
 0x2f6   :  { %760 = vmatpush.msra.mxu3 %v6878_v11 }
 0x2f8   :  { %761 = vmatpush.msra.mxu3 %v6885_v51 }
 0x2fb   :  { %931 = vperm.xlu2 %5748, %v6825_v2  }
 0x2fd   :  { %903 = vperm.xlu0 %5746, %v879_v14   ;;  %v6891_v14 = vld [vmem:[%s10191_s12 + $0x8] sm:$0xff] }
 0x2fe   :  { %762 = vmatpush.msra.mxu3 %v6891_v14 }
 0x300   :  { %763 = vmatpush.msra.mxu3 %v6897_v0 }
 0x303   :  { %936 = vperm.xlu2 %5748, %v6831_v61  }
 0x305   :  { %941 = vperm.xlu0 %5746, %v6836_v50  }
 0x317   :  { %v681_v63 = vpop.permute.xlu2 %680 }
 0x325   :  { %v671_v17 = vpop.permute.xlu2 %670 }
 0x326   :  { %v717_v2 = vsel %vm332_vm11, %v6760_v34, %v671_v17 }
 0x32f   :  { %v669_v53 = vpop.permute.xlu0 %668 }
 0x330   :  { %v716_v57 = vsel %vm332_vm11, %v6745_v18, %v669_v53  ;;  %v693_v22 = vpop.permute.xlu1 %692  ;;  %v707_v18 = vpop.permute.xlu2 %706 }
 0x331   :  { %v720_v49 = vsel %vm463_vm0, %v716_v57, %v681_v63 }
 0x332   :  { %v724_v9 = vsel %vm468_vm1, %v720_v49, %v693_v22 }
 0x337   :  { %v705_v6 = vpop.permute.xlu0 %704 }
 0x338   :  { %v728_v50 = vsel %vm473_vm2, %v724_v9, %v705_v6 }
 0x339   :  { %v732_v61 = vmul.f32 %v728_v50, %v6644_v3 }
 0x33b   :  { %5490 = vmatmul.msk.f32.vlgmr.msra.gmra.mxu3 %vm482_vm3, %v732_v61  ;;  %v697_v61 = vpop.permute.xlu2 %696 }
 0x33d   :  { %v683_v44 = vpop.permute.xlu1 %682 }
 0x33e   :  { %v721_v0 = vsel %vm463_vm0, %v717_v2, %v683_v44 }
 0x33f   :  { %v695_v53 = vpop.permute.xlu0 %694 }
 0x340   :  { %v725_v57 = vsel %vm468_vm1, %v721_v0, %v695_v53 }
 0x341   :  { %v729_v63 = vsel %vm473_vm2, %v725_v57, %v707_v18 }
 0x342   :  { %v733_v49 = vmul.f32 %v729_v63, %v6656_v16 }
 0x343   :  { %v687_v18 = vpop.permute.xlu2 %686 }
 0x344   :  { %5491 = vmatmul.msk.f32.gmra.mxu3 %vm482_vm3, %v733_v49 }
 0x345   :  { %v673_v6 = vpop.permute.xlu1 %672 }
 0x346   :  { %v718_v9 = vsel %vm332_vm11, %v6773_v62, %v673_v6 }
 0x347   :  { %v685_v22 = vpop.permute.xlu0 %684 }
 0x348   :  { %v722_v17 = vsel %vm463_vm0, %v718_v9, %v685_v22 }
 0x349   :  { %v726_v44 = vsel %vm468_vm1, %v722_v17, %v697_v61  ;;  %v6931_v61 = vld [vmem:[%s10192_s14 + $0x8] sm:$0xff]  ;;  %v6938_v17 = vld [vmem:[%s10192_s14] sm:$0xff] }
 0x34d   :  { %v709_v34 = vpop.permute.xlu1 %708 }
 0x34e   :  { %v730_v2 = vsel %vm473_vm2, %v726_v44, %v709_v34  ;;  %v6943_v34 = vld [vmem:[%s10193_s16 + $0x8] sm:$0xff] }
 0x34f   :  { %v734_v0 = vmul.f32 %v730_v2, %v6644_v3  ;;  %v675_v50 = vpop.permute.xlu0 %674 }
 0x350   :  { %v719_v53 = vsel %vm332_vm11, %v6797_v7, %v675_v50  ;;  %v778_v7 = vmul.f32 %v6494_v28, %v6931_v61  ;;  %v6951_v28 = vld [vmem:[%s10193_s16] sm:$0xff] }
 0x351   :  { %5492 = vmatmul.msk.f32.gmra.mxu3 %vm482_vm3, %v734_v0  ;;  %v723_v62 = vsel %vm463_vm0, %v719_v53, %v687_v18  ;;  %v777_v0 = vmul.f32 %v6462_v5, %v6938_v17  ;;  %10275 = vst [vmem:[#allocation18_spill] sm:$0xff] %v6951_v28  ;;  %v780_v5 = vmul.f32 %v6436_v48, %v6931_v61  ;;  %v5508_v48 = vld [vmem:[%s10183_s4 + $0x1] sm:$0x1] }
 0x355   :  { %v699_v57 = vpop.permute.xlu1 %698 }
 0x356   :  { %v727_v63 = vsel %vm468_vm1, %v723_v62, %v699_v57 }
 0x357   :  { %v711_v49 = vpop.permute.xlu0 %710 }
 0x358   :  { %v731_v6 = vsel %vm473_vm2, %v727_v63, %v711_v49 }
 0x359   :  { %v735_v9 = vmul.f32 %v731_v6, %v6656_v16 }
 0x35b   :  { %5493 = vmatmul.msk.f32.gmra.mxu3 %vm482_vm3, %v735_v9  ;;  %v779_v9 = vmul.f32 %v6468_v10, %v6938_v17 }
 0x3be   :  { %v765_v22 = vpop.f32.mrf.mxu3 }
 0x3bf   :  { %v781_v53 = vadd.f32 %v777_v0, %v765_v22 }
 0x3c1   :  { %v785_v18 = vadd.f32 %v781_v53, %v6951_v28 }
 0x3c7   :  { %v768_v44 = vpop.f32.mrf.mxu3 }
 0x3c8   :  { %v782_v2 = vadd.f32 %v778_v7, %v768_v44 }
 0x3ca   :  { %v786_v50 = vadd.f32 %v782_v2, %v6943_v34 }
 0x3cc   :  { %5813 = vtanh.f32 %v786_v50  ;;  %v880_v50 = vmul.f32 %v5508_v48, %v6415_v40  ;;  %v794_v48 = vsub.f32 1.0, %v6715_v29  ;;  %v6994_v40 = vld [vmem:[%s10184_s0 + $0x18] sm:$0xff] }
 0x3cd   :  { %5815 = vtanh.f32 %v785_v18 }
 0x3d2   :  { %v5814_v57 = vpop.eup %5813 }
 0x3d3   :  { %807 = vrot.lane.b32.xlu1 %v5814_v57, %s6196_s29  ;;  %v5816_v63 = vpop.eup %5815  ;;  %v6970_v57 = vpop.permute.xlu2 %888 }
 0x3d4   :  { %v771_v62 = vpop.f32.mrf.mxu3 }
 0x3d5   :  { %v783_v7 = vadd.f32 %v779_v9, %v771_v62  ;;  %v5509_v62 = vld [vmem:[%s10183_s4 + $0x9] sm:$0x1] }
 0x3d7   :  { %v787_v44 = vadd.f32 %v783_v7, %v6951_v28 }
 0x3db   :  { %805 = vrot.lane.b32.xlu1 %v5816_v63, %s6196_s29 }
 0x3de   :  { %v774_v49 = vpop.f32.mrf.mxu3 }
 0x3df   :  { %v784_v6 = vadd.f32 %v780_v5, %v774_v49  ;;  %v881_v5 = vmul.f32 %v5509_v62, %v6409_v31 }
 0x3e1   :  { %v788_v22 = vadd.f32 %v784_v6, %v6943_v34  ;;  %v6978_v6 = vpop.permute.xlu0 %893 }
 0x3e3   :  { %5817 = vtanh.f32 %v788_v22 }
 0x3e4   :  { %5819 = vtanh.f32 %v787_v44 }
 0x3e5   :  { %5821 = vtanh.f32 %v880_v50  ;;  %v927_v50 = vpop.permute.xlu2 %926 }
 0x3e6   :  { %5823 = vtanh.f32 %v881_v5 }
 0x3e9   :  { %v5818_v2 = vpop.eup %5817 }
 0x3ea   :  { %811 = vrot.lane.b32.xlu1 %v5818_v2, %s6196_s29  ;;  %v5820_v0 = vpop.eup %5819  ;;  %v5751_v2 = vld [vmem:[%s10180_s2 + $0x1] ss:$0 sm:$0xff] }
 0x3eb   :  { %v5822_v10 = vpop.eup %5821 }
 0x3ec   :  { %v884_v53 = vmul.f32 0.5, %v5822_v10  ;;  %v5824_v7 = vpop.eup %5823 }
 0x3ed   :  { %v885_v62 = vmul.f32 0.5, %v5824_v7 }
 0x3ee   :  { %v6968_v18 = vperm.slane %v884_v53, 0  ;;  %v798_v53 = vmul.f32 %v794_v48, %v6755_v58 }
 0x3ef   :  { %v6998_v28 = vperm.slane %v885_v62, 0 }
 0x3f0   :  { %v912_v63 = vsub.f32 %v6970_v57, %v6968_v18  ;;  %v913_v22 = vsub.f32 %v6978_v6, %v6968_v18 }
 0x3f2   :  { %809 = vrot.lane.b32.xlu1 %v5820_v0, %s6196_s29  ;;  %v916_v49 = vand.u32 2147483647, %v912_v63  ;;  %v917_v0 = vand.u32 2147483647, %v913_v22  ;;  %v6996_v22 = vpop.permute.xlu0 %898 }
 0x3f4   :  { %v920_v9 = vmul.f32 %v916_v49, %v6465_v8  ;;  %v950_v49 = vmul.f32 %v5751_v2, %v927_v50  ;;  %v921_v31 = vmul.f32 %v917_v0, %v6457_v60  ;;  %v793_v0 = vsub.f32 1.0, %v6705_v52 }
 0x3f6   :  { %v954_v44 = vadd.f32 1.0, %v920_v9  ;;  %v955_v7 = vadd.f32 1.0, %v921_v31  ;;  %v797_v50 = vmul.f32 %v793_v0, %v6740_v59 }
 0x3f8   :  { %v958_v5 = vmul.f32 %v954_v44, %v6484_v20  ;;  %v959_v31 = vmul.f32 %v955_v7, %v6479_v19 }
 0x445   :  { %v808_v10 = vpop.permute.xlu1 %807 }
 0x446   :  { %v818_v63 = vmul.f32 %v808_v10, %v6715_v29  ;;  %v962_v29 = vmul.f32 %v958_v5, %v950_v49  ;;  %v932_v10 = vpop.permute.xlu2 %931  ;;  %v7017_v5 = vld [vmem:[%s10184_s0 + $0x10] sm:$0xff] }
 0x447   :  { %v951_v49 = vmul.f32 %v5751_v2, %v932_v10 }
 0x448   :  { %v822_v9 = vadd.f32 %v818_v63, %v798_v53  ;;  %v914_v53 = vsub.f32 %v6996_v22, %v6998_v28  ;;  %v966_v62 = vmul.f32 %v962_v29, %v6500_v35 }
 0x449   :  { %v963_v29 = vmul.f32 %v959_v31, %v951_v49 }
 0x44a   :  { %v7002_v58 = vsel %vm637_vm15, %v822_v9, 0.0  ;;  %v918_v9 = vand.u32 2147483647, %v914_v53  ;;  %v7029_v19 = vadd.f32 %v6489_v23, %v966_v62  ;;  %v5752_v53 = vld [vmem:[%s10180_s2 + $0x9] ss:$0 sm:$0xff] }
 0x44b   :  { %10276 = vst [vmem:[#allocation19_spill] sm:$0xff] %v7002_v58  ;;  %v975_v44 = vsel %vm327_vm8, %v6994_v40, %v7002_v58  ;;  %v967_v7 = vmul.f32 %v963_v29, %v6503_v36  ;;  %v7058_v29 = vld [vmem:[%s10184_s0 + $0x98] sm:$0xff] }
 0x44c   :  { %998 = vmatpush.msrb.mxu0 %v975_v44  ;;  %v7023_v44 = vpop.permute.xlu0 %903  ;;  %v922_v2 = vmul.f32 %v918_v9, %v6465_v8 }
 0x44d   :  { %v806_v48 = vpop.permute.xlu1 %805  ;;  %v915_v21 = vsub.f32 %v7023_v44, %v6998_v28  ;;  %v7042_v10 = vadd.f32 %v6492_v27, %v967_v7  ;;  %v795_v7 = vsub.f32 1.0, %v6724_v12 }
 0x44e   :  { %v817_v41 = vmul.f32 %v806_v48, %v6705_v52  ;;  %v956_v0 = vadd.f32 1.0, %v922_v2  ;;  %v937_v31 = vpop.permute.xlu2 %936 }
 0x44f   :  { %v919_v48 = vand.u32 2147483647, %v915_v21  ;;  %v952_v2 = vmul.f32 %v5752_v53, %v937_v31 }
 0x450   :  { %v821_v63 = vadd.f32 %v817_v41, %v797_v50  ;;  %v796_v50 = vsub.f32 1.0, %v6733_v30  ;;  %v960_v49 = vmul.f32 %v956_v0, %v6484_v20 }
 0x451   :  { %v923_v9 = vmul.f32 %v919_v48, %v6457_v60 }
 0x452   :  { %v7021_v59 = vsel %vm636_vm9, %v821_v63, 0.0  ;;  %v800_v62 = vmul.f32 %v796_v50, %v6788_v4  ;;  %v964_v4 = vmul.f32 %v960_v49, %v952_v2  ;;  %v799_v50 = vmul.f32 %v795_v7, %v6768_v46 }
 0x453   :  { %10277 = vst [vmem:[#allocation20_spill] sm:$0xff] %v7021_v59  ;;  %v974_v52 = vsel %vm327_vm8, %v7017_v5, %v7021_v59  ;;  %v957_v21 = vadd.f32 1.0, %v923_v9  ;;  %v7084_v9 = vld [vmem:[%s10184_s0 + $0x90] sm:$0xff] }
 0x454   :  { %999 = vmatpush.msrb.mxu0 %v974_v52  ;;  %v942_v0 = vpop.permute.xlu0 %941 }
 0x455   :  { %5510 = vmatmul.msk.f32.vlgmr.msrb.gmra.mxu0 %vm332_vm11, %v7029_v19  ;;  %v953_v31 = vmul.f32 %v5752_v53, %v942_v0 }
 0x456   :  { %1142 = vmatpush.msra.mxu0 %v6568_v24 }
 0x458   :  { %1143 = vmatpush.msra.mxu0 %v6574_v25 }
 0x45a   :  { %1144 = vmatpush.msra.mxu0 %v6579_v26 }
 0x45c   :  { %v812_v41 = vpop.permute.xlu1 %811  ;;  %1145 = vmatpush.msra.mxu0 %v6588_v32 }
 0x45d   :  { %v820_v63 = vmul.f32 %v812_v41, %v6733_v30  ;;  %5511 = vmatmul.msk.f32.gmra.mxu0 %vm332_vm11, %v7042_v10  ;;  %v7076_v41 = vld [vmem:[%s10186_s9 + $0x8] sm:$0xff] }
 0x45e   :  { %1146 = vmatpush.msra.mxu0 %v6593_v33 }
 0x45f   :  { %v824_v52 = vadd.f32 %v820_v63, %v800_v62  ;;  %v961_v62 = vmul.f32 %v7076_v41, %v957_v21  ;;  %v968_v63 = vmul.f32 %v964_v4, %v6500_v35 }
 0x460   :  { %1147 = vmatpush.msra.mxu0 %v6599_v37 }
 0x461   :  { %v7063_v30 = vsel %vm639_vm5, %v824_v52, 0.0  ;;  %v965_v46 = vmul.f32 %v961_v62, %v953_v31  ;;  %v972_v52 = vadd.f32 %v6489_v23, %v968_v63  ;;  %v6066_v62 = vld [vmem:[%s10187_s11 + $0x48] sm:$0xff] }
 0x462   :  { %10278 = vst [vmem:[#allocation21_spill] sm:$0xff] %v7063_v30  ;;  %v977_v20 = vsel %vm327_vm8, %v7058_v29, %v7063_v30  ;;  %1148 = vmatpush.msra.mxu0 %v6605_v38 }
 0x463   :  { %1027 = vmatpush.msrb.mxu1 %v977_v20  ;;  %v969_v47 = vmul.f32 %v965_v46, %v6503_v36  ;;  %v10285_v20 = vld [vmem:[#allocation16_spill] sm:$0xff] }
 0x464   :  { %v810_v48 = vpop.permute.xlu1 %809  ;;  %1149 = vmatpush.msra.mxu0 %v6613_v42  ;;  %vm1256_vm7 = vcmp.ne.f32.partialorder %v10285_v20, 0.0 }
 0x465   :  { %v819_v13 = vmul.f32 %v810_v48, %v6724_v12 }
 0x466   :  { %1150 = vmatpush.msra.mxu0 %v6619_v43 }
 0x467   :  { %v823_v49 = vadd.f32 %v819_v13, %v799_v50 }
 0x468   :  { %1151 = vmatpush.msra.mxu0 %v6624_v45 }
 0x469   :  { %v7089_v12 = vsel %vm638_vm10, %v823_v49, 0.0  ;;  %v6067_v49 = vld [vmem:[%s10187_s11 + $0x40] sm:$0xff] }
 0x46a   :  { %10279 = vst [vmem:[#allocation22_spill] sm:$0xff] %v7089_v12  ;;  %1799 = vmatpush.msrb.mxu0 %v6568_v24  ;;  %v976_v53 = vsel %vm327_vm8, %v7084_v9, %v7089_v12  ;;  %v973_v24 = vadd.f32 %v6492_v27, %v969_v47  ;;  %v6069_v47 = vld [vmem:[%s10187_s11 + $0x30] sm:$0xff] }
 0x46b   :  { %1028 = vmatpush.msrb.mxu1 %v976_v53 }
 0x46c   :  { %1800 = vmatpush.msrb.mxu0 %v6574_v25  ;;  %5512 = vmatmul.msk.f32.vlgmr.msrb.gmra.mxu1 %vm332_vm11, %v972_v52  ;;  %v10280_v25 = vld [vmem:[#allocation17_spill] sm:$0xff] }
 0x46d   :  { %1411 = vmatpush.msra.mxu1 %v6843_v39 }
 0x46e   :  { %1801 = vmatpush.msrb.mxu0 %v6579_v26 }
 0x46f   :  { %1412 = vmatpush.msra.mxu1 %v6848_v54 }
 0x470   :  { %1802 = vmatpush.msrb.mxu0 %v6588_v32 }
 0x471   :  { %1413 = vmatpush.msra.mxu1 %v6854_v15 }
 0x472   :  { %1803 = vmatpush.msrb.mxu0 %v6593_v33 }
 0x473   :  { %1414 = vmatpush.msra.mxu1 %v6861_v55 }
 0x474   :  { %1804 = vmatpush.msrb.mxu0 %v6599_v37  ;;  %5513 = vmatmul.msk.f32.gmra.mxu1 %vm332_vm11, %v973_v24 }
 0x475   :  { %1415 = vmatpush.msra.mxu1 %v6867_v56 }
 0x476   :  { %1805 = vmatpush.msrb.mxu0 %v6605_v38  ;;  %v1036_v38 = vmul.f32 %v7029_v19, %v6968_v18 }
 0x477   :  { %1416 = vmatpush.msra.mxu1 %v6873_v1 }
 0x478   :  { %1806 = vmatpush.msrb.mxu0 %v6613_v42  ;;  %v1040_v42 = vsel %vm332_vm11, %v1036_v38, 0.0  ;;  %v6071_v38 = vld [vmem:[%s10187_s11 + $0x20] sm:$0xff] }
 0x479   :  { %1417 = vmatpush.msra.mxu1 %v6878_v11 }
 0x47a   :  { %1807 = vmatpush.msrb.mxu0 %v6619_v43  ;;  %v1037_v43 = vmul.f32 %v7042_v10, %v6968_v18  ;;  %v10284_v18 = vld [vmem:[#allocation15_spill] sm:$0xff] }
 0x47b   :  { %1418 = vmatpush.msra.mxu1 %v6885_v51  ;;  %vm1255_vm6 = vcmp.ne.f32.partialorder %v10284_v18, 0.0 }
 0x47c   :  { %1808 = vmatpush.msrb.mxu0 %v6624_v45  ;;  %v1038_v45 = vmul.f32 %v972_v52, %v6998_v28 }
 0x47d   :  { %1419 = vmatpush.msra.mxu1 %v6891_v14 }
 0x47f   :  { %1420 = vmatpush.msra.mxu1 %v10280_v25 }
 0x481   :  { %2068 = vmatpush.msrb.mxu1 %v6843_v39  ;;  %v1039_v39 = vmul.f32 %v973_v24, %v6998_v28  ;;  %v6070_v24 = vld [vmem:[%s10187_s11 + $0x28] sm:$0xff] }
 0x483   :  { %2069 = vmatpush.msrb.mxu1 %v6848_v54  ;;  %v1043_v54 = vsel %vm332_vm11, %v1037_v43, 0.0 }
 0x485   :  { %2070 = vmatpush.msrb.mxu1 %v6854_v15  ;;  %v1046_v15 = vsel %vm332_vm11, %v1038_v45, 0.0  ;;  %v6072_v45 = vld [vmem:[%s10187_s11 + $0x18] sm:$0xff] }
 0x487   :  { %2071 = vmatpush.msrb.mxu1 %v6861_v55  ;;  %v1049_v55 = vsel %vm332_vm11, %v1039_v39, 0.0  ;;  %v6073_v39 = vld [vmem:[%s10187_s11 + $0x10] sm:$0xff] }
 0x489   :  { %2072 = vmatpush.msrb.mxu1 %v6867_v56  ;;  %v10281_v56 = vld [vmem:[#allocation13_spill] sm:$0xff] }
 0x48a   :  { %vm1253_vm9 = vcmp.ne.f32.partialorder %v10281_v56, 0.0  ;;  %v6075_v56 = vld [vmem:[%s10187_s11] sm:$0xff] }
 0x48b   :  { %2073 = vmatpush.msrb.mxu1 %v6873_v1  ;;  %v10282_v1 = vmov 0  }
 0x48c   :  { %v1279_v2 = vsel %vm1255_vm6, 1, %v10282_v1  ;;  %v1280_v50 = vsel %vm1256_vm7, 1, %v10282_v1 }
 0x48d   :  { %2074 = vmatpush.msrb.mxu1 %v6878_v11  ;;  %v1277_v11 = vsel %vm1253_vm9, 1, %v10282_v1 }
 0x48f   :  { %2075 = vmatpush.msrb.mxu1 %v6885_v51  ;;  %v10283_v51 = vld [vmem:[#allocation14_spill] sm:$0xff] }
 0x490   :  { %vm1254_vm15 = vcmp.ne.f32.partialorder %v10283_v51, 0.0 }
 0x491   :  { %2076 = vmatpush.msrb.mxu1 %v6891_v14  ;;  %v1278_v28 = vsel %vm1254_vm15, 1, %v10282_v1 }
 0x493   :  { %2077 = vmatpush.msrb.mxu1 %v10280_v25 }
 0x4d2   :  { %v1001_v26 = vpop.f32.mrf.mxu0 }
 0x4d3   :  { %1080 = vrot.lane.b32.xlu0 %v1001_v26, %s6192_s19  ;;  %1056 = vrot.lane.b32.xlu2 %v1001_v26, %s6194_s20 }
 0x4d4   :  { %1068 = vrot.lane.b32.xlu1 %v1001_v26, %s6193_s5 }
 0x4da   :  { %v1004_v32 = vpop.f32.mrf.mxu0 }
 0x4db   :  { %1092 = vrot.lane.b32.xlu2 %v1001_v26, %s6195_s21  ;;  %1070 = vrot.lane.b32.xlu0 %v1004_v32, %s6193_s5 }
 0x4dc   :  { %1058 = vrot.lane.b32.xlu1 %v1004_v32, %s6194_s20 }
 0x4e3   :  { %1082 = vrot.lane.b32.xlu2 %v1004_v32, %s6192_s19 }
 0x4e4   :  { %1094 = vrot.lane.b32.xlu1 %v1004_v32, %s6195_s21 }
 0x4e9   :  { %v7137_v33 = vpop.f32.mrf.mxu1 }
 0x4ea   :  { %1060 = vrot.lane.b32.xlu0 %v7137_v33, %s6194_s20 }
 0x4eb   :  { %1072 = vrot.lane.b32.xlu2 %v7137_v33, %s6193_s5 }
 0x4ec   :  { %1084 = vrot.lane.b32.xlu1 %v7137_v33, %s6192_s19 }
 0x4f1   :  { %v7145_v37 = vpop.f32.mrf.mxu1 }
 0x4f2   :  { %1096 = vrot.lane.b32.xlu0 %v7137_v33, %s6195_s21 }
 0x4f3   :  { %1062 = vrot.lane.b32.xlu2 %v7145_v37, %s6194_s20 }
 0x4f4   :  { %1074 = vrot.lane.b32.xlu1 %v7145_v37, %s6193_s5 }
 0x4fa   :  { %1086 = vrot.lane.b32.xlu0 %v7145_v37, %s6192_s19 }
 0x4fb   :  { %1098 = vrot.lane.b32.xlu2 %v7145_v37, %s6195_s21 }
 0x51e   :  { %1041 = vadd.xlane.f32.xlu1 %v1040_v42 }
 0x524   :  { %1044 = vadd.xlane.f32.xlu0 %v1043_v54  ;;  %1047 = vadd.xlane.f32.xlu2 %v1046_v15  ;;  %v6074_v15 = vld [vmem:[%s10187_s11 + $0x8] sm:$0xff] }
 0x526   :  { %1050 = vadd.xlane.f32.xlu1 %v1049_v55 }
 0x52d   :  { %v1057_v14 = vpop.permute.xlu2 %1056 }
 0x52e   :  { %v1104_v4 = vsel %vm332_vm11, %v1001_v26, %v1057_v14 }
 0x535   :  { %v1093_v19 = vpop.permute.xlu2 %1092 }
 0x538   :  { %1261 = vrot.lane.b32.xlu0 %v7021_v59, %s6197_s25 }
 0x53c   :  { %1282 = vperm.xlu2 %5748, %v1277_v11  }
 0x53d   :  { %v1083_v63 = vpop.permute.xlu2 %1082 }
 0x53f   :  { %1263 = vrot.lane.b32.xlu1 %v7002_v58, %s6197_s25 }
 0x540   :  { %1285 = vperm.xlu0 %5746, %v1278_v28  }
 0x544   :  { %1265 = vrot.lane.b32.xlu2 %v7089_v12, %s6197_s25 }
 0x545   :  { %v1081_v10 = vpop.permute.xlu0 %1080  ;;  %v1073_v43 = vpop.permute.xlu2 %1072 }
 0x546   :  { %v1069_v21 = vpop.permute.xlu1 %1068 }
 0x547   :  { %v1108_v7 = vsel %vm463_vm0, %v1104_v4, %v1069_v21  ;;  %1267 = vrot.lane.b32.xlu1 %v7063_v30, %s6197_s25 }
 0x548   :  { %v1112_v0 = vsel %vm468_vm1, %v1108_v7, %v1081_v10  ;;  %1288 = vperm.xlu0 %5746, %v1279_v2  }
 0x549   :  { %v1116_v48 = vsel %vm473_vm2, %v1112_v0, %v1093_v19  ;;  %v7233_v19 = vld [vmem:[%s10188_s8] sm:$0xff] }
 0x54a   :  { %v1120_v13 = vmul.f32 %v1116_v48, %v6644_v3  ;;  %v6068_v3 = vld [vmem:[%s10187_s11 + $0x38] sm:$0xff]  ;;  %v7245_v48 = vld [vmem:[%s10188_s8 + $0x8] sm:$0xff] }
 0x54c   :  { %5514 = vmatmul.msk.f32.vlgmr.msra.gmra.mxu0 %vm482_vm3, %v1120_v13  ;;  %1291 = vperm.xlu2 %5748, %v1280_v50  }
 0x54d   :  { %2456 = vmatpush.msra.mxu0 %v6066_v62  ;;  %v1071_v53 = vpop.permute.xlu0 %1070  ;;  %v1063_v51 = vpop.permute.xlu2 %1062  ;;  %v10286_v62 = vld [vmem:[#allocation9_spill] sm:$0xff] }
 0x54e   :  { %v1059_v31 = vpop.permute.xlu1 %1058  ;;  %v1107_v2 = vsel %vm332_vm11, %v7145_v37, %v1063_v51 }
 0x54f   :  { %2457 = vmatpush.msra.mxu0 %v6067_v49  ;;  %v1105_v46 = vsel %vm332_vm11, %v1004_v32, %v1059_v31  ;;  %v10287_v49 = vld [vmem:[#allocation10_spill] sm:$0xff] }
 0x550   :  { %v1109_v52 = vsel %vm463_vm0, %v1105_v46, %v1071_v53 }
 0x551   :  { %2458 = vmatpush.msra.mxu0 %v6068_v3  ;;  %v1113_v26 = vsel %vm468_vm1, %v1109_v52, %v1083_v63 }
 0x553   :  { %2459 = vmatpush.msra.mxu0 %v6069_v47  ;;  %v10288_v47 = vld [vmem:[#allocation11_spill] sm:$0xff] }
 0x555   :  { %2460 = vmatpush.msra.mxu0 %v6070_v24  ;;  %v1099_v20 = vpop.permute.xlu2 %1098 }
 0x556   :  { %v1095_v25 = vpop.permute.xlu1 %1094 }
 0x557   :  { %v1117_v32 = vsel %vm473_vm2, %v1113_v26, %v1095_v25  ;;  %2461 = vmatpush.msra.mxu0 %v6071_v38  ;;  %v10289_v38 = vld [vmem:[#allocation12_spill] sm:$0xff] }
 0x558   :  { %v1121_v42 = vmul.f32 %v1117_v32, %v6656_v16 }
 0x559   :  { %2462 = vmatpush.msra.mxu0 %v6072_v45 }
 0x55a   :  { %5515 = vmatmul.msk.f32.gmra.mxu0 %vm482_vm3, %v1121_v42 }
 0x55b   :  { %2463 = vmatpush.msra.mxu0 %v6073_v39 }
 0x55c   :  { %v1061_v54 = vpop.permute.xlu0 %1060 }
 0x55d   :  { %2464 = vmatpush.msra.mxu0 %v6074_v15  ;;  %v1106_v16 = vsel %vm332_vm11, %v7137_v33, %v1061_v54 }
 0x55e   :  { %v1085_v55 = vpop.permute.xlu1 %1084  ;;  %v1110_v11 = vsel %vm463_vm0, %v1106_v16, %v1073_v43 }
 0x55f   :  { %2465 = vmatpush.msra.mxu0 %v6075_v56  ;;  %v1114_v14 = vsel %vm468_vm1, %v1110_v11, %v1085_v55  ;;  %v7256_v56 = vld [vmem:[%s10189_s13] sm:$0xff] }
 0x564   :  { %v1097_v28 = vpop.permute.xlu0 %1096 }
 0x565   :  { %v1118_v18 = vsel %vm473_vm2, %v1114_v14, %v1097_v28 }
 0x566   :  { %v1122_v33 = vmul.f32 %v7233_v19, %v1118_v18  ;;  %v1075_v10 = vpop.permute.xlu1 %1074 }
 0x567   :  { %v1111_v4 = vsel %vm463_vm0, %v1107_v2, %v1075_v10 }
 0x568   :  { %5516 = vmatmul.msk.f32.gmra.mxu0 %vm482_vm3, %v1122_v33 }
 0x56c   :  { %v1087_v21 = vpop.permute.xlu0 %1086 }
 0x56d   :  { %v1115_v7 = vsel %vm468_vm1, %v1111_v4, %v1087_v21  ;;  %v7264_v21 = vld [vmem:[%s10190_s15] sm:$0xff] }
 0x56e   :  { %v1119_v0 = vsel %vm473_vm2, %v1115_v7, %v1099_v20 }
 0x56f   :  { %v1123_v50 = vmul.f32 %v7245_v48, %v1119_v0 }
 0x571   :  { %5517 = vmatmul.msk.f32.gmra.mxu0 %vm482_vm3, %v1123_v50 }
 0x591   :  { %v1042_v13 = vpop.xlane.xlu1 %1041 }
 0x592   :  { %v1165_v37 = vmul.f32 %v1042_v13, %v10286_v62 }
 0x597   :  { %v1045_v3 = vpop.xlane.xlu0 %1044  ;;  %v1048_v45 = vpop.xlane.xlu2 %1047 }
 0x598   :  { %v1166_v24 = vmul.f32 %v1045_v3, %v10288_v47  ;;  %v1167_v11 = vmul.f32 %v7256_v56, %v1048_v45 }
 0x599   :  { %v1051_v13 = vpop.xlane.xlu1 %1050 }
 0x59f   :  { %v7259_v4 = vpop.permute.xlu2 %1282 }
 0x5a0   :  { %vm1293_vm4 = vcmp.eq.s32.totalorder %v7259_v4, 1 }
 0x5aa   :  { %v1262_v0 = vpop.permute.xlu0 %1261 }
 0x5c9   :  { %v1153_v31 = vpop.f32.mrf.mxu0 }
 0x5ca   :  { %v1169_v63 = vadd.f32 %v1165_v37, %v1153_v31 }
 0x5cc   :  { %v1173_v46 = vadd.f32 %v1169_v63, %v10287_v49  ;;  %v7276_v49 = vld [vmem:[%s10189_s13 + $0x8] sm:$0xff] }
 0x5ce   :  { %v5518_v53 = vmul.f32 -1.442695, %v1173_v46  ;;  %v1168_v46 = vmul.f32 %v7276_v49, %v1051_v13 }
 0x5d0   :  { %5825 = vpow2.f32 %v5518_v53 }
 0x5d6   :  { %v5826_v52 = vpop.eup %5825 }
 0x5d7   :  { %v1189_v25 = vadd.f32 1.0, %v5826_v52  ;;  %v1156_v26 = vpop.f32.mrf.mxu0 }
 0x5d8   :  { %v1170_v32 = vadd.f32 %v1166_v24, %v1156_v26  ;;  %v7283_v24 = vld [vmem:[%s10190_s15 + $0x8] sm:$0xff] }
 0x5d9   :  { %5827 = vrcp.f32 %v1189_v25  ;;  %v1204_v16 = vand.u32 2147483648, %v1189_v25  ;;  %v1202_v14 = vand.u32 2147483647, %v1189_v25  ;;  %vm1198_vm12 = vweird.f32 %v1189_v25 }
 0x5da   :  { %v1174_v42 = vadd.f32 %v1170_v32, %v10289_v38 }
 0x5db   :  { %v1205_v2 = vor.u32 1.1754944e-38, %v1204_v16  ;;  %vm1203_vm14 = vcmp.eq.f32.partialorder %v1202_v14, 8.507059e+37 }
 0x5dc   :  { %v5519_v43 = vmul.f32 -1.442695, %v1174_v42 }
 0x5de   :  { %5829 = vpow2.f32 %v5519_v43 }
 0x5df   :  { %v5828_v39 = vpop.eup %5827 }
 0x5e0   :  { %v1194_v54 = vmul.f32 %v5828_v39, %v1189_v25  ;;  %vm1199_vm10 = vweird.f32 %v5828_v39 }
 0x5e1   :  { %vm1200_vm13 = vmor %vm1198_vm12, %vm1199_vm10 }
 0x5e2   :  { %v1195_v15 = vsub.f32 1.0, %v1194_v54 }
 0x5e4   :  { %v5830_v55 = vpop.eup %5829  ;;  %v1196_v51 = vmul.f32 %v5828_v39, %v1195_v15  ;;  %v7286_v15 = vpop.permute.xlu0 %1285 }
 0x5e5   :  { %v1190_v28 = vadd.f32 1.0, %v5830_v55  ;;  %v1159_v18 = vpop.f32.mrf.mxu0  ;;  %v1264_v55 = vpop.permute.xlu1 %1263  ;;  %vm1294_vm7 = vcmp.eq.s32.totalorder %v7286_v15, 1 }
 0x5e6   :  { %v1171_v33 = vadd.f32 %v1167_v11, %v1159_v18  ;;  %v1197_v10 = vadd.f32 %v5828_v39, %v1196_v51 }
 0x5e7   :  { %5831 = vrcp.f32 %v1190_v28  ;;  %v1219_v26 = vand.u32 2147483648, %v1190_v28  ;;  %v1217_v42 = vand.u32 2147483647, %v1190_v28  ;;  %vm1213_vm9 = vweird.f32 %v1190_v28 }
 0x5e8   :  { %v1175_v20 = vadd.f32 %v7264_v21, %v1171_v33  ;;  %v1201_v7 = vsel %vm1200_vm13, %v5828_v39, %v1197_v10 }
 0x5e9   :  { %v7267_v50 = vsel %vm1203_vm14, %v1205_v2, %v1201_v7  ;;  %v1220_v54 = vor.u32 1.1754944e-38, %v1219_v26  ;;  %vm1218_vm6 = vcmp.eq.f32.partialorder %v1217_v42, 8.507059e+37 }
 0x5ea   :  { %v5520_v62 = vmul.f32 -1.442695, %v1175_v20  ;;  %v1273_v37 = vmul.f32 %v1262_v0, %v7267_v50 }
 0x5ec   :  { %5833 = vpow2.f32 %v5520_v62  ;;  %v1297_v31 = vsel %vm1293_vm4, %v1273_v37, %v1262_v0  ;;  %v1266_v37 = vpop.permute.xlu2 %1265 }
 0x5ed   :  { %v5832_v63 = vpop.eup %5831  ;;  %1305 = vrot.lane.b32.xlu0 %v1297_v31, %s6196_s29  ;;  %v7295_v31 = vpop.permute.xlu0 %1288 }
 0x5ee   :  { %v1209_v53 = vmul.f32 %v5832_v63, %v1190_v28  ;;  %v1162_v3 = vpop.f32.mrf.mxu0  ;;  %vm1214_vm5 = vweird.f32 %v5832_v63 }
 0x5ef   :  { %v1172_v52 = vadd.f32 %v1168_v46, %v1162_v3  ;;  %vm1215_vm15 = vmor %vm1213_vm9, %vm1214_vm5  ;;  %vm1295_vm5 = vcmp.eq.s32.totalorder %v7295_v31, 1 }
 0x5f0   :  { %v1210_v47 = vsub.f32 1.0, %v1209_v53 }
 0x5f1   :  { %v1176_v25 = vadd.f32 %v7283_v24, %v1172_v52 }
 0x5f2   :  { %v5834_v32 = vpop.eup %5833  ;;  %v1211_v38 = vmul.f32 %v5832_v63, %v1210_v47 }
 0x5f3   :  { %v1191_v43 = vadd.f32 1.0, %v5834_v32  ;;  %v5521_v45 = vmul.f32 -1.442695, %v1176_v25 }
 0x5f4   :  { %v1212_v39 = vadd.f32 %v5832_v63, %v1211_v38 }
 0x5f5   :  { %5835 = vrcp.f32 %v1191_v43  ;;  %v1234_v20 = vand.u32 2147483648, %v1191_v43  ;;  %v1232_v0 = vand.u32 2147483647, %v1191_v43  ;;  %vm1228_vm12 = vweird.f32 %v1191_v43 }
 0x5f6   :  { %5837 = vpow2.f32 %v5521_v45  ;;  %v1216_v16 = vsel %vm1215_vm15, %v5832_v63, %v1212_v39  ;;  %v7304_v45 = vpop.permute.xlu2 %1291 }
 0x5f7   :  { %v7288_v11 = vsel %vm1218_vm6, %v1220_v54, %v1216_v16  ;;  %v1235_v62 = vor.u32 1.1754944e-38, %v1234_v20  ;;  %vm1233_vm14 = vcmp.eq.f32.partialorder %v1232_v0, 8.507059e+37  ;;  %v1268_v54 = vpop.permute.xlu1 %1267 }
 0x5f8   :  { %v1274_v51 = vmul.f32 %v1264_v55, %v7288_v11 }
 0x5fa   :  { %v1298_v14 = vsel %vm1294_vm7, %v1274_v51, %v1264_v55 }
 0x5fb   :  { %v5836_v18 = vpop.eup %5835  ;;  %1307 = vrot.lane.b32.xlu1 %v1298_v14, %s6196_s29 }
 0x5fc   :  { %v5838_v28 = vpop.eup %5837  ;;  %v1224_v33 = vmul.f32 %v5836_v18, %v1191_v43  ;;  %vm1229_vm10 = vweird.f32 %v5836_v18 }
 0x5fd   :  { %v1192_v10 = vadd.f32 1.0, %v5838_v28  ;;  %vm1230_vm13 = vmor %vm1228_vm12, %vm1229_vm10  ;;  %vm1296_vm12 = vcmp.eq.s32.totalorder %v7304_v45, 1 }
 0x5fe   :  { %v1225_v2 = vsub.f32 1.0, %v1224_v33 }
 0x5ff   :  { %5839 = vrcp.f32 %v1192_v10  ;;  %v1249_v26 = vand.u32 2147483648, %v1192_v10  ;;  %v1247_v38 = vand.u32 2147483647, %v1192_v10  ;;  %vm1243_vm15 = vweird.f32 %v1192_v10 }
 0x600   :  { %v1226_v7 = vmul.f32 %v5836_v18, %v1225_v2  ;;  %v10290_v2 = vld [vmem:[#allocation2_spill] sm:$0xff] }
 0x601   :  { %v1250_v43 = vor.u32 1.1754944e-38, %v1249_v26  ;;  %vm1248_vm10 = vcmp.eq.f32.partialorder %v1247_v38, 8.507059e+37  ;;  %v5539_v26 = vld [vmem:[%s10181_s3 + $0xa8] sm:$0xff] }
 0x602   :  { %v1227_v13 = vadd.f32 %v5836_v18, %v1226_v7 }
 0x604   :  { %v1231_v63 = vsel %vm1230_vm13, %v5836_v18, %v1227_v13  ;;  %v10291_v13 = vld [vmem:[#allocation4_spill] sm:$0xff] }
 0x605   :  { %v5840_v46 = vpop.eup %5839  ;;  %v7297_v53 = vsel %vm1233_vm14, %v1235_v62, %v1231_v63 }
 0x606   :  { %v1239_v3 = vmul.f32 %v5840_v46, %v1192_v10  ;;  %v1275_v52 = vmul.f32 %v1266_v37, %v7297_v53  ;;  %vm1244_vm9 = vweird.f32 %v5840_v46 }
 0x607   :  { %vm1245_vm6 = vmor %vm1243_vm15, %vm1244_vm9 }
 0x608   :  { %v1240_v47 = vsub.f32 1.0, %v1239_v3  ;;  %v1299_v25 = vsel %vm1295_vm5, %v1275_v52, %v1266_v37 }
 0x609   :  { %1309 = vrot.lane.b32.xlu2 %v1299_v25, %s6196_s29 }
 0x60a   :  { %v1241_v32 = vmul.f32 %v5840_v46, %v1240_v47  ;;  %v7376_v47 = vld [vmem:[%s10245_s26 + $0x20] sm:$0xff] }
 0x60c   :  { %v1242_v42 = vadd.f32 %v5840_v46, %v1241_v32  ;;  %v10293_v32 = vld [vmem:[#allocation5_spill] sm:$0xff] }
 0x60d   :  { %v1528_v38 = vmul.f32 %v5539_v26, %v10293_v32 }
 0x60e   :  { %v1246_v39 = vsel %vm1245_vm6, %v5840_v46, %v1242_v42  ;;  %v5538_v46 = vld [vmem:[%s10181_s3 + $0xa0] sm:$0xff] }
 0x60f   :  { %v7306_v16 = vsel %vm1248_vm10, %v1250_v43, %v1246_v39  ;;  %v7386_v43 = vld [vmem:[%s10245_s26 + $0x28] sm:$0xff] }
 0x610   :  { %v1276_v55 = vmul.f32 %v1268_v54, %v7306_v16  ;;  %vm1911_vm13 = vcmp.ne.f32.partialorder %v7386_v43, 0.0 }
 0x612   :  { %v1300_v51 = vsel %vm1296_vm12, %v1276_v55, %v1268_v54  ;;  %v7392_v55 = vld [vmem:[%s10245_s26 + $0xa0] sm:$0xff] }
 0x613   :  { %1311 = vrot.lane.b32.xlu0 %v1300_v51, %s6196_s29 }
 0x65f   :  { %v7313_v14 = vpop.permute.xlu0 %1305 }
 0x660   :  { %v1317_v18 = vsel %vm327_vm8, %v7017_v5, %v7313_v14 }
 0x661   :  { %1349 = vrot.lane.b32.xlu0 %v1317_v18, %s6192_s19  ;;  %1337 = vrot.lane.b32.xlu2 %v1317_v18, %s6193_s5 }
 0x662   :  { %1325 = vrot.lane.b32.xlu1 %v1317_v18, %s6194_s20 }
 0x663   :  { %v7330_v5 = vpop.permute.xlu2 %1309 }
 0x664   :  { %v7335_v10 = vsel %vm327_vm8, %v7084_v9, %v7330_v5  ;;  %v5537_v9 = vld [vmem:[%s10181_s3 + $0x28] sm:$0xff] }
 0x665   :  { %v1526_v62 = vmul.f32 %v5537_v9, %v10291_v13 }
 0x66a   :  { %1361 = vrot.lane.b32.xlu1 %v1317_v18, %s6195_s21 }
 0x66d   :  { %v7322_v28 = vpop.permute.xlu1 %1307 }
 0x66e   :  { %v1318_v33 = vsel %vm327_vm8, %v6994_v40, %v7322_v28  ;;  %v5536_v40 = vld [vmem:[%s10181_s3 + $0x20] sm:$0xff] }
 0x66f   :  { %1339 = vrot.lane.b32.xlu0 %v1318_v33, %s6193_s5  ;;  %1327 = vrot.lane.b32.xlu2 %v1318_v33, %s6194_s20  ;;  %v1525_v20 = vmul.f32 %v5536_v40, %v10290_v2  ;;  %v7398_v40 = vld [vmem:[%s10245_s26 + $0xa8] sm:$0xff] }
 0x670   :  { %vm1913_vm14 = vcmp.ne.f32.partialorder %v7398_v40, 0.0 }
 0x671   :  { %5841 = vtanh.f32 %v1525_v20 }
 0x672   :  { %1351 = vrot.lane.b32.xlu1 %v1318_v33, %s6192_s19  ;;  %5843 = vtanh.f32 %v1526_v62 }
 0x677   :  { %1329 = vrot.lane.b32.xlu0 %v7335_v10, %s6194_s20  ;;  %1363 = vrot.lane.b32.xlu2 %v1318_v33, %s6195_s21  ;;  %v5842_v37 = vpop.eup %5841 }
 0x678   :  { %v1533_v63 = vmul.f32 0.5, %v5842_v37  ;;  %v5844_v52 = vpop.eup %5843 }
 0x679   :  { %v1534_v25 = vmul.f32 0.5, %v5844_v52 }
 0x67a   :  { %1341 = vrot.lane.b32.xlu1 %v7335_v10, %s6193_s5 }
 0x67f   :  { %1365 = vrot.lane.b32.xlu0 %v7335_v10, %s6195_s21  ;;  %1353 = vrot.lane.b32.xlu2 %v7335_v10, %s6192_s19 }
 0x685   :  { %v7353_v7 = vpop.permute.xlu0 %1311 }
 0x686   :  { %v7358_v0 = vsel %vm327_vm8, %v7058_v29, %v7353_v7  ;;  %v10292_v29 = vld [vmem:[#allocation3_spill] sm:$0xff] }
 0x687   :  { %1355 = vrot.lane.b32.xlu0 %v7358_v0, %s6192_s19  ;;  %1343 = vrot.lane.b32.xlu2 %v7358_v0, %s6193_s5  ;;  %v1527_v3 = vmul.f32 %v5538_v46, %v10292_v29 }
 0x688   :  { %1331 = vrot.lane.b32.xlu1 %v7358_v0, %s6194_s20 }
 0x689   :  { %5845 = vtanh.f32 %v1527_v3 }
 0x68a   :  { %5847 = vtanh.f32 %v1528_v38 }
 0x68f   :  { %1545 = vperm.xlu2 %5748, %v1533_v63   ;;  %v5846_v42 = vpop.eup %5845 }
 0x690   :  { %1367 = vrot.lane.b32.xlu1 %v7358_v0, %s6195_s21  ;;  %v1535_v39 = vmul.f32 0.5, %v5846_v42  ;;  %v5848_v54 = vpop.eup %5847 }
 0x691   :  { %v1536_v51 = vmul.f32 0.5, %v5848_v54  ;;  %v6083_v54 = vld [vmem:[%s10191_s12 + $0x40] sm:$0xff] }
 0x697   :  { %1583 = vperm.xlu2 %5748, %v7376_v47  }
 0x698   :  { %1550 = vperm.xlu1 %5747, %v1534_v25  }
 0x69f   :  { %1588 = vperm.xlu2 %5748, %v7386_v43  }
 0x6a0   :  { %1555 = vperm.xlu1 %5747, %v1535_v39  }
 0x6a7   :  { %1593 = vperm.xlu2 %5748, %v7392_v55  }
 0x6a8   :  { %1560 = vperm.xlu1 %5747, %v1536_v51  }
 0x6b0   :  { %1598 = vperm.xlu1 %5747, %v7398_v40  }
 0x6bb   :  { %v1338_v20 = vpop.permute.xlu2 %1337 }
 0x6c9   :  { %v1328_v46 = vpop.permute.xlu2 %1327 }
 0x6ca   :  { %v1374_v38 = vsel %vm332_vm11, %v1318_v33, %v1328_v46  ;;  %v6084_v33 = vld [vmem:[%s10191_s12 + $0x38] sm:$0xff] }
 0x6d3   :  { %v1350_v63 = vpop.permute.xlu0 %1349 }
 0x6d4   :  { %v1326_v9 = vpop.permute.xlu1 %1325 }
 0x6d5   :  { %v1373_v62 = vsel %vm332_vm11, %v1317_v18, %v1326_v9  ;;  %v6082_v18 = vld [vmem:[%s10191_s12 + $0x48] sm:$0xff] }
 0x6d6   :  { %v1377_v37 = vsel %vm463_vm0, %v1373_v62, %v1338_v20  ;;  %v1364_v20 = vpop.permute.xlu2 %1363 }
 0x6d7   :  { %v1381_v3 = vsel %vm468_vm1, %v1377_v37, %v1350_v63  ;;  %v6085_v63 = vld [vmem:[%s10191_s12 + $0x30] sm:$0xff] }
 0x6dc   :  { %v1362_v52 = vpop.permute.xlu1 %1361 }
 0x6dd   :  { %v1385_v25 = vsel %vm473_vm2, %v1381_v3, %v1362_v52  ;;  %v6086_v3 = vld [vmem:[%s10191_s12 + $0x28] sm:$0xff] }
 0x6de   :  { %v1389_v26 = vmul.f32 %v7233_v19, %v1385_v25 }
 0x6e0   :  { %5522 = vmatmul.msk.f32.vlgmr.msra.gmra.mxu1 %vm482_vm3, %v1389_v26  ;;  %v6087_v26 = vld [vmem:[%s10191_s12 + $0x20] sm:$0xff] }
 0x6e1   :  { %v1340_v42 = vpop.permute.xlu0 %1339  ;;  %2725 = vmatpush.msra.mxu1 %v6082_v18  ;;  %v1354_v18 = vpop.permute.xlu2 %1353 }
 0x6e2   :  { %v1378_v39 = vsel %vm463_vm0, %v1374_v38, %v1340_v42  ;;  %v6088_v42 = vld [vmem:[%s10191_s12 + $0x18] sm:$0xff] }
 0x6e3   :  { %2726 = vmatpush.msra.mxu1 %v6083_v54 }
 0x6e4   :  { %v1352_v51 = vpop.permute.xlu1 %1351 }
 0x6e5   :  { %v1382_v9 = vsel %vm468_vm1, %v1378_v39, %v1352_v51  ;;  %2727 = vmatpush.msra.mxu1 %v6084_v33  ;;  %v6089_v39 = vld [vmem:[%s10191_s12 + $0x10] sm:$0xff]  ;;  %v6091_v33 = vld [vmem:[%s10191_s12] sm:$0xff] }
 0x6e6   :  { %v1386_v62 = vsel %vm473_vm2, %v1382_v9, %v1364_v20  ;;  %v6090_v20 = vld [vmem:[%s10191_s12 + $0x8] sm:$0xff] }
 0x6e7   :  { %v1390_v37 = vmul.f32 %v7245_v48, %v1386_v62  ;;  %2728 = vmatpush.msra.mxu1 %v6085_v63 }
 0x6e9   :  { %5523 = vmatmul.msk.f32.gmra.mxu1 %vm482_vm3, %v1390_v37  ;;  %v1330_v46 = vpop.permute.xlu0 %1329  ;;  %v1344_v63 = vpop.permute.xlu2 %1343 }
 0x6ea   :  { %2729 = vmatpush.msra.mxu1 %v6086_v3  ;;  %v1375_v52 = vsel %vm332_vm11, %v7335_v10, %v1330_v46 }
 0x6ec   :  { %v1342_v25 = vpop.permute.xlu1 %1341  ;;  %2730 = vmatpush.msra.mxu1 %v6087_v26 }
 0x6ed   :  { %v1379_v38 = vsel %vm463_vm0, %v1375_v52, %v1342_v25 }
 0x6ee   :  { %2731 = vmatpush.msra.mxu1 %v6088_v42  ;;  %v1383_v10 = vsel %vm468_vm1, %v1379_v38, %v1354_v18  ;;  %v1435_v18 = vmul.f32 %v6978_v6, %v6931_v61  ;;  %v1437_v6 = vmul.f32 %v7023_v44, %v6931_v61  ;;  %v5540_v61 = vld [vmem:[%s10183_s4 + $0x2] sm:$0x1]  ;;  %v10295_v44 = vld [vmem:[#allocation7_spill] sm:$0xff] }
 0x6f0   :  { %2732 = vmatpush.msra.mxu1 %v6089_v39 }
 0x6f1   :  { %v1366_v54 = vpop.permute.xlu0 %1365 }
 0x6f2   :  { %v1387_v51 = vsel %vm473_vm2, %v1383_v10, %v1366_v54  ;;  %2733 = vmatpush.msra.mxu1 %v6090_v20  ;;  %v10294_v20 = vld [vmem:[#allocation18_spill] sm:$0xff] }
 0x6f3   :  { %v1391_v9 = vmul.f32 %v7233_v19, %v1387_v51 }
 0x6f4   :  { %2734 = vmatpush.msra.mxu1 %v6091_v33 }
 0x6f5   :  { %5524 = vmatmul.msk.f32.gmra.mxu1 %vm482_vm3, %v1391_v9 }
 0x6f9   :  { %v1356_v3 = vpop.permute.xlu0 %1355 }
 0x6fa   :  { %v1332_v62 = vpop.permute.xlu1 %1331 }
 0x6fb   :  { %v1376_v37 = vsel %vm332_vm11, %v7358_v0, %v1332_v62  ;;  %v1434_v0 = vmul.f32 %v6970_v57, %v6938_v17  ;;  %v1436_v57 = vmul.f32 %v6996_v22, %v6938_v17 }
 0x6fc   :  { %v1380_v46 = vsel %vm463_vm0, %v1376_v37, %v1344_v63 }
 0x6fd   :  { %v1384_v52 = vsel %vm468_vm1, %v1380_v46, %v1356_v3 }
 0x702   :  { %v1368_v25 = vpop.permute.xlu1 %1367 }
 0x703   :  { %v1388_v26 = vsel %vm473_vm2, %v1384_v52, %v1368_v25 }
 0x704   :  { %v1392_v38 = vmul.f32 %v7245_v48, %v1388_v26 }
 0x706   :  { %5525 = vmatmul.msk.f32.gmra.mxu1 %vm482_vm3, %v1392_v38 }
 0x75d   :  { %v1422_v42 = vpop.f32.mrf.mxu1 }
 0x75e   :  { %v1438_v51 = vadd.f32 %v1434_v0, %v1422_v42  ;;  %v1537_v42 = vmul.f32 %v5540_v61, %v10295_v44  ;;  %v7483_v0 = vpop.permute.xlu1 %1550 }
 0x760   :  { %v1442_v9 = vadd.f32 %v1438_v51, %v10294_v20 }
 0x766   :  { %v1425_v39 = vpop.f32.mrf.mxu1 }
 0x767   :  { %v1439_v10 = vadd.f32 %v1435_v18, %v1425_v39  ;;  %v7479_v18 = vpop.permute.xlu2 %1545 }
 0x769   :  { %v1443_v54 = vadd.f32 %v1439_v10, %v6943_v34 }
 0x76b   :  { %5849 = vtanh.f32 %v1443_v54  ;;  %v5541_v54 = vld [vmem:[%s10183_s4 + $0xa] sm:$0x1] }
 0x76c   :  { %5851 = vtanh.f32 %v1442_v9  ;;  %v10296_v9 = vld [vmem:[#allocation6_spill] sm:$0xff] }
 0x771   :  { %v5850_v33 = vpop.eup %5849 }
 0x772   :  { %1464 = vrot.lane.b32.xlu0 %v5850_v33, %s6196_s29  ;;  %v5852_v62 = vpop.eup %5851  ;;  %v1428_v37 = vpop.f32.mrf.mxu1  ;;  %v1538_v33 = vmul.f32 %v5541_v54, %v10296_v9  ;;  %v1450_v54 = vsub.f32 1.0, %v7267_v50 }
 0x773   :  { %v1440_v52 = vadd.f32 %v1436_v57, %v1428_v37  ;;  %v5753_v37 = vld [vmem:[%s10180_s2 + $0x2] ss:$0 sm:$0xff] }
 0x775   :  { %v1444_v25 = vadd.f32 %v1440_v52, %v10294_v20 }
 0x77a   :  { %1462 = vrot.lane.b32.xlu0 %v5852_v62, %s6196_s29 }
 0x783   :  { %v1431_v63 = vpop.f32.mrf.mxu1 }
 0x784   :  { %v1441_v46 = vadd.f32 %v1437_v6, %v1431_v63  ;;  %v1451_v63 = vsub.f32 1.0, %v7288_v11 }
 0x786   :  { %v1445_v3 = vadd.f32 %v1441_v46, %v6943_v34  ;;  %v1584_v46 = vpop.permute.xlu2 %1583 }
 0x788   :  { %5853 = vtanh.f32 %v1445_v3  ;;  %v1455_v3 = vmul.f32 %v1451_v63, %v7322_v28 }
 0x789   :  { %5855 = vtanh.f32 %v1444_v25  ;;  %v7501_v25 = vld [vmem:[%s10186_s9] sm:$0xff] }
 0x78a   :  { %5857 = vtanh.f32 %v1537_v42 }
 0x78b   :  { %5859 = vtanh.f32 %v1538_v33  ;;  %v1454_v33 = vmul.f32 %v1450_v54, %v7313_v14 }
 0x78e   :  { %v5854_v26 = vpop.eup %5853 }
 0x78f   :  { %1468 = vrot.lane.b32.xlu0 %v5854_v26, %s6196_s29  ;;  %v5856_v38 = vpop.eup %5855 }
 0x790   :  { %v5858_v17 = vpop.eup %5857 }
 0x791   :  { %v1541_v34 = vmul.f32 0.5, %v5858_v17  ;;  %v7508_v17 = vld [vmem:[%s10184_s0 + $0x28] sm:$0xff] }
 0x793   :  { %v7477_v22 = vperm.slane %v1541_v34, 0  ;;  %v5860_v34 = vpop.eup %5859 }
 0x795   :  { %v1569_v39 = vsub.f32 %v7479_v18, %v7477_v22  ;;  %v1570_v20 = vsub.f32 %v7483_v0, %v7477_v22 }
 0x797   :  { %1466 = vrot.lane.b32.xlu0 %v5856_v38, %s6196_s29  ;;  %v1573_v10 = vand.u32 2147483647, %v1569_v39  ;;  %v1574_v6 = vand.u32 2147483647, %v1570_v20  ;;  %v1607_v38 = vmul.f32 %v5753_v37, %v1584_v46  ;;  %v7523_v46 = vpop.permute.xlu1 %1555 }
 0x799   :  { %v1577_v51 = vmul.f32 %v1573_v10, %v6465_v8  ;;  %v1578_v61 = vmul.f32 %v1574_v6, %v6457_v60 }
 0x79b   :  { %v1611_v62 = vadd.f32 1.0, %v1577_v51  ;;  %v1612_v39 = vadd.f32 1.0, %v1578_v61  ;;  %v1542_v51 = vmul.f32 0.5, %v5860_v34 }
 0x79d   :  { %v1615_v26 = vmul.f32 %v7501_v25, %v1611_v62  ;;  %v1589_v62 = vpop.permute.xlu2 %1588  ;;  %v1616_v63 = vmul.f32 %v7076_v41, %v1612_v39 }
 0x79f   :  { %v1619_v28 = vmul.f32 %v1615_v26, %v1607_v38  ;;  %v1608_v26 = vmul.f32 %v5753_v37, %v1589_v62  ;;  %v7548_v34 = vpop.permute.xlu1 %1560 }
 0x7a1   :  { %v1623_v15 = vmul.f32 %v1619_v28, %v6500_v35  ;;  %v1620_v61 = vmul.f32 %v1616_v63, %v1608_v26 }
 0x7a3   :  { %v7541_v38 = vadd.f32 %v6489_v23, %v1623_v15  ;;  %v1624_v37 = vmul.f32 %v1620_v61, %v6503_v36  ;;  %v7569_v61 = vld [vmem:[%s10184_s0 + $0xa8] sm:$0xff] }
 0x7a5   :  { %v7551_v28 = vadd.f32 %v6492_v27, %v1624_v37  ;;  %v1594_v15 = vpop.permute.xlu2 %1593 }
 0x7e4   :  { %v1465_v57 = vpop.permute.xlu0 %1464 }
 0x7e5   :  { %v1475_v52 = vmul.f32 %v1465_v57, %v7288_v11  ;;  %v7525_v57 = vperm.slane %v1542_v51, 0 }
 0x7e7   :  { %v1479_v42 = vadd.f32 %v1475_v52, %v1455_v3  ;;  %v7530_v52 = vld [vmem:[%s10184_s0 + $0x20] sm:$0xff] }
 0x7e9   :  { %v7513_v11 = vsel %vm1294_vm7, %v1479_v42, %v7002_v58  ;;  %v1571_v42 = vsub.f32 %v7523_v46, %v7525_v57  ;;  %vm1912_vm7 = vcmp.ne.f32.partialorder %v7392_v55, 0.0 }
 0x7ea   :  { %10297 = vst [vmem:[#allocation17_spill] sm:$0xff] %v7513_v11  ;;  %v1632_v10 = vsel %vm327_vm8, %v7508_v17, %v7513_v11 }
 0x7eb   :  { %1655 = vmatpush.msrb.mxu2 %v1632_v10  ;;  %v1575_v4 = vand.u32 2147483647, %v1571_v42  ;;  %v1572_v10 = vsub.f32 %v7548_v34, %v7525_v57 }
 0x7ec   :  { %v1463_v20 = vpop.permute.xlu0 %1462 }
 0x7ed   :  { %v1474_v6 = vmul.f32 %v1463_v20, %v7267_v50  ;;  %v1579_v39 = vmul.f32 %v1575_v4, %v6465_v8  ;;  %v1576_v51 = vand.u32 2147483647, %v1572_v10  ;;  %v1453_v20 = vsub.f32 1.0, %v7306_v16  ;;  %v1599_v10 = vpop.permute.xlu1 %1598 }
 0x7ef   :  { %v1478_v3 = vadd.f32 %v1474_v6, %v1454_v33  ;;  %v1613_v54 = vadd.f32 1.0, %v1579_v39  ;;  %v5754_v33 = vld [vmem:[%s10180_s2 + $0xa] ss:$0 sm:$0xff]  ;;  %v1457_v6 = vmul.f32 %v1453_v20, %v7353_v7  ;;  %v1580_v26 = vmul.f32 %v1576_v51, %v6457_v60 }
 0x7f0   :  { %v1609_v42 = vmul.f32 %v5754_v33, %v1594_v15  ;;  %v1452_v39 = vsub.f32 1.0, %v7297_v53  ;;  %v1610_v45 = vmul.f32 %v5754_v33, %v1599_v10 }
 0x7f1   :  { %v7535_v14 = vsel %vm1293_vm4, %v1478_v3, %v7021_v59  ;;  %v1617_v3 = vmul.f32 %v7501_v25, %v1613_v54  ;;  %v1614_v4 = vadd.f32 1.0, %v1580_v26  ;;  %vm1910_vm4 = vcmp.ne.f32.partialorder %v7376_v47, 0.0 }
 0x7f2   :  { %10298 = vst [vmem:[#allocation13_spill] sm:$0xff] %v7535_v14  ;;  %v1631_v50 = vsel %vm327_vm8, %v7530_v52, %v7535_v14  ;;  %v1456_v51 = vmul.f32 %v1452_v39, %v7330_v5  ;;  %v1936_v47 = vsel %vm1912_vm7, 1, %v10282_v1 }
 0x7f3   :  { %1656 = vmatpush.msrb.mxu2 %v1631_v50  ;;  %v1621_v7 = vmul.f32 %v1617_v3, %v1609_v42 }
 0x7f4   :  { %5542 = vmatmul.msk.f32.vlgmr.msrb.gmra.mxu2 %vm332_vm11, %v7541_v38 }
 0x7fc   :  { %5543 = vmatmul.msk.f32.gmra.mxu2 %vm332_vm11, %v7551_v28 }
 0x801   :  { %v1469_v62 = vpop.permute.xlu0 %1468 }
 0x802   :  { %v1477_v63 = vmul.f32 %v1469_v62, %v7306_v16  ;;  %v1618_v62 = vmul.f32 %v7076_v41, %v1614_v4  ;;  %v1693_v4 = vmul.f32 %v7541_v38, %v7477_v22 }
 0x804   :  { %v1481_v50 = vadd.f32 %v1477_v63, %v1457_v6  ;;  %v1625_v6 = vmul.f32 %v1621_v7, %v6500_v35  ;;  %v7587_v63 = vld [vmem:[%s10184_s0 + $0xa0] sm:$0xff]  ;;  %v1622_v26 = vmul.f32 %v1618_v62, %v1610_v45 }
 0x806   :  { %v7574_v37 = vsel %vm1296_vm12, %v1481_v50, %v7063_v30  ;;  %v1629_v41 = vadd.f32 %v6489_v23, %v1625_v6  ;;  %v1626_v5 = vmul.f32 %v1622_v26, %v6503_v36  ;;  %v6106_v30 = vld [vmem:[%s10187_s11 + $0x18] sm:$0xff] }
 0x807   :  { %10299 = vst [vmem:[#allocation14_spill] sm:$0xff] %v7574_v37  ;;  %v1634_v16 = vsel %vm327_vm8, %v7569_v61, %v7574_v37 }
 0x808   :  { %1684 = vmatpush.msrb.mxu3 %v1634_v16  ;;  %v1630_v33 = vadd.f32 %v6492_v27, %v1626_v5  ;;  %v1697_v16 = vsel %vm332_vm11, %v1693_v4, 0.0  ;;  %v1695_v39 = vmul.f32 %v1629_v41, %v7525_v57  ;;  %v1937_v5 = vsel %vm1913_vm14, 1, %v10282_v1 }
 0x809   :  { %v1467_v54 = vpop.permute.xlu0 %1466 }
 0x80a   :  { %v1476_v20 = vmul.f32 %v1467_v54, %v7297_v53  ;;  %v1696_v10 = vmul.f32 %v1630_v33, %v7525_v57  ;;  %v1694_v54 = vmul.f32 %v7551_v28, %v7477_v22  ;;  %v1934_v57 = vsel %vm1910_vm4, 1, %v10282_v1 }
 0x80c   :  { %v1480_v15 = vadd.f32 %v1476_v20, %v1456_v51  ;;  %v1703_v51 = vsel %vm332_vm11, %v1695_v39, 0.0  ;;  %v1706_v20 = vsel %vm332_vm11, %v1696_v10, 0.0  ;;  %v1700_v62 = vsel %vm332_vm11, %v1694_v54, 0.0 }
 0x80e   :  { %v7592_v3 = vsel %vm1295_vm5, %v1480_v15, %v7089_v12 }
 0x80f   :  { %10300 = vst [vmem:[#allocation15_spill] sm:$0xff] %v7592_v3  ;;  %v1633_v53 = vsel %vm327_vm8, %v7587_v63, %v7592_v3 }
 0x810   :  { %1685 = vmatpush.msrb.mxu3 %v1633_v53 }
 0x811   :  { %5544 = vmatmul.msk.f32.vlgmr.msrb.gmra.mxu3 %vm332_vm11, %v1629_v41  ;;  %v1935_v41 = vsel %vm1911_vm13, 1, %v10282_v1 }
 0x819   :  { %5545 = vmatmul.msk.f32.gmra.mxu3 %vm332_vm11, %v1630_v33 }
 0x877   :  { %v1658_v50 = vpop.f32.mrf.mxu2 }
 0x878   :  { %1737 = vrot.lane.b32.xlu1 %v1658_v50, %s6192_s19  ;;  %1725 = vrot.lane.b32.xlu0 %v1658_v50, %s6193_s5 }
 0x879   :  { %1713 = vrot.lane.b32.xlu2 %v1658_v50, %s6194_s20 }
 0x87f   :  { %v1661_v31 = vpop.f32.mrf.mxu2 }
 0x880   :  { %1727 = vrot.lane.b32.xlu1 %v1661_v31, %s6193_s5  ;;  %1715 = vrot.lane.b32.xlu0 %v1661_v31, %s6194_s20 }
 0x881   :  { %1749 = vrot.lane.b32.xlu2 %v1658_v50, %s6195_s21 }
 0x888   :  { %1751 = vrot.lane.b32.xlu0 %v1661_v31, %s6195_s21 }
 0x889   :  { %1739 = vrot.lane.b32.xlu2 %v1661_v31, %s6192_s19 }
 0x894   :  { %v1687_v42 = vpop.f32.mrf.mxu3 }
 0x895   :  { %1741 = vrot.lane.b32.xlu0 %v1687_v42, %s6192_s19  ;;  %1729 = vrot.lane.b32.xlu2 %v1687_v42, %s6193_s5 }
 0x896   :  { %1717 = vrot.lane.b32.xlu1 %v1687_v42, %s6194_s20 }
 0x89c   :  { %v7613_v7 = vpop.f32.mrf.mxu3 }
 0x89d   :  { %1731 = vrot.lane.b32.xlu0 %v7613_v7, %s6193_s5  ;;  %1719 = vrot.lane.b32.xlu2 %v7613_v7, %s6194_s20 }
 0x89e   :  { %1753 = vrot.lane.b32.xlu1 %v1687_v42, %s6195_s21 }
 0x8a5   :  { %1755 = vrot.lane.b32.xlu2 %v7613_v7, %s6195_s21 }
 0x8a6   :  { %1743 = vrot.lane.b32.xlu1 %v7613_v7, %s6192_s19 }
 0x8c7   :  { %1698 = vadd.xlane.f32.xlu0 %v1697_v16 }
 0x8ce   :  { %1704 = vadd.xlane.f32.xlu2 %v1703_v51 }
 0x8cf   :  { %1707 = vadd.xlane.f32.xlu0 %v1706_v20 }
 0x8d0   :  { %1701 = vadd.xlane.f32.xlu1 %v1700_v62 }
 0x8d3   :  { %v1714_v38 = vpop.permute.xlu2 %1713 }
 0x8d4   :  { %v1761_v22 = vsel %vm332_vm11, %v1658_v50, %v1714_v38 }
 0x8db   :  { %v1750_v15 = vpop.permute.xlu2 %1749 }
 0x8e3   :  { %1920 = vrot.lane.b32.xlu0 %v7513_v11, %s6197_s25  ;;  %v1740_v40 = vpop.permute.xlu2 %1739 }
 0x8e6   :  { %1939 = vperm.xlu2 %5748, %v1934_v57  }
 0x8e9   :  { %1918 = vrot.lane.b32.xlu1 %v7535_v14, %s6197_s25 }
 0x8ea   :  { %v1738_v28 = vpop.permute.xlu1 %1737  ;;  %v1726_v45 = vpop.permute.xlu0 %1725 }
 0x8eb   :  { %v1765_v6 = vsel %vm463_vm0, %v1761_v22, %v1726_v45  ;;  %1922 = vrot.lane.b32.xlu0 %v7592_v3, %s6197_s25 }
 0x8ec   :  { %v1769_v26 = vsel %vm468_vm1, %v1765_v6, %v1738_v28 }
 0x8ed   :  { %v1773_v55 = vsel %vm473_vm2, %v1769_v26, %v1750_v15 }
 0x8ee   :  { %v1777_v53 = vmul.f32 %v7233_v19, %v1773_v55  ;;  %1945 = vperm.xlu2 %5748, %v1936_v47  }
 0x8ef   :  { %v1730_v51 = vpop.permute.xlu2 %1729 }
 0x8f0   :  { %5546 = vmatmul.msk.f32.vlgmr.msrb.gmra.mxu0 %vm482_vm3, %v1777_v53 }
 0x8f1   :  { %1942 = vperm.xlu1 %5747, %v1935_v41  }
 0x8f2   :  { %v1716_v33 = vpop.permute.xlu0 %1715  ;;  %v1728_v43 = vpop.permute.xlu1 %1727 }
 0x8f3   :  { %1948 = vperm.xlu0 %5746, %v1937_v5   ;;  %v1762_v50 = vsel %vm332_vm11, %v1661_v31, %v1716_v33 }
 0x8f4   :  { %v1766_v4 = vsel %vm463_vm0, %v1762_v50, %v1728_v43 }
 0x8f5   :  { %v1770_v16 = vsel %vm468_vm1, %v1766_v4, %v1740_v40 }
 0x8f7   :  { %v1720_v57 = vpop.permute.xlu2 %1719 }
 0x8f8   :  { %v1764_v15 = vsel %vm332_vm11, %v7613_v7, %v1720_v57 }
 0x8f9   :  { %1924 = vrot.lane.b32.xlu1 %v7574_v37, %s6197_s25 }
 0x8fa   :  { %v1752_v39 = vpop.permute.xlu0 %1751 }
 0x8fb   :  { %v1774_v10 = vsel %vm473_vm2, %v1770_v16, %v1752_v39 }
 0x8fc   :  { %v1778_v54 = vmul.f32 %v7245_v48, %v1774_v10 }
 0x8fe   :  { %5547 = vmatmul.msk.f32.gmra.mxu0 %vm482_vm3, %v1778_v54 }
 0x8ff   :  { %v1756_v55 = vpop.permute.xlu2 %1755 }
 0x907   :  { %v1742_v31 = vpop.permute.xlu0 %1741 }
 0x908   :  { %v1718_v20 = vpop.permute.xlu1 %1717 }
 0x909   :  { %v1763_v62 = vsel %vm332_vm11, %v1687_v42, %v1718_v20 }
 0x90a   :  { %v1767_v38 = vsel %vm463_vm0, %v1763_v62, %v1730_v51 }
 0x90b   :  { %v1771_v22 = vsel %vm468_vm1, %v1767_v38, %v1742_v31 }
 0x90f   :  { %v1732_v47 = vpop.permute.xlu0 %1731 }
 0x910   :  { %v1754_v28 = vpop.permute.xlu1 %1753  ;;  %v1768_v26 = vsel %vm463_vm0, %v1764_v15, %v1732_v47 }
 0x911   :  { %v1775_v45 = vsel %vm473_vm2, %v1771_v22, %v1754_v28 }
 0x912   :  { %v1779_v6 = vmul.f32 %v7233_v19, %v1775_v45 }
 0x914   :  { %5548 = vmatmul.msk.f32.gmra.mxu0 %vm482_vm3, %v1779_v6 }
 0x918   :  { %v1744_v42 = vpop.permute.xlu1 %1743 }
 0x919   :  { %v1772_v53 = vsel %vm468_vm1, %v1768_v26, %v1744_v42 }
 0x91a   :  { %v1776_v41 = vsel %vm473_vm2, %v1772_v53, %v1756_v55 }
 0x91b   :  { %v1780_v5 = vmul.f32 %v7245_v48, %v1776_v41 }
 0x91d   :  { %5549 = vmatmul.msk.f32.gmra.mxu0 %vm482_vm3, %v1780_v5 }
 0x93a   :  { %v1699_v33 = vpop.xlane.xlu0 %1698 }
 0x93b   :  { %v1822_v19 = vmul.f32 %v7256_v56, %v1699_v33 }
 0x941   :  { %v1705_v62 = vpop.xlane.xlu2 %1704 }
 0x942   :  { %v1824_v33 = vmul.f32 %v7256_v56, %v1705_v62 }
 0x943   :  { %v1702_v40 = vpop.xlane.xlu1 %1701 }
 0x944   :  { %v1823_v39 = vmul.f32 %v7276_v49, %v1702_v40  ;;  %v1708_v40 = vpop.xlane.xlu0 %1707 }
 0x949   :  { %v7679_v42 = vpop.permute.xlu2 %1939 }
 0x94a   :  { %vm1950_vm10 = vcmp.eq.s32.totalorder %v7679_v42, 1  ;;  %v6100_v42 = vld [vmem:[%s10187_s11 + $0x48] sm:$0xff] }
 0x95b   :  { %v1919_v53 = vpop.permute.xlu1 %1918 }
 0x96d   :  { %v1810_v43 = vpop.f32.mrf.mxu0 }
 0x96e   :  { %v1826_v50 = vadd.f32 %v1822_v19, %v1810_v43 }
 0x970   :  { %v1830_v4 = vadd.f32 %v7264_v21, %v1826_v50 }
 0x972   :  { %v5550_v7 = vmul.f32 -1.442695, %v1830_v4 }
 0x974   :  { %5861 = vpow2.f32 %v5550_v7 }
 0x97a   :  { %v5862_v16 = vpop.eup %5861 }
 0x97b   :  { %v1846_v10 = vadd.f32 1.0, %v5862_v16  ;;  %v1813_v54 = vpop.f32.mrf.mxu0 }
 0x97c   :  { %v1827_v51 = vadd.f32 %v1823_v39, %v1813_v54 }
 0x97d   :  { %5863 = vrcp.f32 %v1846_v10  ;;  %v1861_v22 = vand.u32 2147483648, %v1846_v10  ;;  %v1859_v6 = vand.u32 2147483647, %v1846_v10  ;;  %vm1855_vm9 = vweird.f32 %v1846_v10 }
 0x97e   :  { %v1831_v48 = vadd.f32 %v7283_v24, %v1827_v51 }
 0x97f   :  { %v1862_v26 = vor.u32 1.1754944e-38, %v1861_v22  ;;  %vm1860_vm6 = vcmp.eq.f32.partialorder %v1859_v6, 8.507059e+37  ;;  %v1921_v22 = vpop.permute.xlu0 %1920 }
 0x980   :  { %v5551_v20 = vmul.f32 -1.442695, %v1831_v48 }
 0x982   :  { %5865 = vpow2.f32 %v5551_v20  ;;  %v1825_v20 = vmul.f32 %v7276_v49, %v1708_v40  ;;  %v7701_v40 = vpop.permute.xlu2 %1945 }
 0x983   :  { %v5864_v31 = vpop.eup %5863 }
 0x984   :  { %v1851_v38 = vmul.f32 %v5864_v31, %v1846_v10  ;;  %vm1856_vm5 = vweird.f32 %v5864_v31 }
 0x985   :  { %vm1857_vm15 = vmor %vm1855_vm9, %vm1856_vm5 }
 0x986   :  { %v1852_v57 = vsub.f32 1.0, %v1851_v38 }
 0x988   :  { %v5866_v28 = vpop.eup %5865  ;;  %v1853_v45 = vmul.f32 %v5864_v31, %v1852_v57 }
 0x989   :  { %v1847_v47 = vadd.f32 1.0, %v5866_v28 }
 0x98a   :  { %v1854_v15 = vadd.f32 %v5864_v31, %v1853_v45 }
 0x98b   :  { %5867 = vrcp.f32 %v1847_v47  ;;  %v1876_v10 = vand.u32 2147483648, %v1847_v47  ;;  %v1874_v48 = vand.u32 2147483647, %v1847_v47  ;;  %vm1870_vm4 = vweird.f32 %v1847_v47 }
 0x98c   :  { %v1858_v55 = vsel %vm1857_vm15, %v5864_v31, %v1854_v15  ;;  %v7691_v31 = vpop.permute.xlu1 %1942 }
 0x98d   :  { %v7681_v41 = vsel %vm1860_vm6, %v1862_v26, %v1858_v55  ;;  %v1877_v62 = vor.u32 1.1754944e-38, %v1876_v10  ;;  %vm1875_vm13 = vcmp.eq.f32.partialorder %v1874_v48, 8.507059e+37  ;;  %vm1951_vm14 = vcmp.eq.s32.totalorder %v7691_v31, 1 }
 0x98e   :  { %v1930_v5 = vmul.f32 %v1919_v53, %v7681_v41 }
 0x990   :  { %v1954_v19 = vsel %vm1950_vm10, %v1930_v5, %v1919_v53 }
 0x991   :  { %v5868_v43 = vpop.eup %5867  ;;  %v1816_v50 = vpop.f32.mrf.mxu0  ;;  %1962 = vrot.lane.b32.xlu2 %v1954_v19, %s6196_s29 }
 0x992   :  { %v1866_v4 = vmul.f32 %v5868_v43, %v1847_v47  ;;  %v1828_v7 = vadd.f32 %v1824_v33, %v1816_v50  ;;  %vm1871_vm12 = vweird.f32 %v5868_v43 }
 0x993   :  { %vm1872_vm7 = vmor %vm1870_vm4, %vm1871_vm12  ;;  %vm1952_vm12 = vcmp.eq.s32.totalorder %v7701_v40, 1  ;;  %v6110_v40 = vld [vmem:[%s10191_s12 + $0x48] sm:$0xff] }
 0x994   :  { %v1867_v16 = vsub.f32 1.0, %v1866_v4  ;;  %v1832_v39 = vadd.f32 %v7264_v21, %v1828_v7 }
 0x996   :  { %v5552_v54 = vmul.f32 -1.442695, %v1832_v39  ;;  %v1868_v51 = vmul.f32 %v5868_v43, %v1867_v16  ;;  %v1923_v16 = vpop.permute.xlu0 %1922 }
 0x998   :  { %5869 = vpow2.f32 %v5552_v54  ;;  %v1869_v56 = vadd.f32 %v5868_v43, %v1868_v51 }
 0x99a   :  { %v1819_v38 = vpop.f32.mrf.mxu0  ;;  %v1873_v57 = vsel %vm1872_vm7, %v5868_v43, %v1869_v56 }
 0x99b   :  { %v1829_v28 = vadd.f32 %v1825_v20, %v1819_v38  ;;  %v7693_v21 = vsel %vm1875_vm13, %v1877_v62, %v1873_v57 }
 0x99c   :  { %v1931_v45 = vmul.f32 %v1921_v22, %v7693_v21 }
 0x99d   :  { %v1833_v6 = vadd.f32 %v7283_v24, %v1829_v28 }
 0x99e   :  { %v5870_v47 = vpop.eup %5869  ;;  %v1955_v49 = vsel %vm1951_vm14, %v1931_v45, %v1921_v22  ;;  %v7710_v45 = vpop.permute.xlu0 %1948 }
 0x99f   :  { %v1848_v15 = vadd.f32 1.0, %v5870_v47  ;;  %v5553_v26 = vmul.f32 -1.442695, %v1833_v6  ;;  %1964 = vrot.lane.b32.xlu1 %v1955_v49, %s6196_s29  ;;  %v1925_v47 = vpop.permute.xlu1 %1924 }
 0x9a1   :  { %5871 = vrcp.f32 %v1848_v15  ;;  %v1891_v43 = vand.u32 2147483648, %v1848_v15  ;;  %v1889_v24 = vand.u32 2147483647, %v1848_v15  ;;  %vm1885_vm9 = vweird.f32 %v1848_v15 }
 0x9a2   :  { %5873 = vpow2.f32 %v5553_v26 }
 0x9a3   :  { %v1892_v7 = vor.u32 1.1754944e-38, %v1891_v43  ;;  %vm1890_vm6 = vcmp.eq.f32.partialorder %v1889_v24, 8.507059e+37  ;;  %v5569_v24 = vld [vmem:[%s10181_s3 + $0x38] sm:$0xff] }
 0x9a7   :  { %v5872_v55 = vpop.eup %5871 }
 0x9a8   :  { %v5874_v53 = vpop.eup %5873  ;;  %v1881_v5 = vmul.f32 %v5872_v55, %v1848_v15  ;;  %vm1886_vm5 = vweird.f32 %v5872_v55 }
 0x9a9   :  { %v1849_v33 = vadd.f32 1.0, %v5874_v53  ;;  %vm1887_vm15 = vmor %vm1885_vm9, %vm1886_vm5  ;;  %vm1953_vm9 = vcmp.eq.s32.totalorder %v7710_v45, 1 }
 0x9aa   :  { %v1882_v19 = vsub.f32 1.0, %v1881_v5 }
 0x9ab   :  { %5875 = vrcp.f32 %v1849_v33  ;;  %v1906_v62 = vand.u32 2147483648, %v1849_v33  ;;  %v1904_v57 = vand.u32 2147483647, %v1849_v33  ;;  %vm1900_vm7 = vweird.f32 %v1849_v33 }
 0x9ac   :  { %v1883_v50 = vmul.f32 %v5872_v55, %v1882_v19 }
 0x9ad   :  { %v1907_v28 = vor.u32 1.1754944e-38, %v1906_v62  ;;  %vm1905_vm5 = vcmp.eq.f32.partialorder %v1904_v57, 8.507059e+37  ;;  %v7792_v57 = vld [vmem:[%s10245_s26 + $0x38] sm:$0xff] }
 0x9ae   :  { %v1884_v4 = vadd.f32 %v5872_v55, %v1883_v50 }
 0x9b0   :  { %v1888_v39 = vsel %vm1887_vm15, %v5872_v55, %v1884_v4  ;;  %v2183_v4 = vmul.f32 %v5569_v24, %v10291_v13 }
 0x9b1   :  { %v5876_v10 = vpop.eup %5875  ;;  %v7703_v54 = vsel %vm1890_vm6, %v1892_v7, %v1888_v39  ;;  %v5570_v39 = vld [vmem:[%s10181_s3 + $0xb0] sm:$0xff] }
 0x9b2   :  { %v1896_v51 = vmul.f32 %v5876_v10, %v1849_v33  ;;  %v1932_v48 = vmul.f32 %v1923_v16, %v7703_v54  ;;  %vm1901_vm4 = vweird.f32 %v5876_v10 }
 0x9b3   :  { %vm1902_vm13 = vmor %vm1900_vm7, %vm1901_vm4 }
 0x9b4   :  { %v1897_v56 = vsub.f32 1.0, %v1896_v51  ;;  %v1956_v20 = vsel %vm1952_vm12, %v1932_v48, %v1923_v16  ;;  %v5571_v48 = vld [vmem:[%s10181_s3 + $0xb8] sm:$0xff] }
 0x9b5   :  { %1966 = vrot.lane.b32.xlu0 %v1956_v20, %s6196_s29  ;;  %v2185_v20 = vmul.f32 %v5571_v48, %v10293_v32 }
 0x9b6   :  { %v1898_v38 = vmul.f32 %v5876_v10, %v1897_v56  ;;  %v7785_v56 = vld [vmem:[%s10245_s26 + $0x30] sm:$0xff] }
 0x9b8   :  { %v1899_v22 = vadd.f32 %v5876_v10, %v1898_v38 }
 0x9ba   :  { %v1903_v6 = vsel %vm1902_vm13, %v5876_v10, %v1899_v22 }
 0x9bb   :  { %v7712_v49 = vsel %vm1905_vm5, %v1907_v28, %v1903_v6  ;;  %v7798_v6 = vld [vmem:[%s10245_s26 + $0xb0] sm:$0xff] }
 0x9bc   :  { %v1933_v15 = vmul.f32 %v1925_v47, %v7712_v49  ;;  %vm2569_vm6 = vcmp.ne.f32.partialorder %v7798_v6, 0.0 }
 0x9be   :  { %v1957_v26 = vsel %vm1953_vm9, %v1933_v15, %v1925_v47  ;;  %v7804_v47 = vld [vmem:[%s10245_s26 + $0xb8] sm:$0xff] }
 0x9bf   :  { %1968 = vrot.lane.b32.xlu2 %v1957_v26, %s6196_s29  ;;  %vm2570_vm15 = vcmp.ne.f32.partialorder %v7804_v47, 0.0 }
 0x9eb   :  { %v7719_v55 = vpop.permute.xlu2 %1962 }
 0x9ec   :  { %v1974_v53 = vsel %vm327_vm8, %v7530_v52, %v7719_v55  ;;  %v5568_v52 = vld [vmem:[%s10181_s3 + $0x30] sm:$0xff] }
 0x9ed   :  { %1982 = vrot.lane.b32.xlu1 %v1974_v53, %s6194_s20  ;;  %1994 = vrot.lane.b32.xlu0 %v1974_v53, %s6193_s5 }
 0x9ee   :  { %2006 = vrot.lane.b32.xlu2 %v1974_v53, %s6192_s19 }
 0x9f5   :  { %2018 = vrot.lane.b32.xlu1 %v1974_v53, %s6195_s21 }
 0xa11   :  { %v7728_v5 = vpop.permute.xlu1 %1964 }
 0xa12   :  { %v1975_v33 = vsel %vm327_vm8, %v7508_v17, %v7728_v5  ;;  %v2182_v17 = vmul.f32 %v5568_v52, %v10290_v2 }
 0xa13   :  { %2008 = vrot.lane.b32.xlu1 %v1975_v33, %s6192_s19  ;;  %1984 = vrot.lane.b32.xlu0 %v1975_v33, %s6194_s20 }
 0xa14   :  { %1996 = vrot.lane.b32.xlu2 %v1975_v33, %s6193_s5  ;;  %5877 = vtanh.f32 %v2182_v17 }
 0xa15   :  { %5879 = vtanh.f32 %v2183_v4 }
 0xa19   :  { %v7754_v50 = vpop.permute.xlu2 %1968 }
 0xa1a   :  { %v5878_v7 = vpop.eup %5877 }
 0xa1b   :  { %2020 = vrot.lane.b32.xlu0 %v1975_v33, %s6195_s21  ;;  %v2190_v16 = vmul.f32 0.5, %v5878_v7  ;;  %v5880_v10 = vpop.eup %5879 }
 0xa1c   :  { %v2191_v51 = vmul.f32 0.5, %v5880_v10 }
 0xa27   :  { %v7740_v19 = vpop.permute.xlu0 %1966 }
 0xa28   :  { %v7745_v43 = vsel %vm327_vm8, %v7587_v63, %v7740_v19  ;;  %v7762_v63 = vsel %vm327_vm8, %v7569_v61, %v7754_v50  ;;  %v2184_v61 = vmul.f32 %v5570_v39, %v10292_v29  ;;  %v7814_v39 = vld [vmem:[%s10188_s8] sm:$0xff] }
 0xa29   :  { %2010 = vrot.lane.b32.xlu0 %v7745_v43, %s6192_s19  ;;  %1998 = vrot.lane.b32.xlu1 %v7745_v43, %s6193_s5 }
 0xa2a   :  { %1986 = vrot.lane.b32.xlu2 %v7745_v43, %s6194_s20  ;;  %5881 = vtanh.f32 %v2184_v61 }
 0xa2b   :  { %5883 = vtanh.f32 %v2185_v20 }
 0xa30   :  { %v5882_v62 = vpop.eup %5881 }
 0xa31   :  { %2000 = vrot.lane.b32.xlu0 %v7762_v63, %s6193_s5  ;;  %1988 = vrot.lane.b32.xlu1 %v7762_v63, %s6194_s20  ;;  %v2192_v38 = vmul.f32 0.5, %v5882_v62  ;;  %v5884_v22 = vpop.eup %5883 }
 0xa32   :  { %2022 = vrot.lane.b32.xlu2 %v7745_v43, %s6195_s21  ;;  %v2193_v28 = vmul.f32 0.5, %v5884_v22 }
 0xa39   :  { %2202 = vperm.xlu0 %5746, %v2190_v16   ;;  %2024 = vrot.lane.b32.xlu1 %v7762_v63, %s6195_s21 }
 0xa3a   :  { %2012 = vrot.lane.b32.xlu2 %v7762_v63, %s6192_s19 }
 0xa41   :  { %2240 = vperm.xlu0 %5746, %v7785_v56   ;;  %2207 = vperm.xlu1 %5747, %v2191_v51  }
 0xa48   :  { %v2007_v24 = vpop.permute.xlu2 %2006 }
 0xa49   :  { %2245 = vperm.xlu0 %5746, %v7792_v57   ;;  %2212 = vperm.xlu1 %5747, %v2192_v38  }
 0xa51   :  { %2250 = vperm.xlu0 %5746, %v7798_v6   ;;  %2217 = vperm.xlu1 %5747, %v2193_v28   ;;  %v7825_v28 = vld [vmem:[%s10188_s8 + $0x8] sm:$0xff] }
 0xa59   :  { %2255 = vperm.xlu1 %5747, %v7804_v47  }
 0xa5f   :  { %v1983_v15 = vpop.permute.xlu1 %1982  ;;  %v1995_v52 = vpop.permute.xlu0 %1994 }
 0xa60   :  { %v2030_v26 = vsel %vm332_vm11, %v1974_v53, %v1983_v15 }
 0xa61   :  { %v2034_v17 = vsel %vm463_vm0, %v2030_v26, %v1995_v52 }
 0xa62   :  { %v2038_v7 = vsel %vm468_vm1, %v2034_v17, %v2007_v24 }
 0xa67   :  { %v2019_v4 = vpop.permute.xlu1 %2018 }
 0xa68   :  { %v2042_v16 = vsel %vm473_vm2, %v2038_v7, %v2019_v4 }
 0xa69   :  { %v2046_v61 = vmul.f32 %v7814_v39, %v2042_v16 }
 0xa6b   :  { %5554 = vmatmul.msk.f32.vlgmr.msrb.gmra.mxu1 %vm482_vm3, %v2046_v61 }
 0xa6e   :  { %v1997_v51 = vpop.permute.xlu2 %1996 }
 0xa84   :  { %v1987_v26 = vpop.permute.xlu2 %1986 }
 0xa85   :  { %v1985_v10 = vpop.permute.xlu0 %1984  ;;  %v2009_v20 = vpop.permute.xlu1 %2008 }
 0xa86   :  { %v2031_v53 = vsel %vm332_vm11, %v1975_v33, %v1985_v10  ;;  %v2032_v33 = vsel %vm332_vm11, %v7745_v43, %v1987_v26  ;;  %v7846_v26 = vld [vmem:[%s10192_s14 + $0x8] sm:$0xff] }
 0xa87   :  { %v2035_v48 = vsel %vm463_vm0, %v2031_v53, %v1997_v51 }
 0xa88   :  { %v2039_v62 = vsel %vm468_vm1, %v2035_v48, %v2009_v20 }
 0xa8c   :  { %v2023_v4 = vpop.permute.xlu2 %2022 }
 0xa8d   :  { %v2021_v38 = vpop.permute.xlu0 %2020 }
 0xa8e   :  { %v2043_v22 = vsel %vm473_vm2, %v2039_v62, %v2021_v38 }
 0xa8f   :  { %v2047_v15 = vmul.f32 %v7825_v28, %v2043_v22 }
 0xa91   :  { %5555 = vmatmul.msk.f32.gmra.mxu1 %vm482_vm3, %v2047_v15 }
 0xa94   :  { %v2013_v48 = vpop.permute.xlu2 %2012 }
 0xa9b   :  { %v1999_v52 = vpop.permute.xlu1 %1998  ;;  %v2011_v17 = vpop.permute.xlu0 %2010 }
 0xa9c   :  { %v2036_v24 = vsel %vm463_vm0, %v2032_v33, %v1999_v52 }
 0xa9d   :  { %v2040_v7 = vsel %vm468_vm1, %v2036_v24, %v2011_v17  ;;  %v7853_v17 = vld [vmem:[%s10192_s14] sm:$0xff] }
 0xa9e   :  { %v2044_v16 = vsel %vm473_vm2, %v2040_v7, %v2023_v4  ;;  %v2091_v24 = vmul.f32 %v7853_v17, %v7479_v18  ;;  %v7860_v4 = vld [vmem:[%s10193_s16 + $0x8] sm:$0xff] }
 0xa9f   :  { %v2048_v61 = vmul.f32 %v7814_v39, %v2044_v16 }
 0xaa1   :  { %5556 = vmatmul.msk.f32.gmra.mxu1 %vm482_vm3, %v2048_v61 }
 0xaa3   :  { %v1989_v10 = vpop.permute.xlu1 %1988  ;;  %v2001_v51 = vpop.permute.xlu0 %2000 }
 0xaa4   :  { %v2033_v53 = vsel %vm332_vm11, %v7762_v63, %v1989_v10  ;;  %v2092_v63 = vmul.f32 %v7846_v26, %v7483_v0  ;;  %v7866_v0 = vld [vmem:[%s10193_s16] sm:$0xff] }
 0xaa5   :  { %v2037_v43 = vsel %vm463_vm0, %v2033_v53, %v2001_v51  ;;  %v2094_v51 = vmul.f32 %v7846_v26, %v7548_v34  ;;  %v5572_v34 = vld [vmem:[%s10183_s4 + $0x3] sm:$0x1] }
 0xaa6   :  { %v2041_v62 = vsel %vm468_vm1, %v2037_v43, %v2013_v48 }
 0xaab   :  { %v2025_v20 = vpop.permute.xlu1 %2024 }
 0xaac   :  { %v2045_v38 = vsel %vm473_vm2, %v2041_v62, %v2025_v20  ;;  %v2093_v20 = vmul.f32 %v7853_v17, %v7523_v46 }
 0xaad   :  { %v2049_v22 = vmul.f32 %v7825_v28, %v2045_v38 }
 0xaaf   :  { %5557 = vmatmul.msk.f32.gmra.mxu1 %vm482_vm3, %v2049_v22 }
 0xae8   :  { %v2079_v15 = vpop.f32.mrf.mxu1 }
 0xae9   :  { %v2095_v16 = vadd.f32 %v2091_v24, %v2079_v15 }
 0xaeb   :  { %v2099_v61 = vadd.f32 %v7866_v0, %v2095_v16 }
 0xb0e   :  { %v2082_v33 = vpop.f32.mrf.mxu1 }
 0xb0f   :  { %v2096_v52 = vadd.f32 %v2092_v63, %v2082_v33  ;;  %v2194_v33 = vmul.f32 %v5572_v34, %v10295_v44 }
 0xb11   :  { %v2100_v7 = vadd.f32 %v7860_v4, %v2096_v52 }
 0xb13   :  { %5885 = vtanh.f32 %v2100_v7  ;;  %v7885_v7 = vpop.permute.xlu0 %2202 }
 0xb14   :  { %5887 = vtanh.f32 %v2099_v61 }
 0xb19   :  { %v5886_v10 = vpop.eup %5885 }
 0xb1a   :  { %2121 = vrot.lane.b32.xlu2 %v5886_v10, %s6196_s29  ;;  %v5888_v18 = vpop.eup %5887  ;;  %v7889_v10 = vpop.permute.xlu1 %2207 }
 0xb1e   :  { %v2085_v53 = vpop.f32.mrf.mxu1 }
 0xb1f   :  { %v2097_v38 = vadd.f32 %v2093_v20, %v2085_v53 }
 0xb21   :  { %v2101_v22 = vadd.f32 %v7866_v0, %v2097_v38  ;;  %v5755_v38 = vld [vmem:[%s10180_s2 + $0x3] ss:$0 sm:$0xff] }
 0xb22   :  { %2119 = vrot.lane.b32.xlu2 %v5888_v18, %s6196_s29  ;;  %v5573_v18 = vld [vmem:[%s10183_s4 + $0xb] sm:$0x1] }
 0xb2c   :  { %v2088_v43 = vpop.f32.mrf.mxu1 }
 0xb2d   :  { %v2098_v48 = vadd.f32 %v2094_v51, %v2088_v43  ;;  %v2195_v43 = vmul.f32 %v5573_v18, %v10296_v9  ;;  %v7999_v9 = vld [vmem:[%s10184_s0 + $0xb8] sm:$0xff] }
 0xb2f   :  { %v2102_v62 = vadd.f32 %v7860_v4, %v2098_v48  ;;  %v2241_v48 = vpop.permute.xlu0 %2240 }
 0xb31   :  { %5889 = vtanh.f32 %v2102_v62 }
 0xb32   :  { %5891 = vtanh.f32 %v2101_v22  ;;  %v2108_v22 = vsub.f32 1.0, %v7693_v21 }
 0xb33   :  { %5893 = vtanh.f32 %v2194_v33 }
 0xb34   :  { %5895 = vtanh.f32 %v2195_v43  ;;  %v2107_v43 = vsub.f32 1.0, %v7681_v41 }
 0xb37   :  { %v5890_v15 = vpop.eup %5889 }
 0xb38   :  { %2125 = vrot.lane.b32.xlu2 %v5890_v15, %s6196_s29  ;;  %v5892_v63 = vpop.eup %5891 }
 0xb39   :  { %v5894_v46 = vpop.eup %5893 }
 0xb3a   :  { %v2198_v52 = vmul.f32 0.5, %v5894_v46  ;;  %v5896_v18 = vpop.eup %5895 }
 0xb3c   :  { %v7883_v24 = vperm.slane %v2198_v52, 0  ;;  %v2264_v52 = vmul.f32 %v5755_v38, %v2241_v48  ;;  %v2246_v48 = vpop.permute.xlu0 %2245 }
 0xb3e   :  { %v2226_v16 = vsub.f32 %v7885_v7, %v7883_v24  ;;  %v2227_v51 = vsub.f32 %v7889_v10, %v7883_v24 }
 0xb40   :  { %2123 = vrot.lane.b32.xlu2 %v5892_v63, %s6196_s29  ;;  %v2230_v61 = vand.u32 2147483647, %v2226_v16  ;;  %v2231_v62 = vand.u32 2147483647, %v2227_v51  ;;  %v2112_v63 = vmul.f32 %v2108_v22, %v7728_v5  ;;  %v2111_v22 = vmul.f32 %v2107_v43, %v7719_v55  ;;  %v6101_v43 = vld [vmem:[%s10187_s11 + $0x40] sm:$0xff] }
 0xb42   :  { %v2234_v53 = vmul.f32 %v2230_v61, %v6465_v8  ;;  %v2235_v33 = vmul.f32 %v2231_v62, %v6457_v60  ;;  %v7909_v61 = vld [vmem:[%s10184_s0 + $0x38] sm:$0xff] }
 0xb44   :  { %v2268_v20 = vadd.f32 1.0, %v2234_v53  ;;  %v2269_v5 = vadd.f32 1.0, %v2235_v33  ;;  %v2265_v33 = vmul.f32 %v5755_v38, %v2246_v48 }
 0xb46   :  { %v2272_v46 = vmul.f32 %v7501_v25, %v2268_v20  ;;  %v2199_v20 = vmul.f32 0.5, %v5896_v18 }
 0xb48   :  { %v2276_v51 = vmul.f32 %v2272_v46, %v2264_v52  ;;  %v7929_v46 = vpop.permute.xlu1 %2212  ;;  %v7936_v55 = vperm.slane %v2199_v20, 0 }
 0xb4a   :  { %v2280_v31 = vmul.f32 %v2276_v51, %v6500_v35  ;;  %v2228_v51 = vsub.f32 %v7929_v46, %v7936_v55 }
 0xb4c   :  { %v7944_v18 = vadd.f32 %v6489_v23, %v2280_v31  ;;  %v2232_v48 = vand.u32 2147483647, %v2228_v51  ;;  %v5756_v51 = vld [vmem:[%s10180_s2 + $0xb] ss:$0 sm:$0xff] }
 0xb4e   :  { %v2236_v31 = vmul.f32 %v2232_v48, %v6465_v8  ;;  %v2251_v48 = vpop.permute.xlu0 %2250 }
 0xb4f   :  { %v2266_v59 = vmul.f32 %v5756_v51, %v2251_v48 }
 0xb50   :  { %v7960_v20 = vpop.permute.xlu1 %2217 }
 0xb74   :  { %v2122_v15 = vpop.permute.xlu2 %2121 }
 0xb75   :  { %v2132_v34 = vmul.f32 %v2122_v15, %v7693_v21 }
 0xb77   :  { %v2136_v16 = vadd.f32 %v2132_v34, %v2112_v63  ;;  %v7926_v63 = vld [vmem:[%s10186_s9 + $0x8] sm:$0xff] }
 0xb78   :  { %v2273_v34 = vmul.f32 %v7926_v63, %v2269_v5 }
 0xb79   :  { %v7914_v53 = vsel %vm1951_vm14, %v2136_v16, %v7513_v11  ;;  %v7934_v16 = vld [vmem:[%s10184_s0 + $0x30] sm:$0xff]  ;;  %vm2567_vm14 = vcmp.ne.f32.partialorder %v7785_v56, 0.0 }
 0xb7a   :  { %10301 = vst [vmem:[#allocation16_spill] sm:$0xff] %v7914_v53  ;;  %v2289_v21 = vsel %vm327_vm8, %v7909_v61, %v7914_v53  ;;  %v2277_v5 = vmul.f32 %v2273_v34, %v2265_v33  ;;  %v2229_v34 = vsub.f32 %v7960_v20, %v7936_v55  ;;  %v6104_v33 = vld [vmem:[%s10187_s11 + $0x28] sm:$0xff] }
 0xb7b   :  { %2312 = vmatpush.msra.mxu2 %v2289_v21 }
 0xb7c   :  { %v2120_v62 = vpop.permute.xlu2 %2119  ;;  %v2281_v21 = vmul.f32 %v2277_v5, %v6503_v36  ;;  %v2270_v5 = vadd.f32 1.0, %v2236_v31  ;;  %v6107_v31 = vld [vmem:[%s10187_s11 + $0x10] sm:$0xff] }
 0xb7d   :  { %v2131_v15 = vmul.f32 %v2120_v62, %v7681_v41  ;;  %v6102_v62 = vld [vmem:[%s10187_s11 + $0x38] sm:$0xff] }
 0xb7e   :  { %v2274_v58 = vmul.f32 %v7501_v25, %v2270_v5  ;;  %v6109_v25 = vld [vmem:[%s10187_s11] sm:$0xff]  ;;  %v2109_v5 = vsub.f32 1.0, %v7703_v54 }
 0xb7f   :  { %v2135_v52 = vadd.f32 %v2131_v15, %v2111_v22  ;;  %v7966_v22 = vadd.f32 %v6492_v27, %v2281_v21  ;;  %v6103_v15 = vld [vmem:[%s10187_s11 + $0x30] sm:$0xff]  ;;  %v2110_v21 = vsub.f32 1.0, %v7712_v49 }
 0xb81   :  { %v7941_v41 = vsel %vm1950_vm10, %v2135_v52, %v7535_v14  ;;  %v6105_v52 = vld [vmem:[%s10187_s11 + $0x20] sm:$0xff]  ;;  %v2114_v11 = vmul.f32 %v2110_v21, %v7754_v50  ;;  %vm2568_vm10 = vcmp.ne.f32.partialorder %v7792_v57, 0.0 }
 0xb82   :  { %10302 = vst [vmem:[#allocation9_spill] sm:$0xff] %v7941_v41  ;;  %v2288_v38 = vsel %vm327_vm8, %v7934_v16, %v7941_v41 }
 0xb83   :  { %2313 = vmatpush.msra.mxu2 %v2288_v38  ;;  %v2233_v38 = vand.u32 2147483647, %v2229_v34 }
 0xb84   :  { %5574 = vmatmul.msk.f32.vlgmr.msra.gmra.mxu2 %vm332_vm11, %v7944_v18 }
 0xb85   :  { %5718 = vmatpush.msrb.mxu2 %v6100_v42  ;;  %v2237_v34 = vmul.f32 %v2233_v38, %v6457_v60  ;;  %v2256_v38 = vpop.permute.xlu1 %2255 }
 0xb87   :  { %5719 = vmatpush.msrb.mxu2 %v6101_v43 }
 0xb89   :  { %5720 = vmatpush.msrb.mxu2 %v6102_v62 }
 0xb8b   :  { %5721 = vmatpush.msrb.mxu2 %v6103_v15 }
 0xb8c   :  { %5575 = vmatmul.msk.f32.gmra.mxu2 %vm332_vm11, %v7966_v22 }
 0xb8d   :  { %5722 = vmatpush.msrb.mxu2 %v6104_v33 }
 0xb8f   :  { %5723 = vmatpush.msrb.mxu2 %v6105_v52 }
 0xb91   :  { %5724 = vmatpush.msrb.mxu2 %v6106_v30 }
 0xb92   :  { %v2126_v12 = vpop.permute.xlu2 %2125 }
 0xb93   :  { %v2134_v14 = vmul.f32 %v2126_v12, %v7712_v49  ;;  %5725 = vmatpush.msrb.mxu2 %v6107_v31  ;;  %v6108_v12 = vld [vmem:[%s10187_s11 + $0x8] sm:$0xff] }
 0xb95   :  { %v2138_v8 = vadd.f32 %v2134_v14, %v2114_v11  ;;  %5726 = vmatpush.msrb.mxu2 %v6108_v12  ;;  %v2271_v11 = vadd.f32 1.0, %v2237_v34  ;;  %v2278_v14 = vmul.f32 %v2274_v58, %v2266_v59  ;;  %v2267_v58 = vmul.f32 %v5756_v51, %v2256_v38  ;;  %v6111_v51 = vld [vmem:[%s10191_s12 + $0x40] sm:$0xff] }
 0xb97   :  { %v8007_v49 = vsel %vm1953_vm9, %v2138_v8, %v7574_v37  ;;  %5727 = vmatpush.msrb.mxu2 %v6109_v25  ;;  %v2113_v8 = vmul.f32 %v2109_v5, %v7740_v19  ;;  %v2282_v48 = vmul.f32 %v2278_v14, %v6500_v35  ;;  %v2275_v34 = vmul.f32 %v7926_v63, %v2271_v11  ;;  %v6113_v11 = vld [vmem:[%s10191_s12 + $0x30] sm:$0xff] }
 0xb98   :  { %10303 = vst [vmem:[#allocation10_spill] sm:$0xff] %v8007_v49  ;;  %v2291_v50 = vsel %vm327_vm8, %v7999_v9, %v8007_v49  ;;  %v6117_v14 = vld [vmem:[%s10191_s12 + $0x10] sm:$0xff] }
 0xb99   :  { %3113 = vmatpush.msra.mxu2 %v6100_v42  ;;  %2341 = vmatpush.msra.mxu3 %v2291_v50  ;;  %v8023_v42 = vld [vmem:[%s10184_s0 + $0xb0] sm:$0xff]  ;;  %v2279_v19 = vmul.f32 %v2275_v34, %v2267_v58  ;;  %v6119_v50 = vld [vmem:[%s10191_s12] sm:$0xff] }
 0xb9a   :  { %v2124_v21 = vpop.permute.xlu2 %2123 }
 0xb9b   :  { %3114 = vmatpush.msra.mxu2 %v6101_v43  ;;  %v2133_v45 = vmul.f32 %v2124_v21, %v7703_v54  ;;  %v8031_v54 = vadd.f32 %v6489_v23, %v2282_v48 }
 0xb9d   :  { %3115 = vmatpush.msra.mxu2 %v6102_v62  ;;  %v2137_v59 = vadd.f32 %v2133_v45, %v2113_v8  ;;  %v2350_v45 = vmul.f32 %v7944_v18, %v7883_v24  ;;  %v2352_v48 = vmul.f32 %v8031_v54, %v7936_v55 }
 0xb9f   :  { %3116 = vmatpush.msra.mxu2 %v6103_v15  ;;  %v8028_v43 = vsel %vm1952_vm12, %v2137_v59, %v7592_v3  ;;  %v2283_v15 = vmul.f32 %v2279_v19, %v6503_v36  ;;  %v2354_v34 = vsel %vm332_vm11, %v2350_v45, 0.0  ;;  %v2360_v58 = vsel %vm332_vm11, %v2352_v48, 0.0 }
 0xba0   :  { %10304 = vst [vmem:[#allocation11_spill] sm:$0xff] %v8028_v43  ;;  %v2290_v62 = vsel %vm327_vm8, %v8023_v42, %v8028_v43  ;;  %v2351_v59 = vmul.f32 %v7966_v22, %v7883_v24  ;;  %v2591_v24 = vsel %vm2567_vm14, 1, %v10282_v1 }
 0xba1   :  { %3117 = vmatpush.msra.mxu2 %v6104_v33  ;;  %2342 = vmatpush.msra.mxu3 %v2290_v62  ;;  %v6112_v33 = vld [vmem:[%s10191_s12 + $0x38] sm:$0xff] }
 0xba2   :  { %5576 = vmatmul.msk.f32.vlgmr.msra.gmra.mxu3 %vm332_vm11, %v8031_v54  ;;  %v2357_v19 = vsel %vm332_vm11, %v2351_v59, 0.0  ;;  %v2592_v54 = vsel %vm2568_vm10, 1, %v10282_v1 }
 0xba3   :  { %3118 = vmatpush.msra.mxu2 %v6105_v52  ;;  %5728 = vmatpush.msrb.mxu3 %v6110_v40  ;;  %v2287_v52 = vadd.f32 %v6492_v27, %v2283_v15 }
 0xba5   :  { %3119 = vmatpush.msra.mxu2 %v6106_v30  ;;  %5729 = vmatpush.msrb.mxu3 %v6111_v51  ;;  %v6114_v30 = vld [vmem:[%s10191_s12 + $0x28] sm:$0xff]  ;;  %v2353_v62 = vmul.f32 %v2287_v52, %v7936_v55 }
 0xba7   :  { %3120 = vmatpush.msra.mxu2 %v6107_v31  ;;  %5730 = vmatpush.msrb.mxu3 %v6112_v33  ;;  %v6115_v31 = vld [vmem:[%s10191_s12 + $0x20] sm:$0xff]  ;;  %v2363_v18 = vsel %vm332_vm11, %v2353_v62, 0.0 }
 0xba9   :  { %3121 = vmatpush.msra.mxu2 %v6108_v12  ;;  %5731 = vmatpush.msrb.mxu3 %v6113_v11  ;;  %v6116_v12 = vld [vmem:[%s10191_s12 + $0x18] sm:$0xff] }
 0xbaa   :  { %5577 = vmatmul.msk.f32.gmra.mxu3 %vm332_vm11, %v2287_v52 }
 0xbab   :  { %3122 = vmatpush.msra.mxu2 %v6109_v25  ;;  %5732 = vmatpush.msrb.mxu3 %v6114_v30  ;;  %v6118_v25 = vld [vmem:[%s10191_s12 + $0x8] sm:$0xff] }
 0xbad   :  { %5733 = vmatpush.msrb.mxu3 %v6115_v31 }
 0xbaf   :  { %5734 = vmatpush.msrb.mxu3 %v6116_v12 }
 0xbb1   :  { %5735 = vmatpush.msrb.mxu3 %v6117_v14 }
 0xbb3   :  { %5736 = vmatpush.msrb.mxu3 %v6118_v25 }
 0xbb5   :  { %5737 = vmatpush.msrb.mxu3 %v6119_v50 }
 0xbb7   :  { %3382 = vmatpush.msra.mxu3 %v6110_v40 }
 0xbb9   :  { %3383 = vmatpush.msra.mxu3 %v6111_v51 }
 0xbbb   :  { %3384 = vmatpush.msra.mxu3 %v6112_v33  ;;  %v2594_v33 = vsel %vm2570_vm15, 1, %v10282_v1 }
 0xbbd   :  { %3385 = vmatpush.msra.mxu3 %v6113_v11 }
 0xbbf   :  { %3386 = vmatpush.msra.mxu3 %v6114_v30 }
 0xbc1   :  { %3387 = vmatpush.msra.mxu3 %v6115_v31 }
 0xbc3   :  { %3388 = vmatpush.msra.mxu3 %v6116_v12 }
 0xbc5   :  { %3389 = vmatpush.msra.mxu3 %v6117_v14  ;;  %v2593_v14 = vsel %vm2569_vm6, 1, %v10282_v1 }
 0xbc7   :  { %3390 = vmatpush.msra.mxu3 %v6118_v25 }
 0xbc9   :  { %3391 = vmatpush.msra.mxu3 %v6119_v50 }
 0xc07   :  { %v8071_v5 = vpop.f32.mrf.mxu2 }
 0xc08   :  { %2382 = vrot.lane.b32.xlu0 %v8071_v5, %s6193_s5  ;;  %2370 = vrot.lane.b32.xlu1 %v8071_v5, %s6194_s20 }
 0xc0f   :  { %v2318_v38 = vpop.f32.mrf.mxu2 }
 0xc10   :  { %2396 = vrot.lane.b32.xlu1 %v2318_v38, %s6192_s19  ;;  %2384 = vrot.lane.b32.xlu2 %v2318_v38, %s6193_s5 }
 0xc11   :  { %2372 = vrot.lane.b32.xlu0 %v2318_v38, %s6194_s20 }
 0xc19   :  { %2408 = vrot.lane.b32.xlu0 %v2318_v38, %s6195_s21 }
 0xc25   :  { %v2344_v21 = vpop.f32.mrf.mxu3 }
 0xc26   :  { %2398 = vrot.lane.b32.xlu0 %v2344_v21, %s6192_s19  ;;  %2386 = vrot.lane.b32.xlu1 %v2344_v21, %s6193_s5 }
 0xc27   :  { %2374 = vrot.lane.b32.xlu2 %v2344_v21, %s6194_s20 }
 0xc2d   :  { %v8084_v8 = vpop.f32.mrf.mxu3 }
 0xc2e   :  { %2394 = vrot.lane.b32.xlu1 %v8071_v5, %s6192_s19  ;;  %2388 = vrot.lane.b32.xlu0 %v8084_v8, %s6193_s5 }
 0xc2f   :  { %2410 = vrot.lane.b32.xlu2 %v2344_v21, %s6195_s21 }
 0xc36   :  { %2400 = vrot.lane.b32.xlu1 %v8084_v8, %s6192_s19  ;;  %2412 = vrot.lane.b32.xlu0 %v8084_v8, %s6195_s21 }
 0xc37   :  { %2376 = vrot.lane.b32.xlu2 %v8084_v8, %s6194_s20 }
 0xc3f   :  { %2406 = vrot.lane.b32.xlu2 %v8071_v5, %s6195_s21 }
 0xc60   :  { %2355 = vadd.xlane.f32.xlu1 %v2354_v34  ;;  %2361 = vadd.xlane.f32.xlu0 %v2360_v58 }
 0xc68   :  { %2358 = vadd.xlane.f32.xlu2 %v2357_v19 }
 0xc6a   :  { %v2385_v15 = vpop.permute.xlu2 %2384 }
 0xc70   :  { %2364 = vadd.xlane.f32.xlu2 %v2363_v18 }
 0xc74   :  { %2599 = vperm.xlu0 %5746, %v2592_v54  }
 0xc79   :  { %2577 = vrot.lane.b32.xlu1 %v7914_v53, %s6197_s25 }
 0xc7a   :  { %v2383_v40 = vpop.permute.xlu0 %2382  ;;  %v2371_v55 = vpop.permute.xlu1 %2370 }
 0xc7b   :  { %v2418_v59 = vsel %vm332_vm11, %v8071_v5, %v2371_v55 }
 0xc7c   :  { %2579 = vrot.lane.b32.xlu0 %v8028_v43, %s6197_s25  ;;  %v2422_v19 = vsel %vm463_vm0, %v2418_v59, %v2383_v40 }
 0xc81   :  { %2596 = vperm.xlu1 %5747, %v2591_v24   ;;  %v2375_v57 = vpop.permute.xlu2 %2374 }
 0xc82   :  { %v2397_v52 = vpop.permute.xlu1 %2396  ;;  %v2420_v50 = vsel %vm332_vm11, %v2344_v21, %v2375_v57 }
 0xc83   :  { %v2373_v22 = vpop.permute.xlu0 %2372 }
 0xc84   :  { %2581 = vrot.lane.b32.xlu0 %v8007_v49, %s6197_s25  ;;  %v2419_v51 = vsel %vm332_vm11, %v2318_v38, %v2373_v22 }
 0xc85   :  { %v2423_v56 = vsel %vm463_vm0, %v2419_v51, %v2385_v15 }
 0xc86   :  { %v2427_v11 = vsel %vm468_vm1, %v2423_v56, %v2397_v52  ;;  %v8155_v52 = vld [vmem:[%s10189_s13 + $0x8] sm:$0xff] }
 0xc88   :  { %2575 = vrot.lane.b32.xlu2 %v7941_v41, %s6197_s25 }
 0xc89   :  { %2605 = vperm.xlu1 %5747, %v2594_v33   ;;  %v2411_v31 = vpop.permute.xlu2 %2410 }
 0xc8b   :  { %v2409_v30 = vpop.permute.xlu0 %2408 }
 0xc8c   :  { %v2431_v47 = vsel %vm473_vm2, %v2427_v11, %v2409_v30 }
 0xc8d   :  { %v2435_v12 = vmul.f32 %v7825_v28, %v2431_v47  ;;  %v8161_v47 = vld [vmem:[%s10190_s15 + $0x8] sm:$0xff] }
 0xc8f   :  { %5579 = vmatmul.msk.f32.vlgmr.msrb.gmra.mxu2 %vm482_vm3, %v2435_v12 }
 0xc90   :  { %2602 = vperm.xlu2 %5748, %v2593_v14  }
 0xc91   :  { %v2377_v25 = vpop.permute.xlu2 %2376 }
 0xc92   :  { %v2421_v57 = vsel %vm332_vm11, %v8084_v8, %v2377_v25 }
 0xc98   :  { %v2387_v38 = vpop.permute.xlu1 %2386  ;;  %v2399_v45 = vpop.permute.xlu0 %2398 }
 0xc99   :  { %v2424_v6 = vsel %vm463_vm0, %v2420_v50, %v2387_v38  ;;  %v2407_v21 = vpop.permute.xlu2 %2406  ;;  %v8167_v38 = vld [vmem:[%s10189_s13] sm:$0xff] }
 0xc9a   :  { %v2428_v48 = vsel %vm468_vm1, %v2424_v6, %v2399_v45 }
 0xc9b   :  { %v2432_v34 = vsel %vm473_vm2, %v2428_v48, %v2411_v31 }
 0xc9c   :  { %v2436_v58 = vmul.f32 %v7814_v39, %v2432_v34 }
 0xc9e   :  { %5580 = vmatmul.msk.f32.gmra.mxu2 %vm482_vm3, %v2436_v58 }
 0xca0   :  { %v2395_v62 = vpop.permute.xlu1 %2394  ;;  %v2389_v18 = vpop.permute.xlu0 %2388 }
 0xca1   :  { %v2426_v54 = vsel %vm468_vm1, %v2422_v19, %v2395_v62  ;;  %v2425_v5 = vsel %vm463_vm0, %v2421_v57, %v2389_v18  ;;  %v8174_v62 = vld [vmem:[%s10190_s15] sm:$0xff] }
 0xca2   :  { %v2430_v15 = vsel %vm473_vm2, %v2426_v54, %v2407_v21 }
 0xca3   :  { %v2434_v24 = vmul.f32 %v7814_v39, %v2430_v15 }
 0xca5   :  { %5578 = vmatmul.msk.f32.vlgmr.msra.gmra.mxu0 %vm482_vm3, %v2434_v24 }
 0xca8   :  { %v2401_v55 = vpop.permute.xlu1 %2400  ;;  %v2413_v22 = vpop.permute.xlu0 %2412 }
 0xca9   :  { %v2429_v40 = vsel %vm468_vm1, %v2425_v5, %v2401_v55 }
 0xcaa   :  { %v2433_v51 = vsel %vm473_vm2, %v2429_v40, %v2413_v22 }
 0xcab   :  { %v2437_v33 = vmul.f32 %v7825_v28, %v2433_v51 }
 0xcad   :  { %5581 = vmatmul.msk.f32.gmra.mxu2 %vm482_vm3, %v2437_v33 }
 0xcd3   :  { %v2362_v14 = vpop.xlane.xlu0 %2361  ;;  %v2356_v25 = vpop.xlane.xlu1 %2355 }
 0xcd4   :  { %v2481_v45 = vmul.f32 %v8167_v38, %v2362_v14  ;;  %v2479_v48 = vmul.f32 %v8167_v38, %v2356_v25 }
 0xcdb   :  { %v2359_v56 = vpop.xlane.xlu2 %2358 }
 0xcdc   :  { %v2480_v8 = vmul.f32 %v8155_v52, %v2359_v56 }
 0xce3   :  { %v2365_v55 = vpop.xlane.xlu2 %2364 }
 0xce6   :  { %v8179_v25 = vpop.permute.xlu0 %2599 }
 0xce7   :  { %vm2608_vm5 = vcmp.eq.s32.totalorder %v8179_v25, 1 }
 0xd12   :  { %v2470_v11 = vpop.f32.mrf.mxu2 }
 0xd13   :  { %v2484_v30 = vadd.f32 %v2480_v8, %v2470_v11  ;;  %v2482_v8 = vmul.f32 %v8155_v52, %v2365_v55 }
 0xd15   :  { %v2488_v31 = vadd.f32 %v8161_v47, %v2484_v30 }
 0xd17   :  { %v5583_v12 = vmul.f32 -1.442695, %v2488_v31 }
 0xd19   :  { %5897 = vpow2.f32 %v5583_v12 }
 0xd1f   :  { %v5898_v50 = vpop.eup %5897 }
 0xd20   :  { %v2504_v6 = vadd.f32 1.0, %v5898_v50 }
 0xd21   :  { %v2473_v34 = vpop.f32.mrf.mxu2 }
 0xd22   :  { %5899 = vrcp.f32 %v2504_v6  ;;  %v2485_v58 = vadd.f32 %v2481_v45, %v2473_v34  ;;  %v2467_v59 = vpop.f32.mrf.mxu0  ;;  %v2533_v22 = vand.u32 2147483648, %v2504_v6  ;;  %v2531_v51 = vand.u32 2147483647, %v2504_v6 }
 0xd23   :  { %v2483_v19 = vadd.f32 %v2479_v48, %v2467_v59  ;;  %vm2527_vm4 = vweird.f32 %v2504_v6  ;;  %v2578_v48 = vpop.permute.xlu1 %2577 }
 0xd24   :  { %v2489_v18 = vadd.f32 %v8174_v62, %v2485_v58  ;;  %v2534_v14 = vor.u32 1.1754944e-38, %v2533_v22  ;;  %vm2532_vm13 = vcmp.eq.f32.partialorder %v2531_v51, 8.507059e+37 }
 0xd25   :  { %v2487_v21 = vadd.f32 %v8174_v62, %v2483_v19 }
 0xd26   :  { %v5584_v54 = vmul.f32 -1.442695, %v2489_v18  ;;  %v2576_v18 = vpop.permute.xlu2 %2575 }
 0xd27   :  { %v5582_v15 = vmul.f32 -1.442695, %v2487_v21 }
 0xd28   :  { %v5900_v24 = vpop.eup %5899  ;;  %5901 = vpow2.f32 %v5584_v54 }
 0xd29   :  { %v2523_v57 = vmul.f32 %v5900_v24, %v2504_v6  ;;  %5903 = vpow2.f32 %v5582_v15  ;;  %vm2528_vm12 = vweird.f32 %v5900_v24 }
 0xd2a   :  { %vm2529_vm7 = vmor %vm2527_vm4, %vm2528_vm12 }
 0xd2b   :  { %v2524_v5 = vsub.f32 1.0, %v2523_v57 }
 0xd2d   :  { %v2525_v40 = vmul.f32 %v5900_v24, %v2524_v5 }
 0xd2e   :  { %v5902_v33 = vpop.eup %5901 }
 0xd2f   :  { %v5904_v56 = vpop.eup %5903  ;;  %v2505_v11 = vadd.f32 1.0, %v5902_v33  ;;  %v2526_v30 = vadd.f32 %v5900_v24, %v2525_v40 }
 0xd30   :  { %v2503_v31 = vadd.f32 1.0, %v5904_v56  ;;  %v2476_v12 = vpop.f32.mrf.mxu2 }
 0xd31   :  { %5905 = vrcp.f32 %v2505_v11  ;;  %v2486_v50 = vadd.f32 %v2482_v8, %v2476_v12  ;;  %v2530_v45 = vsel %vm2529_vm7, %v5900_v24, %v2526_v30  ;;  %v2548_v55 = vand.u32 2147483648, %v2505_v11 }
 0xd32   :  { %5907 = vrcp.f32 %v2503_v31  ;;  %v8181_v34 = vsel %vm2532_vm13, %v2534_v14, %v2530_v45  ;;  %v2546_v40 = vand.u32 2147483647, %v2505_v11  ;;  %v2518_v51 = vand.u32 2147483648, %v2503_v31  ;;  %v8189_v45 = vpop.permute.xlu2 %2602 }
 0xd33   :  { %v2490_v58 = vadd.f32 %v8161_v47, %v2486_v50  ;;  %v2588_v59 = vmul.f32 %v2578_v48, %v8181_v34  ;;  %v2516_v8 = vand.u32 2147483647, %v2503_v31  ;;  %vm2542_vm14 = vweird.f32 %v2505_v11 }
 0xd34   :  { %v2549_v14 = vor.u32 1.1754944e-38, %v2548_v55  ;;  %vm2512_vm6 = vweird.f32 %v2503_v31  ;;  %vm2547_vm12 = vcmp.eq.f32.partialorder %v2546_v40, 8.507059e+37  ;;  %vm2609_vm13 = vcmp.eq.s32.totalorder %v8189_v45, 1 }
 0xd35   :  { %v5585_v6 = vmul.f32 -1.442695, %v2490_v58  ;;  %v2612_v19 = vsel %vm2608_vm5, %v2588_v59, %v2578_v48  ;;  %v2519_v58 = vor.u32 1.1754944e-38, %v2518_v51  ;;  %v2580_v59 = vpop.permute.xlu0 %2579  ;;  %vm2517_vm7 = vcmp.eq.f32.partialorder %v2516_v8, 8.507059e+37 }
 0xd36   :  { %2621 = vrot.lane.b32.xlu2 %v2612_v19, %s6196_s29 }
 0xd37   :  { %v5906_v21 = vpop.eup %5905  ;;  %5909 = vpow2.f32 %v5585_v6  ;;  %v8191_v6 = vpop.permute.xlu1 %2596 }
 0xd38   :  { %v5908_v54 = vpop.eup %5907  ;;  %v2538_v15 = vmul.f32 %v5906_v21, %v2505_v11  ;;  %vm2543_vm9 = vweird.f32 %v5906_v21 }
 0xd39   :  { %v2508_v24 = vmul.f32 %v5908_v54, %v2503_v31  ;;  %vm2513_vm10 = vweird.f32 %v5908_v54  ;;  %vm2544_vm15 = vmor %vm2542_vm14, %vm2543_vm9  ;;  %vm2607_vm9 = vcmp.eq.s32.totalorder %v8191_v6, 1 }
 0xd3a   :  { %v2539_v57 = vsub.f32 1.0, %v2538_v15  ;;  %vm2514_vm4 = vmor %vm2512_vm6, %vm2513_vm10 }
 0xd3b   :  { %v2509_v5 = vsub.f32 1.0, %v2508_v24 }
 0xd3c   :  { %v2540_v22 = vmul.f32 %v5906_v21, %v2539_v57 }
 0xd3d   :  { %v5910_v33 = vpop.eup %5909  ;;  %v2510_v56 = vmul.f32 %v5908_v54, %v2509_v5 }
 0xd3e   :  { %v2506_v30 = vadd.f32 1.0, %v5910_v33  ;;  %v2541_v12 = vadd.f32 %v5906_v21, %v2540_v22 }
 0xd3f   :  { %v2511_v50 = vadd.f32 %v5908_v54, %v2510_v56  ;;  %v8207_v8 = vpop.permute.xlu1 %2605 }
 0xd40   :  { %5911 = vrcp.f32 %v2506_v30  ;;  %v2545_v48 = vsel %vm2544_vm15, %v5906_v21, %v2541_v12  ;;  %v2563_v22 = vand.u32 2147483648, %v2506_v30  ;;  %v2561_v51 = vand.u32 2147483647, %v2506_v30 }
 0xd41   :  { %v8193_v19 = vsel %vm2547_vm12, %v2549_v14, %v2545_v48  ;;  %v2515_v15 = vsel %vm2514_vm4, %v5908_v54, %v2511_v50  ;;  %vm2557_vm14 = vweird.f32 %v2506_v30  ;;  %v2582_v14 = vpop.permute.xlu0 %2581  ;;  %vm2610_vm12 = vcmp.eq.s32.totalorder %v8207_v8, 1  ;;  %v8463_v8 = vld [vmem:[%s10186_s9 + $0x8] sm:$0xff] }
 0xd42   :  { %v2589_v11 = vmul.f32 %v2580_v59, %v8193_v19  ;;  %v8196_v24 = vsel %vm2517_vm7, %v2519_v58, %v2515_v15  ;;  %v2564_v56 = vor.u32 1.1754944e-38, %v2563_v22  ;;  %vm2562_vm6 = vcmp.eq.f32.partialorder %v2561_v51, 8.507059e+37 }
 0xd43   :  { %v2587_v31 = vmul.f32 %v2576_v18, %v8196_v24 }
 0xd44   :  { %v2613_v21 = vsel %vm2609_vm13, %v2589_v11, %v2580_v59 }
 0xd45   :  { %2623 = vrot.lane.b32.xlu1 %v2613_v21, %s6196_s29  ;;  %v2611_v57 = vsel %vm2607_vm9, %v2587_v31, %v2576_v18  ;;  %v5601_v21 = vld [vmem:[%s10181_s3 + $0x48] sm:$0xff] }
 0xd46   :  { %v5912_v54 = vpop.eup %5911  ;;  %2619 = vrot.lane.b32.xlu0 %v2611_v57, %s6196_s29 }
 0xd47   :  { %v2553_v5 = vmul.f32 %v5912_v54, %v2506_v30  ;;  %vm2558_vm10 = vweird.f32 %v5912_v54 }
 0xd48   :  { %vm2559_vm15 = vmor %vm2557_vm14, %vm2558_vm10 }
 0xd49   :  { %v2554_v55 = vsub.f32 1.0, %v2553_v5 }
 0xd4b   :  { %v2555_v40 = vmul.f32 %v5912_v54, %v2554_v55  ;;  %v5602_v55 = vld [vmem:[%s10181_s3 + $0xc0] sm:$0xff] }
 0xd4d   :  { %v2556_v33 = vadd.f32 %v5912_v54, %v2555_v40 }
 0xd4f   :  { %v2560_v12 = vsel %vm2559_vm15, %v5912_v54, %v2556_v33  ;;  %v2840_v54 = vmul.f32 %v5601_v21, %v10291_v13  ;;  %v5603_v33 = vld [vmem:[%s10181_s3 + $0xc8] sm:$0xff]  ;;  %v8301_v21 = vld [vmem:[%s10245_s26 + $0xc0] sm:$0xff] }
 0xd50   :  { %v8209_v50 = vsel %vm2562_vm6, %v2564_v56, %v2560_v12  ;;  %v8288_v56 = vld [vmem:[%s10245_s26 + $0x40] sm:$0xff]  ;;  %v2842_v12 = vmul.f32 %v5603_v33, %v10293_v32  ;;  %vm3226_vm7 = vcmp.ne.f32.partialorder %v8301_v21, 0.0 }
 0xd51   :  { %v2590_v18 = vmul.f32 %v2582_v14, %v8209_v50 }
 0xd53   :  { %v2614_v48 = vsel %vm2610_vm12, %v2590_v18, %v2582_v14 }
 0xd54   :  { %2625 = vrot.lane.b32.xlu2 %v2614_v48, %s6196_s29  ;;  %v8295_v48 = vld [vmem:[%s10245_s26 + $0x48] sm:$0xff] }
 0xd55   :  { %vm3225_vm4 = vcmp.ne.f32.partialorder %v8295_v48, 0.0 }
 0xd90   :  { %v8224_v59 = vpop.permute.xlu2 %2621 }
 0xd91   :  { %v8229_v15 = vsel %vm327_vm8, %v7909_v61, %v8224_v59  ;;  %v5600_v61 = vld [vmem:[%s10181_s3 + $0x40] sm:$0xff] }
 0xdae   :  { %v8259_v31 = vpop.permute.xlu2 %2625 }
 0xdaf   :  { %v8267_v57 = vsel %vm327_vm8, %v7999_v9, %v8259_v31  ;;  %v2841_v9 = vmul.f32 %v5602_v55, %v10292_v29 }
 0xdb8   :  { %v8216_v58 = vpop.permute.xlu0 %2619 }
 0xdb9   :  { %v2631_v30 = vsel %vm327_vm8, %v7934_v16, %v8216_v58  ;;  %v8236_v16 = vpop.permute.xlu1 %2623 }
 0xdba   :  { %2663 = vrot.lane.b32.xlu2 %v2631_v30, %s6192_s19  ;;  %2651 = vrot.lane.b32.xlu0 %v2631_v30, %s6193_s5  ;;  %v8241_v11 = vsel %vm327_vm8, %v8023_v42, %v8236_v16  ;;  %v2839_v42 = vmul.f32 %v5600_v61, %v10290_v2 }
 0xdbb   :  { %2639 = vrot.lane.b32.xlu1 %v2631_v30, %s6194_s20 }
 0xdbc   :  { %5913 = vtanh.f32 %v2839_v42 }
 0xdbd   :  { %5915 = vtanh.f32 %v2840_v54  ;;  %v8307_v54 = vld [vmem:[%s10245_s26 + $0xc8] sm:$0xff] }
 0xdbe   :  { %5917 = vtanh.f32 %v2841_v9 }
 0xdbf   :  { %5919 = vtanh.f32 %v2842_v12 }
 0xdc2   :  { %2665 = vrot.lane.b32.xlu2 %v8229_v15, %s6192_s19  ;;  %2641 = vrot.lane.b32.xlu0 %v8229_v15, %s6194_s20  ;;  %v5914_v5 = vpop.eup %5913 }
 0xdc3   :  { %2675 = vrot.lane.b32.xlu1 %v2631_v30, %s6195_s21  ;;  %v2847_v22 = vmul.f32 0.5, %v5914_v5  ;;  %v5916_v40 = vpop.eup %5915 }
 0xdc4   :  { %v2848_v51 = vmul.f32 0.5, %v5916_v40  ;;  %v5918_v14 = vpop.eup %5917 }
 0xdc5   :  { %v2849_v18 = vmul.f32 0.5, %v5918_v14  ;;  %v5920_v61 = vpop.eup %5919 }
 0xdc6   :  { %v2850_v42 = vmul.f32 0.5, %v5920_v61 }
 0xdca   :  { %2643 = vrot.lane.b32.xlu2 %v8241_v11, %s6194_s20  ;;  %2677 = vrot.lane.b32.xlu0 %v8229_v15, %s6195_s21 }
 0xdcb   :  { %2653 = vrot.lane.b32.xlu1 %v8229_v15, %s6193_s5 }
 0xdd2   :  { %2679 = vrot.lane.b32.xlu2 %v8241_v11, %s6195_s21  ;;  %2667 = vrot.lane.b32.xlu0 %v8241_v11, %s6192_s19 }
 0xdd3   :  { %2655 = vrot.lane.b32.xlu1 %v8241_v11, %s6193_s5 }
 0xdda   :  { %2669 = vrot.lane.b32.xlu2 %v8267_v57, %s6192_s19  ;;  %2645 = vrot.lane.b32.xlu0 %v8267_v57, %s6194_s20 }
 0xddb   :  { %2657 = vrot.lane.b32.xlu1 %v8267_v57, %s6193_s5 }
 0xde2   :  { %2681 = vrot.lane.b32.xlu0 %v8267_v57, %s6195_s21 }
 0xde3   :  { %2859 = vperm.xlu1 %5747, %v2847_v22  }
 0xdea   :  { %2864 = vperm.xlu0 %5746, %v2848_v51  }
 0xdeb   :  { %2897 = vperm.xlu1 %5747, %v8288_v56  }
 0xdf2   :  { %2869 = vperm.xlu0 %5746, %v2849_v18  }
 0xdf3   :  { %2902 = vperm.xlu1 %5747, %v8295_v48  }
 0xdfa   :  { %2874 = vperm.xlu0 %5746, %v2850_v42  }
 0xdfb   :  { %2907 = vperm.xlu1 %5747, %v8301_v21  }
 0xe02   :  { %2912 = vperm.xlu0 %5746, %v8307_v54  }
 0xe14   :  { %v2664_v5 = vpop.permute.xlu2 %2663 }
 0xe1c   :  { %v2666_v51 = vpop.permute.xlu2 %2665 }
 0xe24   :  { %v2644_v37 = vpop.permute.xlu2 %2643 }
 0xe2c   :  { %v2652_v55 = vpop.permute.xlu0 %2651 }
 0xe2d   :  { %v2640_v22 = vpop.permute.xlu1 %2639 }
 0xe2e   :  { %v2687_v9 = vsel %vm332_vm11, %v2631_v30, %v2640_v22 }
 0xe2f   :  { %v2691_v40 = vsel %vm463_vm0, %v2687_v9, %v2652_v55 }
 0xe30   :  { %v2695_v12 = vsel %vm468_vm1, %v2691_v40, %v2664_v5  ;;  %v2689_v40 = vsel %vm332_vm11, %v8241_v11, %v2644_v37 }
 0xe34   :  { %v2642_v33 = vpop.permute.xlu0 %2641 }
 0xe35   :  { %v2676_v14 = vpop.permute.xlu1 %2675  ;;  %v2688_v3 = vsel %vm332_vm11, %v8229_v15, %v2642_v33 }
 0xe36   :  { %v2699_v18 = vsel %vm473_vm2, %v2695_v12, %v2676_v14 }
 0xe37   :  { %v2703_v61 = vmul.f32 %v7814_v39, %v2699_v18  ;;  %v2680_v18 = vpop.permute.xlu2 %2679 }
 0xe39   :  { %5586 = vmatmul.msk.f32.vlgmr.msra.gmra.mxu1 %vm482_vm3, %v2703_v61 }
 0xe3c   :  { %v2678_v42 = vpop.permute.xlu0 %2677 }
 0xe3d   :  { %v2654_v32 = vpop.permute.xlu1 %2653 }
 0xe3e   :  { %v2692_v30 = vsel %vm463_vm0, %v2688_v3, %v2654_v32 }
 0xe3f   :  { %v2696_v55 = vsel %vm468_vm1, %v2692_v30, %v2666_v51  ;;  %v2670_v37 = vpop.permute.xlu2 %2669 }
 0xe40   :  { %v2700_v22 = vsel %vm473_vm2, %v2696_v55, %v2678_v42 }
 0xe41   :  { %v2704_v5 = vmul.f32 %v7825_v28, %v2700_v22 }
 0xe43   :  { %5587 = vmatmul.msk.f32.vlgmr.msrb.gmra.mxu3 %vm482_vm3, %v2704_v5 }
 0xe44   :  { %v2668_v9 = vpop.permute.xlu0 %2667 }
 0xe45   :  { %v2656_v12 = vpop.permute.xlu1 %2655 }
 0xe46   :  { %v2693_v14 = vsel %vm463_vm0, %v2689_v40, %v2656_v12 }
 0xe47   :  { %v2697_v15 = vsel %vm468_vm1, %v2693_v14, %v2668_v9 }
 0xe48   :  { %v2701_v32 = vsel %vm473_vm2, %v2697_v15, %v2680_v18 }
 0xe49   :  { %v2705_v3 = vmul.f32 %v7814_v39, %v2701_v32  ;;  %v2749_v39 = vmul.f32 %v7846_v26, %v7889_v10  ;;  %v2751_v10 = vmul.f32 %v7846_v26, %v7960_v20  ;;  %v5604_v26 = vld [vmem:[%s10183_s4 + $0x4] sm:$0x1] }
 0xe4a   :  { %v2851_v20 = vmul.f32 %v5604_v26, %v10295_v44 }
 0xe4b   :  { %5588 = vmatmul.msk.f32.gmra.mxu3 %vm482_vm3, %v2705_v3 }
 0xe4c   :  { %v2646_v51 = vpop.permute.xlu0 %2645 }
 0xe4d   :  { %v2690_v33 = vsel %vm332_vm11, %v8267_v57, %v2646_v51  ;;  %v2658_v61 = vpop.permute.xlu1 %2657  ;;  %v2748_v57 = vmul.f32 %v7853_v17, %v7885_v7  ;;  %v2750_v7 = vmul.f32 %v7853_v17, %v7929_v46 }
 0xe4e   :  { %v2694_v42 = vsel %vm463_vm0, %v2690_v33, %v2658_v61 }
 0xe4f   :  { %v2698_v30 = vsel %vm468_vm1, %v2694_v42, %v2670_v37 }
 0xe54   :  { %v2682_v11 = vpop.permute.xlu0 %2681 }
 0xe55   :  { %v2702_v55 = vsel %vm473_vm2, %v2698_v30, %v2682_v11  ;;  %v8359_v30 = vpop.permute.xlu1 %2859 }
 0xe56   :  { %v2706_v22 = vmul.f32 %v7825_v28, %v2702_v55 }
 0xe58   :  { %5589 = vmatmul.msk.f32.gmra.mxu3 %vm482_vm3, %v2706_v22  ;;  %v10305_v22 = vld [vmem:[#allocation6_spill] sm:$0xff] }
 0xeb6   :  { %v2736_v40 = vpop.f32.mrf.mxu1 }
 0xeb7   :  { %v2752_v14 = vadd.f32 %v2748_v57, %v2736_v40  ;;  %v10306_v40 = vld [vmem:[#allocation8_spill] sm:$0xff] }
 0xeb9   :  { %v2756_v18 = vadd.f32 %v7866_v0, %v2752_v14 }
 0xec6   :  { %v2739_v5 = vpop.f32.mrf.mxu3 }
 0xec7   :  { %v2753_v9 = vadd.f32 %v2749_v39, %v2739_v5 }
 0xec9   :  { %v2757_v12 = vadd.f32 %v7860_v4, %v2753_v9  ;;  %v8367_v9 = vpop.permute.xlu0 %2864 }
 0xecb   :  { %5921 = vtanh.f32 %v2757_v12 }
 0xecc   :  { %5923 = vtanh.f32 %v2756_v18  ;;  %v2898_v18 = vpop.permute.xlu1 %2897 }
 0xece   :  { %v2742_v28 = vpop.f32.mrf.mxu3 }
 0xecf   :  { %v2754_v61 = vadd.f32 %v2750_v7, %v2742_v28 }
 0xed1   :  { %v5922_v15 = vpop.eup %5921  ;;  %v2758_v42 = vadd.f32 %v7866_v0, %v2754_v61  ;;  %v5605_v0 = vld [vmem:[%s10183_s4 + $0xc] sm:$0x1]  ;;  %v8385_v26 = vpop.permute.xlu0 %2869 }
 0xed2   :  { %2778 = vrot.lane.b32.xlu2 %v5922_v15, %s6196_s29  ;;  %v5924_v32 = vpop.eup %5923  ;;  %v2852_v39 = vmul.f32 %v5605_v0, %v10305_v22 }
 0xeda   :  { %2776 = vrot.lane.b32.xlu2 %v5924_v32, %s6196_s29  ;;  %v5757_v32 = vld [vmem:[%s10180_s2 + $0x4] ss:$0 sm:$0xff] }
 0xedb   :  { %v2745_v3 = vpop.f32.mrf.mxu3 }
 0xedc   :  { %v2755_v51 = vadd.f32 %v2751_v10, %v2745_v3  ;;  %v2765_v10 = vsub.f32 1.0, %v8181_v34 }
 0xede   :  { %v2759_v33 = vadd.f32 %v7860_v4, %v2755_v51  ;;  %v2769_v7 = vmul.f32 %v2765_v10, %v8224_v59  ;;  %v8392_v59 = vld [vmem:[%s10184_s0 + $0x48] sm:$0xff] }
 0xee0   :  { %5925 = vtanh.f32 %v2759_v33 }
 0xee1   :  { %5927 = vtanh.f32 %v2758_v42  ;;  %v8382_v42 = vld [vmem:[%s10186_s9] sm:$0xff] }
 0xee2   :  { %5929 = vtanh.f32 %v2851_v20 }
 0xee3   :  { %5931 = vtanh.f32 %v2852_v39  ;;  %v2764_v39 = vsub.f32 1.0, %v8196_v24 }
 0xee6   :  { %v5926_v37 = vpop.eup %5925 }
 0xee7   :  { %2782 = vrot.lane.b32.xlu2 %v5926_v37, %s6196_s29  ;;  %v5928_v11 = vpop.eup %5927 }
 0xee8   :  { %v5930_v17 = vpop.eup %5929 }
 0xee9   :  { %v2855_v4 = vmul.f32 0.5, %v5930_v17  ;;  %v5932_v14 = vpop.eup %5931 }
 0xeea   :  { %v2856_v3 = vmul.f32 0.5, %v5932_v14  ;;  %v2768_v14 = vmul.f32 %v2764_v39, %v8216_v58 }
 0xeeb   :  { %v8357_v46 = vperm.slane %v2855_v4, 0 }
 0xeec   :  { %v8387_v20 = vperm.slane %v2856_v3, 0 }
 0xeed   :  { %v2883_v55 = vsub.f32 %v8359_v30, %v8357_v46  ;;  %v2884_v12 = vsub.f32 %v8367_v9, %v8357_v46 }
 0xeef   :  { %2780 = vrot.lane.b32.xlu2 %v5928_v11, %s6196_s29  ;;  %v2887_v5 = vand.u32 2147483647, %v2883_v55  ;;  %v2888_v28 = vand.u32 2147483647, %v2884_v12  ;;  %v2921_v11 = vmul.f32 %v5757_v32, %v2898_v18 }
 0xef1   :  { %v2891_v57 = vmul.f32 %v2887_v5, %v10306_v40  ;;  %v2892_v61 = vmul.f32 %v2888_v28, %v6457_v60  ;;  %v2885_v5 = vsub.f32 %v8385_v26, %v8387_v20 }
 0xef3   :  { %v2925_v15 = vadd.f32 1.0, %v2891_v57  ;;  %v2926_v4 = vadd.f32 1.0, %v2892_v61  ;;  %v2903_v57 = vpop.permute.xlu1 %2902  ;;  %v2889_v10 = vand.u32 2147483647, %v2885_v5 }
 0xef4   :  { %v2922_v28 = vmul.f32 %v5757_v32, %v2903_v57 }
 0xef5   :  { %v2929_v37 = vmul.f32 %v8382_v42, %v2925_v15  ;;  %v2930_v15 = vmul.f32 %v7926_v63, %v2926_v4  ;;  %v2893_v32 = vmul.f32 %v2889_v10, %v10306_v40  ;;  %v2767_v4 = vsub.f32 1.0, %v8209_v50 }
 0xef7   :  { %v2933_v0 = vmul.f32 %v2929_v37, %v2921_v11  ;;  %v2927_v37 = vadd.f32 1.0, %v2893_v32  ;;  %v2771_v39 = vmul.f32 %v2767_v4, %v8259_v31 }
 0xef9   :  { %v2937_v18 = vmul.f32 %v2933_v0, %v6500_v35 }
 0xefb   :  { %v2908_v0 = vpop.permute.xlu1 %2907 }
 0xf2c   :  { %v2779_v51 = vpop.permute.xlu2 %2778 }
 0xf2d   :  { %v2789_v33 = vmul.f32 %v2779_v51, %v8181_v34  ;;  %v8412_v51 = vld [vmem:[%s10184_s0 + $0x40] sm:$0xff] }
 0xf2f   :  { %v2793_v17 = vadd.f32 %v2789_v33, %v2769_v7  ;;  %v8414_v7 = vpop.permute.xlu0 %2874  ;;  %v2934_v33 = vmul.f32 %v2930_v15, %v2922_v28  ;;  %v8446_v15 = vld [vmem:[%s10184_s0 + $0xc8] sm:$0xff] }
 0xf30   :  { %v2886_v61 = vsub.f32 %v8414_v7, %v8387_v20 }
 0xf31   :  { %v8397_v34 = vsel %vm2608_vm5, %v2793_v17, %v7914_v53  ;;  %v2938_v6 = vmul.f32 %v2934_v33, %v6503_v36  ;;  %v5758_v17 = vld [vmem:[%s10180_s2 + $0xc] ss:$0 sm:$0xff]  ;;  %vm3224_vm5 = vcmp.ne.f32.partialorder %v8288_v56, 0.0 }
 0xf32   :  { %10307 = vst [vmem:[#allocation12_spill] sm:$0xff] %v8397_v34  ;;  %v2946_v55 = vsel %vm327_vm8, %v8392_v59, %v8397_v34  ;;  %v2890_v11 = vand.u32 2147483647, %v2886_v61  ;;  %v6140_v53 = vld [vmem:[%s10187_s11 + $0x8] sm:$0xff] }
 0xf33   :  { %2969 = vmatpush.msrb.mxu0 %v2946_v55  ;;  %v2942_v57 = vadd.f32 %v6492_v27, %v2938_v6 }
 0xf34   :  { %v2777_v12 = vpop.permute.xlu2 %2776 }
 0xf35   :  { %v2788_v25 = vmul.f32 %v2777_v12, %v8196_v24  ;;  %v8422_v24 = vadd.f32 %v6489_v23, %v2937_v18  ;;  %v2894_v12 = vmul.f32 %v2890_v11, %v6457_v60 }
 0xf37   :  { %v2792_v3 = vadd.f32 %v2788_v25, %v2768_v14  ;;  %v2931_v14 = vmul.f32 %v8382_v42, %v2927_v37  ;;  %v2923_v25 = vmul.f32 %v5758_v17, %v2908_v0  ;;  %v2913_v33 = vpop.permute.xlu0 %2912  ;;  %v8469_v0 = vld [vmem:[%s10184_s0 + $0xc0] sm:$0xff] }
 0xf38   :  { %v2924_v11 = vmul.f32 %v5758_v17, %v2913_v33 }
 0xf39   :  { %v8419_v58 = vsel %vm2607_vm9, %v2792_v3, %v7941_v41  ;;  %v2935_v28 = vmul.f32 %v2931_v14, %v2923_v25  ;;  %v2766_v3 = vsub.f32 1.0, %v8193_v19  ;;  %v8896_v41 = vld [vmem:[%s10184_s0 + $0xd0] sm:$0xff] }
 0xf3a   :  { %10308 = vst [vmem:[#allocation2_spill] sm:$0xff] %v8419_v58  ;;  %v2945_v63 = vsel %vm327_vm8, %v8412_v51, %v8419_v58 }
 0xf3b   :  { %2970 = vmatpush.msrb.mxu0 %v2945_v63  ;;  %v2770_v32 = vmul.f32 %v2766_v3, %v8236_v16  ;;  %v2939_v6 = vmul.f32 %v2935_v28, %v6500_v35  ;;  %v3008_v28 = vmul.f32 %v2942_v57, %v8357_v46 }
 0xf3c   :  { %5606 = vmatmul.msk.f32.vlgmr.msrb.gmra.mxu0 %vm332_vm11, %v8422_v24 }
 0xf3d   :  { %v2943_v16 = vadd.f32 %v6489_v23, %v2939_v6  ;;  %v3014_v3 = vsel %vm332_vm11, %v3008_v28, 0.0 }
 0xf3f   :  { %v3009_v33 = vmul.f32 %v2943_v16, %v8387_v20 }
 0xf41   :  { %v2783_v55 = vpop.permute.xlu2 %2782 }
 0xf42   :  { %v2791_v5 = vmul.f32 %v2783_v55, %v8209_v50  ;;  %v2928_v50 = vadd.f32 1.0, %v2894_v12 }
 0xf44   :  { %v2795_v18 = vadd.f32 %v2791_v5, %v2771_v39  ;;  %5607 = vmatmul.msk.f32.gmra.mxu0 %vm332_vm11, %v2942_v57  ;;  %v2932_v37 = vmul.f32 %v8463_v8, %v2928_v50  ;;  %v3250_v57 = vsel %vm3226_vm7, 1, %v10282_v1 }
 0xf46   :  { %v8451_v31 = vsel %vm2610_vm12, %v2795_v18, %v8007_v49  ;;  %v2936_v55 = vmul.f32 %v2932_v37, %v2924_v11  ;;  %v3007_v18 = vmul.f32 %v8422_v24, %v8357_v46  ;;  %v3248_v46 = vsel %vm3224_vm5, 1, %v10282_v1 }
 0xf47   :  { %10309 = vst [vmem:[#allocation4_spill] sm:$0xff] %v8451_v31  ;;  %v2948_v10 = vsel %vm327_vm8, %v8446_v15, %v8451_v31  ;;  %v3249_v24 = vsel %vm3225_vm4, 1, %v10282_v1 }
 0xf48   :  { %2998 = vmatpush.msrb.mxu1 %v2948_v10  ;;  %v2940_v17 = vmul.f32 %v2936_v55, %v6503_v36  ;;  %v3011_v50 = vsel %vm332_vm11, %v3007_v18, 0.0 }
 0xf49   :  { %v2781_v63 = vpop.permute.xlu2 %2780 }
 0xf4a   :  { %v2790_v61 = vmul.f32 %v2781_v63, %v8193_v19  ;;  %v2944_v5 = vadd.f32 %v6492_v27, %v2940_v17 }
 0xf4c   :  { %v2794_v4 = vadd.f32 %v2790_v61, %v2770_v32  ;;  %v3010_v10 = vmul.f32 %v2944_v5, %v8387_v20  ;;  %v3017_v32 = vsel %vm332_vm11, %v3009_v33, 0.0 }
 0xf4e   :  { %v8474_v19 = vsel %vm2609_vm13, %v2794_v4, %v8028_v43  ;;  %v3020_v63 = vsel %vm332_vm11, %v3010_v10, 0.0  ;;  %vm3227_vm13 = vcmp.ne.f32.partialorder %v8307_v54, 0.0  ;;  %v8538_v54 = vld [vmem:[%s10188_s8] sm:$0xff]  ;;  %v8549_v10 = vld [vmem:[%s10188_s8 + $0x8] sm:$0xff] }
 0xf4f   :  { %v2947_v39 = vsel %vm327_vm8, %v8469_v0, %v8474_v19  ;;  %v3251_v6 = vsel %vm3227_vm13, 1, %v10282_v1  ;;  %v6136_v43 = vld [vmem:[%s10187_s11 + $0x28] sm:$0xff] }
 0xf50   :  { %2999 = vmatpush.msrb.mxu1 %v2947_v39 }
 0xf51   :  { %5608 = vmatmul.msk.f32.vlgmr.msrb.gmra.mxu1 %vm332_vm11, %v2943_v16 }
 0xf59   :  { %5609 = vmatmul.msk.f32.gmra.mxu1 %vm332_vm11, %v2944_v5 }
 0xfb9   :  { %v2972_v12 = vpop.f32.mrf.mxu0 }
 0xfba   :  { %3051 = vrot.lane.b32.xlu0 %v2972_v12, %s6192_s19  ;;  %3039 = vrot.lane.b32.xlu2 %v2972_v12, %s6193_s5 }
 0xfbb   :  { %3027 = vrot.lane.b32.xlu1 %v2972_v12, %s6194_s20 }
 0xfc1   :  { %v2975_v45 = vpop.f32.mrf.mxu0 }
 0xfc2   :  { %3041 = vrot.lane.b32.xlu0 %v2975_v45, %s6193_s5  ;;  %3029 = vrot.lane.b32.xlu2 %v2975_v45, %s6194_s20 }
 0xfc3   :  { %3063 = vrot.lane.b32.xlu1 %v2972_v12, %s6195_s21 }
 0xfca   :  { %3065 = vrot.lane.b32.xlu2 %v2975_v45, %s6195_s21 }
 0xfcb   :  { %3053 = vrot.lane.b32.xlu1 %v2975_v45, %s6192_s19 }
 0xfce   :  { %v3001_v14 = vpop.f32.mrf.mxu1 }
 0xfcf   :  { %3031 = vrot.lane.b32.xlu0 %v3001_v14, %s6194_s20 }
 0xfd2   :  { %3055 = vrot.lane.b32.xlu2 %v3001_v14, %s6192_s19 }
 0xfd3   :  { %3043 = vrot.lane.b32.xlu1 %v3001_v14, %s6193_s5 }
 0xfd6   :  { %v8496_v25 = vpop.f32.mrf.mxu1 }
 0xfd7   :  { %3067 = vrot.lane.b32.xlu0 %v3001_v14, %s6195_s21 }
 0xfda   :  { %3045 = vrot.lane.b32.xlu2 %v8496_v25, %s6193_s5 }
 0xfdb   :  { %3033 = vrot.lane.b32.xlu1 %v8496_v25, %s6194_s20 }
 0xfdf   :  { %3057 = vrot.lane.b32.xlu0 %v8496_v25, %s6192_s19 }
 0xfe3   :  { %3069 = vrot.lane.b32.xlu1 %v8496_v25, %s6195_s21 }
0x1003   :  { %3012 = vadd.xlane.f32.xlu2 %v3011_v50 }
0x1009   :  { %3015 = vadd.xlane.f32.xlu0 %v3014_v3 }
0x100b   :  { %3021 = vadd.xlane.f32.xlu2 %v3020_v63 }
0x100d   :  { %3018 = vadd.xlane.f32.xlu1 %v3017_v32 }
0x1014   :  { %v3040_v20 = vpop.permute.xlu2 %3039 }
0x101c   :  { %v3030_v37 = vpop.permute.xlu2 %3029 }
0x101d   :  { %3232 = vrot.lane.b32.xlu0 %v8419_v58, %s6197_s25  ;;  %v3076_v17 = vsel %vm332_vm11, %v2975_v45, %v3030_v37 }
0x1023   :  { %3253 = vperm.xlu2 %5748, %v3248_v46  }
0x1024   :  { %v3066_v5 = vpop.permute.xlu2 %3065 }
0x1025   :  { %3256 = vperm.xlu0 %5746, %v3249_v24  }
0x1026   :  { %3234 = vrot.lane.b32.xlu1 %v8397_v34, %s6197_s25 }
0x102b   :  { %3236 = vrot.lane.b32.xlu2 %v8474_v19, %s6197_s25 }
0x102c   :  { %v3052_v48 = vpop.permute.xlu0 %3051  ;;  %v3056_v46 = vpop.permute.xlu2 %3055 }
0x102d   :  { %v3028_v56 = vpop.permute.xlu1 %3027  ;;  %3259 = vperm.xlu0 %5746, %v3250_v57  }
0x102e   :  { %3238 = vrot.lane.b32.xlu1 %v8451_v31, %s6197_s25  ;;  %v3075_v61 = vsel %vm332_vm11, %v2972_v12, %v3028_v56 }
0x102f   :  { %v3079_v21 = vsel %vm463_vm0, %v3075_v61, %v3040_v20 }
0x1030   :  { %v3083_v11 = vsel %vm468_vm1, %v3079_v21, %v3052_v48 }
0x1033   :  { %3262 = vperm.xlu2 %5748, %v3251_v6  }
0x1034   :  { %v3042_v39 = vpop.permute.xlu0 %3041  ;;  %v3046_v6 = vpop.permute.xlu2 %3045 }
0x1035   :  { %v3064_v4 = vpop.permute.xlu1 %3063  ;;  %v3080_v12 = vsel %vm463_vm0, %v3076_v17, %v3042_v39 }
0x1036   :  { %v3087_v16 = vsel %vm473_vm2, %v3083_v11, %v3064_v4 }
0x1037   :  { %v3091_v55 = vmul.f32 %v8538_v54, %v3087_v16 }
0x1039   :  { %5610 = vmatmul.msk.f32.vlgmr.msra.gmra.mxu2 %vm482_vm3, %v3091_v55 }
0x103d   :  { %v3054_v18 = vpop.permute.xlu1 %3053 }
0x103e   :  { %v3084_v50 = vsel %vm468_vm1, %v3080_v12, %v3054_v18 }
0x103f   :  { %v3088_v28 = vsel %vm473_vm2, %v3084_v50, %v3066_v5 }
0x1040   :  { %v3092_v3 = vmul.f32 %v8549_v10, %v3088_v28 }
0x1041   :  { %v3032_v33 = vpop.permute.xlu0 %3031 }
0x1042   :  { %5611 = vmatmul.msk.f32.gmra.mxu2 %vm482_vm3, %v3092_v3  ;;  %v3077_v45 = vsel %vm332_vm11, %v3001_v14, %v3032_v33 }
0x1045   :  { %v3044_v63 = vpop.permute.xlu1 %3043 }
0x1046   :  { %v3081_v32 = vsel %vm463_vm0, %v3077_v45, %v3044_v63 }
0x1047   :  { %v3085_v20 = vsel %vm468_vm1, %v3081_v32, %v3056_v46 }
0x1049   :  { %v3068_v24 = vpop.permute.xlu0 %3067 }
0x104a   :  { %v3089_v57 = vsel %vm473_vm2, %v3085_v20, %v3068_v24 }
0x104b   :  { %v3093_v56 = vmul.f32 %v8538_v54, %v3089_v57 }
0x104d   :  { %v3034_v48 = vpop.permute.xlu1 %3033  ;;  %5612 = vmatmul.msk.f32.gmra.mxu2 %vm482_vm3, %v3093_v56 }
0x104e   :  { %v3078_v61 = vsel %vm332_vm11, %v8496_v25, %v3034_v48 }
0x104f   :  { %v3082_v14 = vsel %vm463_vm0, %v3078_v61, %v3046_v6 }
0x1051   :  { %v3058_v21 = vpop.permute.xlu0 %3057 }
0x1052   :  { %v3086_v37 = vsel %vm468_vm1, %v3082_v14, %v3058_v21 }
0x1055   :  { %v3070_v11 = vpop.permute.xlu1 %3069 }
0x1056   :  { %v3090_v4 = vsel %vm473_vm2, %v3086_v37, %v3070_v11 }
0x1057   :  { %v3094_v16 = vmul.f32 %v8549_v10, %v3090_v4 }
0x1059   :  { %5613 = vmatmul.msk.f32.gmra.mxu2 %vm482_vm3, %v3094_v16 }
0x1076   :  { %v3013_v55 = vpop.xlane.xlu2 %3012 }
0x1077   :  { %v3136_v39 = vmul.f32 %v8167_v38, %v3013_v55 }
0x107c   :  { %v3016_v12 = vpop.xlane.xlu0 %3015 }
0x107d   :  { %v3137_v50 = vmul.f32 %v8155_v52, %v3016_v12 }
0x107e   :  { %v3022_v57 = vpop.xlane.xlu2 %3021 }
0x1080   :  { %v3019_v46 = vpop.xlane.xlu1 %3018 }
0x1081   :  { %v3138_v24 = vmul.f32 %v8167_v38, %v3019_v46 }
0x10bc   :  { %v3124_v17 = vpop.f32.mrf.mxu2 }
0x10bd   :  { %v3140_v5 = vadd.f32 %v3136_v39, %v3124_v17  ;;  %v3139_v17 = vmul.f32 %v8155_v52, %v3022_v57 }
0x10bf   :  { %v3144_v25 = vadd.f32 %v8174_v62, %v3140_v5  ;;  %v8573_v5 = vpop.permute.xlu2 %3253 }
0x10c0   :  { %vm3264_vm6 = vcmp.eq.s32.totalorder %v8573_v5, 1 }
0x10c1   :  { %v5614_v18 = vmul.f32 -1.442695, %v3144_v25  ;;  %v3233_v25 = vpop.permute.xlu0 %3232 }
0x10c3   :  { %5933 = vpow2.f32 %v5614_v18 }
0x10c5   :  { %v3127_v28 = vpop.f32.mrf.mxu2 }
0x10c6   :  { %v3141_v3 = vadd.f32 %v3137_v50, %v3127_v28 }
0x10c8   :  { %v3145_v33 = vadd.f32 %v8161_v47, %v3141_v3 }
0x10c9   :  { %v5934_v45 = vpop.eup %5933 }
0x10ca   :  { %v3160_v63 = vadd.f32 1.0, %v5934_v45  ;;  %v5615_v32 = vmul.f32 -1.442695, %v3145_v33 }
0x10cc   :  { %5935 = vrcp.f32 %v3160_v63  ;;  %v3175_v4 = vand.u32 2147483648, %v3160_v63  ;;  %v3173_v55 = vand.u32 2147483647, %v3160_v63  ;;  %vm3169_vm10 = vweird.f32 %v3160_v63 }
0x10cd   :  { %5937 = vpow2.f32 %v5615_v32 }
0x10ce   :  { %v3176_v38 = vor.u32 1.1754944e-38, %v3175_v4  ;;  %vm3174_vm15 = vcmp.eq.f32.partialorder %v3173_v55, 8.507059e+37 }
0x10d0   :  { %v3130_v20 = vpop.f32.mrf.mxu2 }
0x10d1   :  { %v3142_v56 = vadd.f32 %v3138_v24, %v3130_v20 }
0x10d2   :  { %v5936_v48 = vpop.eup %5935 }
0x10d3   :  { %v5938_v61 = vpop.eup %5937  ;;  %v3165_v6 = vmul.f32 %v5936_v48, %v3160_v63  ;;  %v3146_v21 = vadd.f32 %v8174_v62, %v3142_v56  ;;  %vm3170_vm9 = vweird.f32 %v5936_v48 }
0x10d4   :  { %v3161_v14 = vadd.f32 1.0, %v5938_v61  ;;  %vm3171_vm14 = vmor %vm3169_vm10, %vm3170_vm9 }
0x10d5   :  { %v3166_v37 = vsub.f32 1.0, %v3165_v6  ;;  %v5616_v11 = vmul.f32 -1.442695, %v3146_v21  ;;  %v8583_v6 = vpop.permute.xlu0 %3256 }
0x10d6   :  { %5939 = vrcp.f32 %v3161_v14  ;;  %v3190_v24 = vand.u32 2147483648, %v3161_v14  ;;  %v3188_v56 = vand.u32 2147483647, %v3161_v14  ;;  %vm3184_vm5 = vweird.f32 %v3161_v14 }
0x10d7   :  { %5941 = vpow2.f32 %v5616_v11  ;;  %v3167_v16 = vmul.f32 %v5936_v48, %v3166_v37  ;;  %v3235_v37 = vpop.permute.xlu1 %3234  ;;  %vm3265_vm13 = vcmp.eq.s32.totalorder %v8583_v6, 1 }
0x10d8   :  { %v3191_v61 = vor.u32 1.1754944e-38, %v3190_v24  ;;  %vm3189_vm7 = vcmp.eq.f32.partialorder %v3188_v56, 8.507059e+37 }
0x10d9   :  { %v3168_v39 = vadd.f32 %v5936_v48, %v3167_v16 }
0x10db   :  { %v3172_v12 = vsel %vm3171_vm14, %v5936_v48, %v3168_v39 }
0x10dc   :  { %v5940_v62 = vpop.eup %5939  ;;  %v3133_v18 = vpop.f32.mrf.mxu2  ;;  %v8575_v50 = vsel %vm3174_vm15, %v3176_v38, %v3172_v12 }
0x10dd   :  { %v5942_v28 = vpop.eup %5941  ;;  %v3180_v3 = vmul.f32 %v5940_v62, %v3161_v14  ;;  %v3143_v33 = vadd.f32 %v3139_v17, %v3133_v18  ;;  %v3244_v45 = vmul.f32 %v3233_v25, %v8575_v50  ;;  %vm3185_vm12 = vweird.f32 %v5940_v62 }
0x10de   :  { %v3162_v63 = vadd.f32 1.0, %v5942_v28  ;;  %vm3186_vm4 = vmor %vm3184_vm5, %vm3185_vm12  ;;  %v8592_v28 = vpop.permute.xlu0 %3259 }
0x10df   :  { %v3181_v32 = vsub.f32 1.0, %v3180_v3  ;;  %v3147_v52 = vadd.f32 %v8161_v47, %v3143_v33  ;;  %v3268_v46 = vsel %vm3264_vm6, %v3244_v45, %v3233_v25  ;;  %v3237_v33 = vpop.permute.xlu2 %3236  ;;  %vm3266_vm12 = vcmp.eq.s32.totalorder %v8592_v28, 1  ;;  %v6142_v28 = vld [vmem:[%s10191_s12 + $0x48] sm:$0xff] }
0x10e0   :  { %5943 = vrcp.f32 %v3162_v63  ;;  %3276 = vrot.lane.b32.xlu0 %v3268_v46, %s6196_s29  ;;  %v3205_v17 = vand.u32 2147483648, %v3162_v63  ;;  %v3203_v12 = vand.u32 2147483647, %v3162_v63  ;;  %vm3199_vm10 = vweird.f32 %v3162_v63 }
0x10e1   :  { %v5617_v20 = vmul.f32 -1.442695, %v3147_v52  ;;  %v3182_v57 = vmul.f32 %v5940_v62, %v3181_v32 }
0x10e2   :  { %v3206_v18 = vor.u32 1.1754944e-38, %v3205_v17  ;;  %vm3204_vm15 = vcmp.eq.f32.partialorder %v3203_v12, 8.507059e+37 }
0x10e3   :  { %5945 = vpow2.f32 %v5617_v20  ;;  %v3183_v48 = vadd.f32 %v5940_v62, %v3182_v57 }
0x10e5   :  { %v3187_v21 = vsel %vm3186_vm4, %v5940_v62, %v3183_v48 }
0x10e6   :  { %v5944_v47 = vpop.eup %5943  ;;  %v8585_v11 = vsel %vm3189_vm7, %v3191_v61, %v3187_v21 }
0x10e7   :  { %v3195_v4 = vmul.f32 %v5944_v47, %v3162_v63  ;;  %v3245_v16 = vmul.f32 %v3235_v37, %v8585_v11  ;;  %vm3200_vm9 = vweird.f32 %v5944_v47  ;;  %v8601_v21 = vpop.permute.xlu2 %3262 }
0x10e8   :  { %vm3201_vm14 = vmor %vm3199_vm10, %vm3200_vm9  ;;  %vm3267_vm10 = vcmp.eq.s32.totalorder %v8601_v21, 1 }
0x10e9   :  { %v5946_v55 = vpop.eup %5945  ;;  %v3196_v39 = vsub.f32 1.0, %v3195_v4  ;;  %v3269_v14 = vsel %vm3265_vm13, %v3245_v16, %v3235_v37  ;;  %v3239_v37 = vpop.permute.xlu1 %3238 }
0x10ea   :  { %v3163_v38 = vadd.f32 1.0, %v5946_v55  ;;  %3278 = vrot.lane.b32.xlu1 %v3269_v14, %s6196_s29 }
0x10eb   :  { %v3197_v25 = vmul.f32 %v5944_v47, %v3196_v39 }
0x10ec   :  { %5947 = vrcp.f32 %v3163_v38  ;;  %v3220_v20 = vand.u32 2147483648, %v3163_v38  ;;  %v3218_v56 = vand.u32 2147483647, %v3163_v38  ;;  %vm3214_vm4 = vweird.f32 %v3163_v38 }
0x10ed   :  { %v3198_v62 = vadd.f32 %v5944_v47, %v3197_v25 }
0x10ee   :  { %v3221_v61 = vor.u32 1.1754944e-38, %v3220_v20  ;;  %vm3219_vm9 = vcmp.eq.f32.partialorder %v3218_v56, 8.507059e+37  ;;  %v8676_v20 = vld [vmem:[%s10245_s26 + $0x50] sm:$0xff] }
0x10ef   :  { %v3202_v3 = vsel %vm3201_vm14, %v5944_v47, %v3198_v62 }
0x10f0   :  { %v8594_v45 = vsel %vm3204_vm15, %v3206_v18, %v3202_v3 }
0x10f1   :  { %v3246_v32 = vmul.f32 %v3237_v33, %v8594_v45 }
0x10f2   :  { %v5948_v52 = vpop.eup %5947 }
0x10f3   :  { %v3210_v46 = vmul.f32 %v5948_v52, %v3163_v38  ;;  %v3270_v24 = vsel %vm3266_vm12, %v3246_v32, %v3237_v33  ;;  %vm3215_vm5 = vweird.f32 %v5948_v52  ;;  %v5634_v32 = vld [vmem:[%s10181_s3 + $0xd0] sm:$0xff] }
0x10f4   :  { %3280 = vrot.lane.b32.xlu2 %v3270_v24, %s6196_s29  ;;  %vm3216_vm7 = vmor %vm3214_vm4, %vm3215_vm5 }
0x10f5   :  { %v3211_v63 = vsub.f32 1.0, %v3210_v46 }
0x10f7   :  { %v3212_v57 = vmul.f32 %v5948_v52, %v3211_v63  ;;  %v5635_v63 = vld [vmem:[%s10181_s3 + $0xd8] sm:$0xff] }
0x10f9   :  { %v3213_v48 = vadd.f32 %v5948_v52, %v3212_v57  ;;  %v10310_v57 = vld [vmem:[#allocation5_spill] sm:$0xff] }
0x10fa   :  { %v3499_v56 = vmul.f32 %v5635_v63, %v10310_v57 }
0x10fb   :  { %v3217_v47 = vsel %vm3216_vm7, %v5948_v52, %v3213_v48 }
0x10fc   :  { %v8603_v4 = vsel %vm3219_vm9, %v3221_v61, %v3217_v47  ;;  %v8683_v47 = vld [vmem:[%s10245_s26 + $0x58] sm:$0xff] }
0x10fd   :  { %v3247_v16 = vmul.f32 %v3239_v37, %v8603_v4  ;;  %vm3882_vm14 = vcmp.ne.f32.partialorder %v8683_v47, 0.0 }
0x10ff   :  { %v3271_v55 = vsel %vm3267_vm10, %v3247_v16, %v3239_v37 }
0x1100   :  { %3282 = vrot.lane.b32.xlu0 %v3271_v55, %s6196_s29  ;;  %v8689_v55 = vld [vmem:[%s10245_s26 + $0xd0] sm:$0xff] }
0x114e   :  { %v8626_v25 = vpop.permute.xlu2 %3280 }
0x1152   :  { %v8610_v39 = vpop.permute.xlu0 %3276 }
0x1153   :  { %v3288_v14 = vsel %vm327_vm8, %v8412_v51, %v8610_v39  ;;  %v8632_v51 = vsel %vm327_vm8, %v8469_v0, %v8626_v25  ;;  %v5633_v0 = vld [vmem:[%s10181_s3 + $0x58] sm:$0xff] }
0x1154   :  { %3308 = vrot.lane.b32.xlu2 %v3288_v14, %s6193_s5  ;;  %3296 = vrot.lane.b32.xlu1 %v3288_v14, %s6194_s20  ;;  %v3497_v3 = vmul.f32 %v5633_v0, %v10291_v13 }
0x1155   :  { %3320 = vrot.lane.b32.xlu0 %v3288_v14, %s6192_s19 }
0x115c   :  { %v8618_v38 = vpop.permute.xlu1 %3278  ;;  %3332 = vrot.lane.b32.xlu1 %v3288_v14, %s6195_s21 }
0x115d   :  { %v3289_v17 = vsel %vm327_vm8, %v8392_v59, %v8618_v38  ;;  %v5632_v59 = vld [vmem:[%s10181_s3 + $0x50] sm:$0xff] }
0x115e   :  { %3310 = vrot.lane.b32.xlu0 %v3289_v17, %s6193_s5  ;;  %3298 = vrot.lane.b32.xlu2 %v3289_v17, %s6194_s20  ;;  %v3496_v12 = vmul.f32 %v5632_v59, %v10290_v2  ;;  %v8695_v59 = vld [vmem:[%s10245_s26 + $0xd8] sm:$0xff] }
0x115f   :  { %vm3884_vm15 = vcmp.ne.f32.partialorder %v8695_v59, 0.0 }
0x1160   :  { %5949 = vtanh.f32 %v3496_v12 }
0x1161   :  { %5951 = vtanh.f32 %v3497_v3 }
0x1164   :  { %3322 = vrot.lane.b32.xlu1 %v3289_v17, %s6192_s19 }
0x1166   :  { %3300 = vrot.lane.b32.xlu0 %v8632_v51, %s6194_s20  ;;  %3334 = vrot.lane.b32.xlu2 %v3289_v17, %s6195_s21  ;;  %v5950_v33 = vpop.eup %5949 }
0x1167   :  { %v3504_v52 = vmul.f32 0.5, %v5950_v33  ;;  %v5952_v46 = vpop.eup %5951 }
0x1168   :  { %v3505_v24 = vmul.f32 0.5, %v5952_v46 }
0x116c   :  { %3312 = vrot.lane.b32.xlu1 %v8632_v51, %s6193_s5 }
0x116e   :  { %3336 = vrot.lane.b32.xlu0 %v8632_v51, %s6195_s21  ;;  %3324 = vrot.lane.b32.xlu2 %v8632_v51, %s6192_s19 }
0x1172   :  { %v8650_v62 = vpop.permute.xlu0 %3282 }
0x1173   :  { %v8655_v18 = vsel %vm327_vm8, %v8446_v15, %v8650_v62  ;;  %v3498_v15 = vmul.f32 %v5634_v32, %v10292_v29 }
0x1174   :  { %3302 = vrot.lane.b32.xlu1 %v8655_v18, %s6194_s20 }
0x1175   :  { %5953 = vtanh.f32 %v3498_v15 }
0x1176   :  { %3326 = vrot.lane.b32.xlu0 %v8655_v18, %s6192_s19  ;;  %3314 = vrot.lane.b32.xlu2 %v8655_v18, %s6193_s5  ;;  %5955 = vtanh.f32 %v3499_v56 }
0x117b   :  { %v5954_v48 = vpop.eup %5953 }
0x117c   :  { %3338 = vrot.lane.b32.xlu1 %v8655_v18, %s6195_s21  ;;  %v3506_v61 = vmul.f32 0.5, %v5954_v48  ;;  %v5956_v37 = vpop.eup %5955 }
0x117d   :  { %v3507_v16 = vmul.f32 0.5, %v5956_v37 }
0x117e   :  { %3516 = vperm.xlu2 %5748, %v3504_v52  }
0x1184   :  { %3521 = vperm.xlu1 %5747, %v3505_v24  }
0x1186   :  { %3554 = vperm.xlu2 %5748, %v8676_v20  }
0x118c   :  { %3526 = vperm.xlu1 %5747, %v3506_v61  }
0x118e   :  { %3559 = vperm.xlu2 %5748, %v8683_v47   ;;  %v3908_v47 = vsel %vm3884_vm15, 1, %v10282_v1 }
0x1194   :  { %3531 = vperm.xlu1 %5747, %v3507_v16  }
0x1196   :  { %3564 = vperm.xlu2 %5748, %v8689_v55  }
0x119c   :  { %3569 = vperm.xlu1 %5747, %v8695_v59  }
0x11ae   :  { %v3309_v12 = vpop.permute.xlu2 %3308 }
0x11b8   :  { %v3299_v32 = vpop.permute.xlu2 %3298 }
0x11b9   :  { %v3345_v48 = vsel %vm332_vm11, %v3289_v17, %v3299_v32 }
0x11c0   :  { %v3335_v61 = vpop.permute.xlu2 %3334 }
0x11c6   :  { %v3297_v0 = vpop.permute.xlu1 %3296 }
0x11c7   :  { %v3321_v3 = vpop.permute.xlu0 %3320  ;;  %v3344_v33 = vsel %vm332_vm11, %v3288_v14, %v3297_v0 }
0x11c8   :  { %v3348_v52 = vsel %vm463_vm0, %v3344_v33, %v3309_v12 }
0x11c9   :  { %v3352_v15 = vsel %vm468_vm1, %v3348_v52, %v3321_v3 }
0x11ce   :  { %v3333_v46 = vpop.permute.xlu1 %3332 }
0x11cf   :  { %v3356_v24 = vsel %vm473_vm2, %v3352_v15, %v3333_v46  ;;  %v3325_v15 = vpop.permute.xlu2 %3324 }
0x11d0   :  { %v3360_v63 = vmul.f32 %v8538_v54, %v3356_v24  ;;  %v3311_v56 = vpop.permute.xlu0 %3310 }
0x11d1   :  { %v3349_v37 = vsel %vm463_vm0, %v3345_v48, %v3311_v56 }
0x11d2   :  { %5618 = vmatmul.msk.f32.vlgmr.msra.gmra.mxu3 %vm482_vm3, %v3360_v63 }
0x11d6   :  { %v3323_v16 = vpop.permute.xlu1 %3322 }
0x11d7   :  { %v3353_v14 = vsel %vm468_vm1, %v3349_v37, %v3323_v16 }
0x11d8   :  { %v3357_v12 = vsel %vm473_vm2, %v3353_v14, %v3335_v61  ;;  %v3301_v0 = vpop.permute.xlu0 %3300  ;;  %v3315_v61 = vpop.permute.xlu2 %3314 }
0x11d9   :  { %v3361_v3 = vmul.f32 %v8549_v10, %v3357_v12  ;;  %v3346_v33 = vsel %vm332_vm11, %v8632_v51, %v3301_v0 }
0x11db   :  { %5619 = vmatmul.msk.f32.gmra.mxu3 %vm482_vm3, %v3361_v3 }
0x11de   :  { %v3313_v52 = vpop.permute.xlu1 %3312 }
0x11df   :  { %v3350_v17 = vsel %vm463_vm0, %v3346_v33, %v3313_v52  ;;  %v8727_v33 = vld [vmem:[%s10192_s14 + $0x8] sm:$0xff] }
0x11e0   :  { %v3337_v32 = vpop.permute.xlu0 %3336  ;;  %v3354_v46 = vsel %vm468_vm1, %v3350_v17, %v3325_v15  ;;  %v8734_v17 = vld [vmem:[%s10192_s14] sm:$0xff] }
0x11e1   :  { %v3358_v24 = vsel %vm473_vm2, %v3354_v46, %v3337_v32  ;;  %v3405_v32 = vmul.f32 %v8734_v17, %v8359_v30  ;;  %v8741_v46 = vld [vmem:[%s10193_s16 + $0x8] sm:$0xff] }
0x11e2   :  { %v3362_v63 = vmul.f32 %v8538_v54, %v3358_v24 }
0x11e4   :  { %5620 = vmatmul.msk.f32.gmra.mxu3 %vm482_vm3, %v3362_v63 }
0x11e6   :  { %v3303_v56 = vpop.permute.xlu1 %3302 }
0x11e7   :  { %v3347_v48 = vsel %vm332_vm11, %v8655_v18, %v3303_v56  ;;  %v3406_v18 = vmul.f32 %v8727_v33, %v8367_v9  ;;  %v8747_v9 = vld [vmem:[%s10193_s16] sm:$0xff] }
0x11e8   :  { %v3327_v37 = vpop.permute.xlu0 %3326  ;;  %v3351_v51 = vsel %vm463_vm0, %v3347_v48, %v3315_v61 }
0x11e9   :  { %v3355_v16 = vsel %vm468_vm1, %v3351_v51, %v3327_v37  ;;  %v3408_v37 = vmul.f32 %v8727_v33, %v8414_v7  ;;  %v5636_v7 = vld [vmem:[%s10183_s4 + $0x5] sm:$0x1] }
0x11ee   :  { %v3339_v14 = vpop.permute.xlu1 %3338 }
0x11ef   :  { %v3359_v12 = vsel %vm473_vm2, %v3355_v16, %v3339_v14  ;;  %v3407_v14 = vmul.f32 %v8734_v17, %v8385_v26 }
0x11f0   :  { %v3363_v0 = vmul.f32 %v8549_v10, %v3359_v12 }
0x11f2   :  { %5621 = vmatmul.msk.f32.gmra.mxu3 %vm482_vm3, %v3363_v0 }
0x1255   :  { %v3393_v3 = vpop.f32.mrf.mxu3 }
0x1256   :  { %v3409_v63 = vadd.f32 %v3405_v32, %v3393_v3 }
0x1258   :  { %v3413_v56 = vadd.f32 %v8747_v9, %v3409_v63  ;;  %v8766_v63 = vpop.permute.xlu2 %3516 }
0x125e   :  { %v3396_v52 = vpop.f32.mrf.mxu3 }
0x125f   :  { %v3410_v15 = vadd.f32 %v3406_v18, %v3396_v52 }
0x1261   :  { %v3414_v24 = vadd.f32 %v8741_v46, %v3410_v15  ;;  %v3508_v15 = vmul.f32 %v5636_v7, %v10295_v44 }
0x1263   :  { %5957 = vtanh.f32 %v3414_v24 }
0x1264   :  { %5959 = vtanh.f32 %v3413_v56  ;;  %v5637_v56 = vld [vmem:[%s10183_s4 + $0xd] sm:$0x1] }
0x1267   :  { %v3399_v30 = vpop.f32.mrf.mxu3 }
0x1268   :  { %v3411_v0 = vadd.f32 %v3407_v14, %v3399_v30  ;;  %v3509_v30 = vmul.f32 %v5637_v56, %v10305_v22 }
0x1269   :  { %v5958_v48 = vpop.eup %5957 }
0x126a   :  { %3435 = vrot.lane.b32.xlu0 %v5958_v48, %s6196_s29  ;;  %v5960_v61 = vpop.eup %5959  ;;  %v3415_v3 = vadd.f32 %v8747_v9, %v3411_v0  ;;  %v5759_v0 = vld [vmem:[%s10180_s2 + $0x5] ss:$0 sm:$0xff] }
0x1272   :  { %3433 = vrot.lane.b32.xlu0 %v5960_v61, %s6196_s29 }
0x1275   :  { %v3402_v51 = vpop.f32.mrf.mxu3 }
0x1276   :  { %v3412_v16 = vadd.f32 %v3408_v37, %v3402_v51  ;;  %v8774_v37 = vpop.permute.xlu1 %3521 }
0x1278   :  { %v3416_v12 = vadd.f32 %v8741_v46, %v3412_v16 }
0x127a   :  { %5961 = vtanh.f32 %v3416_v12 }
0x127b   :  { %5963 = vtanh.f32 %v3415_v3 }
0x127c   :  { %5965 = vtanh.f32 %v3508_v15 }
0x127d   :  { %5967 = vtanh.f32 %v3509_v30 }
0x1280   :  { %v5962_v18 = vpop.eup %5961 }
0x1281   :  { %3439 = vrot.lane.b32.xlu0 %v5962_v18, %s6196_s29  ;;  %v5964_v52 = vpop.eup %5963  ;;  %v3422_v18 = vsub.f32 1.0, %v8585_v11 }
0x1282   :  { %v5966_v26 = vpop.eup %5965 }
0x1283   :  { %v3512_v32 = vmul.f32 0.5, %v5966_v26  ;;  %v5968_v14 = vpop.eup %5967  ;;  %v3426_v15 = vmul.f32 %v3422_v18, %v8618_v38 }
0x1284   :  { %v3513_v26 = vmul.f32 0.5, %v5968_v14 }
0x1285   :  { %v8764_v24 = vperm.slane %v3512_v32, 0 }
0x1286   :  { %v8794_v49 = vperm.slane %v3513_v26, 0 }
0x1287   :  { %v3540_v48 = vsub.f32 %v8766_v63, %v8764_v24  ;;  %v3541_v16 = vsub.f32 %v8774_v37, %v8764_v24 }
0x1289   :  { %3437 = vrot.lane.b32.xlu0 %v5964_v52, %s6196_s29  ;;  %v3544_v61 = vand.u32 2147483647, %v3540_v48  ;;  %v3545_v3 = vand.u32 2147483647, %v3541_v16  ;;  %v3555_v52 = vpop.permute.xlu2 %3554  ;;  %v8792_v16 = vpop.permute.xlu1 %3526 }
0x128a   :  { %v3578_v48 = vmul.f32 %v5759_v0, %v3555_v52 }
0x128b   :  { %v3548_v51 = vmul.f32 %v3544_v61, %v10306_v40  ;;  %v3549_v30 = vmul.f32 %v3545_v3, %v6457_v60  ;;  %v3421_v3 = vsub.f32 1.0, %v8575_v50 }
0x128d   :  { %v3582_v12 = vadd.f32 1.0, %v3548_v51  ;;  %v8790_v51 = vld [vmem:[%s10184_s0 + $0x58] sm:$0xff]  ;;  %v3583_v14 = vadd.f32 1.0, %v3549_v30  ;;  %v3425_v52 = vmul.f32 %v3421_v3, %v8610_v39  ;;  %v6132_v3 = vld [vmem:[%s10187_s11 + $0x48] sm:$0xff] }
0x128f   :  { %v3586_v56 = vmul.f32 %v8382_v42, %v3582_v12 }
0x12dc   :  { %v3436_v7 = vpop.permute.xlu0 %3435 }
0x12dd   :  { %v3446_v32 = vmul.f32 %v3436_v7, %v8585_v11  ;;  %v3590_v11 = vmul.f32 %v3586_v56, %v3578_v48  ;;  %v3560_v7 = vpop.permute.xlu2 %3559  ;;  %v8814_v48 = vld [vmem:[%s10184_s0 + $0x50] sm:$0xff] }
0x12de   :  { %v3579_v30 = vmul.f32 %v5759_v0, %v3560_v7 }
0x12df   :  { %v3450_v61 = vadd.f32 %v3446_v32, %v3426_v15  ;;  %v3542_v15 = vsub.f32 %v8792_v16, %v8794_v49  ;;  %v3594_v26 = vmul.f32 %v3590_v11, %v6500_v35  ;;  %v3587_v32 = vmul.f32 %v8463_v8, %v3583_v14 }
0x12e1   :  { %v8799_v38 = vsel %vm3265_vm13, %v3450_v61, %v8397_v34  ;;  %v3546_v61 = vand.u32 2147483647, %v3542_v15  ;;  %v3591_v14 = vmul.f32 %v3587_v32, %v3579_v30  ;;  %vm3883_vm13 = vcmp.ne.f32.partialorder %v8689_v55, 0.0 }
0x12e2   :  { %v3603_v12 = vsel %vm327_vm8, %v8790_v51, %v8799_v38 }
0x12e3   :  { %3626 = vmatpush.msra.mxu0 %v3603_v12  ;;  %v8822_v12 = vadd.f32 %v6489_v23, %v3594_v26  ;;  %v3550_v0 = vmul.f32 %v3546_v61, %v10306_v40  ;;  %v3424_v26 = vsub.f32 1.0, %v8603_v4  ;;  %v6135_v61 = vld [vmem:[%s10187_s11 + $0x30] sm:$0xff] }
0x12e4   :  { %v3434_v18 = vpop.permute.xlu0 %3433 }
0x12e5   :  { %v3445_v6 = vmul.f32 %v3434_v18, %v8575_v50  ;;  %v8824_v50 = vpop.permute.xlu1 %3531  ;;  %v3595_v18 = vmul.f32 %v3591_v14, %v6503_v36  ;;  %v3584_v7 = vadd.f32 1.0, %v3550_v0  ;;  %v3565_v14 = vpop.permute.xlu2 %3564 }
0x12e6   :  { %v3543_v5 = vsub.f32 %v8824_v50, %v8794_v49 }
0x12e7   :  { %v3449_v56 = vadd.f32 %v3445_v6, %v3425_v52  ;;  %v6133_v52 = vld [vmem:[%s10187_s11 + $0x40] sm:$0xff]  ;;  %v6134_v6 = vld [vmem:[%s10187_s11 + $0x38] sm:$0xff]  ;;  %v8846_v32 = vadd.f32 %v6492_v27, %v3595_v18 }
0x12e8   :  { %v3547_v15 = vand.u32 2147483647, %v3543_v5  ;;  %v3588_v5 = vmul.f32 %v8382_v42, %v3584_v7 }
0x12e9   :  { %v8819_v39 = vsel %vm3264_vm6, %v3449_v56, %v8419_v58  ;;  %v5760_v56 = vld [vmem:[%s10180_s2 + $0xd] ss:$0 sm:$0xff]  ;;  %vm3881_vm6 = vcmp.ne.f32.partialorder %v8676_v20, 0.0  ;;  %v3906_v20 = vsel %vm3882_vm14, 1, %v10282_v1 }
0x12ea   :  { %v3602_v11 = vsel %vm327_vm8, %v8814_v48, %v8819_v39  ;;  %v3551_v18 = vmul.f32 %v3547_v15, %v6457_v60 }
0x12eb   :  { %3627 = vmatpush.msra.mxu0 %v3602_v11  ;;  %v3428_v11 = vmul.f32 %v3424_v26, %v8650_v62  ;;  %v8866_v62 = vld [vmem:[%s10184_s0 + $0xd8] sm:$0xff]  ;;  %v3580_v26 = vmul.f32 %v5760_v56, %v3565_v14  ;;  %v3423_v14 = vsub.f32 1.0, %v8594_v45 }
0x12ec   :  { %5638 = vmatmul.msk.f32.vlgmr.msra.gmra.mxu0 %vm332_vm11, %v8822_v12  ;;  %v3585_v15 = vadd.f32 1.0, %v3551_v18 }
0x12ed   :  { %3770 = vmatpush.msrb.mxu0 %v6132_v3  ;;  %v3592_v7 = vmul.f32 %v3588_v5, %v3580_v26  ;;  %v3427_v21 = vmul.f32 %v3423_v14, %v8626_v25  ;;  %v6151_v14 = vld [vmem:[%s10191_s12] sm:$0xff] }
0x12ee   :  { %v3589_v26 = vmul.f32 %v8463_v8, %v3585_v15  ;;  %v6148_v15 = vld [vmem:[%s10191_s12 + $0x18] sm:$0xff] }
0x12ef   :  { %3771 = vmatpush.msrb.mxu0 %v6133_v52  ;;  %v3596_v18 = vmul.f32 %v3592_v7, %v6500_v35 }
0x12f1   :  { %3772 = vmatpush.msrb.mxu0 %v6134_v6 }
0x12f3   :  { %v3440_v30 = vpop.permute.xlu0 %3439  ;;  %3773 = vmatpush.msrb.mxu0 %v6135_v61 }
0x12f4   :  { %v3448_v0 = vmul.f32 %v3440_v30, %v8603_v4  ;;  %5639 = vmatmul.msk.f32.gmra.mxu0 %vm332_vm11, %v8846_v32  ;;  %v6137_v4 = vld [vmem:[%s10187_s11 + $0x20] sm:$0xff] }
0x12f5   :  { %3774 = vmatpush.msrb.mxu0 %v6136_v43 }
0x12f6   :  { %v3452_v34 = vadd.f32 %v3448_v0, %v3428_v11  ;;  %v6138_v11 = vld [vmem:[%s10187_s11 + $0x18] sm:$0xff]  ;;  %v3570_v0 = vpop.permute.xlu1 %3569 }
0x12f7   :  { %3775 = vmatpush.msrb.mxu0 %v6137_v4 }
0x12f8   :  { %v8874_v42 = vsel %vm3267_vm10, %v3452_v34, %v8451_v31  ;;  %v6139_v34 = vld [vmem:[%s10187_s11 + $0x10] sm:$0xff]  ;;  %v3581_v31 = vmul.f32 %v5760_v56, %v3570_v0  ;;  %v8910_v56 = vadd.f32 %v6489_v23, %v3596_v18 }
0x12f9   :  { %v3605_v30 = vsel %vm327_vm8, %v8866_v62, %v8874_v42  ;;  %3776 = vmatpush.msrb.mxu0 %v6138_v11 }
0x12fa   :  { %3655 = vmatpush.msra.mxu1 %v3605_v30 }
0x12fb   :  { %v3438_v58 = vpop.permute.xlu0 %3437  ;;  %3777 = vmatpush.msrb.mxu0 %v6139_v34 }
0x12fc   :  { %v3447_v5 = vmul.f32 %v3438_v58, %v8594_v45  ;;  %v6141_v58 = vld [vmem:[%s10187_s11] sm:$0xff]  ;;  %v3593_v45 = vmul.f32 %v3589_v26, %v3581_v31  ;;  %v3665_v26 = vmul.f32 %v8846_v32, %v8764_v24 }
0x12fd   :  { %3778 = vmatpush.msrb.mxu0 %v6140_v53 }
0x12fe   :  { %v3451_v30 = vadd.f32 %v3447_v5, %v3427_v21  ;;  %v3597_v31 = vmul.f32 %v3593_v45, %v6503_v36  ;;  %v3664_v5 = vmul.f32 %v8822_v12, %v8764_v24  ;;  %v3671_v45 = vsel %vm332_vm11, %v3665_v26, 0.0 }
0x12ff   :  { %3779 = vmatpush.msrb.mxu0 %v6141_v58  ;;  %v3905_v12 = vsel %vm3881_vm6, 1, %v10282_v1 }
0x1300   :  { %v8904_v8 = vsel %vm3266_vm12, %v3451_v30, %v8474_v19  ;;  %v3601_v7 = vadd.f32 %v6492_v27, %v3597_v31  ;;  %v3668_v18 = vsel %vm332_vm11, %v3664_v5, 0.0  ;;  %v3666_v30 = vmul.f32 %v8910_v56, %v8794_v49 }
0x1301   :  { %4427 = vmatpush.msra.mxu0 %v6132_v3  ;;  %v3604_v25 = vsel %vm327_vm8, %v8896_v41, %v8904_v8  ;;  %v6143_v3 = vld [vmem:[%s10191_s12 + $0x40] sm:$0xff] }
0x1302   :  { %3656 = vmatpush.msra.mxu1 %v3604_v25  ;;  %v3674_v25 = vsel %vm332_vm11, %v3666_v30, 0.0 }
0x1303   :  { %4428 = vmatpush.msra.mxu0 %v6133_v52  ;;  %5640 = vmatmul.msk.f32.vlgmr.msra.gmra.mxu1 %vm332_vm11, %v8910_v56  ;;  %v6144_v52 = vld [vmem:[%s10191_s12 + $0x38] sm:$0xff] }
0x1304   :  { %4039 = vmatpush.msrb.mxu1 %v6142_v28 }
0x1305   :  { %4429 = vmatpush.msra.mxu0 %v6134_v6  ;;  %v6145_v6 = vld [vmem:[%s10191_s12 + $0x30] sm:$0xff] }
0x1306   :  { %4040 = vmatpush.msrb.mxu1 %v6143_v3 }
0x1307   :  { %4430 = vmatpush.msra.mxu0 %v6135_v61  ;;  %v6146_v61 = vld [vmem:[%s10191_s12 + $0x28] sm:$0xff] }
0x1308   :  { %4041 = vmatpush.msrb.mxu1 %v6144_v52 }
0x1309   :  { %4431 = vmatpush.msra.mxu0 %v6136_v43  ;;  %v6147_v43 = vld [vmem:[%s10191_s12 + $0x20] sm:$0xff] }
0x130a   :  { %4042 = vmatpush.msrb.mxu1 %v6145_v6 }
0x130b   :  { %4432 = vmatpush.msra.mxu0 %v6137_v4  ;;  %5641 = vmatmul.msk.f32.gmra.mxu1 %vm332_vm11, %v3601_v7  ;;  %v6149_v4 = vld [vmem:[%s10191_s12 + $0x10] sm:$0xff] }
0x130c   :  { %4043 = vmatpush.msrb.mxu1 %v6146_v61 }
0x130d   :  { %4433 = vmatpush.msra.mxu0 %v6138_v11  ;;  %v6150_v11 = vld [vmem:[%s10191_s12 + $0x8] sm:$0xff] }
0x130e   :  { %4044 = vmatpush.msrb.mxu1 %v6147_v43 }
0x130f   :  { %4434 = vmatpush.msra.mxu0 %v6139_v34 }
0x1310   :  { %4045 = vmatpush.msrb.mxu1 %v6148_v15 }
0x1311   :  { %4435 = vmatpush.msra.mxu0 %v6140_v53 }
0x1312   :  { %4046 = vmatpush.msrb.mxu1 %v6149_v4 }
0x1313   :  { %4436 = vmatpush.msra.mxu0 %v6141_v58  ;;  %v3667_v58 = vmul.f32 %v3601_v7, %v8794_v49  ;;  %v3907_v49 = vsel %vm3883_vm13, 1, %v10282_v1 }
0x1314   :  { %4047 = vmatpush.msrb.mxu1 %v6150_v11 }
0x1316   :  { %4048 = vmatpush.msrb.mxu1 %v6151_v14 }
0x1318   :  { %4696 = vmatpush.msra.mxu1 %v6142_v28  ;;  %v3677_v28 = vsel %vm332_vm11, %v3667_v58, 0.0 }
0x131a   :  { %4697 = vmatpush.msra.mxu1 %v6143_v3 }
0x131c   :  { %4698 = vmatpush.msra.mxu1 %v6144_v52 }
0x131e   :  { %4699 = vmatpush.msra.mxu1 %v6145_v6 }
0x1320   :  { %4700 = vmatpush.msra.mxu1 %v6146_v61 }
0x1322   :  { %4701 = vmatpush.msra.mxu1 %v6147_v43 }
0x1324   :  { %4702 = vmatpush.msra.mxu1 %v6148_v15 }
0x1326   :  { %4703 = vmatpush.msra.mxu1 %v6149_v4 }
0x1328   :  { %4704 = vmatpush.msra.mxu1 %v6150_v11 }
0x132a   :  { %4705 = vmatpush.msra.mxu1 %v6151_v14 }
0x1369   :  { %v3629_v53 = vpop.f32.mrf.mxu0 }
0x136a   :  { %3708 = vrot.lane.b32.xlu1 %v3629_v53, %s6192_s19  ;;  %3684 = vrot.lane.b32.xlu2 %v3629_v53, %s6194_s20 }
0x136b   :  { %3696 = vrot.lane.b32.xlu0 %v3629_v53, %s6193_s5 }
0x1371   :  { %v3632_v0 = vpop.f32.mrf.mxu0 }
0x1372   :  { %3720 = vrot.lane.b32.xlu2 %v3629_v53, %s6195_s21  ;;  %3698 = vrot.lane.b32.xlu1 %v3632_v0, %s6193_s5 }
0x1373   :  { %3686 = vrot.lane.b32.xlu0 %v3632_v0, %s6194_s20 }
0x137a   :  { %3710 = vrot.lane.b32.xlu2 %v3632_v0, %s6192_s19 }
0x137b   :  { %3722 = vrot.lane.b32.xlu0 %v3632_v0, %s6195_s21 }
0x1380   :  { %v3658_v34 = vpop.f32.mrf.mxu1 }
0x1381   :  { %3688 = vrot.lane.b32.xlu1 %v3658_v34, %s6194_s20 }
0x1382   :  { %3700 = vrot.lane.b32.xlu2 %v3658_v34, %s6193_s5 }
0x1383   :  { %3712 = vrot.lane.b32.xlu0 %v3658_v34, %s6192_s19 }
0x1388   :  { %v8958_v21 = vpop.f32.mrf.mxu1 }
0x1389   :  { %3724 = vrot.lane.b32.xlu1 %v3658_v34, %s6195_s21 }
0x138a   :  { %3690 = vrot.lane.b32.xlu2 %v8958_v21, %s6194_s20 }
0x138b   :  { %3702 = vrot.lane.b32.xlu0 %v8958_v21, %s6193_s5 }
0x1391   :  { %3714 = vrot.lane.b32.xlu1 %v8958_v21, %s6192_s19 }
0x1392   :  { %3726 = vrot.lane.b32.xlu2 %v8958_v21, %s6195_s21 }
0x13b5   :  { %3669 = vadd.xlane.f32.xlu0 %v3668_v18 }
0x13bb   :  { %3672 = vadd.xlane.f32.xlu1 %v3671_v45  ;;  %3675 = vadd.xlane.f32.xlu2 %v3674_v25 }
0x13bd   :  { %3678 = vadd.xlane.f32.xlu0 %v3677_v28 }
0x13c4   :  { %v3685_v24 = vpop.permute.xlu2 %3684 }
0x13c5   :  { %v3732_v31 = vsel %vm332_vm11, %v3629_v53, %v3685_v24 }
0x13cc   :  { %v3721_v32 = vpop.permute.xlu2 %3720 }
0x13d1   :  { %3891 = vrot.lane.b32.xlu0 %v8799_v38, %s6197_s25 }
0x13d3   :  { %3910 = vperm.xlu2 %5748, %v3905_v12  }
0x13d4   :  { %3889 = vrot.lane.b32.xlu1 %v8819_v39, %s6197_s25  ;;  %v3711_v61 = vpop.permute.xlu2 %3710 }
0x13d9   :  { %3893 = vrot.lane.b32.xlu0 %v8904_v8, %s6197_s25 }
0x13db   :  { %3916 = vperm.xlu2 %5748, %v3907_v49  }
0x13dc   :  { %3913 = vperm.xlu1 %5747, %v3906_v20   ;;  %v3709_v56 = vpop.permute.xlu1 %3708  ;;  %v3701_v18 = vpop.permute.xlu2 %3700 }
0x13dd   :  { %v3697_v3 = vpop.permute.xlu0 %3696 }
0x13de   :  { %v3736_v55 = vsel %vm463_vm0, %v3732_v31, %v3697_v3 }
0x13df   :  { %v3740_v52 = vsel %vm468_vm1, %v3736_v55, %v3709_v56 }
0x13e0   :  { %v3744_v7 = vsel %vm473_vm2, %v3740_v52, %v3721_v32 }
0x13e1   :  { %v3748_v6 = vmul.f32 %v8538_v54, %v3744_v7  ;;  %3919 = vperm.xlu0 %5746, %v3908_v47  }
0x13e3   :  { %5642 = vmatmul.msk.f32.vlgmr.msrb.gmra.mxu0 %vm482_vm3, %v3748_v6  ;;  %v9030_v6 = vld [vmem:[%s10190_s15] sm:$0xff] }
0x13e4   :  { %3895 = vrot.lane.b32.xlu1 %v8874_v42, %s6197_s25  ;;  %v3699_v15 = vpop.permute.xlu1 %3698 }
0x13e5   :  { %v3687_v59 = vpop.permute.xlu0 %3686 }
0x13e6   :  { %v3733_v43 = vsel %vm332_vm11, %v3632_v0, %v3687_v59  ;;  %v3691_v0 = vpop.permute.xlu2 %3690 }
0x13e7   :  { %v3737_v4 = vsel %vm463_vm0, %v3733_v43, %v3699_v15  ;;  %v3735_v20 = vsel %vm332_vm11, %v8958_v21, %v3691_v0  ;;  %v9036_v15 = vld [vmem:[%s10189_s13 + $0x8] sm:$0xff] }
0x13e8   :  { %v3741_v14 = vsel %vm468_vm1, %v3737_v4, %v3711_v61 }
0x13ed   :  { %v3723_v11 = vpop.permute.xlu0 %3722 }
0x13ee   :  { %v3745_v53 = vsel %vm473_vm2, %v3741_v14, %v3723_v11  ;;  %v3727_v56 = vpop.permute.xlu2 %3726 }
0x13ef   :  { %v3749_v5 = vmul.f32 %v8549_v10, %v3745_v53 }
0x13f1   :  { %5643 = vmatmul.msk.f32.gmra.mxu0 %vm482_vm3, %v3749_v5  ;;  %v9042_v5 = vld [vmem:[%s10190_s15 + $0x8] sm:$0xff] }
0x13f3   :  { %v3689_v26 = vpop.permute.xlu1 %3688 }
0x13f4   :  { %v3734_v30 = vsel %vm332_vm11, %v3658_v34, %v3689_v26 }
0x13f5   :  { %v3713_v58 = vpop.permute.xlu0 %3712  ;;  %v3738_v45 = vsel %vm463_vm0, %v3734_v30, %v3701_v18 }
0x13f6   :  { %v3742_v25 = vsel %vm468_vm1, %v3738_v45, %v3713_v58 }
0x13fb   :  { %v3725_v28 = vpop.permute.xlu1 %3724 }
0x13fc   :  { %v3746_v12 = vsel %vm473_vm2, %v3742_v25, %v3725_v28 }
0x13fd   :  { %v3750_v24 = vmul.f32 %v8538_v54, %v3746_v12  ;;  %v3703_v49 = vpop.permute.xlu0 %3702  ;;  %v9024_v54 = vld [vmem:[%s10189_s13] sm:$0xff] }
0x13fe   :  { %v3739_v32 = vsel %vm463_vm0, %v3735_v20, %v3703_v49 }
0x13ff   :  { %5644 = vmatmul.msk.f32.gmra.mxu0 %vm482_vm3, %v3750_v24 }
0x1403   :  { %v3715_v34 = vpop.permute.xlu1 %3714 }
0x1404   :  { %v3743_v31 = vsel %vm468_vm1, %v3739_v32, %v3715_v34 }
0x1405   :  { %v3747_v3 = vsel %vm473_vm2, %v3743_v31, %v3727_v56 }
0x1406   :  { %v3751_v55 = vmul.f32 %v8549_v10, %v3747_v3 }
0x1408   :  { %5645 = vmatmul.msk.f32.gmra.mxu0 %vm482_vm3, %v3751_v55 }
0x1428   :  { %v3670_v47 = vpop.xlane.xlu0 %3669 }
0x1429   :  { %v3793_v21 = vmul.f32 %v9024_v54, %v3670_v47 }
0x142e   :  { %v3673_v61 = vpop.xlane.xlu1 %3672  ;;  %v3676_v30 = vpop.xlane.xlu2 %3675 }
0x142f   :  { %v3794_v4 = vmul.f32 %v9036_v15, %v3673_v61  ;;  %v3795_v12 = vmul.f32 %v9024_v54, %v3676_v30 }
0x1436   :  { %v9046_v3 = vpop.permute.xlu2 %3910 }
0x1437   :  { %vm3921_vm9 = vcmp.eq.s32.totalorder %v9046_v3, 1 }
0x1460   :  { %v3781_v52 = vpop.f32.mrf.mxu0 }
0x1461   :  { %v3797_v7 = vadd.f32 %v3793_v21, %v3781_v52  ;;  %v3890_v21 = vpop.permute.xlu1 %3889 }
0x1463   :  { %v3801_v59 = vadd.f32 %v9030_v6, %v3797_v7  ;;  %v3679_v7 = vpop.xlane.xlu0 %3678 }
0x1465   :  { %v5646_v10 = vmul.f32 -1.442695, %v3801_v59 }
0x1467   :  { %5969 = vpow2.f32 %v5646_v10 }
0x146d   :  { %v5970_v43 = vpop.eup %5969 }
0x146e   :  { %v3817_v11 = vadd.f32 1.0, %v5970_v43  ;;  %v3784_v14 = vpop.f32.mrf.mxu0 }
0x146f   :  { %v3798_v53 = vadd.f32 %v3794_v4, %v3784_v14  ;;  %v3796_v4 = vmul.f32 %v9036_v15, %v3679_v7 }
0x1470   :  { %5971 = vrcp.f32 %v3817_v11  ;;  %v3832_v25 = vand.u32 2147483648, %v3817_v11  ;;  %v3830_v49 = vand.u32 2147483647, %v3817_v11  ;;  %vm3826_vm5 = vweird.f32 %v3817_v11 }
0x1471   :  { %v3802_v18 = vadd.f32 %v9042_v5, %v3798_v53 }
0x1472   :  { %v3833_v31 = vor.u32 1.1754944e-38, %v3832_v25  ;;  %vm3831_vm7 = vcmp.eq.f32.partialorder %v3830_v49, 8.507059e+37  ;;  %v9058_v49 = vpop.permute.xlu1 %3913 }
0x1473   :  { %v5647_v26 = vmul.f32 -1.442695, %v3802_v18  ;;  %vm3922_vm15 = vcmp.eq.s32.totalorder %v9058_v49, 1 }
0x1475   :  { %5973 = vpow2.f32 %v5647_v26 }
0x1476   :  { %v5972_v58 = vpop.eup %5971 }
0x1477   :  { %v3822_v45 = vmul.f32 %v5972_v58, %v3817_v11  ;;  %vm3827_vm12 = vweird.f32 %v5972_v58 }
0x1478   :  { %vm3828_vm4 = vmor %vm3826_vm5, %vm3827_vm12 }
0x1479   :  { %v3823_v0 = vsub.f32 1.0, %v3822_v45 }
0x147b   :  { %v5974_v28 = vpop.eup %5973  ;;  %v3824_v24 = vmul.f32 %v5972_v58, %v3823_v0 }
0x147c   :  { %v3818_v20 = vadd.f32 1.0, %v5974_v28  ;;  %v3787_v32 = vpop.f32.mrf.mxu0 }
0x147d   :  { %v3799_v34 = vadd.f32 %v3795_v12, %v3787_v32  ;;  %v3825_v56 = vadd.f32 %v5972_v58, %v3824_v24 }
0x147e   :  { %5975 = vrcp.f32 %v3818_v20  ;;  %v3847_v30 = vand.u32 2147483648, %v3818_v20  ;;  %v3845_v0 = vand.u32 2147483647, %v3818_v20  ;;  %vm3841_vm6 = vweird.f32 %v3818_v20 }
0x147f   :  { %v3803_v55 = vadd.f32 %v9030_v6, %v3799_v34  ;;  %v3829_v47 = vsel %vm3828_vm4, %v5972_v58, %v3825_v56  ;;  %v3892_v34 = vpop.permute.xlu0 %3891 }
0x1480   :  { %v9049_v52 = vsel %vm3831_vm7, %v3833_v31, %v3829_v47  ;;  %v3848_v24 = vor.u32 1.1754944e-38, %v3847_v30  ;;  %vm3846_vm14 = vcmp.eq.f32.partialorder %v3845_v0, 8.507059e+37 }
0x1481   :  { %v5648_v59 = vmul.f32 -1.442695, %v3803_v55  ;;  %v3901_v10 = vmul.f32 %v3890_v21, %v9049_v52 }
0x1483   :  { %5977 = vpow2.f32 %v5648_v59  ;;  %v3925_v61 = vsel %vm3921_vm9, %v3901_v10, %v3890_v21 }
0x1484   :  { %v5976_v43 = vpop.eup %5975  ;;  %3933 = vrot.lane.b32.xlu2 %v3925_v61, %s6196_s29 }
0x1485   :  { %v3837_v11 = vmul.f32 %v5976_v43, %v3818_v20  ;;  %v3790_v14 = vpop.f32.mrf.mxu0  ;;  %vm3842_vm10 = vweird.f32 %v5976_v43 }
0x1486   :  { %v3800_v53 = vadd.f32 %v3796_v4, %v3790_v14  ;;  %vm3843_vm13 = vmor %vm3841_vm6, %vm3842_vm10  ;;  %v9067_v14 = vpop.permute.xlu2 %3916 }
0x1487   :  { %v3838_v18 = vsub.f32 1.0, %v3837_v11  ;;  %vm3923_vm10 = vcmp.eq.s32.totalorder %v9067_v14, 1 }
0x1488   :  { %v3804_v26 = vadd.f32 %v9042_v5, %v3800_v53  ;;  %v3894_v53 = vpop.permute.xlu0 %3893 }
0x1489   :  { %v5978_v58 = vpop.eup %5977  ;;  %v3839_v45 = vmul.f32 %v5976_v43, %v3838_v18 }
0x148a   :  { %v3819_v25 = vadd.f32 1.0, %v5978_v58  ;;  %v5649_v28 = vmul.f32 -1.442695, %v3804_v26 }
0x148b   :  { %v3840_v12 = vadd.f32 %v5976_v43, %v3839_v45 }
0x148c   :  { %5979 = vrcp.f32 %v3819_v25  ;;  %v3862_v10 = vand.u32 2147483648, %v3819_v25  ;;  %vm3856_vm5 = vweird.f32 %v3819_v25 }
0x148d   :  { %5981 = vpow2.f32 %v5649_v28  ;;  %v3844_v32 = vsel %vm3843_vm13, %v5976_v43, %v3840_v12  ;;  %v3860_v43 = vand.u32 2147483647, %v3819_v25 }
0x148e   :  { %v9060_v56 = vsel %vm3846_vm14, %v3848_v24, %v3844_v32  ;;  %v3863_v11 = vor.u32 1.1754944e-38, %v3862_v10 }
0x148f   :  { %v3902_v31 = vmul.f32 %v3892_v34, %v9060_v56  ;;  %vm3861_vm7 = vcmp.eq.f32.partialorder %v3860_v43, 8.507059e+37 }
0x1491   :  { %v3926_v55 = vsel %vm3922_vm15, %v3902_v31, %v3892_v34  ;;  %v9076_v31 = vpop.permute.xlu0 %3919 }
0x1492   :  { %v5980_v47 = vpop.eup %5979  ;;  %3935 = vrot.lane.b32.xlu1 %v3926_v55, %s6196_s29 }
0x1493   :  { %v5982_v20 = vpop.eup %5981  ;;  %v3852_v21 = vmul.f32 %v5980_v47, %v3819_v25  ;;  %vm3857_vm12 = vweird.f32 %v5980_v47 }
0x1494   :  { %v3820_v7 = vadd.f32 1.0, %v5982_v20  ;;  %vm3858_vm4 = vmor %vm3856_vm5, %vm3857_vm12  ;;  %vm3924_vm5 = vcmp.eq.s32.totalorder %v9076_v31, 1 }
0x1495   :  { %v3853_v59 = vsub.f32 1.0, %v3852_v21 }
0x1496   :  { %5983 = vrcp.f32 %v3820_v7  ;;  %v3877_v25 = vand.u32 2147483648, %v3820_v7  ;;  %v3875_v24 = vand.u32 2147483647, %v3820_v7  ;;  %vm3871_vm13 = vweird.f32 %v3820_v7 }
0x1497   :  { %v3854_v61 = vmul.f32 %v5980_v47, %v3853_v59 }
0x1498   :  { %v3878_v34 = vor.u32 1.1754944e-38, %v3877_v25  ;;  %vm3876_vm12 = vcmp.eq.f32.partialorder %v3875_v24, 8.507059e+37 }
0x1499   :  { %v3855_v4 = vadd.f32 %v5980_v47, %v3854_v61 }
0x149b   :  { %v3859_v18 = vsel %vm3858_vm4, %v5980_v47, %v3855_v4  ;;  %v3896_v47 = vpop.permute.xlu1 %3895 }
0x149c   :  { %v5984_v26 = vpop.eup %5983  ;;  %v9069_v30 = vsel %vm3861_vm7, %v3863_v11, %v3859_v18 }
0x149d   :  { %v3867_v58 = vmul.f32 %v5984_v26, %v3820_v7  ;;  %v3903_v45 = vmul.f32 %v3894_v53, %v9069_v30  ;;  %vm3872_vm6 = vweird.f32 %v5984_v26 }
0x149e   :  { %vm3873_vm14 = vmor %vm3871_vm13, %vm3872_vm6 }
0x149f   :  { %v3868_v0 = vsub.f32 1.0, %v3867_v58  ;;  %v3927_v28 = vsel %vm3923_vm10, %v3903_v45, %v3894_v53  ;;  %v5666_v45 = vld [vmem:[%s10181_s3 + $0xe0] sm:$0xff] }
0x14a0   :  { %3937 = vrot.lane.b32.xlu0 %v3927_v28, %s6196_s29 }
0x14a1   :  { %v3869_v12 = vmul.f32 %v5984_v26, %v3868_v0 }
0x14a3   :  { %v3870_v32 = vadd.f32 %v5984_v26, %v3869_v12  ;;  %v5667_v12 = vld [vmem:[%s10181_s3 + $0xe8] sm:$0xff] }
0x14a4   :  { %v4156_v24 = vmul.f32 %v5667_v12, %v10310_v57  ;;  %v9186_v12 = vld [vmem:[%s10188_s8] sm:$0xff] }
0x14a5   :  { %v3874_v55 = vsel %vm3873_vm14, %v5984_v26, %v3870_v32  ;;  %v9158_v32 = vld [vmem:[%s10245_s26 + $0x60] sm:$0xff] }
0x14a6   :  { %v9078_v20 = vsel %vm3876_vm12, %v3878_v34, %v3874_v55 }
0x14a7   :  { %v3904_v21 = vmul.f32 %v3896_v47, %v9078_v20 }
0x14a9   :  { %v3928_v59 = vsel %vm3924_vm5, %v3904_v21, %v3896_v47  ;;  %v9164_v47 = vld [vmem:[%s10245_s26 + $0x68] sm:$0xff] }
0x14aa   :  { %3939 = vrot.lane.b32.xlu2 %v3928_v59, %s6196_s29 }
0x14de   :  { %v9085_v10 = vpop.permute.xlu2 %3933 }
0x14df   :  { %v3945_v7 = vsel %vm327_vm8, %v8814_v48, %v9085_v10 }
0x14e0   :  { %3965 = vrot.lane.b32.xlu0 %v3945_v7, %s6193_s5  ;;  %3953 = vrot.lane.b32.xlu1 %v3945_v7, %s6194_s20 }
0x14e1   :  { %3977 = vrot.lane.b32.xlu2 %v3945_v7, %s6192_s19 }
0x14e8   :  { %3989 = vrot.lane.b32.xlu1 %v3945_v7, %s6195_s21 }
0x1504   :  { %v9094_v61 = vpop.permute.xlu1 %3935  ;;  %v9126_v53 = vpop.permute.xlu2 %3939 }
0x1505   :  { %v9099_v43 = vsel %vm327_vm8, %v8790_v51, %v9094_v61  ;;  %v5664_v51 = vld [vmem:[%s10181_s3 + $0x60] sm:$0xff]  ;;  %v9134_v18 = vsel %vm327_vm8, %v8866_v62, %v9126_v53  ;;  %v4155_v62 = vmul.f32 %v5666_v45, %v10292_v29 }
0x1506   :  { %3979 = vrot.lane.b32.xlu1 %v9099_v43, %s6192_s19  ;;  %3967 = vrot.lane.b32.xlu2 %v9099_v43, %s6193_s5  ;;  %v4153_v11 = vmul.f32 %v5664_v51, %v10290_v2  ;;  %v9170_v51 = vld [vmem:[%s10245_s26 + $0xe0] sm:$0xff] }
0x1507   :  { %3955 = vrot.lane.b32.xlu0 %v9099_v43, %s6194_s20  ;;  %vm4540_vm4 = vcmp.ne.f32.partialorder %v9170_v51, 0.0 }
0x1508   :  { %5985 = vtanh.f32 %v4153_v11  ;;  %v9176_v11 = vld [vmem:[%s10245_s26 + $0xe8] sm:$0xff] }
0x1509   :  { %vm4541_vm7 = vcmp.ne.f32.partialorder %v9176_v11, 0.0 }
0x150e   :  { %v5986_v58 = vpop.eup %5985 }
0x150f   :  { %3991 = vrot.lane.b32.xlu0 %v9099_v43, %s6195_s21  ;;  %v4161_v0 = vmul.f32 0.5, %v5986_v58 }
0x1512   :  { %v9109_v48 = vpop.permute.xlu0 %3937 }
0x1513   :  { %v9114_v4 = vsel %vm327_vm8, %v8896_v41, %v9109_v48  ;;  %v5665_v41 = vld [vmem:[%s10181_s3 + $0x68] sm:$0xff] }
0x1514   :  { %3969 = vrot.lane.b32.xlu1 %v9114_v4, %s6193_s5  ;;  %3957 = vrot.lane.b32.xlu2 %v9114_v4, %s6194_s20  ;;  %v4154_v26 = vmul.f32 %v5665_v41, %v10291_v13 }
0x1516   :  { %5987 = vtanh.f32 %v4154_v26 }
0x1517   :  { %3981 = vrot.lane.b32.xlu0 %v9114_v4, %s6192_s19  ;;  %5989 = vtanh.f32 %v4155_v62 }
0x1518   :  { %5991 = vtanh.f32 %v4156_v24 }
0x151c   :  { %3959 = vrot.lane.b32.xlu1 %v9134_v18, %s6194_s20  ;;  %3993 = vrot.lane.b32.xlu2 %v9114_v4, %s6195_s21  ;;  %v5988_v28 = vpop.eup %5987 }
0x151d   :  { %v4162_v25 = vmul.f32 0.5, %v5988_v28  ;;  %v5990_v34 = vpop.eup %5989 }
0x151e   :  { %v4163_v55 = vmul.f32 0.5, %v5990_v34  ;;  %v5992_v21 = vpop.eup %5991 }
0x151f   :  { %3971 = vrot.lane.b32.xlu0 %v9134_v18, %s6193_s5  ;;  %v4164_v59 = vmul.f32 0.5, %v5992_v21 }
0x1524   :  { %3995 = vrot.lane.b32.xlu1 %v9134_v18, %s6195_s21  ;;  %3983 = vrot.lane.b32.xlu2 %v9134_v18, %s6192_s19 }
0x1527   :  { %4173 = vperm.xlu0 %5746, %v4161_v0  }
0x152c   :  { %4178 = vperm.xlu1 %5747, %v4162_v25  }
0x152f   :  { %4211 = vperm.xlu0 %5746, %v9158_v32  }
0x1534   :  { %4183 = vperm.xlu1 %5747, %v4163_v55  }
0x1537   :  { %4216 = vperm.xlu0 %5746, %v9164_v47  }
0x153b   :  { %v3978_v0 = vpop.permute.xlu2 %3977 }
0x153c   :  { %4188 = vperm.xlu1 %5747, %v4164_v59  }
0x153f   :  { %4221 = vperm.xlu0 %5746, %v9170_v51  }
0x1544   :  { %4226 = vperm.xlu1 %5747, %v9176_v11  }
0x1552   :  { %v3954_v41 = vpop.permute.xlu1 %3953  ;;  %v3966_v26 = vpop.permute.xlu0 %3965 }
0x1553   :  { %v4001_v58 = vsel %vm332_vm11, %v3945_v7, %v3954_v41 }
0x1554   :  { %v4005_v45 = vsel %vm463_vm0, %v4001_v58, %v3966_v26 }
0x1555   :  { %v4009_v62 = vsel %vm468_vm1, %v4005_v45, %v3978_v0  ;;  %v9198_v0 = vld [vmem:[%s10188_s8 + $0x8] sm:$0xff] }
0x155a   :  { %v3990_v28 = vpop.permute.xlu1 %3989 }
0x155b   :  { %v4013_v25 = vsel %vm473_vm2, %v4009_v62, %v3990_v28 }
0x155c   :  { %v4017_v24 = vmul.f32 %v9186_v12, %v4013_v25 }
0x155e   :  { %5650 = vmatmul.msk.f32.vlgmr.msrb.gmra.mxu1 %vm482_vm3, %v4017_v24 }
0x1560   :  { %v3968_v34 = vpop.permute.xlu2 %3967 }
0x156e   :  { %v3958_v41 = vpop.permute.xlu2 %3957 }
0x1578   :  { %v3980_v59 = vpop.permute.xlu1 %3979 }
0x1579   :  { %v3956_v55 = vpop.permute.xlu0 %3955 }
0x157a   :  { %v4002_v7 = vsel %vm332_vm11, %v9099_v43, %v3956_v55  ;;  %v4003_v43 = vsel %vm332_vm11, %v9114_v4, %v3958_v41 }
0x157b   :  { %v4006_v21 = vsel %vm463_vm0, %v4002_v7, %v3968_v34  ;;  %v3994_v34 = vpop.permute.xlu2 %3993 }
0x157c   :  { %v4010_v26 = vsel %vm468_vm1, %v4006_v21, %v3980_v59 }
0x1581   :  { %v3992_v58 = vpop.permute.xlu0 %3991 }
0x1582   :  { %v4014_v45 = vsel %vm473_vm2, %v4010_v26, %v3992_v58 }
0x1583   :  { %v4018_v62 = vmul.f32 %v9198_v0, %v4014_v45  ;;  %v3984_v41 = vpop.permute.xlu2 %3983 }
0x1585   :  { %5651 = vmatmul.msk.f32.gmra.mxu1 %vm482_vm3, %v4018_v62 }
0x1586   :  { %v3970_v28 = vpop.permute.xlu1 %3969 }
0x1587   :  { %v4007_v25 = vsel %vm463_vm0, %v4003_v43, %v3970_v28 }
0x1589   :  { %v3982_v24 = vpop.permute.xlu0 %3981 }
0x158a   :  { %v4011_v55 = vsel %vm468_vm1, %v4007_v25, %v3982_v24  ;;  %v4063_v24 = vmul.f32 %v8727_v33, %v8774_v37  ;;  %v4065_v37 = vmul.f32 %v8727_v33, %v8824_v50  ;;  %v5668_v33 = vld [vmem:[%s10183_s4 + $0x6] sm:$0x1] }
0x158b   :  { %v4015_v7 = vsel %vm473_vm2, %v4011_v55, %v3994_v34  ;;  %v4165_v50 = vmul.f32 %v5668_v33, %v10295_v44  ;;  %v9261_v33 = vld [vmem:[%s10186_s9] sm:$0xff] }
0x158c   :  { %v4019_v21 = vmul.f32 %v9186_v12, %v4015_v7 }
0x158e   :  { %5652 = vmatmul.msk.f32.gmra.mxu1 %vm482_vm3, %v4019_v21  ;;  %v3960_v59 = vpop.permute.xlu1 %3959 }
0x158f   :  { %v4004_v26 = vsel %vm332_vm11, %v9134_v18, %v3960_v59  ;;  %v4062_v18 = vmul.f32 %v8734_v17, %v8766_v63  ;;  %v4064_v63 = vmul.f32 %v8734_v17, %v8792_v16 }
0x1591   :  { %v3972_v58 = vpop.permute.xlu0 %3971 }
0x1592   :  { %v4008_v4 = vsel %vm463_vm0, %v4004_v26, %v3972_v58 }
0x1593   :  { %v4012_v45 = vsel %vm468_vm1, %v4008_v4, %v3984_v41 }
0x1596   :  { %v3996_v62 = vpop.permute.xlu1 %3995 }
0x1597   :  { %v4016_v43 = vsel %vm473_vm2, %v4012_v45, %v3996_v62 }
0x1598   :  { %v4020_v28 = vmul.f32 %v9198_v0, %v4016_v43 }
0x159a   :  { %5653 = vmatmul.msk.f32.gmra.mxu1 %vm482_vm3, %v4020_v28 }
0x15db   :  { %v4050_v25 = vpop.f32.mrf.mxu1 }
0x15dc   :  { %v4066_v21 = vadd.f32 %v4062_v18, %v4050_v25 }
0x15de   :  { %v4070_v59 = vadd.f32 %v8747_v9, %v4066_v21  ;;  %v9246_v21 = vpop.permute.xlu1 %4178 }
0x1602   :  { %v4053_v34 = vpop.f32.mrf.mxu1 }
0x1603   :  { %v4067_v55 = vadd.f32 %v4063_v24, %v4053_v34  ;;  %v9238_v34 = vpop.permute.xlu0 %4173 }
0x1605   :  { %v4071_v7 = vadd.f32 %v8741_v46, %v4067_v55 }
0x1607   :  { %5993 = vtanh.f32 %v4071_v7 }
0x1608   :  { %5995 = vtanh.f32 %v4070_v59 }
0x160b   :  { %v4056_v58 = vpop.f32.mrf.mxu1 }
0x160c   :  { %v4068_v43 = vadd.f32 %v4064_v63, %v4056_v58  ;;  %v4079_v63 = vsub.f32 1.0, %v9060_v56 }
0x160d   :  { %v5994_v26 = vpop.eup %5993 }
0x160e   :  { %4092 = vrot.lane.b32.xlu2 %v5994_v26, %s6196_s29  ;;  %v5996_v4 = vpop.eup %5995  ;;  %v4072_v28 = vadd.f32 %v8747_v9, %v4068_v43  ;;  %v5669_v9 = vld [vmem:[%s10183_s4 + $0xe] sm:$0x1] }
0x160f   :  { %v4166_v18 = vmul.f32 %v5669_v9, %v10305_v22 }
0x1616   :  { %4090 = vrot.lane.b32.xlu2 %v5996_v4, %s6196_s29  ;;  %v4212_v4 = vpop.permute.xlu0 %4211 }
0x1617   :  { %v4059_v41 = vpop.f32.mrf.mxu1 }
0x1618   :  { %v4069_v45 = vadd.f32 %v4065_v37, %v4059_v41 }
0x161a   :  { %v4073_v62 = vadd.f32 %v8741_v46, %v4069_v45  ;;  %v5761_v45 = vld [vmem:[%s10180_s2 + $0x6] ss:$0 sm:$0xff] }
0x161c   :  { %5997 = vtanh.f32 %v4073_v62 }
0x161d   :  { %5999 = vtanh.f32 %v4072_v28  ;;  %v4083_v28 = vmul.f32 %v4079_v63, %v9094_v61  ;;  %v9271_v61 = vld [vmem:[%s10184_s0 + $0x68] sm:$0xff] }
0x161e   :  { %6001 = vtanh.f32 %v4165_v50 }
0x161f   :  { %6003 = vtanh.f32 %v4166_v18 }
0x1622   :  { %v5998_v25 = vpop.eup %5997 }
0x1623   :  { %4096 = vrot.lane.b32.xlu2 %v5998_v25, %s6196_s29  ;;  %v6000_v24 = vpop.eup %5999 }
0x1624   :  { %v6002_v17 = vpop.eup %6001 }
0x1625   :  { %v4169_v46 = vmul.f32 0.5, %v6002_v17  ;;  %v6004_v58 = vpop.eup %6003  ;;  %v4235_v17 = vmul.f32 %v5761_v45, %v4212_v4  ;;  %v4217_v4 = vpop.permute.xlu0 %4216 }
0x1626   :  { %v4170_v62 = vmul.f32 0.5, %v6004_v58 }
0x1627   :  { %v9236_v16 = vperm.slane %v4169_v46, 0  ;;  %v9264_v46 = vpop.permute.xlu1 %4183 }
0x1628   :  { %v9266_v9 = vperm.slane %v4170_v62, 0  ;;  %v4236_v62 = vmul.f32 %v5761_v45, %v4217_v4  ;;  %v4081_v4 = vsub.f32 1.0, %v9078_v20 }
0x1629   :  { %v4197_v55 = vsub.f32 %v9238_v34, %v9236_v16  ;;  %v4198_v26 = vsub.f32 %v9246_v21, %v9236_v16 }
0x162a   :  { %v4199_v58 = vsub.f32 %v9264_v46, %v9266_v9 }
0x162b   :  { %4094 = vrot.lane.b32.xlu2 %v6000_v24, %s6196_s29  ;;  %v4201_v7 = vand.u32 2147483647, %v4197_v55  ;;  %v4202_v41 = vand.u32 2147483647, %v4198_v26  ;;  %v4078_v26 = vsub.f32 1.0, %v9049_v52 }
0x162d   :  { %v4205_v59 = vmul.f32 %v4201_v7, %v10306_v40  ;;  %v4206_v24 = vmul.f32 %v4202_v41, %v6457_v60  ;;  %v4082_v41 = vmul.f32 %v4078_v26, %v9085_v10 }
0x162f   :  { %v4239_v37 = vadd.f32 1.0, %v4205_v59  ;;  %v4240_v18 = vadd.f32 1.0, %v4206_v24  ;;  %v9298_v10 = vpop.permute.xlu1 %4188 }
0x1631   :  { %v4243_v50 = vmul.f32 %v9261_v33, %v4239_v37 }
0x1633   :  { %v4247_v7 = vmul.f32 %v4243_v50, %v4235_v17  ;;  %v9296_v50 = vld [vmem:[%s10184_s0 + $0x60] sm:$0xff] }
0x1635   :  { %v4251_v63 = vmul.f32 %v4247_v7, %v6500_v35  ;;  %v4200_v7 = vsub.f32 %v9298_v10, %v9266_v9 }
0x1637   :  { %v9306_v45 = vadd.f32 %v6489_v23, %v4251_v63  ;;  %v4204_v26 = vand.u32 2147483647, %v4200_v7 }
0x1668   :  { %v4093_v43 = vpop.permute.xlu2 %4092 }
0x1669   :  { %v4103_v25 = vmul.f32 %v4093_v43, %v9060_v56  ;;  %v9290_v43 = vld [vmem:[%s10186_s9 + $0x8] sm:$0xff] }
0x166b   :  { %v4107_v55 = vadd.f32 %v4103_v25, %v4083_v28  ;;  %v4244_v28 = vmul.f32 %v9290_v43, %v4240_v18  ;;  %v4203_v25 = vand.u32 2147483647, %v4199_v58  ;;  %v5762_v58 = vld [vmem:[%s10180_s2 + $0xe] ss:$0 sm:$0xff] }
0x166d   :  { %v9276_v56 = vsel %vm3922_vm15, %v4107_v55, %v8799_v38  ;;  %v4248_v17 = vmul.f32 %v4244_v28, %v4236_v62  ;;  %v4207_v18 = vmul.f32 %v4203_v25, %v10306_v40  ;;  %v4208_v28 = vmul.f32 %v4204_v26, %v6457_v60 }
0x166e   :  { %v4260_v59 = vsel %vm327_vm8, %v9271_v61, %v9276_v56  ;;  %vm4539_vm15 = vcmp.ne.f32.partialorder %v9164_v47, 0.0 }
0x166f   :  { %4283 = vmatpush.msrb.mxu2 %v4260_v59  ;;  %v4252_v3 = vmul.f32 %v4248_v17, %v6503_v36  ;;  %v4241_v59 = vadd.f32 1.0, %v4207_v18 }
0x1670   :  { %v4091_v37 = vpop.permute.xlu2 %4090 }
0x1671   :  { %v4102_v49 = vmul.f32 %v4091_v37, %v9049_v52  ;;  %v4222_v37 = vpop.permute.xlu0 %4221  ;;  %v4256_v62 = vadd.f32 %v6492_v27, %v4252_v3  ;;  %v4080_v3 = vsub.f32 1.0, %v9069_v30 }
0x1672   :  { %v4237_v25 = vmul.f32 %v5762_v58, %v4222_v37 }
0x1673   :  { %v4106_v24 = vadd.f32 %v4102_v49, %v4082_v41  ;;  %v4085_v49 = vmul.f32 %v4081_v4, %v9126_v53  ;;  %v4084_v4 = vmul.f32 %v4080_v3, %v9109_v48  ;;  %v4321_v3 = vmul.f32 %v9306_v45, %v9236_v16 }
0x1675   :  { %v9303_v52 = vsel %vm3921_vm9, %v4106_v24, %v8819_v39  ;;  %v4245_v24 = vmul.f32 %v9261_v33, %v4241_v59  ;;  %v4227_v59 = vpop.permute.xlu1 %4226  ;;  %vm4538_vm9 = vcmp.ne.f32.partialorder %v9158_v32, 0.0 }
0x1676   :  { %v4259_v55 = vsel %vm327_vm8, %v9296_v50, %v9303_v52 }
0x1677   :  { %4284 = vmatpush.msrb.mxu2 %v4259_v55  ;;  %v9330_v55 = vld [vmem:[%s10184_s0 + $0xe8] sm:$0xff]  ;;  %v4249_v18 = vmul.f32 %v4245_v24, %v4237_v25 }
0x1678   :  { %5670 = vmatmul.msk.f32.vlgmr.msrb.gmra.mxu2 %vm332_vm11, %v9306_v45  ;;  %v4562_v45 = vsel %vm4538_vm9, 1, %v10282_v1 }
0x167d   :  { %v4097_v41 = vpop.permute.xlu2 %4096 }
0x167e   :  { %v4105_v63 = vmul.f32 %v4097_v41, %v9078_v20  ;;  %v4242_v20 = vadd.f32 1.0, %v4208_v28  ;;  %v4253_v41 = vmul.f32 %v4249_v18, %v6500_v35  ;;  %v9348_v28 = vld [vmem:[%s10184_s0 + $0xe0] sm:$0xff] }
0x1680   :  { %v4109_v17 = vadd.f32 %v4105_v63, %v4085_v49  ;;  %5671 = vmatmul.msk.f32.gmra.mxu2 %vm332_vm11, %v4256_v62  ;;  %v4246_v31 = vmul.f32 %v9290_v43, %v4242_v20  ;;  %v4238_v49 = vmul.f32 %v5762_v58, %v4227_v59  ;;  %v4257_v48 = vadd.f32 %v6489_v23, %v4253_v41 }
0x1681   :  { %v4325_v59 = vsel %vm332_vm11, %v4321_v3, 0.0 }
0x1682   :  { %v9335_v53 = vsel %vm3924_vm5, %v4109_v17, %v8874_v42  ;;  %v4250_v24 = vmul.f32 %v4246_v31, %v4238_v49 }
0x1683   :  { %v4262_v7 = vsel %vm327_vm8, %v9330_v55, %v9335_v53 }
0x1684   :  { %4312 = vmatpush.msrb.mxu3 %v4262_v7  ;;  %v4254_v58 = vmul.f32 %v4250_v24, %v6503_v36 }
0x1685   :  { %v4095_v26 = vpop.permute.xlu2 %4094 }
0x1686   :  { %v4104_v37 = vmul.f32 %v4095_v26, %v9069_v30  ;;  %v4258_v17 = vadd.f32 %v6492_v27, %v4254_v58  ;;  %v4322_v26 = vmul.f32 %v4256_v62, %v9236_v16  ;;  %v4563_v16 = vsel %vm4539_vm15, 1, %v10282_v1 }
0x1687   :  { %v4564_v62 = vsel %vm4540_vm4, 1, %v10282_v1 }
0x1688   :  { %v4108_v63 = vadd.f32 %v4104_v37, %v4084_v4  ;;  %v4324_v4 = vmul.f32 %v4258_v17, %v9266_v9  ;;  %v4323_v37 = vmul.f32 %v4257_v48, %v9266_v9  ;;  %v4328_v41 = vsel %vm332_vm11, %v4322_v26, 0.0 }
0x168a   :  { %v9353_v25 = vsel %vm3923_vm10, %v4108_v63, %v8904_v8  ;;  %v4334_v31 = vsel %vm332_vm11, %v4324_v4, 0.0  ;;  %v4331_v49 = vsel %vm332_vm11, %v4323_v37, 0.0 }
0x168b   :  { %v4261_v30 = vsel %vm327_vm8, %v9348_v28, %v9353_v25 }
0x168c   :  { %4313 = vmatpush.msrb.mxu3 %v4261_v30 }
0x168d   :  { %5672 = vmatmul.msk.f32.vlgmr.msrb.gmra.mxu3 %vm332_vm11, %v4257_v48  ;;  %v4565_v48 = vsel %vm4541_vm7, 1, %v10282_v1 }
0x1695   :  { %5673 = vmatmul.msk.f32.gmra.mxu3 %vm332_vm11, %v4258_v17 }
0x16fb   :  { %v4286_v20 = vpop.f32.mrf.mxu2 }
0x16fc   :  { %4365 = vrot.lane.b32.xlu1 %v4286_v20, %s6192_s19  ;;  %4341 = vrot.lane.b32.xlu0 %v4286_v20, %s6194_s20 }
0x16fd   :  { %4353 = vrot.lane.b32.xlu2 %v4286_v20, %s6193_s5 }
0x1703   :  { %v4289_v14 = vpop.f32.mrf.mxu2 }
0x1704   :  { %4377 = vrot.lane.b32.xlu0 %v4286_v20, %s6195_s21  ;;  %4355 = vrot.lane.b32.xlu1 %v4289_v14, %s6193_s5 }
0x1705   :  { %4343 = vrot.lane.b32.xlu2 %v4289_v14, %s6194_s20 }
0x170c   :  { %4367 = vrot.lane.b32.xlu0 %v4289_v14, %s6192_s19 }
0x170d   :  { %4379 = vrot.lane.b32.xlu2 %v4289_v14, %s6195_s21 }
0x1710   :  { %v4315_v18 = vpop.f32.mrf.mxu3 }
0x1711   :  { %4345 = vrot.lane.b32.xlu1 %v4315_v18, %s6194_s20 }
0x1714   :  { %4357 = vrot.lane.b32.xlu0 %v4315_v18, %s6193_s5 }
0x1715   :  { %4369 = vrot.lane.b32.xlu2 %v4315_v18, %s6192_s19 }
0x1718   :  { %v9374_v7 = vpop.f32.mrf.mxu3 }
0x1719   :  { %4381 = vrot.lane.b32.xlu1 %v4315_v18, %s6195_s21 }
0x171c   :  { %4347 = vrot.lane.b32.xlu0 %v9374_v7, %s6194_s20 }
0x171d   :  { %4359 = vrot.lane.b32.xlu2 %v9374_v7, %s6193_s5 }
0x1721   :  { %4371 = vrot.lane.b32.xlu1 %v9374_v7, %s6192_s19 }
0x1724   :  { %4383 = vrot.lane.b32.xlu0 %v9374_v7, %s6195_s21 }
0x1746   :  { %4326 = vadd.xlane.f32.xlu2 %v4325_v59 }
0x174b   :  { %4329 = vadd.xlane.f32.xlu1 %v4328_v41 }
0x174e   :  { %4335 = vadd.xlane.f32.xlu2 %v4334_v31  ;;  %4332 = vadd.xlane.f32.xlu0 %v4331_v49 }
0x1757   :  { %v4354_v9 = vpop.permute.xlu2 %4353 }
0x175f   :  { %v4344_v24 = vpop.permute.xlu2 %4343 }
0x1762   :  { %4567 = vperm.xlu0 %5746, %v4562_v45  }
0x1764   :  { %4546 = vrot.lane.b32.xlu1 %v9303_v52, %s6197_s25 }
0x1766   :  { %4548 = vrot.lane.b32.xlu2 %v9276_v56, %s6197_s25 }
0x1767   :  { %v4380_v59 = vpop.permute.xlu2 %4379 }
0x176a   :  { %4570 = vperm.xlu0 %5746, %v4563_v16  }
0x176c   :  { %4550 = vrot.lane.b32.xlu1 %v9353_v25, %s6197_s25 }
0x176e   :  { %4573 = vperm.xlu2 %5748, %v4564_v62   ;;  %v4342_v32 = vpop.permute.xlu0 %4341  ;;  %v4366_v63 = vpop.permute.xlu1 %4365 }
0x176f   :  { %v4389_v47 = vsel %vm332_vm11, %v4286_v20, %v4342_v32  ;;  %v4390_v20 = vsel %vm332_vm11, %v4289_v14, %v4344_v24 }
0x1770   :  { %v4393_v51 = vsel %vm463_vm0, %v4389_v47, %v4354_v9  ;;  %v4370_v9 = vpop.permute.xlu2 %4369 }
0x1771   :  { %v4397_v30 = vsel %vm468_vm1, %v4393_v51, %v4366_v63 }
0x1772   :  { %4552 = vrot.lane.b32.xlu0 %v9335_v53, %s6197_s25 }
0x1774   :  { %4576 = vperm.xlu1 %5747, %v4565_v48  }
0x1776   :  { %v4378_v58 = vpop.permute.xlu0 %4377  ;;  %v4356_v11 = vpop.permute.xlu1 %4355 }
0x1777   :  { %v4401_v17 = vsel %vm473_vm2, %v4397_v30, %v4378_v58  ;;  %v4394_v26 = vsel %vm463_vm0, %v4390_v20, %v4356_v11 }
0x1778   :  { %v4405_v3 = vmul.f32 %v9186_v12, %v4401_v17  ;;  %v4360_v24 = vpop.permute.xlu2 %4359 }
0x177a   :  { %5674 = vmatmul.msk.f32.vlgmr.msra.gmra.mxu0 %vm482_vm3, %v4405_v3 }
0x177e   :  { %v4368_v4 = vpop.permute.xlu0 %4367 }
0x177f   :  { %v4398_v37 = vsel %vm468_vm1, %v4394_v26, %v4368_v4 }
0x1780   :  { %v4402_v41 = vsel %vm473_vm2, %v4398_v37, %v4380_v59 }
0x1781   :  { %v4406_v31 = vmul.f32 %v9198_v0, %v4402_v41 }
0x1783   :  { %5675 = vmatmul.msk.f32.gmra.mxu0 %vm482_vm3, %v4406_v31  ;;  %v4346_v49 = vpop.permute.xlu1 %4345 }
0x1784   :  { %v4391_v45 = vsel %vm332_vm11, %v4315_v18, %v4346_v49 }
0x1786   :  { %v4358_v16 = vpop.permute.xlu0 %4357 }
0x1787   :  { %v4395_v62 = vsel %vm463_vm0, %v4391_v45, %v4358_v16 }
0x1788   :  { %v4399_v14 = vsel %vm468_vm1, %v4395_v62, %v4370_v9 }
0x178b   :  { %v4382_v32 = vpop.permute.xlu1 %4381 }
0x178c   :  { %v4403_v47 = vsel %vm473_vm2, %v4399_v14, %v4382_v32 }
0x178d   :  { %v4407_v63 = vmul.f32 %v9186_v12, %v4403_v47 }
0x178e   :  { %v4348_v48 = vpop.permute.xlu0 %4347 }
0x178f   :  { %5676 = vmatmul.msk.f32.gmra.mxu0 %vm482_vm3, %v4407_v63  ;;  %v4392_v51 = vsel %vm332_vm11, %v9374_v7, %v4348_v48 }
0x1790   :  { %v4396_v18 = vsel %vm463_vm0, %v4392_v51, %v4360_v24 }
0x1793   :  { %v4372_v30 = vpop.permute.xlu1 %4371 }
0x1794   :  { %v4400_v58 = vsel %vm468_vm1, %v4396_v18, %v4372_v30 }
0x1796   :  { %v4384_v17 = vpop.permute.xlu0 %4383 }
0x1797   :  { %v4404_v3 = vsel %vm473_vm2, %v4400_v58, %v4384_v17 }
0x1798   :  { %v4408_v11 = vmul.f32 %v9198_v0, %v4404_v3 }
0x179a   :  { %5677 = vmatmul.msk.f32.gmra.mxu0 %vm482_vm3, %v4408_v11 }
0x17b9   :  { %v4327_v20 = vpop.xlane.xlu2 %4326 }
0x17ba   :  { %v4450_v59 = vmul.f32 %v9024_v54, %v4327_v20 }
0x17be   :  { %v4330_v37 = vpop.xlane.xlu1 %4329 }
0x17bf   :  { %v4451_v31 = vmul.f32 %v9036_v15, %v4330_v37 }
0x17c1   :  { %v4333_v32 = vpop.xlane.xlu0 %4332 }
0x17c2   :  { %v4452_v47 = vmul.f32 %v9024_v54, %v4333_v32 }
0x17d4   :  { %v9442_v37 = vpop.permute.xlu0 %4567 }
0x17d5   :  { %vm4578_vm12 = vcmp.eq.s32.totalorder %v9442_v37, 1  ;;  %v5764_v37 = vld [vmem:[%s10180_s2 + $0xf] ss:$0 sm:$0xff] }
0x17f7   :  { %v4438_v26 = vpop.f32.mrf.mxu0 }
0x17f8   :  { %v4454_v4 = vadd.f32 %v4450_v59, %v4438_v26  ;;  %v4336_v26 = vpop.xlane.xlu2 %4335 }
0x17fa   :  { %v4458_v7 = vadd.f32 %v9030_v6, %v4454_v4 }
0x17fc   :  { %v5678_v41 = vmul.f32 -1.442695, %v4458_v7  ;;  %v4453_v7 = vmul.f32 %v9036_v15, %v4336_v26 }
0x17fe   :  { %6005 = vpow2.f32 %v5678_v41 }
0x1800   :  { %v4441_v49 = vpop.f32.mrf.mxu0 }
0x1801   :  { %v4455_v45 = vadd.f32 %v4451_v31, %v4441_v49  ;;  %v4547_v31 = vpop.permute.xlu1 %4546 }
0x1803   :  { %v4459_v16 = vadd.f32 %v9042_v5, %v4455_v45 }
0x1804   :  { %v6006_v9 = vpop.eup %6005 }
0x1805   :  { %v4474_v62 = vadd.f32 1.0, %v6006_v9  ;;  %v5679_v14 = vmul.f32 -1.442695, %v4459_v16 }
0x1807   :  { %6007 = vrcp.f32 %v4474_v62  ;;  %v4489_v11 = vand.u32 2147483648, %v4474_v62  ;;  %v4487_v59 = vand.u32 2147483647, %v4474_v62  ;;  %vm4483_vm6 = vweird.f32 %v4474_v62 }
0x1808   :  { %6009 = vpow2.f32 %v5679_v14 }
0x1809   :  { %v4490_v54 = vor.u32 1.1754944e-38, %v4489_v11  ;;  %vm4488_vm14 = vcmp.eq.f32.partialorder %v4487_v59, 8.507059e+37 }
0x180c   :  { %v4444_v63 = vpop.f32.mrf.mxu0 }
0x180d   :  { %v6008_v48 = vpop.eup %6007  ;;  %v4456_v51 = vadd.f32 %v4452_v47, %v4444_v63 }
0x180e   :  { %v6010_v24 = vpop.eup %6009  ;;  %v4479_v18 = vmul.f32 %v6008_v48, %v4474_v62  ;;  %vm4484_vm10 = vweird.f32 %v6008_v48 }
0x180f   :  { %v4475_v30 = vadd.f32 1.0, %v6010_v24  ;;  %v4460_v58 = vadd.f32 %v9030_v6, %v4456_v51  ;;  %vm4485_vm13 = vmor %vm4483_vm6, %vm4484_vm10 }
0x1810   :  { %v4480_v17 = vsub.f32 1.0, %v4479_v18 }
0x1811   :  { %6011 = vrcp.f32 %v4475_v30  ;;  %v5680_v3 = vmul.f32 -1.442695, %v4460_v58  ;;  %v4504_v51 = vand.u32 2147483648, %v4475_v30  ;;  %vm4498_vm9 = vweird.f32 %v4475_v30 }
0x1812   :  { %v4481_v20 = vmul.f32 %v6008_v48, %v4480_v17 }
0x1813   :  { %6013 = vpow2.f32 %v5680_v3  ;;  %v4505_v17 = vor.u32 1.1754944e-38, %v4504_v51  ;;  %v9452_v3 = vpop.permute.xlu0 %4570 }
0x1814   :  { %v4482_v4 = vadd.f32 %v6008_v48, %v4481_v20  ;;  %vm4579_vm7 = vcmp.eq.s32.totalorder %v9452_v3, 1 }
0x1816   :  { %v4486_v41 = vsel %vm4485_vm13, %v6008_v48, %v4482_v4  ;;  %v4502_v48 = vand.u32 2147483647, %v4475_v30 }
0x1817   :  { %v6012_v6 = vpop.eup %6011  ;;  %v4447_v49 = vpop.f32.mrf.mxu0  ;;  %v9444_v45 = vsel %vm4488_vm14, %v4490_v54, %v4486_v41 }
0x1818   :  { %v4494_v16 = vmul.f32 %v6012_v6, %v4475_v30  ;;  %v4457_v9 = vadd.f32 %v4453_v7, %v4447_v49  ;;  %v4558_v14 = vmul.f32 %v4547_v31, %v9444_v45  ;;  %vm4499_vm5 = vweird.f32 %v6012_v6 }
0x1819   :  { %v6014_v32 = vpop.eup %6013  ;;  %vm4500_vm15 = vmor %vm4498_vm9, %vm4499_vm5  ;;  %vm4503_vm4 = vcmp.eq.f32.partialorder %v4502_v48, 8.507059e+37 }
0x181a   :  { %v4495_v62 = vsub.f32 1.0, %v4494_v16  ;;  %v4476_v47 = vadd.f32 1.0, %v6014_v32  ;;  %v4461_v15 = vadd.f32 %v9042_v5, %v4457_v9  ;;  %v4582_v63 = vsel %vm4578_vm12, %v4558_v14, %v4547_v31  ;;  %v4549_v5 = vpop.permute.xlu2 %4548 }
0x181b   :  { %4590 = vrot.lane.b32.xlu2 %v4582_v63, %s6196_s29 }
0x181c   :  { %6015 = vrcp.f32 %v4476_v47  ;;  %v5681_v24 = vmul.f32 -1.442695, %v4461_v15  ;;  %v4496_v18 = vmul.f32 %v6012_v6, %v4495_v62  ;;  %v4519_v31 = vand.u32 2147483648, %v4476_v47  ;;  %v4551_v62 = vpop.permute.xlu1 %4550 }
0x181d   :  { %v4517_v49 = vand.u32 2147483647, %v4476_v47  ;;  %vm4513_vm6 = vweird.f32 %v4476_v47 }
0x181e   :  { %6017 = vpow2.f32 %v5681_v24  ;;  %v4497_v58 = vadd.f32 %v6012_v6, %v4496_v18  ;;  %v4520_v9 = vor.u32 1.1754944e-38, %v4519_v31 }
0x181f   :  { %vm4518_vm14 = vcmp.eq.f32.partialorder %v4517_v49, 8.507059e+37 }
0x1820   :  { %v4501_v11 = vsel %vm4500_vm15, %v6012_v6, %v4497_v58 }
0x1821   :  { %v9454_v20 = vsel %vm4503_vm4, %v4505_v17, %v4501_v11 }
0x1822   :  { %v6016_v59 = vpop.eup %6015  ;;  %v4559_v26 = vmul.f32 %v4549_v5, %v9454_v20  ;;  %v9461_v14 = vpop.permute.xlu2 %4573 }
0x1823   :  { %v4509_v4 = vmul.f32 %v6016_v59, %v4476_v47  ;;  %vm4514_vm10 = vweird.f32 %v6016_v59  ;;  %vm4580_vm5 = vcmp.eq.s32.totalorder %v9461_v14, 1  ;;  %v6173_v14 = vld [vmem:[%s10187_s11] sm:$0xff] }
0x1824   :  { %v6018_v54 = vpop.eup %6017  ;;  %v4583_v7 = vsel %vm4579_vm7, %v4559_v26, %v4549_v5  ;;  %vm4515_vm13 = vmor %vm4513_vm6, %vm4514_vm10 }
0x1825   :  { %v4510_v30 = vsub.f32 1.0, %v4509_v4  ;;  %v4477_v41 = vadd.f32 1.0, %v6018_v54  ;;  %4592 = vrot.lane.b32.xlu0 %v4583_v7, %s6196_s29  ;;  %v4553_v4 = vpop.permute.xlu0 %4552 }
0x1827   :  { %6019 = vrcp.f32 %v4477_v41  ;;  %v4511_v6 = vmul.f32 %v6016_v59, %v4510_v30  ;;  %v4534_v47 = vand.u32 2147483648, %v4477_v41  ;;  %v4532_v17 = vand.u32 2147483647, %v4477_v41 }
0x1828   :  { %vm4528_vm15 = vweird.f32 %v4477_v41 }
0x1829   :  { %v4512_v16 = vadd.f32 %v6016_v59, %v4511_v6  ;;  %v4535_v5 = vor.u32 1.1754944e-38, %v4534_v47  ;;  %vm4533_vm10 = vcmp.eq.f32.partialorder %v4532_v17, 8.507059e+37 }
0x182b   :  { %v4516_v32 = vsel %vm4515_vm13, %v6016_v59, %v4512_v16  ;;  %v9470_v59 = vpop.permute.xlu1 %4576 }
0x182c   :  { %v9463_v15 = vsel %vm4518_vm14, %v4520_v9, %v4516_v32  ;;  %vm4581_vm6 = vcmp.eq.s32.totalorder %v9470_v59, 1 }
0x182d   :  { %v6020_v63 = vpop.eup %6019  ;;  %v4560_v48 = vmul.f32 %v4551_v62, %v9463_v15 }
0x182e   :  { %v4524_v51 = vmul.f32 %v6020_v63, %v4477_v41  ;;  %vm4529_vm9 = vweird.f32 %v6020_v63 }
0x182f   :  { %v4584_v24 = vsel %vm4580_vm5, %v4560_v48, %v4551_v62  ;;  %vm4530_vm4 = vmor %vm4528_vm15, %vm4529_vm9  ;;  %v5697_v62 = vld [vmem:[%s10181_s3 + $0x78] sm:$0xff] }
0x1830   :  { %v4525_v18 = vsub.f32 1.0, %v4524_v51  ;;  %4594 = vrot.lane.b32.xlu1 %v4584_v24, %s6196_s29 }
0x1832   :  { %v4526_v58 = vmul.f32 %v6020_v63, %v4525_v18  ;;  %v5699_v18 = vld [vmem:[%s10181_s3 + $0xf8] sm:$0xff] }
0x1833   :  { %v4813_v47 = vmul.f32 %v5699_v18, %v10310_v57  ;;  %v9558_v57 = vld [vmem:[%s10245_s26 + $0xf0] sm:$0xff] }
0x1834   :  { %v4527_v11 = vadd.f32 %v6020_v63, %v4526_v58  ;;  %vm5197_vm13 = vcmp.ne.f32.partialorder %v9558_v57, 0.0 }
0x1836   :  { %v4531_v26 = vsel %vm4530_vm4, %v6020_v63, %v4527_v11  ;;  %v4811_v63 = vmul.f32 %v5697_v62, %v10291_v13 }
0x1837   :  { %v9472_v54 = vsel %vm4533_vm10, %v4535_v5, %v4531_v26  ;;  %v9552_v5 = vld [vmem:[%s10245_s26 + $0x78] sm:$0xff] }
0x1838   :  { %v4561_v7 = vmul.f32 %v4553_v4, %v9472_v54 }
0x183a   :  { %v4585_v30 = vsel %vm4581_vm6, %v4561_v7, %v4553_v4  ;;  %v9564_v4 = vld [vmem:[%s10245_s26 + $0xf8] sm:$0xff] }
0x183b   :  { %4596 = vrot.lane.b32.xlu2 %v4585_v30, %s6196_s29  ;;  %vm5198_vm14 = vcmp.ne.f32.partialorder %v9564_v4, 0.0 }
0x1875   :  { %v9479_v31 = vpop.permute.xlu2 %4590 }
0x1876   :  { %v4602_v41 = vsel %vm327_vm8, %v9296_v50, %v9479_v31 }
0x1877   :  { %4610 = vrot.lane.b32.xlu0 %v4602_v41, %s6194_s20  ;;  %4622 = vrot.lane.b32.xlu1 %v4602_v41, %s6193_s5 }
0x1878   :  { %4634 = vrot.lane.b32.xlu2 %v4602_v41, %s6192_s19 }
0x187f   :  { %4646 = vrot.lane.b32.xlu0 %v4602_v41, %s6195_s21 }
0x1895   :  { %v9511_v9 = vpop.permute.xlu2 %4596 }
0x1897   :  { %v9488_v6 = vpop.permute.xlu0 %4592 }
0x1898   :  { %v4603_v49 = vsel %vm327_vm8, %v9271_v61, %v9488_v6  ;;  %v5696_v61 = vld [vmem:[%s10181_s3 + $0x70] sm:$0xff] }
0x1899   :  { %4636 = vrot.lane.b32.xlu0 %v4603_v49, %s6192_s19  ;;  %4612 = vrot.lane.b32.xlu1 %v4603_v49, %s6194_s20  ;;  %v4810_v32 = vmul.f32 %v5696_v61, %v10290_v2  ;;  %v5698_v2 = vld [vmem:[%s10181_s3 + $0xf0] sm:$0xff] }
0x189a   :  { %4624 = vrot.lane.b32.xlu2 %v4603_v49, %s6193_s5 }
0x189b   :  { %6021 = vtanh.f32 %v4810_v32 }
0x189c   :  { %6023 = vtanh.f32 %v4811_v63 }
0x18a1   :  { %4648 = vrot.lane.b32.xlu1 %v4603_v49, %s6195_s21  ;;  %v6022_v48 = vpop.eup %6021 }
0x18a2   :  { %v9497_v50 = vpop.permute.xlu1 %4594  ;;  %v6024_v13 = vpop.eup %6023  ;;  %v4818_v51 = vmul.f32 0.5, %v6022_v48 }
0x18a3   :  { %v9502_v16 = vsel %vm327_vm8, %v9348_v28, %v9497_v50  ;;  %v9522_v28 = vsel %vm327_vm8, %v9330_v55, %v9511_v9  ;;  %v4812_v55 = vmul.f32 %v5698_v2, %v10292_v29  ;;  %v4819_v24 = vmul.f32 0.5, %v6024_v13  ;;  %v9546_v29 = vld [vmem:[%s10245_s26 + $0x70] sm:$0xff] }
0x18a4   :  { %4626 = vrot.lane.b32.xlu0 %v9502_v16, %s6193_s5  ;;  %4614 = vrot.lane.b32.xlu2 %v9502_v16, %s6194_s20 }
0x18a5   :  { %6025 = vtanh.f32 %v4812_v55 }
0x18a6   :  { %6027 = vtanh.f32 %v4813_v47 }
0x18a9   :  { %4638 = vrot.lane.b32.xlu1 %v9502_v16, %s6192_s19 }
0x18ab   :  { %v6026_v58 = vpop.eup %6025 }
0x18ac   :  { %4616 = vrot.lane.b32.xlu0 %v9522_v28, %s6194_s20  ;;  %4650 = vrot.lane.b32.xlu2 %v9502_v16, %s6195_s21  ;;  %v4820_v17 = vmul.f32 0.5, %v6026_v58  ;;  %v6028_v11 = vpop.eup %6027 }
0x18ad   :  { %v4821_v26 = vmul.f32 0.5, %v6028_v11 }
0x18b1   :  { %4628 = vrot.lane.b32.xlu1 %v9522_v28, %s6193_s5 }
0x18b4   :  { %4652 = vrot.lane.b32.xlu0 %v9522_v28, %s6195_s21  ;;  %4640 = vrot.lane.b32.xlu2 %v9522_v28, %s6192_s19 }
0x18b9   :  { %4830 = vperm.xlu1 %5747, %v4818_v51  }
0x18bc   :  { %4835 = vperm.xlu0 %5746, %v4819_v24  }
0x18c1   :  { %4868 = vperm.xlu1 %5747, %v9546_v29  }
0x18c4   :  { %4840 = vperm.xlu0 %5746, %v4820_v17  }
0x18c9   :  { %4873 = vperm.xlu1 %5747, %v9552_v5  }
0x18cc   :  { %4845 = vperm.xlu0 %5746, %v4821_v26  }
0x18d1   :  { %4878 = vperm.xlu1 %5747, %v9558_v57  }
0x18d2   :  { %v4635_v62 = vpop.permute.xlu2 %4634 }
0x18d4   :  { %4883 = vperm.xlu0 %5746, %v9564_v4  }
0x18e9   :  { %v4611_v7 = vpop.permute.xlu0 %4610  ;;  %v4623_v61 = vpop.permute.xlu1 %4622 }
0x18ea   :  { %v4658_v30 = vsel %vm332_vm11, %v4602_v41, %v4611_v7 }
0x18eb   :  { %v4662_v32 = vsel %vm463_vm0, %v4658_v30, %v4623_v61 }
0x18ec   :  { %v4666_v2 = vsel %vm468_vm1, %v4662_v32, %v4635_v62 }
0x18f1   :  { %v4647_v63 = vpop.permute.xlu0 %4646 }
0x18f2   :  { %v4670_v48 = vsel %vm473_vm2, %v4666_v2, %v4647_v63 }
0x18f3   :  { %v4674_v55 = vmul.f32 %v9186_v12, %v4670_v48 }
0x18f4   :  { %v4625_v13 = vpop.permute.xlu2 %4624 }
0x18f5   :  { %5682 = vmatmul.msk.f32.vlgmr.msra.gmra.mxu1 %vm482_vm3, %v4674_v55 }
0x18fe   :  { %v4615_v47 = vpop.permute.xlu2 %4614 }
0x18ff   :  { %v4660_v30 = vsel %vm332_vm11, %v9502_v16, %v4615_v47 }
0x190b   :  { %v4613_v51 = vpop.permute.xlu1 %4612  ;;  %v4637_v18 = vpop.permute.xlu0 %4636 }
0x190c   :  { %v4659_v24 = vsel %vm332_vm11, %v4603_v49, %v4613_v51  ;;  %v4651_v49 = vpop.permute.xlu2 %4650 }
0x190d   :  { %v4663_v41 = vsel %vm463_vm0, %v4659_v24, %v4625_v13 }
0x190e   :  { %v4667_v58 = vsel %vm468_vm1, %v4663_v41, %v4637_v18 }
0x1913   :  { %v4649_v17 = vpop.permute.xlu1 %4648 }
0x1914   :  { %v4671_v11 = vsel %vm473_vm2, %v4667_v58, %v4649_v17  ;;  %v4641_v16 = vpop.permute.xlu2 %4640  ;;  %v9596_v58 = vld [vmem:[%s10192_s14 + $0x8] sm:$0xff] }
0x1915   :  { %v4675_v26 = vmul.f32 %v9198_v0, %v4671_v11 }
0x1916   :  { %v4627_v7 = vpop.permute.xlu0 %4626 }
0x1917   :  { %5683 = vmatmul.msk.f32.gmra.mxu1 %vm482_vm3, %v4675_v26  ;;  %v4664_v61 = vsel %vm463_vm0, %v4660_v30, %v4627_v7  ;;  %v9603_v26 = vld [vmem:[%s10192_s14] sm:$0xff]  ;;  %v9610_v7 = vld [vmem:[%s10193_s16 + $0x8] sm:$0xff] }
0x191b   :  { %v4639_v32 = vpop.permute.xlu1 %4638 }
0x191c   :  { %v4668_v62 = vsel %vm468_vm1, %v4664_v61, %v4639_v32 }
0x191d   :  { %v4672_v63 = vsel %vm473_vm2, %v4668_v62, %v4651_v49 }
0x191e   :  { %v4676_v2 = vmul.f32 %v9186_v12, %v4672_v63  ;;  %v4617_v48 = vpop.permute.xlu0 %4616 }
0x191f   :  { %v4661_v55 = vsel %vm332_vm11, %v9522_v28, %v4617_v48  ;;  %v4720_v28 = vmul.f32 %v9596_v58, %v9246_v21  ;;  %v9616_v21 = vld [vmem:[%s10193_s16] sm:$0xff] }
0x1920   :  { %5684 = vmatmul.msk.f32.gmra.mxu1 %vm482_vm3, %v4676_v2 }
0x1923   :  { %v4629_v13 = vpop.permute.xlu1 %4628 }
0x1924   :  { %v4665_v51 = vsel %vm463_vm0, %v4661_v55, %v4629_v13  ;;  %v4721_v55 = vmul.f32 %v9603_v26, %v9264_v46 }
0x1925   :  { %v4669_v18 = vsel %vm468_vm1, %v4665_v51, %v4641_v16 }
0x1926   :  { %v4653_v24 = vpop.permute.xlu0 %4652 }
0x1927   :  { %v4673_v41 = vsel %vm473_vm2, %v4669_v18, %v4653_v24 }
0x1928   :  { %v4677_v47 = vmul.f32 %v9198_v0, %v4673_v41  ;;  %v4719_v0 = vmul.f32 %v9603_v26, %v9238_v34  ;;  %v4722_v34 = vmul.f32 %v9596_v58, %v9298_v10  ;;  %v5700_v10 = vld [vmem:[%s10183_s4 + $0x7] sm:$0x1] }
0x1929   :  { %v4822_v41 = vmul.f32 %v5700_v10, %v10295_v44 }
0x192a   :  { %5685 = vmatmul.msk.f32.gmra.mxu1 %vm482_vm3, %v4677_v47 }
0x1972   :  { %v4707_v12 = vpop.f32.mrf.mxu1 }
0x1973   :  { %v4723_v61 = vadd.f32 %v4719_v0, %v4707_v12 }
0x1975   :  { %v4727_v49 = vadd.f32 %v9616_v21, %v4723_v61  ;;  %v9643_v61 = vpop.permute.xlu0 %4835 }
0x1994   :  { %v4710_v17 = vpop.f32.mrf.mxu1 }
0x1995   :  { %v4724_v11 = vadd.f32 %v4720_v28, %v4710_v17  ;;  %v9635_v28 = vpop.permute.xlu1 %4830  ;;  %v5701_v17 = vld [vmem:[%s10183_s4 + $0xf] sm:$0x1] }
0x1996   :  { %v4823_v0 = vmul.f32 %v5701_v17, %v10305_v22 }
0x1997   :  { %v4728_v30 = vadd.f32 %v9610_v7, %v4724_v11 }
0x1999   :  { %6029 = vtanh.f32 %v4728_v30 }
0x199a   :  { %6031 = vtanh.f32 %v4727_v49 }
0x199d   :  { %v4713_v62 = vpop.f32.mrf.mxu1 }
0x199e   :  { %v4725_v51 = vadd.f32 %v4721_v55, %v4713_v62  ;;  %v4869_v62 = vpop.permute.xlu1 %4868  ;;  %v9652_v55 = vpop.permute.xlu0 %4840 }
0x199f   :  { %v6030_v32 = vpop.eup %6029 }
0x19a0   :  { %4749 = vrot.lane.b32.xlu2 %v6030_v32, %s6196_s29  ;;  %v6032_v63 = vpop.eup %6031  ;;  %v4729_v16 = vadd.f32 %v9616_v21, %v4725_v51 }
0x19a7   :  { %v4716_v2 = vpop.f32.mrf.mxu1 }
0x19a8   :  { %4747 = vrot.lane.b32.xlu2 %v6032_v63, %s6196_s29  ;;  %v4726_v48 = vadd.f32 %v4722_v34, %v4716_v2  ;;  %v5763_v63 = vld [vmem:[%s10180_s2 + $0x7] ss:$0 sm:$0xff]  ;;  %v4736_v2 = vsub.f32 1.0, %v9454_v20 }
0x19aa   :  { %v4730_v13 = vadd.f32 %v9610_v7, %v4726_v48  ;;  %v4740_v51 = vmul.f32 %v4736_v2, %v9488_v6  ;;  %v9679_v2 = vpop.permute.xlu0 %4845 }
0x19ac   :  { %6033 = vtanh.f32 %v4730_v13 }
0x19ad   :  { %6035 = vtanh.f32 %v4729_v16 }
0x19ae   :  { %6037 = vtanh.f32 %v4822_v41 }
0x19af   :  { %6039 = vtanh.f32 %v4823_v0 }
0x19b2   :  { %v6034_v24 = vpop.eup %6033 }
0x19b3   :  { %4753 = vrot.lane.b32.xlu2 %v6034_v24, %s6196_s29  ;;  %v6036_v18 = vpop.eup %6035 }
0x19b4   :  { %v6038_v46 = vpop.eup %6037 }
0x19b5   :  { %v4826_v47 = vmul.f32 0.5, %v6038_v46  ;;  %v6040_v49 = vpop.eup %6039  ;;  %v9662_v46 = vld [vmem:[%s10184_s0 + $0x78] sm:$0xff] }
0x19b6   :  { %v4827_v48 = vmul.f32 0.5, %v6040_v49 }
0x19b7   :  { %v9633_v12 = vperm.slane %v4826_v47, 0 }
0x19b8   :  { %v9657_v10 = vperm.slane %v4827_v48, 0 }
0x19b9   :  { %v4854_v11 = vsub.f32 %v9635_v28, %v9633_v12  ;;  %v4855_v32 = vsub.f32 %v9643_v61, %v9633_v12 }
0x19ba   :  { %v4856_v0 = vsub.f32 %v9652_v55, %v9657_v10 }
0x19bb   :  { %4751 = vrot.lane.b32.xlu2 %v6036_v18, %s6196_s29  ;;  %v4858_v30 = vand.u32 2147483647, %v4854_v11  ;;  %v4859_v22 = vand.u32 2147483647, %v4855_v32  ;;  %v4892_v18 = vmul.f32 %v5763_v63, %v4869_v62  ;;  %v4735_v11 = vsub.f32 1.0, %v9444_v45 }
0x19bc   :  { %v4860_v48 = vand.u32 2147483647, %v4856_v0 }
0x19bd   :  { %v4862_v44 = vmul.f32 %v4858_v30, %v10306_v40  ;;  %v4863_v47 = vmul.f32 %v4859_v22, %v6457_v60  ;;  %v4874_v30 = vpop.permute.xlu1 %4873  ;;  %v4739_v32 = vmul.f32 %v4735_v11, %v9479_v31 }
0x19bf   :  { %v4896_v34 = vadd.f32 1.0, %v4862_v44  ;;  %v4897_v44 = vadd.f32 1.0, %v4863_v47  ;;  %v6164_v47 = vld [vmem:[%s10187_s11 + $0x48] sm:$0xff] }
0x19c1   :  { %v4900_v24 = vmul.f32 %v9261_v33, %v4896_v34  ;;  %v4893_v34 = vmul.f32 %v5763_v63, %v4874_v30  ;;  %v6165_v30 = vld [vmem:[%s10187_s11 + $0x40] sm:$0xff] }
0x19c3   :  { %v4904_v6 = vmul.f32 %v4900_v24, %v4892_v18  ;;  %v4864_v18 = vmul.f32 %v4860_v48, %v10306_v40 }
0x19c5   :  { %v4908_v62 = vmul.f32 %v4904_v6, %v6500_v35  ;;  %v4738_v6 = vsub.f32 1.0, %v9472_v54  ;;  %v4879_v11 = vpop.permute.xlu1 %4878  ;;  %v4898_v40 = vadd.f32 1.0, %v4864_v18  ;;  %v4884_v18 = vpop.permute.xlu0 %4883 }
0x19c7   :  { %v9695_v31 = vadd.f32 %v6489_v23, %v4908_v62  ;;  %v6166_v62 = vld [vmem:[%s10187_s11 + $0x38] sm:$0xff] }
0x19fa   :  { %v4750_v13 = vpop.permute.xlu2 %4749 }
0x19fb   :  { %v4760_v16 = vmul.f32 %v4750_v13, %v9454_v20  ;;  %v9684_v13 = vld [vmem:[%s10184_s0 + $0x70] sm:$0xff] }
0x19fd   :  { %v4764_v41 = vadd.f32 %v4760_v16, %v4740_v51  ;;  %v4901_v51 = vmul.f32 %v9290_v43, %v4897_v44  ;;  %v4857_v16 = vsub.f32 %v9679_v2, %v9657_v10  ;;  %v4742_v44 = vmul.f32 %v4738_v6, %v9511_v9 }
0x19fe   :  { %v4902_v9 = vmul.f32 %v9261_v33, %v4898_v40  ;;  %v6168_v33 = vld [vmem:[%s10187_s11 + $0x28] sm:$0xff]  ;;  %v4895_v40 = vmul.f32 %v5764_v37, %v4884_v18 }
0x19ff   :  { %v9668_v17 = vsel %vm4579_vm7, %v4764_v41, %v9276_v56  ;;  %v4905_v63 = vmul.f32 %v4901_v51, %v4893_v34  ;;  %v4861_v41 = vand.u32 2147483647, %v4857_v16  ;;  %vm5195_vm7 = vcmp.ne.f32.partialorder %v9546_v29, 0.0 }
0x1a00   :  { %v4917_v20 = vsel %vm327_vm8, %v9662_v46, %v9668_v17 }
0x1a01   :  { %4940 = vmatpush.msra.mxu2 %v4917_v20  ;;  %v4909_v20 = vmul.f32 %v4905_v63, %v6503_v36 }
0x1a02   :  { %v4748_v49 = vpop.permute.xlu2 %4747 }
0x1a03   :  { %v4759_v3 = vmul.f32 %v4748_v49, %v9444_v45  ;;  %v9721_v48 = vadd.f32 %v6492_v27, %v4909_v20 }
0x1a05   :  { %v4763_v22 = vadd.f32 %v4759_v3, %v4739_v32  ;;  %v4865_v32 = vmul.f32 %v4861_v41, %v6457_v60  ;;  %v4894_v3 = vmul.f32 %v5764_v37, %v4879_v11  ;;  %v6167_v60 = vld [vmem:[%s10187_s11 + $0x30] sm:$0xff]  ;;  %v6169_v41 = vld [vmem:[%s10187_s11 + $0x20] sm:$0xff] }
0x1a07   :  { %v9692_v45 = vsel %vm4578_vm12, %v4763_v22, %v9303_v52  ;;  %v9726_v22 = vld [vmem:[%s10184_s0 + $0xf8] sm:$0xff]  ;;  %v4899_v51 = vadd.f32 1.0, %v4865_v32  ;;  %v4906_v16 = vmul.f32 %v4902_v9, %v4894_v3  ;;  %v6175_v3 = vld [vmem:[%s10191_s12 + $0x40] sm:$0xff]  ;;  %v6177_v9 = vld [vmem:[%s10191_s12 + $0x30] sm:$0xff]  ;;  %vm5196_vm12 = vcmp.ne.f32.partialorder %v9552_v5, 0.0 }
0x1a08   :  { %v4916_v24 = vsel %vm327_vm8, %v9684_v13, %v9692_v45 }
0x1a09   :  { %4941 = vmatpush.msra.mxu2 %v4916_v24  ;;  %v4737_v24 = vsub.f32 1.0, %v9463_v15  ;;  %v4910_v20 = vmul.f32 %v4906_v16, %v6500_v35  ;;  %v4903_v11 = vmul.f32 %v9290_v43, %v4899_v51  ;;  %v6181_v51 = vld [vmem:[%s10191_s12 + $0x10] sm:$0xff]  ;;  %v6182_v16 = vld [vmem:[%s10191_s12 + $0x8] sm:$0xff] }
0x1a0a   :  { %5702 = vmatmul.msk.f32.vlgmr.msra.gmra.mxu2 %vm332_vm11, %v9695_v31 }
0x1a0b   :  { %5084 = vmatpush.msrb.mxu2 %v6164_v47  ;;  %v4741_v47 = vmul.f32 %v4737_v24, %v9497_v50  ;;  %v4914_v43 = vadd.f32 %v6489_v23, %v4910_v20  ;;  %v4907_v50 = vmul.f32 %v4903_v11, %v4895_v40  ;;  %v6174_v23 = vld [vmem:[%s10191_s12 + $0x48] sm:$0xff] }
0x1a0d   :  { %v4754_v0 = vpop.permute.xlu2 %4753  ;;  %5085 = vmatpush.msrb.mxu2 %v6165_v30  ;;  %v4911_v32 = vmul.f32 %v4907_v50, %v6503_v36  ;;  %v6178_v36 = vld [vmem:[%s10191_s12 + $0x28] sm:$0xff]  ;;  %v4980_v40 = vmul.f32 %v4914_v43, %v9657_v10 }
0x1a0e   :  { %v4762_v49 = vmul.f32 %v4754_v0, %v9472_v54  ;;  %v6170_v0 = vld [vmem:[%s10187_s11 + $0x18] sm:$0xff] }
0x1a0f   :  { %5086 = vmatpush.msrb.mxu2 %v6166_v62  ;;  %v6176_v62 = vld [vmem:[%s10191_s12 + $0x38] sm:$0xff] }
0x1a10   :  { %v4766_v34 = vadd.f32 %v4762_v49, %v4742_v44  ;;  %v9759_v44 = vld [vmem:[%s10184_s0 + $0xf0] sm:$0xff]  ;;  %v6172_v49 = vld [vmem:[%s10187_s11 + $0x8] sm:$0xff] }
0x1a11   :  { %5087 = vmatpush.msrb.mxu2 %v6167_v60  ;;  %v6179_v60 = vld [vmem:[%s10191_s12 + $0x20] sm:$0xff] }
0x1a12   :  { %v9735_v54 = vsel %vm4581_vm6, %v4766_v34, %v9335_v53  ;;  %5703 = vmatmul.msk.f32.gmra.mxu2 %vm332_vm11, %v9721_v48  ;;  %v4915_v34 = vadd.f32 %v6492_v27, %v4911_v32  ;;  %v6180_v27 = vld [vmem:[%s10191_s12 + $0x18] sm:$0xff]  ;;  %v9868_v32 = vld [vmem:[%s10188_s8] sm:$0xff] }
0x1a13   :  { %v4919_v63 = vsel %vm327_vm8, %v9726_v22, %v9735_v54  ;;  %5088 = vmatpush.msrb.mxu2 %v6168_v33 }
0x1a14   :  { %4969 = vmatpush.msra.mxu3 %v4919_v63  ;;  %v6183_v63 = vld [vmem:[%s10191_s12] sm:$0xff]  ;;  %v4981_v11 = vmul.f32 %v4915_v34, %v9657_v10  ;;  %v5219_v10 = vsel %vm5195_vm7, 1, %v10282_v1 }
0x1a15   :  { %v4752_v59 = vpop.permute.xlu2 %4751  ;;  %5089 = vmatpush.msrb.mxu2 %v6169_v41  ;;  %v4978_v41 = vmul.f32 %v9695_v31, %v9633_v12 }
0x1a16   :  { %v4761_v6 = vmul.f32 %v4752_v59, %v9463_v15  ;;  %v6171_v15 = vld [vmem:[%s10187_s11 + $0x10] sm:$0xff] }
0x1a17   :  { %5090 = vmatpush.msrb.mxu2 %v6170_v0  ;;  %v4991_v0 = vsel %vm332_vm11, %v4981_v11, 0.0 }
0x1a18   :  { %v4765_v30 = vadd.f32 %v4761_v6, %v4741_v47  ;;  %v4982_v47 = vsel %vm332_vm11, %v4978_v41, 0.0  ;;  %v4979_v6 = vmul.f32 %v9721_v48, %v9633_v12  ;;  %v5220_v12 = vsel %vm5196_vm12, 1, %v10282_v1 }
0x1a19   :  { %5091 = vmatpush.msrb.mxu2 %v6171_v15  ;;  %v5221_v48 = vsel %vm5197_vm13, 1, %v10282_v1 }
0x1a1a   :  { %v9767_v35 = vsel %vm4580_vm5, %v4765_v30, %v9353_v25  ;;  %v4985_v20 = vsel %vm332_vm11, %v4979_v6, 0.0  ;;  %v4988_v30 = vsel %vm332_vm11, %v4980_v40, 0.0 }
0x1a1b   :  { %v4918_v37 = vsel %vm327_vm8, %v9759_v44, %v9767_v35  ;;  %5092 = vmatpush.msrb.mxu2 %v6172_v49 }
0x1a1c   :  { %4970 = vmatpush.msra.mxu3 %v4918_v37 }
0x1a1d   :  { %5704 = vmatmul.msk.f32.vlgmr.msra.gmra.mxu3 %vm332_vm11, %v4914_v43  ;;  %5093 = vmatpush.msrb.mxu2 %v6173_v14  ;;  %v5222_v43 = vsel %vm5198_vm14, 1, %v10282_v1 }
0x1a1e   :  { %5353 = vmatpush.msrb.mxu3 %v6174_v23 }
0x1a20   :  { %5354 = vmatpush.msrb.mxu3 %v6175_v3 }
0x1a22   :  { %5355 = vmatpush.msrb.mxu3 %v6176_v62 }
0x1a24   :  { %5356 = vmatpush.msrb.mxu3 %v6177_v9 }
0x1a25   :  { %5705 = vmatmul.msk.f32.gmra.mxu3 %vm332_vm11, %v4915_v34 }
0x1a26   :  { %5357 = vmatpush.msrb.mxu3 %v6178_v36 }
0x1a28   :  { %5358 = vmatpush.msrb.mxu3 %v6179_v60 }
0x1a2a   :  { %5359 = vmatpush.msrb.mxu3 %v6180_v27 }
0x1a2c   :  { %5360 = vmatpush.msrb.mxu3 %v6181_v51  ;;  %v9879_v51 = vld [vmem:[%s10188_s8 + $0x8] sm:$0xff] }
0x1a2e   :  { %5361 = vmatpush.msrb.mxu3 %v6182_v16 }
0x1a30   :  { %5362 = vmatpush.msrb.mxu3 %v6183_v63 }
0x1a8d   :  { %v4943_v33 = vpop.f32.mrf.mxu2 }
0x1a8e   :  { %5022 = vrot.lane.b32.xlu0 %v4943_v33, %s6192_s19  ;;  %5010 = vrot.lane.b32.xlu2 %v4943_v33, %s6193_s5 }
0x1a8f   :  { %4998 = vrot.lane.b32.xlu1 %v4943_v33, %s6194_s20 }
0x1a95   :  { %v4946_v24 = vpop.f32.mrf.mxu2 }
0x1a96   :  { %5012 = vrot.lane.b32.xlu0 %v4946_v24, %s6193_s5  ;;  %5000 = vrot.lane.b32.xlu2 %v4946_v24, %s6194_s20 }
0x1a97   :  { %5034 = vrot.lane.b32.xlu1 %v4943_v33, %s6195_s21 }
0x1a9e   :  { %5036 = vrot.lane.b32.xlu2 %v4946_v24, %s6195_s21 }
0x1a9f   :  { %5024 = vrot.lane.b32.xlu1 %v4946_v24, %s6192_s19 }
0x1aa0   :  { %v4972_v18 = vpop.f32.mrf.mxu3 }
0x1aa1   :  { %5002 = vrot.lane.b32.xlu0 %v4972_v18, %s6194_s20 }
0x1aa6   :  { %5026 = vrot.lane.b32.xlu2 %v4972_v18, %s6192_s19 }
0x1aa7   :  { %5014 = vrot.lane.b32.xlu1 %v4972_v18, %s6193_s5 }
0x1aa8   :  { %v9825_v59 = vpop.f32.mrf.mxu3 }
0x1aa9   :  { %5038 = vrot.lane.b32.xlu0 %v4972_v18, %s6195_s21 }
0x1aae   :  { %5016 = vrot.lane.b32.xlu2 %v9825_v59, %s6193_s5 }
0x1aaf   :  { %5004 = vrot.lane.b32.xlu1 %v9825_v59, %s6194_s20 }
0x1ab1   :  { %5028 = vrot.lane.b32.xlu0 %v9825_v59, %s6192_s19 }
0x1ab7   :  { %5040 = vrot.lane.b32.xlu1 %v9825_v59, %s6195_s21 }
0x1ad7   :  { %4983 = vadd.xlane.f32.xlu2 %v4982_v47 }
0x1adb   :  { %4986 = vadd.xlane.f32.xlu0 %v4985_v20 }
0x1adf   :  { %4992 = vadd.xlane.f32.xlu2 %v4991_v0 }
0x1ae1   :  { %4989 = vadd.xlane.f32.xlu1 %v4988_v30 }
0x1ae8   :  { %v5011_v31 = vpop.permute.xlu2 %5010 }
0x1aef   :  { %5203 = vrot.lane.b32.xlu0 %v9692_v45, %s6197_s25 }
0x1af0   :  { %v5001_v50 = vpop.permute.xlu2 %5000 }
0x1af1   :  { %v5047_v3 = vsel %vm332_vm11, %v4946_v24, %v5001_v50 }
0x1af7   :  { %5205 = vrot.lane.b32.xlu2 %v9668_v17, %s6197_s25  ;;  %5227 = vperm.xlu0 %5746, %v5220_v12  }
0x1af8   :  { %v5037_v62 = vpop.permute.xlu2 %5036 }
0x1afa   :  { %5224 = vperm.xlu1 %5747, %v5219_v10  }
0x1aff   :  { %5209 = vrot.lane.b32.xlu2 %v9735_v54, %s6197_s25  ;;  %5207 = vrot.lane.b32.xlu0 %v9767_v35, %s6197_s25 }
0x1b00   :  { %v5023_v29 = vpop.permute.xlu0 %5022  ;;  %v5027_v24 = vpop.permute.xlu2 %5026 }
0x1b01   :  { %v4999_v5 = vpop.permute.xlu1 %4998 }
0x1b02   :  { %5230 = vperm.xlu1 %5747, %v5221_v48   ;;  %v5046_v15 = vsel %vm332_vm11, %v4943_v33, %v4999_v5 }
0x1b03   :  { %v5050_v57 = vsel %vm463_vm0, %v5046_v15, %v5011_v31  ;;  %v6186_v15 = vld [vmem:[%s10189_s13] sm:$0xff] }
0x1b04   :  { %v5054_v37 = vsel %vm468_vm1, %v5050_v57, %v5023_v29  ;;  %v6187_v57 = vld [vmem:[%s10190_s15] sm:$0xff] }
0x1b07   :  { %5233 = vperm.xlu0 %5746, %v5222_v43  }
0x1b08   :  { %v5013_v23 = vpop.permute.xlu0 %5012  ;;  %v5017_v12 = vpop.permute.xlu2 %5016 }
0x1b09   :  { %v5035_v49 = vpop.permute.xlu1 %5034  ;;  %v5051_v34 = vsel %vm463_vm0, %v5047_v3, %v5013_v23  ;;  %v6188_v23 = vld [vmem:[%s10189_s13 + $0x8] sm:$0xff] }
0x1b0a   :  { %v5058_v14 = vsel %vm473_vm2, %v5054_v37, %v5035_v49 }
0x1b0b   :  { %v5062_v4 = vmul.f32 %v9868_v32, %v5058_v14 }
0x1b0d   :  { %5706 = vmatmul.msk.f32.vlgmr.msrb.gmra.mxu2 %vm482_vm3, %v5062_v4 }
0x1b11   :  { %v5025_v9 = vpop.permute.xlu1 %5024 }
0x1b12   :  { %v5055_v36 = vsel %vm468_vm1, %v5051_v34, %v5025_v9  ;;  %v6189_v34 = vld [vmem:[%s10190_s15 + $0x8] sm:$0xff] }
0x1b13   :  { %v5059_v60 = vsel %vm473_vm2, %v5055_v36, %v5037_v62  ;;  %v5003_v27 = vpop.permute.xlu0 %5002 }
0x1b14   :  { %v5063_v16 = vmul.f32 %v9879_v51, %v5059_v60  ;;  %v5048_v63 = vsel %vm332_vm11, %v4972_v18, %v5003_v27 }
0x1b16   :  { %5707 = vmatmul.msk.f32.gmra.mxu2 %vm482_vm3, %v5063_v16 }
0x1b19   :  { %v5015_v33 = vpop.permute.xlu1 %5014 }
0x1b1a   :  { %v5052_v41 = vsel %vm463_vm0, %v5048_v63, %v5015_v33 }
0x1b1b   :  { %v5039_v47 = vpop.permute.xlu0 %5038  ;;  %v5056_v6 = vsel %vm468_vm1, %v5052_v41, %v5027_v24 }
0x1b1c   :  { %v5060_v20 = vsel %vm473_vm2, %v5056_v6, %v5039_v47 }
0x1b1d   :  { %v5064_v11 = vmul.f32 %v9868_v32, %v5060_v20 }
0x1b1f   :  { %5708 = vmatmul.msk.f32.gmra.mxu2 %vm482_vm3, %v5064_v11 }
0x1b21   :  { %v5005_v40 = vpop.permute.xlu1 %5004 }
0x1b22   :  { %v5049_v0 = vsel %vm332_vm11, %v9825_v59, %v5005_v40 }
0x1b23   :  { %v5029_v30 = vpop.permute.xlu0 %5028  ;;  %v5053_v18 = vsel %vm463_vm0, %v5049_v0, %v5017_v12 }
0x1b24   :  { %v5057_v10 = vsel %vm468_vm1, %v5053_v18, %v5029_v30 }
0x1b29   :  { %v5041_v31 = vpop.permute.xlu1 %5040 }
0x1b2a   :  { %v5061_v48 = vsel %vm473_vm2, %v5057_v10, %v5041_v31 }
0x1b2b   :  { %v5065_v29 = vmul.f32 %v9879_v51, %v5061_v48 }
0x1b2d   :  { %5709 = vmatmul.msk.f32.gmra.mxu2 %vm482_vm3, %v5065_v29 }
0x1b4a   :  { %v4984_v5 = vpop.xlane.xlu2 %4983 }
0x1b4b   :  { %v5107_v43 = vmul.f32 %v6186_v15, %v4984_v5 }
0x1b4e   :  { %v4987_v49 = vpop.xlane.xlu0 %4986 }
0x1b4f   :  { %v5108_v4 = vmul.f32 %v6188_v23, %v4987_v49 }
0x1b52   :  { %v4993_v10 = vpop.xlane.xlu2 %4992 }
0x1b54   :  { %v4990_v60 = vpop.xlane.xlu1 %4989 }
0x1b55   :  { %v5109_v63 = vmul.f32 %v6186_v15, %v4990_v60  ;;  %v5110_v15 = vmul.f32 %v6188_v23, %v4993_v10 }
0x1b61   :  { %v5204_v48 = vpop.permute.xlu0 %5203 }
0x1b90   :  { %v5095_v59 = vpop.f32.mrf.mxu2 }
0x1b91   :  { %v5111_v50 = vadd.f32 %v5107_v43, %v5095_v59  ;;  %v9908_v43 = vpop.permute.xlu1 %5224 }
0x1b92   :  { %vm5235_vm10 = vcmp.eq.s32.totalorder %v9908_v43, 1 }
0x1b93   :  { %v5115_v37 = vadd.f32 %v6187_v57, %v5111_v50 }
0x1b95   :  { %v5710_v14 = vmul.f32 -1.442695, %v5115_v37 }
0x1b97   :  { %6041 = vpow2.f32 %v5710_v14 }
0x1b99   :  { %v5098_v3 = vpop.f32.mrf.mxu2 }
0x1b9a   :  { %v5112_v62 = vadd.f32 %v5108_v4, %v5098_v3 }
0x1b9c   :  { %v5116_v9 = vadd.f32 %v6189_v34, %v5112_v62 }
0x1b9d   :  { %v6042_v36 = vpop.eup %6041 }
0x1b9e   :  { %v5131_v27 = vadd.f32 1.0, %v6042_v36  ;;  %v5711_v16 = vmul.f32 -1.442695, %v5116_v9 }
0x1ba0   :  { %6043 = vrcp.f32 %v5131_v27  ;;  %v5146_v30 = vand.u32 2147483648, %v5131_v27  ;;  %v5144_v18 = vand.u32 2147483647, %v5131_v27  ;;  %vm5140_vm9 = vweird.f32 %v5131_v27 }
0x1ba1   :  { %6045 = vpow2.f32 %v5711_v16 }
0x1ba2   :  { %v5101_v33 = vpop.f32.mrf.mxu2  ;;  %v5147_v29 = vor.u32 1.1754944e-38, %v5146_v30  ;;  %vm5145_vm4 = vcmp.eq.f32.partialorder %v5144_v18, 8.507059e+37 }
0x1ba3   :  { %v5113_v24 = vadd.f32 %v5109_v63, %v5101_v33 }
0x1ba5   :  { %v5117_v41 = vadd.f32 %v6187_v57, %v5113_v24  ;;  %v9917_v24 = vpop.permute.xlu0 %5227 }
0x1ba6   :  { %v6044_v47 = vpop.eup %6043  ;;  %vm5236_vm14 = vcmp.eq.s32.totalorder %v9917_v24, 1  ;;  %v10323_v24 = vld [vmem:[#allocation11_spill] sm:$0xff] }
0x1ba7   :  { %v6046_v6 = vpop.eup %6045  ;;  %v5136_v20 = vmul.f32 %v6044_v47, %v5131_v27  ;;  %v5712_v11 = vmul.f32 -1.442695, %v5117_v41  ;;  %vm5141_vm5 = vweird.f32 %v6044_v47 }
0x1ba8   :  { %v5132_v40 = vadd.f32 1.0, %v6046_v6  ;;  %vm5142_vm15 = vmor %vm5140_vm9, %vm5141_vm5  ;;  %v5206_v6 = vpop.permute.xlu2 %5205 }
0x1ba9   :  { %v5137_v0 = vsub.f32 1.0, %v5136_v20  ;;  %6047 = vpow2.f32 %v5712_v11 }
0x1baa   :  { %6049 = vrcp.f32 %v5132_v40  ;;  %v5161_v36 = vand.u32 2147483648, %v5132_v40  ;;  %v5159_v16 = vand.u32 2147483647, %v5132_v40  ;;  %vm5155_vm12 = vweird.f32 %v5132_v40 }
0x1bab   :  { %v5138_v12 = vmul.f32 %v6044_v47, %v5137_v0 }
0x1bac   :  { %v5162_v41 = vor.u32 1.1754944e-38, %v5161_v36  ;;  %vm5160_vm13 = vcmp.eq.f32.partialorder %v5159_v16, 8.507059e+37 }
0x1bad   :  { %v5139_v31 = vadd.f32 %v6044_v47, %v5138_v12 }
0x1baf   :  { %v6048_v5 = vpop.eup %6047  ;;  %v5143_v59 = vsel %vm5142_vm15, %v6044_v47, %v5139_v31 }
0x1bb0   :  { %v6050_v50 = vpop.eup %6049  ;;  %v5133_v57 = vadd.f32 1.0, %v6048_v5  ;;  %v5104_v37 = vpop.f32.mrf.mxu2  ;;  %v9910_v49 = vsel %vm5145_vm4, %v5147_v29, %v5143_v59 }
0x1bb1   :  { %v5151_v14 = vmul.f32 %v6050_v50, %v5132_v40  ;;  %v5114_v4 = vadd.f32 %v5110_v15, %v5104_v37  ;;  %v5215_v3 = vmul.f32 %v5204_v48, %v9910_v49  ;;  %vm5156_vm6 = vweird.f32 %v6050_v50  ;;  %v9926_v5 = vpop.permute.xlu1 %5230  ;;  %v5208_v59 = vpop.permute.xlu0 %5207 }
0x1bb2   :  { %6051 = vrcp.f32 %v5133_v57  ;;  %vm5157_vm7 = vmor %vm5155_vm12, %vm5156_vm6  ;;  %v5176_v30 = vand.u32 2147483648, %v5133_v57  ;;  %v5174_v10 = vand.u32 2147483647, %v5133_v57  ;;  %vm5170_vm9 = vweird.f32 %v5133_v57 }
0x1bb3   :  { %v5152_v62 = vsub.f32 1.0, %v5151_v14  ;;  %v5118_v9 = vadd.f32 %v6189_v34, %v5114_v4  ;;  %v5239_v23 = vsel %vm5235_vm10, %v5215_v3, %v5204_v48  ;;  %vm5237_vm6 = vcmp.eq.s32.totalorder %v9926_v5, 1 }
0x1bb4   :  { %5247 = vrot.lane.b32.xlu1 %v5239_v23, %s6196_s29  ;;  %v5177_v29 = vor.u32 1.1754944e-38, %v5176_v30  ;;  %vm5175_vm4 = vcmp.eq.f32.partialorder %v5174_v10, 8.507059e+37  ;;  %v90_v30 = vld [vmem:[%s10194_s7] sm:$0x1] }
0x1bb5   :  { %v5713_v60 = vmul.f32 -1.442695, %v5118_v9  ;;  %v5153_v27 = vmul.f32 %v6050_v50, %v5152_v62 }
0x1bb7   :  { %6053 = vpow2.f32 %v5713_v60  ;;  %v5154_v63 = vadd.f32 %v6050_v50, %v5153_v27 }
0x1bb8   :  { %v6052_v33 = vpop.eup %6051 }
0x1bb9   :  { %v5166_v47 = vmul.f32 %v6052_v33, %v5133_v57  ;;  %v5158_v34 = vsel %vm5157_vm7, %v6050_v50, %v5154_v63  ;;  %vm5171_vm5 = vweird.f32 %v6052_v33  ;;  %v9935_v27 = vpop.permute.xlu0 %5233  ;;  %v5210_v63 = vpop.permute.xlu2 %5209 }
0x1bba   :  { %v9919_v20 = vsel %vm5160_vm13, %v5162_v41, %v5158_v34  ;;  %vm5172_vm15 = vmor %vm5170_vm9, %vm5171_vm5  ;;  %vm5238_vm9 = vcmp.eq.s32.totalorder %v9935_v27, 1 }
0x1bbb   :  { %v5167_v11 = vsub.f32 1.0, %v5166_v47  ;;  %v5216_v0 = vmul.f32 %v5206_v6, %v9919_v20 }
0x1bbd   :  { %v6054_v12 = vpop.eup %6053  ;;  %v5240_v40 = vsel %vm5236_vm14, %v5216_v0, %v5206_v6  ;;  %v5168_v18 = vmul.f32 %v6052_v33, %v5167_v11 }
0x1bbe   :  { %v5134_v31 = vadd.f32 1.0, %v6054_v12  ;;  %5249 = vrot.lane.b32.xlu2 %v5240_v40, %s6196_s29  ;;  %v91_v12 = vld [vmem:[%s10194_s7 + $0x1] sm:$0x1] }
0x1bbf   :  { %v5169_v48 = vadd.f32 %v6052_v33, %v5168_v18  ;;  %v9997_v40 = vadd.s32 4294967295, %v91_v12 }
0x1bc0   :  { %6055 = vrcp.f32 %v5134_v31  ;;  %v5191_v62 = vand.u32 2147483648, %v5134_v31  ;;  %v5189_v23 = vand.u32 2147483647, %v5134_v31  ;;  %vm5185_vm7 = vweird.f32 %v5134_v31 }
0x1bc1   :  { %v5173_v15 = vsel %vm5172_vm15, %v6052_v33, %v5169_v48 }
0x1bc2   :  { %v9928_v50 = vsel %vm5175_vm4, %v5177_v29, %v5173_v15  ;;  %v5192_v60 = vor.u32 1.1754944e-38, %v5191_v62  ;;  %vm5190_vm5 = vcmp.eq.f32.partialorder %v5189_v23, 8.507059e+37  ;;  %vm830_vm4 = vcmp.eq.s32.totalorder %v9997_v40, 0 }
0x1bc3   :  { %v5217_v37 = vmul.f32 %v5208_v59, %v9928_v50  ;;  %v832_v48 = vsel %vm830_vm4, 1, %v10282_v1  ;;  %vm2801_vm4 = vcmp.eq.s32.totalorder %v9997_v40, 3 }
0x1bc4   :  { %v834_v15 = vperm.slane %v832_v48, 0 }
0x1bc5   :  { %v5241_v14 = vsel %vm5237_vm6, %v5217_v37, %v5208_v59 }
0x1bc6   :  { %v6056_v4 = vpop.eup %6055  ;;  %5251 = vrot.lane.b32.xlu0 %v5241_v14, %s6196_s29 }
0x1bc7   :  { %v5181_v57 = vmul.f32 %v6056_v4, %v5134_v31  ;;  %vm5186_vm12 = vweird.f32 %v6056_v4 }
0x1bc8   :  { %vm5187_vm13 = vmor %vm5185_vm7, %vm5186_vm12  ;;  %vm1487_vm12 = vcmp.eq.s32.totalorder %v9997_v40, 1 }
0x1bc9   :  { %v5182_v3 = vsub.f32 1.0, %v5181_v57 }
0x1bcb   :  { %v5183_v9 = vmul.f32 %v6056_v4, %v5182_v3 }
0x1bcd   :  { %v5184_v36 = vadd.f32 %v6056_v4, %v5183_v9  ;;  %v2803_v9 = vsel %vm2801_vm4, 1, %v10282_v1 }
0x1bcf   :  { %v5188_v16 = vsel %vm5187_vm13, %v6056_v4, %v5184_v36 }
0x1bd0   :  { %v9937_v33 = vsel %vm5190_vm5, %v5192_v60, %v5188_v16  ;;  %v2805_v60 = vperm.slane %v2803_v9, 0 }
0x1bd1   :  { %v5218_v41 = vmul.f32 %v5210_v63, %v9937_v33 }
0x1bd3   :  { %v5242_v47 = vsel %vm5238_vm9, %v5218_v41, %v5210_v63 }
0x1bd4   :  { %5253 = vrot.lane.b32.xlu1 %v5242_v47, %s6196_s29 }
0x1c18   :  { %v9957_v11 = vpop.permute.xlu2 %5249 }
0x1c19   :  { %v9962_v0 = vsel %vm327_vm8, %v9662_v46, %v9957_v11 }
0x1c26   :  { %v9944_v34 = vpop.permute.xlu1 %5247 }
0x1c27   :  { %v9949_v6 = vsel %vm327_vm8, %v9684_v13, %v9944_v34 }
0x1c28   :  { %5291 = vrot.lane.b32.xlu1 %v9949_v6, %s6192_s19  ;;  %5279 = vrot.lane.b32.xlu0 %v9949_v6, %s6193_s5 }
0x1c29   :  { %5267 = vrot.lane.b32.xlu2 %v9949_v6, %s6194_s20 }
0x1c30   :  { %5281 = vrot.lane.b32.xlu1 %v9962_v0, %s6193_s5  ;;  %5269 = vrot.lane.b32.xlu0 %v9962_v0, %s6194_s20 }
0x1c31   :  { %5303 = vrot.lane.b32.xlu2 %v9949_v6, %s6195_s21 }
0x1c38   :  { %5305 = vrot.lane.b32.xlu0 %v9962_v0, %s6195_s21  ;;  %v9972_v13 = vpop.permute.xlu0 %5251 }
0x1c39   :  { %5293 = vrot.lane.b32.xlu2 %v9962_v0, %s6192_s19  ;;  %v9979_v46 = vsel %vm327_vm8, %v9759_v44, %v9972_v13  ;;  %v9995_v44 = vadd.s32 4294967295, %v90_v30 }
0x1c3a   :  { %5271 = vrot.lane.b32.xlu1 %v9979_v46, %s6194_s20 }
0x1c3b   :  { %vm829_vm15 = vcmp.eq.s32.totalorder %v9995_v44, 0  ;;  %vm1486_vm7 = vcmp.eq.s32.totalorder %v9995_v44, 1  ;;  %vm2143_vm13 = vcmp.eq.s32.totalorder %v9995_v44, 2  ;;  %vm2800_vm5 = vcmp.eq.s32.totalorder %v9995_v44, 3 }
0x1c3c   :  { %v831_v31 = vsel %vm829_vm15, 1, %v10282_v1  ;;  %v1488_v59 = vsel %vm1486_vm7, 1, %v10282_v1  ;;  %v2145_v37 = vsel %vm2143_vm13, 1, %v10282_v1  ;;  %vm2144_vm15 = vcmp.eq.s32.totalorder %v9997_v40, 2 }
0x1c3d   :  { %v833_v29 = vperm.slane %v831_v31, 0  ;;  %v1490_v4 = vperm.slane %v1488_v59, 0  ;;  %v2147_v57 = vperm.slane %v2145_v37, 0  ;;  %v2802_v3 = vsel %vm2800_vm5, 1, %v10282_v1 }
0x1c3e   :  { %v2146_v62 = vsel %vm2144_vm15, 1, %v10282_v1  ;;  %v2804_v23 = vperm.slane %v2802_v3, 0  ;;  %vm4114_vm7 = vcmp.eq.s32.totalorder %v9995_v44, 5  ;;  %vm3458_vm13 = vcmp.eq.s32.totalorder %v9997_v40, 4 }
0x1c3f   :  { %v2148_v36 = vperm.slane %v2146_v62, 0  ;;  %v4116_v63 = vsel %vm4114_vm7, 1, %v10282_v1  ;;  %v3460_v41 = vsel %vm3458_vm13, 1, %v10282_v1  ;;  %vm4115_vm5 = vcmp.eq.s32.totalorder %v9997_v40, 5 }
0x1c40   :  { %5295 = vrot.lane.b32.xlu0 %v9979_v46, %s6192_s19  ;;  %v4118_v30 = vperm.slane %v4116_v63, 0  ;;  %v3462_v12 = vperm.slane %v3460_v41, 0  ;;  %vm4771_vm15 = vcmp.eq.s32.totalorder %v9995_v44, 6  ;;  %v4117_v31 = vsel %vm4115_vm5, 1, %v10282_v1 }
0x1c41   :  { %5283 = vrot.lane.b32.xlu2 %v9979_v46, %s6193_s5  ;;  %v4773_v48 = vsel %vm4771_vm15, 1, %v10282_v1 }
0x1c42   :  { %5307 = vrot.lane.b32.xlu1 %v9979_v46, %s6195_s21 }
0x1c46   :  { %v9999_v18 = vpop.permute.xlu1 %5253 }
0x1c47   :  { %v10005_v10 = vsel %vm327_vm8, %v9726_v22, %v9999_v18  ;;  %v1489_v22 = vsel %vm1487_vm12, 1, %v10282_v1  ;;  %vm3457_vm12 = vcmp.eq.s32.totalorder %v9995_v44, 4 }
0x1c48   :  { %5285 = vrot.lane.b32.xlu0 %v10005_v10, %s6193_s5  ;;  %v1491_v14 = vperm.slane %v1489_v22, 0  ;;  %v3459_v16 = vsel %vm3457_vm12, 1, %v10282_v1 }
0x1c49   :  { %5273 = vrot.lane.b32.xlu2 %v10005_v10, %s6194_s20  ;;  %v3461_v47 = vperm.slane %v3459_v16, 0 }
0x1c4a   :  { %5297 = vrot.lane.b32.xlu1 %v10005_v10, %s6192_s19 }
0x1c50   :  { %836 = vperm.xlu0 %5746, %v833_v29   ;;  %v4119_v29 = vperm.slane %v4117_v31, 0 }
0x1c51   :  { %5309 = vrot.lane.b32.xlu2 %v10005_v10, %s6195_s21 }
0x1c52   :  { %839 = vperm.xlu1 %5747, %v834_v15   ;;  %v4775_v15 = vperm.slane %v4773_v48, 0 }
0x1c58   :  { %1496 = vperm.xlu0 %5746, %v1491_v14  }
0x1c59   :  { %1493 = vperm.xlu2 %5748, %v1490_v4  }
0x1c5a   :  { %2150 = vperm.xlu1 %5747, %v2147_v57  }
0x1c60   :  { %2807 = vperm.xlu0 %5746, %v2804_v23  }
0x1c61   :  { %2153 = vperm.xlu2 %5748, %v2148_v36  }
0x1c62   :  { %2810 = vperm.xlu1 %5747, %v2805_v60  }
0x1c68   :  { %3464 = vperm.xlu0 %5746, %v3461_v47  }
0x1c69   :  { %4121 = vperm.xlu2 %5748, %v4118_v30  }
0x1c6a   :  { %3467 = vperm.xlu1 %5747, %v3462_v12  }
0x1c70   :  { %4124 = vperm.xlu0 %5746, %v4119_v29  }
0x1c72   :  { %4778 = vperm.xlu1 %5747, %v4775_v15  }
0x1c83   :  { %v5268_v22 = vpop.permute.xlu2 %5267 }
0x1c84   :  { %v5315_v37 = vsel %vm332_vm11, %v9949_v6, %v5268_v22 }
0x1c8b   :  { %v5304_v59 = vpop.permute.xlu2 %5303 }
0x1c93   :  { %v5294_v23 = vpop.permute.xlu2 %5293 }
0x1c9a   :  { %v5280_v14 = vpop.permute.xlu0 %5279  ;;  %v5292_v4 = vpop.permute.xlu1 %5291 }
0x1c9b   :  { %v5319_v57 = vsel %vm463_vm0, %v5315_v37, %v5280_v14  ;;  %v5284_v63 = vpop.permute.xlu2 %5283 }
0x1c9c   :  { %v5323_v3 = vsel %vm468_vm1, %v5319_v57, %v5292_v4 }
0x1c9d   :  { %v5327_v62 = vsel %vm473_vm2, %v5323_v3, %v5304_v59 }
0x1c9e   :  { %v5331_v9 = vmul.f32 %v9868_v32, %v5327_v62 }
0x1ca0   :  { %5714 = vmatmul.msk.f32.vlgmr.msrb.gmra.mxu3 %vm482_vm3, %v5331_v9 }
0x1ca2   :  { %v5270_v36 = vpop.permute.xlu0 %5269  ;;  %v5282_v16 = vpop.permute.xlu1 %5281 }
0x1ca3   :  { %v5316_v60 = vsel %vm332_vm11, %v9962_v0, %v5270_v36  ;;  %v5274_v15 = vpop.permute.xlu2 %5273 }
0x1ca4   :  { %v5320_v6 = vsel %vm463_vm0, %v5316_v60, %v5282_v16  ;;  %v5318_v57 = vsel %vm332_vm11, %v10005_v10, %v5274_v15 }
0x1ca5   :  { %v5324_v47 = vsel %vm468_vm1, %v5320_v6, %v5294_v23 }
0x1caa   :  { %v5306_v41 = vpop.permute.xlu0 %5305 }
0x1cab   :  { %v5328_v30 = vsel %vm473_vm2, %v5324_v47, %v5306_v41  ;;  %v5310_v62 = vpop.permute.xlu2 %5309 }
0x1cac   :  { %v5332_v12 = vmul.f32 %v9879_v51, %v5328_v30  ;;  %v5272_v31 = vpop.permute.xlu1 %5271  ;;  %v5378_v30 = vmul.f32 %v9603_v26, %v9652_v55 }
0x1cad   :  { %v5317_v48 = vsel %vm332_vm11, %v9979_v46, %v5272_v31  ;;  %vm5428_vm11 = vcmp.eq.s32.totalorder %v9995_v44, 7 }
0x1cae   :  { %5715 = vmatmul.msk.f32.gmra.mxu3 %vm482_vm3, %v5332_v12  ;;  %v5321_v29 = vsel %vm463_vm0, %v5317_v48, %v5284_v63  ;;  %v5377_v63 = vmul.f32 %v9596_v58, %v9643_v61 }
0x1cb2   :  { %v5296_v0 = vpop.permute.xlu0 %5295 }
0x1cb3   :  { %v5325_v22 = vsel %vm468_vm1, %v5321_v29, %v5296_v0  ;;  %v5430_v29 = vsel %vm5428_vm11, 1, %v10282_v1  ;;  %v5379_v0 = vmul.f32 %v9596_v58, %v9679_v2 }
0x1cb4   :  { %v5308_v59 = vpop.permute.xlu1 %5307  ;;  %v5432_v61 = vperm.slane %v5430_v29, 0 }
0x1cb5   :  { %v5329_v37 = vsel %vm473_vm2, %v5325_v22, %v5308_v59 }
0x1cb6   :  { %v5333_v14 = vmul.f32 %v9868_v32, %v5329_v37  ;;  %v5376_v32 = vmul.f32 %v9603_v26, %v9635_v28 }
0x1cb8   :  { %5716 = vmatmul.msk.f32.gmra.mxu3 %vm482_vm3, %v5333_v14 }
0x1cba   :  { %v5286_v4 = vpop.permute.xlu0 %5285 }
0x1cbb   :  { %v5322_v3 = vsel %vm463_vm0, %v5318_v57, %v5286_v4  ;;  %vm5429_vm0 = vcmp.eq.s32.totalorder %v9997_v40, 7 }
0x1cbc   :  { %v5298_v46 = vpop.permute.xlu1 %5297  ;;  %v5431_v44 = vsel %vm5429_vm0, 1, %v10282_v1 }
0x1cbd   :  { %v5326_v9 = vsel %vm468_vm1, %v5322_v3, %v5298_v46  ;;  %vm4772_vm1 = vcmp.eq.s32.totalorder %v9997_v40, 6 }
0x1cbe   :  { %v5330_v23 = vsel %vm473_vm2, %v5326_v9, %v5310_v62  ;;  %v4774_v58 = vsel %vm4772_vm1, 1, %v10282_v1 }
0x1cbf   :  { %v5334_v36 = vmul.f32 %v9879_v51, %v5330_v23  ;;  %v4776_v2 = vperm.slane %v4774_v58, 0 }
0x1cc1   :  { %5717 = vmatmul.msk.f32.gmra.mxu3 %vm482_vm3, %v5334_v36 }
0x1cc2   :  { %v837_v37 = vpop.permute.xlu0 %836 }
0x1cc3   :  { %vm841_vm2 = vcmp.eq.s32.totalorder %v837_v37, 1 }
0x1cc4   :  { %v840_v14 = vpop.permute.xlu1 %839 }
0x1cc5   :  { %vm842_vm12 = vcmp.eq.s32.totalorder %v840_v14, 1  ;;  %v10322_v14 = vld [vmem:[#allocation14_spill] sm:$0xff] }
0x1cca   :  { %v1497_v4 = vpop.permute.xlu0 %1496 }
0x1ccb   :  { %vm1499_vm5 = vcmp.eq.s32.totalorder %v1497_v4, 1  ;;  %v10324_v4 = vld [vmem:[#allocation10_spill] sm:$0xff] }
0x1ccc   :  { %v2151_v57 = vpop.permute.xlu1 %2150 }
0x1ccd   :  { %vm2155_vm3 = vcmp.eq.s32.totalorder %v2151_v57, 1 }
0x1cd2   :  { %v2808_v3 = vpop.permute.xlu0 %2807 }
0x1cd3   :  { %vm2812_vm7 = vcmp.eq.s32.totalorder %v2808_v3, 1 }
0x1cd4   :  { %v10092_v62 = vpop.permute.xlu1 %2810 }
0x1cd5   :  { %vm2813_vm1 = vcmp.eq.s32.totalorder %v10092_v62, 1 }
0x1cda   :  { %v3465_v9 = vpop.permute.xlu0 %3464 }
0x1cdb   :  { %vm3469_vm13 = vcmp.eq.s32.totalorder %v3465_v9, 1  ;;  %v5395_v9 = vsub.f32 1.0, %v9937_v33 }
0x1cdc   :  { %v10094_v23 = vpop.permute.xlu1 %3467 }
0x1ce2   :  { %v10096_v36 = vpop.permute.xlu0 %4124 }
0x1d23   :  { %v5364_v60 = vpop.f32.mrf.mxu3 }
0x1d24   :  { %v5380_v16 = vadd.f32 %v5376_v32, %v5364_v60  ;;  %v10311_v32 = vld [vmem:[#allocation20_spill] sm:$0xff] }
0x1d25   :  { %v843_v60 = vsel %vm841_vm2, %v10311_v32, 0.0 }
0x1d26   :  { %v5384_v6 = vadd.f32 %v9616_v21, %v5380_v16  ;;  %v10312_v16 = vld [vmem:[#allocation19_spill] sm:$0xff] }
0x1d28   :  { %6057 = vtanh.f32 %v5384_v6  ;;  %v844_v6 = vsel %vm841_vm2, %v10312_v16, 0.0  ;;  %vm4127_vm2 = vcmp.eq.s32.totalorder %v10096_v36, 1 }
0x1d2e   :  { %v6058_v10 = vpop.eup %6057 }
0x1d2f   :  { %5404 = vrot.lane.b32.xlu2 %v6058_v10, %s6196_s29  ;;  %v5393_v10 = vsub.f32 1.0, %v9919_v20 }
0x1d31   :  { %v5367_v41 = vpop.f32.mrf.mxu3 }
0x1d32   :  { %v5381_v47 = vadd.f32 %v5377_v63, %v5367_v41  ;;  %v5392_v63 = vsub.f32 1.0, %v9910_v49  ;;  %v10313_v41 = vld [vmem:[#allocation13_spill] sm:$0xff] }
0x1d34   :  { %v5385_v51 = vadd.f32 %v9610_v7, %v5381_v47 }
0x1d36   :  { %6059 = vtanh.f32 %v5385_v51  ;;  %v10314_v51 = vld [vmem:[#allocation17_spill] sm:$0xff] }
0x1d3b   :  { %v5370_v28 = vpop.f32.mrf.mxu3 }
0x1d3c   :  { %v6060_v12 = vpop.eup %6059  ;;  %v5382_v31 = vadd.f32 %v5378_v30, %v5370_v28  ;;  %v10315_v28 = vld [vmem:[#allocation9_spill] sm:$0xff] }
0x1d3d   :  { %5406 = vrot.lane.b32.xlu0 %v6060_v12, %s6196_s29 }
0x1d3e   :  { %v5386_v48 = vadd.f32 %v9616_v21, %v5382_v31  ;;  %v5433_v21 = vperm.slane %v5431_v44, 0 }
0x1d40   :  { %6061 = vtanh.f32 %v5386_v48  ;;  %v10316_v48 = vld [vmem:[#allocation16_spill] sm:$0xff] }
0x1d44   :  { %v5373_v15 = vpop.f32.mrf.mxu3 }
0x1d45   :  { %5435 = vperm.xlu0 %5746, %v5432_v61   ;;  %v5383_v22 = vadd.f32 %v5379_v0, %v5373_v15  ;;  %v4779_v15 = vpop.permute.xlu1 %4778 }
0x1d46   :  { %v6062_v26 = vpop.eup %6061  ;;  %vm4783_vm15 = vcmp.eq.s32.totalorder %v4779_v15, 1 }
0x1d47   :  { %v5387_v55 = vadd.f32 %v9610_v7, %v5383_v22  ;;  %5408 = vrot.lane.b32.xlu1 %v6062_v26, %s6196_s29  ;;  %v1494_v7 = vpop.permute.xlu2 %1493  ;;  %v5397_v22 = vmul.f32 %v5393_v10, %v9957_v11  ;;  %v5396_v26 = vmul.f32 %v5392_v63, %v9944_v34  ;;  %v10320_v11 = vld [vmem:[#allocation21_spill] sm:$0xff] }
0x1d48   :  { %vm1498_vm4 = vcmp.eq.s32.totalorder %v1494_v7, 1  ;;  %v846_v34 = vsel %vm842_vm12, %v10320_v11, 0.0 }
0x1d49   :  { %6063 = vtanh.f32 %v5387_v55  ;;  %v1500_v47 = vsel %vm1498_vm4, %v10313_v41, %v843_v60  ;;  %v1501_v30 = vsel %vm1498_vm4, %v10314_v51, %v844_v6  ;;  %v10317_v55 = vld [vmem:[#allocation2_spill] sm:$0xff]  ;;  %v1503_v6 = vsel %vm1499_vm5, %v10322_v14, %v846_v34 }
0x1d4a   :  { %v2157_v12 = vsel %vm2155_vm3, %v10315_v28, %v1500_v47  ;;  %v2158_v29 = vsel %vm2155_vm3, %v10316_v48, %v1501_v30  ;;  %v5394_v47 = vsub.f32 1.0, %v9928_v50  ;;  %v10325_v28 = vld [vmem:[#allocation4_spill] sm:$0xff] }
0x1d4b   :  { %v2814_v44 = vsel %vm2812_vm7, %v10317_v55, %v2157_v12 }
0x1d4c   :  { %v3471_v7 = vsel %vm3469_vm13, %v8819_v39, %v2814_v44  ;;  %v5398_v43 = vmul.f32 %v5394_v47, %v9972_v13 }
0x1d4f   :  { %v6064_v59 = vpop.eup %6063  ;;  %5438 = vperm.xlu1 %5747, %v5433_v21   ;;  %v10090_v46 = vpop.permute.xlu2 %2153 }
0x1d50   :  { %5410 = vrot.lane.b32.xlu2 %v6064_v59, %s6196_s29  ;;  %v10318_v59 = vld [vmem:[#allocation22_spill] sm:$0xff] }
0x1d51   :  { %v845_v58 = vsel %vm842_vm12, %v10318_v59, 0.0 }
0x1d57   :  { %v4122_v40 = vpop.permute.xlu2 %4121 }
0x1d58   :  { %4781 = vperm.xlu2 %5748, %v4776_v2   ;;  %v10319_v2 = vld [vmem:[#allocation12_spill] sm:$0xff]  ;;  %vm4126_vm11 = vcmp.eq.s32.totalorder %v4122_v40, 1 }
0x1d59   :  { %v2815_v37 = vsel %vm2812_vm7, %v10319_v2, %v2158_v29  ;;  %v4128_v3 = vsel %vm4126_vm11, %v9303_v52, %v3471_v7 }
0x1d5a   :  { %v4785_v39 = vsel %vm4783_vm15, %v9692_v45, %v4128_v3 }
0x1d89   :  { %v5405_v1 = vpop.permute.xlu2 %5404 }
0x1d8a   :  { %v5416_v61 = vmul.f32 %v5405_v1, %v9910_v49  ;;  %v3472_v49 = vsel %vm3469_vm13, %v8799_v38, %v2815_v37  ;;  %v10321_v1 = vld [vmem:[#allocation15_spill] sm:$0xff] }
0x1d8b   :  { %v1502_v32 = vsel %vm1499_vm5, %v10321_v1, %v845_v58  ;;  %v4129_v60 = vsel %vm4126_vm11, %v9276_v56, %v3472_v49 }
0x1d8c   :  { %v4786_v38 = vsel %vm4783_vm15, %v9668_v17, %v4129_v60 }
0x1daa   :  { %v5411_v21 = vpop.permute.xlu2 %5410 }
0x1dab   :  { %v5419_v10 = vmul.f32 %v5411_v21, %v9937_v33 }
0x1daf   :  { %v5407_v31 = vpop.permute.xlu0 %5406 }
0x1db0   :  { %v5417_v0 = vmul.f32 %v5407_v31, %v9919_v20  ;;  %v5420_v20 = vadd.f32 %v5416_v61, %v5396_v26 }
0x1db2   :  { %v5421_v57 = vadd.f32 %v5417_v0, %v5397_v22  ;;  %v5424_v40 = vsel %vm5235_vm10, %v5420_v20, %v9692_v45  ;;  %vm2156_vm10 = vcmp.eq.s32.totalorder %v10090_v46, 1  ;;  %v4782_v30 = vpop.permute.xlu2 %4781 }
0x1db3   :  { %v2159_v33 = vsel %vm2156_vm10, %v10323_v24, %v1502_v32  ;;  %v2160_v51 = vsel %vm2156_vm10, %v10324_v4, %v1503_v6  ;;  %vm4784_vm3 = vcmp.eq.s32.totalorder %v4782_v30, 1 }
0x1db4   :  { %v5425_v52 = vsel %vm5236_vm14, %v5421_v57, %v9668_v17  ;;  %v5399_v17 = vmul.f32 %v5395_v9, %v9999_v18  ;;  %vm3470_vm14 = vcmp.eq.s32.totalorder %v10094_v23, 1  ;;  %v2816_v62 = vsel %vm2813_vm1, %v8474_v19, %v2159_v33 }
0x1db5   :  { %v2817_v12 = vsel %vm2813_vm1, %v10325_v28, %v2160_v51 }
0x1db6   :  { %v5423_v31 = vadd.f32 %v5419_v10, %v5399_v17  ;;  %v3474_v18 = vsel %vm3470_vm14, %v8874_v42, %v2817_v12 }
0x1db7   :  { %v5436_v16 = vpop.permute.xlu0 %5435  ;;  %v4131_v23 = vsel %vm4127_vm2, %v9335_v53, %v3474_v18 }
0x1db8   :  { %vm5440_vm0 = vcmp.eq.s32.totalorder %v5436_v16, 1  ;;  %v5427_v48 = vsel %vm5238_vm9, %v5423_v31, %v9735_v54  ;;  %v4788_v61 = vsel %vm4784_vm3, %v9735_v54, %v4131_v23 }
0x1db9   :  { %v5442_v56 = vsel %vm5440_vm0, %v5424_v40, %v4785_v39  ;;  %v5443_v63 = vsel %vm5440_vm0, %v5425_v52, %v4786_v38  ;;  %v5409_v41 = vpop.permute.xlu1 %5408 }
0x1dba   :  { %5452 = vrot.lane.b32.xlu0 %v5443_v63, %s6197_s25  ;;  %5450 = vrot.lane.b32.xlu2 %v5442_v56, %s6197_s25  ;;  %v5418_v45 = vmul.f32 %v5409_v41, %v9928_v50  ;;  %v3473_v50 = vsel %vm3470_vm14, %v8904_v8, %v2816_v62 }
0x1dbb   :  { %v4130_v13 = vsel %vm4127_vm2, %v9353_v25, %v3473_v50 }
0x1dbc   :  { %v5422_v46 = vadd.f32 %v5418_v45, %v5398_v43  ;;  %v4787_v29 = vsel %vm4784_vm3, %v9767_v35, %v4130_v13 }
0x1dbe   :  { %v5426_v42 = vsel %vm5237_vm6, %v5422_v46, %v9767_v35 }
0x1dc1   :  { %v5439_v19 = vpop.permute.xlu1 %5438 }
0x1dc2   :  { %vm5441_vm4 = vcmp.eq.s32.totalorder %v5439_v19, 1 }
0x1dc3   :  { %v5444_v8 = vsel %vm5441_vm4, %v5426_v42, %v4787_v29  ;;  %v5445_v36 = vsel %vm5441_vm4, %v5427_v48, %v4788_v61 }
0x1dc4   :  { %5456 = vrot.lane.b32.xlu2 %v5445_v36, %s6197_s25  ;;  %5454 = vrot.lane.b32.xlu1 %v5444_v8, %s6197_s25 }
0x1e14   :  { %v5451_v53 = vpop.permute.xlu2 %5450 }
0x1e15   :  { %5462 = vst.msk [vmem:[%s10195_s17] sm:$0xff] %vm327_vm8, %v5451_v53 }
0x1e1e   :  { %v5457_v25 = vpop.permute.xlu2 %5456 }
0x1e1f   :  { %5465 = vst.msk [vmem:[%s10195_s17 + $0x18] sm:$0xff] %vm327_vm8, %v5457_v25 }
0x1e2c   :  { %v5453_v54 = vpop.permute.xlu0 %5452 }
0x1e2d   :  { %5463 = vst.msk [vmem:[%s10195_s17 + $0x8] sm:$0xff] %vm327_vm8, %v5453_v54 }
0x1e36   :  { %v5455_v35 = vpop.permute.xlu1 %5454 }
0x1e37   :  { %5464 = vst.msk [vmem:[%s10195_s17 + $0x10] sm:$0xff] %vm327_vm8, %v5455_v35 }

</bundles_post_ra>
